<compile_context>
chip_gen: v5e
topology: v5e:2x2
jax: 0.10.0
libtpu: 0.0.40
codegen_flags: <defaults>
</compile_context>

<pallas_src>
import functools
import math

import jax
import jax.numpy as jnp
from jax.experimental import pallas as pl
from jax.experimental.pallas import tpu as pltpu


# ----------------------------------------------------------------------------
# hardware-aware knobs
# ----------------------------------------------------------------------------

def _detect_vmem_limit():
    try:
        cap = int(pltpu.get_tpu_info().vmem_capacity_bytes)
    except Exception:
        cap = 64 * 1024 * 1024
    if cap >= 128 * 1024 * 1024:          # v5e / v6e
        return 100 * 1024 * 1024
    return 48 * 1024 * 1024               # v7x (64 MiB) / unknown


_VMEM_LIMIT = _detect_vmem_limit()
_TIME_TILE_TARGET = 64 if _VMEM_LIMIT > 64 * 1024 * 1024 else 32
_ROW_TILE_TARGET = 4096
_LANE_TILE_TARGET = 2048


def _cparams(*sem):
    return pltpu.CompilerParams(dimension_semantics=sem,
                                vmem_limit_bytes=_VMEM_LIMIT)


# ----------------------------------------------------------------------------
# helpers
# ----------------------------------------------------------------------------

def _bf16(x):
    return x.astype(jnp.bfloat16)


def _silu(x):
    return x * jax.nn.sigmoid(x)


def _ln(x, g, b, eps):
    mu = jnp.mean(x, axis=-1, keepdims=True)
    var = jnp.mean(jnp.square(x - mu), axis=-1, keepdims=True)
    return (x - mu) * jax.lax.rsqrt(var + eps) * g + b


def _row_tile(n, target=_ROW_TILE_TARGET):
    """Largest row tile <= target that divides n and is a multiple of 8."""
    if n <= target:
        return n
    t = target - target % 8
    while t >= 8:
        if n % t == 0:
            return t
        t -= 8
    return n


def _time_tile(n, target=_TIME_TILE_TARGET):
    if n <= target:
        return n
    t = target - target % 8
    while t >= 8:
        if n % t == 0:
            return t
        t -= 8
    return n


def _lane_tile(n, target=_LANE_TILE_TARGET):
    """Largest lane tile <= target dividing n; prefer multiples of 128."""
    if n <= target:
        return n
    t = target - target % 128
    while t >= 128:
        if n % t == 0:
            return t
        t -= 128
    t = target - target % 8
    while t >= 8:
        if n % t == 0:
            return t
        t -= 8
    return n


def _any_tile(n, target):
    t = min(n, target)
    while n % t:
        t -= 1
    return t


def _conv_blockdiag(w, groups):
    """Torch Conv1d weight [Cout, Cin/g, K] -> block-diagonal [K, Cin, Cout]."""
    Cout, Cing, K = w.shape
    Og = Cout // groups
    wg = w.reshape(groups, Og, Cing, K)
    eye = jnp.eye(groups, dtype=w.dtype)
    wbd = jnp.einsum('gock,gh->kgcho', wg, eye)  # [K, g, Cing, g', Og]
    return wbd.reshape(K, groups * Cing, groups * Og)


# ----------------------------------------------------------------------------
# Pallas kernels
# ----------------------------------------------------------------------------

def _fconv_kernel(x_ref, g_ref, b_ref, w_ref, cb_ref, a_ref, o_ref, pad_ref,
                  *, K, pad_left, eps):
    """LN over H -> grouped conv along F (shifted matmuls) -> PReLU -> +x."""
    F, TT, H = x_ref.shape
    x = x_ref[...]
    xl = _ln(x, g_ref[...], b_ref[...], eps)
    pad_right = K - 1 - pad_left
    # zero only the halo rows; the data region is fully overwritten below
    if pad_left > 0:
        pad_ref[0:pad_left] = jnp.zeros((pad_left, TT, H), pad_ref.dtype)
    if pad_right > 0:
        pad_ref[pad_left + F:pad_left + F + pad_right] = jnp.zeros(
            (pad_right, TT, H), pad_ref.dtype)
    pad_ref[pad_left:pad_left + F] = xl.astype(pad_ref.dtype)
    acc = jnp.dot(pad_ref[0:F].reshape(F * TT, H), w_ref[0],
                  preferred_element_type=jnp.float32)
    for k in range(1, K):
        acc = acc + jnp.dot(pad_ref[k:k + F].reshape(F * TT, H), w_ref[k],
                            preferred_element_type=jnp.float32)
    y = acc + cb_ref[...]
    a = a_ref[...]
    y = jnp.where(y >= 0.0, y, a * y)                     # fused PReLU
    o_ref[...] = x + y.reshape(F, TT, H)                  # fused residual


def _ln_mm_silu_kernel(x_ref, g_ref, b_ref, w_ref, wb_ref, o_ref, *, eps):
    """LN -> matmul -> SiLU (squeeze of the full branch), bf16 output."""
    xl = _ln(x_ref[...], g_ref[...], b_ref[...], eps)
    y = jnp.dot(_bf16(xl), w_ref[...], preferred_element_type=jnp.float32)
    o_ref[...] = _silu(y + wb_ref[...]).astype(o_ref.dtype)


def _lingroup_kernel(w_ref, z_ref, b_ref, o_ref):
    """Per-squeeze-channel freq->freq linear, lane-dense in B*T."""
    y = jnp.dot(w_ref[...], z_ref[...],
                preferred_element_type=jnp.float32) + b_ref[...]
    o_ref[...] = y.astype(o_ref.dtype)


def _unsq_residual_kernel(y_ref, x_ref, w_ref, b_ref, o_ref):
    """unsqueeze matmul -> SiLU -> +residual."""
    # TODO(synk): fuse this into the following fconv LN to save one full
    #             residual-stream HBM round-trip per layer.
    u = jnp.dot(y_ref[...], w_ref[...], preferred_element_type=jnp.float32)
    o_ref[...] = x_ref[...] + _silu(u + b_ref[...])


def _tsa_kernel(x_ref, g_ref, b_ref, wi_ref, bi_ref, wo_ref, bo_ref, o_ref,
                *, heads, scope, eps):
    """LN -> QKV -> banded causal MHSA (mask built in-kernel) -> out-proj -> +x."""
    T, H = x_ref.shape
    Dh = H // heads
    x = x_ref[...]
    xl = _ln(x, g_ref[...], b_ref[...], eps)
    qkv = jnp.dot(_bf16(xl), wi_ref[...],
                  preferred_element_type=jnp.float32) + bi_ref[...]
    rows = jax.lax.broadcasted_iota(jnp.int32, (T, T), 0)
    cols = jax.lax.broadcasted_iota(jnp.int32, (T, T), 1)
    band = (rows >= cols) & ((rows - cols) < scope)
    scale = 1.0 / math.sqrt(Dh)
    o_acc = jnp.zeros((T, H), jnp.float32)
    # TODO(synk): flash-style KV blocking (band width = attn_scope) for long T.
    for h in range(heads):
        q = qkv[:, h * Dh:(h + 1) * Dh] * scale
        k = qkv[:, H + h * Dh:H + (h + 1) * Dh]
        v = qkv[:, 2 * H + h * Dh:2 * H + (h + 1) * Dh]
        s = jax.lax.dot_general(_bf16(q), _bf16(k), (((1,), (1,)), ((), ())),
                                preferred_element_type=jnp.float32)
        s = jnp.where(band, s, -1e30)
        s = s - jnp.max(s, axis=-1, keepdims=True)
        p = jnp.exp(s)
        inv_l = pl.reciprocal(jnp.sum(p, axis=-1, keepdims=True), approx=True)
        pv = jnp.dot(_bf16(p), _bf16(v),
                     preferred_element_type=jnp.float32) * inv_l
        o_acc = o_acc + jnp.dot(_bf16(pv), wo_ref[h * Dh:(h + 1) * Dh, :],
                                preferred_element_type=jnp.float32)
    o_ref[...] = x + o_acc + bo_ref[...]


def _tff_in_kernel(x_ref, g_ref, b_ref, w1_ref, b1_ref, wc1_ref, bc1_ref,
                   wc2_ref, bc2_ref, o_ref, pad_ref, *, K, eps):
    """LN -> 1x1(H->Dffn)+SiLU -> causal conv+SiLU -> causal conv (bf16 out)."""
    R, T, H = x_ref.shape
    D = o_ref.shape[-1]
    xl = _ln(x_ref[...], g_ref[...], b_ref[...], eps)
    h = _silu(jnp.dot(_bf16(xl.reshape(R * T, H)), w1_ref[...],
                      preferred_element_type=jnp.float32) + b1_ref[...])
    # zero only the causal halo once; data region is fully overwritten below
    pad_ref[:, 0:K - 1, :] = jnp.zeros((R, K - 1, D), pad_ref.dtype)
    # causal conv 1 (+SiLU)
    pad_ref[:, K - 1:, :] = h.reshape(R, T, D).astype(pad_ref.dtype)
    acc = jnp.dot(pad_ref[:, 0:T, :].reshape(R * T, D), wc1_ref[0],
                  preferred_element_type=jnp.float32)
    for k in range(1, K):
        acc = acc + jnp.dot(pad_ref[:, k:k + T, :].reshape(R * T, D),
                            wc1_ref[k], preferred_element_type=jnp.float32)
    h = _silu(acc + bc1_ref[...])
    # causal conv 2 (GroupNorm+SiLU follows in the next kernel)
    pad_ref[:, K - 1:, :] = h.reshape(R, T, D).astype(pad_ref.dtype)
    acc = jnp.dot(pad_ref[:, 0:T, :].reshape(R * T, D), wc2_ref[0],
                  preferred_element_type=jnp.float32)
    for k in range(1, K):
        acc = acc + jnp.dot(pad_ref[:, k:k + T, :].reshape(R * T, D),
                            wc2_ref[k], preferred_element_type=jnp.float32)
    o_ref[...] = (acc + bc2_ref[...]).reshape(R, T, D).astype(o_ref.dtype)


def _tff_gn_kernel(h_ref, red_ref, exp_ref, g_ref, b_ref, o_ref, *, eps):
    """GroupNorm over (channel-group x all freqs) per (b, t), then SiLU."""
    x = h_ref[...].astype(jnp.float32)               # [F, TT, C]
    s1 = jnp.sum(x, axis=0)                          # [TT, C]
    s2 = jnp.sum(x * x, axis=0)
    # skinny group reduce (C -> G) then expand (G -> C), f32 for accuracy
    mean_g = jnp.dot(s1, red_ref[...], preferred_element_type=jnp.float32)
    ex2_g = jnp.dot(s2, red_ref[...], preferred_element_type=jnp.float32)
    mean = jnp.dot(mean_g, exp_ref[...], preferred_element_type=jnp.float32)
    ex2 = jnp.dot(ex2_g, exp_ref[...], preferred_element_type=jnp.float32)
    var = jnp.maximum(ex2 - mean * mean, 0.0)
    y = (x - mean) * jax.lax.rsqrt(var + eps)
    y = y * g_ref[...] + b_ref[...]
    o_ref[...] = _silu(y).astype(o_ref.dtype)


def _tff_out_kernel(h_ref, x_ref, wc3_ref, bc3_ref, w2_ref, b2_ref, o_ref,
                    pad_ref, *, K):
    """causal conv+SiLU -> 1x1(Dffn->H) -> +residual."""
    R, T, D = h_ref.shape
    H = o_ref.shape[-1]
    pad_ref[:, 0:K - 1, :] = jnp.zeros((R, K - 1, D), pad_ref.dtype)
    pad_ref[:, K - 1:, :] = h_ref[...].astype(pad_ref.dtype)
    acc = jnp.dot(pad_ref[:, 0:T, :].reshape(R * T, D), wc3_ref[0],
                  preferred_element_type=jnp.float32)
    for k in range(1, K):
        acc = acc + jnp.dot(pad_ref[:, k:k + T, :].reshape(R * T, D),
                            wc3_ref[k], preferred_element_type=jnp.float32)
    h = _silu(acc + bc3_ref[...])
    y = jnp.dot(_bf16(h), w2_ref[...],
                preferred_element_type=jnp.float32) + b2_ref[...]
    o_ref[...] = x_ref[...] + y.reshape(R, T, H)


def _encoder_kernel(x_ref, w_ref, b_ref, o_ref, pad_ref, *, K):
    """Causal conv along T (dim_input -> dim_hidden) via shifted matmuls."""
    R, T, H0 = x_ref.shape
    H = o_ref.shape[-1]
    pad_ref[:, 0:K - 1, :] = jnp.zeros((R, K - 1, H0), pad_ref.dtype)
    pad_ref[:, K - 1:, :] = x_ref[...]
    acc = jnp.dot(_bf16(pad_ref[:, 0:T, :].reshape(R * T, H0)), w_ref[0],
                  preferred_element_type=jnp.float32)
    for k in range(1, K):
        acc = acc + jnp.dot(_bf16(pad_ref[:, k:k + T, :].reshape(R * T, H0)),
                            w_ref[k], preferred_element_type=jnp.float32)
    o_ref[...] = (acc + b_ref[...]).reshape(R, T, H)


def _dense_kernel(x_ref, w_ref, b_ref, o_ref):
    o_ref[...] = jnp.dot(_bf16(x_ref[...]), w_ref[...],
                         preferred_element_type=jnp.float32) + b_ref[...]


# ----------------------------------------------------------------------------
# branch wrappers (pallas_call plumbing)
# ----------------------------------------------------------------------------

def fconv_branch(x, ln_g, ln_b, cw, cb, alpha, groups, eps=1e-5):
    B, Fq, T, H = x.shape
    K = cw.shape[-1]
    pad_left = (K - 1) // 2                      # 'same' padding (odd kernel)
    wbd = _bf16(_conv_blockdiag(cw, groups))     # [K, H, H]
    tt = _time_tile(T)
    return pl.pallas_call(
        functools.partial(_fconv_kernel, K=K, pad_left=pad_left, eps=eps),
        out_shape=jax.ShapeDtypeStruct((B, Fq, T, H), jnp.float32),
        grid=(B, T // tt),
        in_specs=[
            pl.BlockSpec((None, Fq, tt, H), lambda b, t: (b, 0, t, 0)),
            pl.BlockSpec((1, H), lambda b, t: (0, 0)),
            pl.BlockSpec((1, H), lambda b, t: (0, 0)),
            pl.BlockSpec((K, H, H), lambda b, t: (0, 0, 0)),
            pl.BlockSpec((1, H), lambda b, t: (0, 0)),
            pl.BlockSpec((1, H), lambda b, t: (0, 0)),
        ],
        out_specs=pl.BlockSpec((None, Fq, tt, H), lambda b, t: (b, 0, t, 0)),
        scratch_shapes=[pltpu.VMEM((Fq + K - 1, tt, H), jnp.bfloat16)],
        compiler_params=_cparams("parallel", "parallel"),
    )(x, ln_g.reshape(1, H), ln_b.reshape(1, H), wbd, cb.reshape(1, H),
      alpha.reshape(1, H))


def full_branch(x, p, full_w, full_b, eps=1e-5):
    B, Fq, T, H = x.shape
    S = p["sq_w"].shape[0]
    R = B * Fq * T
    x2 = x.reshape(R, H)
    tr = _row_tile(R)

    # (1) LN + squeeze(H->S) + SiLU    -> bf16 [R, S]
    z = pl.pallas_call(
        functools.partial(_ln_mm_silu_kernel, eps=eps),
        out_shape=jax.ShapeDtypeStruct((R, S), jnp.bfloat16),
        grid=(R // tr,),
        in_specs=[
            pl.BlockSpec((tr, H), lambda i: (i, 0)),
            pl.BlockSpec((1, H), lambda i: (0, 0)),
            pl.BlockSpec((1, H), lambda i: (0, 0)),
            pl.BlockSpec((H, S), lambda i: (0, 0)),
            pl.BlockSpec((1, S), lambda i: (0, 0)),
        ],
        out_specs=pl.BlockSpec((tr, S), lambda i: (i, 0)),
        compiler_params=_cparams("parallel"),
    )(x2, p["lnf_g"].reshape(1, H), p["lnf_b"].reshape(1, H),
      _bf16(p["sq_w"].T), p["sq_b"].reshape(1, S))

    # (2) LinearGroup, lane-dense in B*T: out[s, f_out, bt] = W[s] @ z[s]
    BT = B * T
    zg = z.reshape(B, Fq, T, S).transpose(3, 1, 0, 2).reshape(S, Fq, BT)
    tb = _lane_tile(BT)
    wlg = _bf16(full_w)                                   # [S, F_out, F_in]
    y = pl.pallas_call(
        _lingroup_kernel,
        out_shape=jax.ShapeDtypeStruct((S, Fq, BT), jnp.bfloat16),
        grid=(S, BT // tb),
        in_specs=[
            pl.BlockSpec((None, Fq, Fq), lambda s, r: (s, 0, 0)),
            pl.BlockSpec((None, Fq, tb), lambda s, r: (s, 0, r)),
            pl.BlockSpec((None, Fq, 1), lambda s, r: (s, 0, 0)),
        ],
        out_specs=pl.BlockSpec((None, Fq, tb), lambda s, r: (s, 0, r)),
        compiler_params=_cparams("parallel", "parallel"),
    )(wlg, zg, full_b.reshape(S, Fq, 1))
    yr = y.reshape(S, Fq, B, T).transpose(2, 1, 3, 0).reshape(R, S)

    # (3) unsqueeze(S->H) + SiLU + residual
    out = pl.pallas_call(
        _unsq_residual_kernel,
        out_shape=jax.ShapeDtypeStruct((R, H), jnp.float32),
        grid=(R // tr,),
        in_specs=[
            pl.BlockSpec((tr, S), lambda i: (i, 0)),
            pl.BlockSpec((tr, H), lambda i: (i, 0)),
            pl.BlockSpec((S, H), lambda i: (0, 0)),
            pl.BlockSpec((1, H), lambda i: (0, 0)),
        ],
        out_specs=pl.BlockSpec((tr, H), lambda i: (i, 0)),
        compiler_params=_cparams("parallel"),
    )(yr, x2, _bf16(p["usq_w"].T), p["usq_b"].reshape(1, H))
    return out.reshape(B, Fq, T, H)


def tsa_branch(x, p, heads, scope, eps=1e-5):
    B, Fq, T, H = x.shape
    x3 = x.reshape(B * Fq, T, H)
    out = pl.pallas_call(
        functools.partial(_tsa_kernel, heads=heads, scope=scope, eps=eps),
        out_shape=jax.ShapeDtypeStruct((B * Fq, T, H), jnp.float32),
        grid=(B * Fq,),
        in_specs=[
            pl.BlockSpec((None, T, H), lambda n: (n, 0, 0)),
            pl.BlockSpec((1, H), lambda n: (0, 0)),
            pl.BlockSpec((1, H), lambda n: (0, 0)),
            pl.BlockSpec((H, 3 * H), lambda n: (0, 0)),
            pl.BlockSpec((1, 3 * H), lambda n: (0, 0)),
            pl.BlockSpec((H, H), lambda n: (0, 0)),
            pl.BlockSpec((1, H), lambda n: (0, 0)),
        ],
        out_specs=pl.BlockSpec((None, T, H), lambda n: (n, 0, 0)),
        compiler_params=_cparams("parallel"),
    )(x3, p["lnm_g"].reshape(1, H), p["lnm_b"].reshape(1, H),
      _bf16(p["in_w"].T), p["in_b"].reshape(1, 3 * H),
      _bf16(p["out_w"].T), p["out_b"].reshape(1, H))
    return out.reshape(B, Fq, T, H)


def tconvffn_branch(x, p, groups, eps=1e-5):
    B, Fq, T, H = x.shape
    D = p["tc1_w"].shape[0]
    K = p["cc1_w"].shape[-1]
    Cg = D // groups
    Rbf = B * Fq
    rt = _any_tile(Rbf, 8)
    x3 = x.reshape(Rbf, T, H)

    wc1 = _bf16(_conv_blockdiag(p["cc1_w"], groups))
    wc2 = _bf16(_conv_blockdiag(p["cc2_w"], groups))
    wc3 = _bf16(_conv_blockdiag(p["cc3_w"], groups))

    # (1) LN -> 1x1 + SiLU -> causal conv + SiLU -> causal conv   (bf16 out)
    h = pl.pallas_call(
        functools.partial(_tff_in_kernel, K=K, eps=eps),
        out_shape=jax.ShapeDtypeStruct((Rbf, T, D), jnp.bfloat16),
        grid=(Rbf // rt,),
        in_specs=[
            pl.BlockSpec((rt, T, H), lambda i: (i, 0, 0)),
            pl.BlockSpec((1, H), lambda i: (0, 0)),
            pl.BlockSpec((1, H), lambda i: (0, 0)),
            pl.BlockSpec((H, D), lambda i: (0, 0)),
            pl.BlockSpec((1, D), lambda i: (0, 0)),
            pl.BlockSpec((K, D, D), lambda i: (0, 0, 0)),
            pl.BlockSpec((1, D), lambda i: (0, 0)),
            pl.BlockSpec((K, D, D), lambda i: (0, 0, 0)),
            pl.BlockSpec((1, D), lambda i: (0, 0)),
        ],
        out_specs=pl.BlockSpec((rt, T, D), lambda i: (i, 0, 0)),
        scratch_shapes=[pltpu.VMEM((rt, T + K - 1, D), jnp.bfloat16)],
        compiler_params=_cparams("parallel"),
    )(x3, p["lnt_g"].reshape(1, H), p["lnt_b"].reshape(1, H),
      _bf16(p["tc1_w"].T), p["tc1_b"].reshape(1, D),
      wc1, p["cc1_b"].reshape(1, D), wc2, p["cc2_b"].reshape(1, D))

    # (2) GroupNorm (stats over channel-group x all freqs per (b,t)) + SiLU
    tt = _time_tile(T)
    red = jnp.kron(jnp.eye(groups, dtype=jnp.float32),
                   jnp.ones((Cg, 1), jnp.float32)) / float(Cg * Fq)   # [D, G]
    exp = jnp.kron(jnp.eye(groups, dtype=jnp.float32),
                   jnp.ones((1, Cg), jnp.float32))                    # [G, D]
    h4 = h.reshape(B, Fq, T, D)
    hn = pl.pallas_call(
        functools.partial(_tff_gn_kernel, eps=eps),
        out_shape=jax.ShapeDtypeStruct((B, Fq, T, D), jnp.bfloat16),
        grid=(B, T // tt),
        in_specs=[
            pl.BlockSpec((None, Fq, tt, D), lambda b, t: (b, 0, t, 0)),
            pl.BlockSpec((D, groups), lambda b, t: (0, 0)),
            pl.BlockSpec((groups, D), lambda b, t: (0, 0)),
            pl.BlockSpec((1, D), lambda b, t: (0, 0)),
            pl.BlockSpec((1, D), lambda b, t: (0, 0)),
        ],
        out_specs=pl.BlockSpec((None, Fq, tt, D), lambda b, t: (b, 0, t, 0)),
        compiler_params=_cparams("parallel", "parallel"),
    )(h4, red, exp, p["gn_g"].reshape(1, D), p["gn_b"].reshape(1, D))

    # (3) causal conv + SiLU -> 1x1 (Dffn->H) -> +residual
    h3 = hn.reshape(Rbf, T, D)
    out = pl.pallas_call(
        functools.partial(_tff_out_kernel, K=K),
        out_shape=jax.ShapeDtypeStruct((Rbf, T, H), jnp.float32),
        grid=(Rbf // rt,),
        in_specs=[
            pl.BlockSpec((rt, T, D), lambda i: (i, 0, 0)),
            pl.BlockSpec((rt, T, H), lambda i: (i, 0, 0)),
            pl.BlockSpec((K, D, D), lambda i: (0, 0, 0)),
            pl.BlockSpec((1, D), lambda i: (0, 0)),
            pl.BlockSpec((D, H), lambda i: (0, 0)),
            pl.BlockSpec((1, H), lambda i: (0, 0)),
        ],
        out_specs=pl.BlockSpec((rt, T, H), lambda i: (i, 0, 0)),
        scratch_shapes=[pltpu.VMEM((rt, T + K - 1, D), jnp.bfloat16)],
        compiler_params=_cparams("parallel"),
    )(h3, x3, wc3, p["cc3_b"].reshape(1, D),
      _bf16(p["tc2_w"].T), p["tc2_b"].reshape(1, H))
    return out.reshape(B, Fq, T, H)


def encoder_conv(x3, w, b):
    R, T, H0 = x3.shape
    H, _, K = w.shape
    wk = _bf16(_conv_blockdiag(w, 1))                 # [K, H0, H]
    rt = _any_tile(R, 8)
    return pl.pallas_call(
        functools.partial(_encoder_kernel, K=K),
        out_shape=jax.ShapeDtypeStruct((R, T, H), jnp.float32),
        grid=(R // rt,),
        in_specs=[
            pl.BlockSpec((rt, T, H0), lambda i: (i, 0, 0)),
            pl.BlockSpec((K, H0, H), lambda i: (0, 0, 0)),
            pl.BlockSpec((1, H), lambda i: (0, 0)),
        ],
        out_specs=pl.BlockSpec((rt, T, H), lambda i: (i, 0, 0)),
        scratch_shapes=[pltpu.VMEM((rt, T + K - 1, H0), jnp.float32)],
        compiler_params=_cparams("parallel"),
    )(x3, wk, b.reshape(1, H))


def decoder_dense(x2d, w, b):
    R, H = x2d.shape
    Dout = w.shape[0]
    tr = _row_tile(R)
    return pl.pallas_call(
        _dense_kernel,
        out_shape=jax.ShapeDtypeStruct((R, Dout), jnp.float32),
        grid=(R // tr,),
        in_specs=[
            pl.BlockSpec((tr, H), lambda i: (i, 0)),
            pl.BlockSpec((H, Dout), lambda i: (0, 0)),
            pl.BlockSpec((1, Dout), lambda i: (0, 0)),
        ],
        out_specs=pl.BlockSpec((tr, Dout), lambda i: (i, 0)),
        compiler_params=_cparams("parallel"),
    )(x2d, _bf16(w.T), b.reshape(1, Dout))


# ----------------------------------------------------------------------------
# SpatialNetLayer / OnlineSpatialNet forward
# ----------------------------------------------------------------------------

def spatialnet_layer(x, p, full_w, full_b, cfg):
    x = fconv_branch(x, p["ln1_g"], p["ln1_b"], p["c1_w"], p["c1_b"],
                     p["pr1_a"], cfg["f_groups"])
    x = full_branch(x, p, full_w, full_b)
    x = fconv_branch(x, p["ln2_g"], p["ln2_b"], p["c2_w"], p["c2_b"],
                     p["pr2_a"], cfg["f_groups"])
    x = tsa_branch(x, p, cfg["num_heads"], cfg["attn_scope"])
    x = tconvffn_branch(x, p, cfg["t_groups"])
    return x


def online_spatialnet_forward(x, params, cfg):
    B, Fq, T, H0 = x.shape
    H = cfg["dim_hidden"]
    xe = encoder_conv(x.reshape(B * Fq, T, H0), params["enc_w"],
                      params["enc_b"])
    h = xe.reshape(B, Fq, T, H)
    for lp in params["layers"]:
        h = spatialnet_layer(h, lp, params["full"]["w"], params["full"]["b"],
                             cfg)
    y = decoder_dense(h.reshape(-1, H), params["dec_w"], params["dec_b"])
    return y.reshape(B, Fq, T, cfg["dim_output"])


# ----------------------------------------------------------------------------
# deterministic parameter initialization
# ----------------------------------------------------------------------------

def init_params(key, cfg):
    H, H0 = cfg["dim_hidden"], cfg["dim_input"]
    Dffn, S, Fq = cfg["dim_ffn"], cfg["dim_squeeze"], cfg["num_freqs"]
    Ek, Kf, Kt = cfg["enc_k"], cfg["f_kernel"], cfg["t_kernel"]
    Gf, Gt, Dout = cfg["f_groups"], cfg["t_groups"], cfg["dim_output"]

    keys = iter(jax.random.split(key, 512))

    def w(shape, scale=0.1):
        return scale * jax.random.normal(next(keys), shape, dtype=jnp.float32)

    zeros = lambda s: jnp.zeros(s, jnp.float32)
    ones = lambda s: jnp.ones(s, jnp.float32)

    params = {
        "enc_w": w((H, H0, Ek)), "enc_b": w((H,), 0.01),
        "dec_w": w((Dout, H)), "dec_b": zeros((Dout,)),
        # LinearGroup `full` module shared across layers (full_share=0)
        "full": {"w": w((S, Fq, Fq)), "b": zeros((S, Fq))},
        "layers": [],
    }
    for _ in range(cfg["num_layers"]):
        lp = {
            "ln1_g": ones((H,)), "ln1_b": zeros((H,)),
            "c1_w": w((H, H // Gf, Kf)), "c1_b": zeros((H,)),
            "pr1_a": 0.25 * ones((H,)),
            "lnf_g": ones((H,)), "lnf_b": zeros((H,)),
            "sq_w": w((S, H)), "sq_b": zeros((S,)),
            "usq_w": w((H, S)), "usq_b": zeros((H,)),
            "ln2_g": ones((H,)), "ln2_b": zeros((H,)),
            "c2_w": w((H, H // Gf, Kf)), "c2_b": zeros((H,)),
            "pr2_a": 0.25 * ones((H,)),
            "lnm_g": ones((H,)), "lnm_b": zeros((H,)),
            "in_w": w((3 * H, H)), "in_b": zeros((3 * H,)),
            "out_w": w((H, H)), "out_b": zeros((H,)),
            "lnt_g": ones((H,)), "lnt_b": zeros((H,)),
            "tc1_w": w((Dffn, H)), "tc1_b": zeros((Dffn,)),
            "cc1_w": w((Dffn, Dffn // Gt, Kt)), "cc1_b": zeros((Dffn,)),
            "cc2_w": w((Dffn, Dffn // Gt, Kt)), "cc2_b": zeros((Dffn,)),
            "gn_g": ones((Dffn,)), "gn_b": zeros((Dffn,)),
            "cc3_w": w((Dffn, Dffn // Gt, Kt)), "cc3_b": zeros((Dffn,)),
            "tc2_w": w((H, Dffn)), "tc2_b": zeros((H,)),
        }
        params["layers"].append(lp)
    return params


# ----------------------------------------------------------------------------
# main
# ----------------------------------------------------------------------------

if __name__ == "__main__":
    cfg = dict(
        dim_input=4, dim_output=2, num_layers=2, dim_squeeze=8, num_freqs=16,
        enc_k=5, dim_hidden=32, dim_ffn=64, num_heads=2,
        f_kernel=5, t_kernel=3, f_groups=8, t_groups=8, attn_scope=251,
    )
    key = jax.random.PRNGKey(0)
    pkey, xkey = jax.random.split(key)
    params = init_params(pkey, cfg)

    B, T = 2, 8
    x = jax.random.normal(xkey, (B, cfg["num_freqs"], T, cfg["dim_input"]),
                          dtype=jnp.float32)

    fwd = jax.jit(lambda xx, pp: online_spatialnet_forward(xx, pp, cfg))
    y = fwd(x, params)
    jax.block_until_ready(y)

    assert y.shape == (B, cfg["num_freqs"], T, cfg["dim_output"]), y.shape
    assert bool(jnp.all(jnp.isfinite(y)))
    print("KERNEL_OK")
</pallas_src>

<mosaic_0001>
module attributes {stable_mosaic.version = 11 : i64} {
  func.func @_encoder_kernel(%arg0: i32, %arg1: memref<8x8x4xf32, #tpu.memory_space<vmem>>, %arg2: memref<5x4x32xbf16, #tpu.memory_space<vmem>>, %arg3: memref<1x32xf32, #tpu.memory_space<vmem>>, %arg4: memref<8x8x32xf32, #tpu.memory_space<vmem>>, %arg5: memref<8x12x4xf32, #tpu.memory_space<vmem>>) attributes {dimension_semantics = [#tpu.dimension_semantics<parallel>], iteration_bounds = array<i64: 4>, scalar_prefetch = 0 : i64, scratch_operands = 1 : i64, tpu.core_type = #tpu.core_type<tc>, window_params = [{transform_indices = @transform_0, window_bounds = array<i64: 8, 8, 4>}, {pipeline_mode = #tpu.pipeline_mode<synchronous>, transform_indices = @transform_1, window_bounds = array<i64: 5, 4, 32>}, {pipeline_mode = #tpu.pipeline_mode<synchronous>, transform_indices = @transform_2, window_bounds = array<i64: 1, 32>}, {transform_indices = @transform_3, window_bounds = array<i64: 8, 8, 32>}]} {
    %cst = arith.constant 0.000000e+00 : f32
    %0 = vector.broadcast %cst : f32 to vector<8x4x4xf32>
    %c0 = arith.constant 0 : index
    %c0_0 = arith.constant 0 : index
    %c0_1 = arith.constant 0 : index
    %1 = vector.load %arg5[%c0, %c0_0, %c0_1] : memref<8x12x4xf32, #tpu.memory_space<vmem>>, vector<8x4x4xf32>
    tpu.vector_store %arg5[%c0, %c0_0, %c0_1], %0 {strides = array<i32>} : memref<8x12x4xf32, #tpu.memory_space<vmem>>, vector<8x4x4xf32>,
    %c0_2 = arith.constant 0 : index
    %c0_3 = arith.constant 0 : index
    %c0_4 = arith.constant 0 : index
    %2 = vector.load %arg1[%c0_2, %c0_3, %c0_4] : memref<8x8x4xf32, #tpu.memory_space<vmem>>, vector<8x8x4xf32>
    %c0_5 = arith.constant 0 : index
    %c4 = arith.constant 4 : index
    %c0_6 = arith.constant 0 : index
    %3 = vector.load %arg5[%c0_5, %c4, %c0_6] : memref<8x12x4xf32, #tpu.memory_space<vmem>>, vector<8x8x4xf32>
    tpu.vector_store %arg5[%c0_5, %c4, %c0_6], %2 {strides = array<i32>} : memref<8x12x4xf32, #tpu.memory_space<vmem>>, vector<8x8x4xf32>,
    %c0_7 = arith.constant 0 : index
    %c0_8 = arith.constant 0 : index
    %c0_9 = arith.constant 0 : index
    %4 = vector.load %arg5[%c0_7, %c0_8, %c0_9] : memref<8x12x4xf32, #tpu.memory_space<vmem>>, vector<8x8x4xf32>
    %5 = vector.shape_cast %4 : vector<8x8x4xf32> to vector<64x4xf32>
    %6 = arith.truncf %5 : vector<64x4xf32> to vector<64x4xbf16>
    %c0_10 = arith.constant 0 : index
    %c0_11 = arith.constant 0 : index
    %c0_12 = arith.constant 0 : index
    %7 = vector.load %arg2[%c0_10, %c0_11, %c0_12] : memref<5x4x32xbf16, #tpu.memory_space<vmem>>, vector<1x4x32xbf16>
    %8 = vector.shape_cast %7 : vector<1x4x32xbf16> to vector<4x32xbf16>
    %cst_13 = arith.constant dense<0.000000e+00> : vector<64x32xf32>
    %9 = tpu.matmul %6, %8, %cst_13 {dimension_numbers = #tpu.dot_dimension_numbers<[1], [0], [0], [1], [0, 0, 1, 1], [], []>} : vector<64x4xbf16>, vector<4x32xbf16>, vector<64x32xf32> -> vector<64x32xf32>
    %c0_14 = arith.constant 0 : index
    %c1 = arith.constant 1 : index
    %c0_15 = arith.constant 0 : index
    %10 = vector.load %arg5[%c0_14, %c1, %c0_15] : memref<8x12x4xf32, #tpu.memory_space<vmem>>, vector<8x8x4xf32>
    %11 = vector.shape_cast %10 : vector<8x8x4xf32> to vector<64x4xf32>
    %12 = arith.truncf %11 : vector<64x4xf32> to vector<64x4xbf16>
    %c1_16 = arith.constant 1 : index
    %c0_17 = arith.constant 0 : index
    %c0_18 = arith.constant 0 : index
    %13 = vector.load %arg2[%c1_16, %c0_17, %c0_18] : memref<5x4x32xbf16, #tpu.memory_space<vmem>>, vector<1x4x32xbf16>
    %14 = vector.shape_cast %13 : vector<1x4x32xbf16> to vector<4x32xbf16>
    %cst_19 = arith.constant dense<0.000000e+00> : vector<64x32xf32>
    %15 = tpu.matmul %12, %14, %cst_19 {dimension_numbers = #tpu.dot_dimension_numbers<[1], [0], [0], [1], [0, 0, 1, 1], [], []>} : vector<64x4xbf16>, vector<4x32xbf16>, vector<64x32xf32> -> vector<64x32xf32>
    %16 = arith.addf %9, %15 : vector<64x32xf32>
    %c0_20 = arith.constant 0 : index
    %c2 = arith.constant 2 : index
    %c0_21 = arith.constant 0 : index
    %17 = vector.load %arg5[%c0_20, %c2, %c0_21] : memref<8x12x4xf32, #tpu.memory_space<vmem>>, vector<8x8x4xf32>
    %18 = vector.shape_cast %17 : vector<8x8x4xf32> to vector<64x4xf32>
    %19 = arith.truncf %18 : vector<64x4xf32> to vector<64x4xbf16>
    %c2_22 = arith.constant 2 : index
    %c0_23 = arith.constant 0 : index
    %c0_24 = arith.constant 0 : index
    %20 = vector.load %arg2[%c2_22, %c0_23, %c0_24] : memref<5x4x32xbf16, #tpu.memory_space<vmem>>, vector<1x4x32xbf16>
    %21 = vector.shape_cast %20 : vector<1x4x32xbf16> to vector<4x32xbf16>
    %cst_25 = arith.constant dense<0.000000e+00> : vector<64x32xf32>
    %22 = tpu.matmul %19, %21, %cst_25 {dimension_numbers = #tpu.dot_dimension_numbers<[1], [0], [0], [1], [0, 0, 1, 1], [], []>} : vector<64x4xbf16>, vector<4x32xbf16>, vector<64x32xf32> -> vector<64x32xf32>
    %23 = arith.addf %16, %22 : vector<64x32xf32>
    %c0_26 = arith.constant 0 : index
    %c3 = arith.constant 3 : index
    %c0_27 = arith.constant 0 : index
    %24 = vector.load %arg5[%c0_26, %c3, %c0_27] : memref<8x12x4xf32, #tpu.memory_space<vmem>>, vector<8x8x4xf32>
    %25 = vector.shape_cast %24 : vector<8x8x4xf32> to vector<64x4xf32>
    %26 = arith.truncf %25 : vector<64x4xf32> to vector<64x4xbf16>
    %c3_28 = arith.constant 3 : index
    %c0_29 = arith.constant 0 : index
    %c0_30 = arith.constant 0 : index
    %27 = vector.load %arg2[%c3_28, %c0_29, %c0_30] : memref<5x4x32xbf16, #tpu.memory_space<vmem>>, vector<1x4x32xbf16>
    %28 = vector.shape_cast %27 : vector<1x4x32xbf16> to vector<4x32xbf16>
    %cst_31 = arith.constant dense<0.000000e+00> : vector<64x32xf32>
    %29 = tpu.matmul %26, %28, %cst_31 {dimension_numbers = #tpu.dot_dimension_numbers<[1], [0], [0], [1], [0, 0, 1, 1], [], []>} : vector<64x4xbf16>, vector<4x32xbf16>, vector<64x32xf32> -> vector<64x32xf32>
    %30 = arith.addf %23, %29 : vector<64x32xf32>
    %c0_32 = arith.constant 0 : index
    %c4_33 = arith.constant 4 : index
    %c0_34 = arith.constant 0 : index
    %31 = vector.load %arg5[%c0_32, %c4_33, %c0_34] : memref<8x12x4xf32, #tpu.memory_space<vmem>>, vector<8x8x4xf32>
    %32 = vector.shape_cast %31 : vector<8x8x4xf32> to vector<64x4xf32>
    %33 = arith.truncf %32 : vector<64x4xf32> to vector<64x4xbf16>
    %c4_35 = arith.constant 4 : index
    %c0_36 = arith.constant 0 : index
    %c0_37 = arith.constant 0 : index
    %34 = vector.load %arg2[%c4_35, %c0_36, %c0_37] : memref<5x4x32xbf16, #tpu.memory_space<vmem>>, vector<1x4x32xbf16>
    %35 = vector.shape_cast %34 : vector<1x4x32xbf16> to vector<4x32xbf16>
    %cst_38 = arith.constant dense<0.000000e+00> : vector<64x32xf32>
    %36 = tpu.matmul %33, %35, %cst_38 {dimension_numbers = #tpu.dot_dimension_numbers<[1], [0], [0], [1], [0, 0, 1, 1], [], []>} : vector<64x4xbf16>, vector<4x32xbf16>, vector<64x32xf32> -> vector<64x32xf32>
    %37 = arith.addf %30, %36 : vector<64x32xf32>
    %c0_39 = arith.constant 0 : index
    %c0_40 = arith.constant 0 : index
    %38 = vector.load %arg3[%c0_39, %c0_40] : memref<1x32xf32, #tpu.memory_space<vmem>>, vector<1x32xf32>
    %39 = vector.broadcast %38 : vector<1x32xf32> to vector<64x32xf32>
    %40 = arith.addf %37, %39 : vector<64x32xf32>
    %41 = vector.shape_cast %40 : vector<64x32xf32> to vector<8x8x32xf32>
    %c0_41 = arith.constant 0 : index
    %c0_42 = arith.constant 0 : index
    %c0_43 = arith.constant 0 : index
    %42 = vector.load %arg4[%c0_41, %c0_42, %c0_43] : memref<8x8x32xf32, #tpu.memory_space<vmem>>, vector<8x8x32xf32>
    tpu.vector_store %arg4[%c0_41, %c0_42, %c0_43], %41 {strides = array<i32>} : memref<8x8x32xf32, #tpu.memory_space<vmem>>, vector<8x8x32xf32>,
    return
  }
  func.func @transform_0(%arg0: i32) -> (i32, i32, i32) {
    %c0_i32 = arith.constant 0 : i32
    %c0_i32_0 = arith.constant 0 : i32
    %c0_i32_1 = arith.constant 0 : i32
    return %arg0, %c0_i32, %c0_i32_0 : i32, i32, i32
  }
  func.func @transform_1(%arg0: i32) -> (i32, i32, i32) {
    %c0_i32 = arith.constant 0 : i32
    %c0_i32_0 = arith.constant 0 : i32
    %c0_i32_1 = arith.constant 0 : i32
    %c0_i32_2 = arith.constant 0 : i32
    return %c0_i32, %c0_i32_0, %c0_i32_1 : i32, i32, i32
  }
  func.func @transform_2(%arg0: i32) -> (i32, i32) {
    %c0_i32 = arith.constant 0 : i32
    %c0_i32_0 = arith.constant 0 : i32
    %c0_i32_1 = arith.constant 0 : i32
    return %c0_i32, %c0_i32_0 : i32, i32
  }
  func.func @transform_3(%arg0: i32) -> (i32, i32, i32) {
    %c0_i32 = arith.constant 0 : i32
    %c0_i32_0 = arith.constant 0 : i32
    %c0_i32_1 = arith.constant 0 : i32
    return %arg0, %c0_i32, %c0_i32_0 : i32, i32, i32
  }
}

module attributes {stable_mosaic.version = 11 : i64} {
  func.func @_fconv_kernel(%arg0: i32, %arg1: i32, %arg2: memref<1x16x8x32xf32, #tpu.memory_space<vmem>>, %arg3: memref<1x32xf32, #tpu.memory_space<vmem>>, %arg4: memref<1x32xf32, #tpu.memory_space<vmem>>, %arg5: memref<5x32x32xbf16, #tpu.memory_space<vmem>>, %arg6: memref<1x32xf32, #tpu.memory_space<vmem>>, %arg7: memref<1x32xf32, #tpu.memory_space<vmem>>, %arg8: memref<1x16x8x32xf32, #tpu.memory_space<vmem>>, %arg9: memref<20x8x32xbf16, #tpu.memory_space<vmem>>) attributes {dimension_semantics = [#tpu.dimension_semantics<parallel>, #tpu.dimension_semantics<parallel>], iteration_bounds = array<i64: 2, 1>, scalar_prefetch = 0 : i64, scratch_operands = 1 : i64, tpu.core_type = #tpu.core_type<tc>, window_params = [{transform_indices = @transform_0, window_bounds = array<i64: 1, 16, 8, 32>}, {pipeline_mode = #tpu.pipeline_mode<synchronous>, transform_indices = @transform_1, window_bounds = array<i64: 1, 32>}, {pipeline_mode = #tpu.pipeline_mode<synchronous>, transform_indices = @transform_2, window_bounds = array<i64: 1, 32>}, {pipeline_mode = #tpu.pipeline_mode<synchronous>, transform_indices = @transform_3, window_bounds = array<i64: 5, 32, 32>}, {pipeline_mode = #tpu.pipeline_mode<synchronous>, transform_indices = @transform_4, window_bounds = array<i64: 1, 32>}, {pipeline_mode = #tpu.pipeline_mode<synchronous>, transform_indices = @transform_5, window_bounds = array<i64: 1, 32>}, {transform_indices = @transform_6, window_bounds = array<i64: 1, 16, 8, 32>}]} {
    %c0 = arith.constant 0 : index
    %c0_0 = arith.constant 0 : index
    %c0_1 = arith.constant 0 : index
    %c0_2 = arith.constant 0 : index
    %0 = vector.load %arg2[%c0, %c0_0, %c0_1, %c0_2] : memref<1x16x8x32xf32, #tpu.memory_space<vmem>>, vector<1x16x8x32xf32>
    %1 = vector.shape_cast %0 : vector<1x16x8x32xf32> to vector<16x8x32xf32>
    %c0_3 = arith.constant 0 : index
    %c0_4 = arith.constant 0 : index
    %2 = vector.load %arg3[%c0_3, %c0_4] : memref<1x32xf32, #tpu.memory_space<vmem>>, vector<1x32xf32>
    %c0_5 = arith.constant 0 : index
    %c0_6 = arith.constant 0 : index
    %3 = vector.load %arg4[%c0_5, %c0_6] : memref<1x32xf32, #tpu.memory_space<vmem>>, vector<1x32xf32>
    %cst = arith.constant dense<0.000000e+00> : vector<16x8xf32>
    %4 = vector.multi_reduction <add>, %1, %cst [2] : vector<16x8x32xf32> to vector<16x8xf32>
    %5 = vector.shape_cast %4 : vector<16x8xf32> to vector<16x8x1xf32>
    %cst_7 = arith.constant 3.200000e+01 : f32
    %6 = vector.broadcast %cst_7 : f32 to vector<16x8x1xf32>
    %7 = arith.divf %5, %6 : vector<16x8x1xf32>
    %8 = vector.broadcast %7 : vector<16x8x1xf32> to vector<16x8x32xf32>
    %9 = arith.subf %1, %8 : vector<16x8x32xf32>
    %10 = arith.mulf %9, %9 : vector<16x8x32xf32>
    %cst_8 = arith.constant dense<0.000000e+00> : vector<16x8xf32>
    %11 = vector.multi_reduction <add>, %10, %cst_8 [2] : vector<16x8x32xf32> to vector<16x8xf32>
    %12 = vector.shape_cast %11 : vector<16x8xf32> to vector<16x8x1xf32>
    %cst_9 = arith.constant 3.200000e+01 : f32
    %13 = vector.broadcast %cst_9 : f32 to vector<16x8x1xf32>
    %14 = arith.divf %12, %13 : vector<16x8x1xf32>
    %15 = vector.broadcast %7 : vector<16x8x1xf32> to vector<16x8x32xf32>
    %16 = arith.subf %1, %15 : vector<16x8x32xf32>
    %cst_10 = arith.constant 9.99999974E-6 : f32
    %17 = vector.broadcast %cst_10 : f32 to vector<16x8x1xf32>
    %18 = arith.addf %14, %17 : vector<16x8x1xf32>
    %19 = math.rsqrt %18 : vector<16x8x1xf32>
    %20 = vector.broadcast %19 : vector<16x8x1xf32> to vector<16x8x32xf32>
    %21 = arith.mulf %16, %20 : vector<16x8x32xf32>
    %22 = vector.shape_cast %2 : vector<1x32xf32> to vector<1x1x32xf32>
    %23 = vector.broadcast %22 : vector<1x1x32xf32> to vector<16x8x32xf32>
    %24 = arith.mulf %21, %23 : vector<16x8x32xf32>
    %25 = vector.shape_cast %3 : vector<1x32xf32> to vector<1x1x32xf32>
    %26 = vector.broadcast %25 : vector<1x1x32xf32> to vector<16x8x32xf32>
    %27 = arith.addf %24, %26 : vector<16x8x32xf32>
    %cst_11 = arith.constant 0.000000e+00 : bf16
    %28 = vector.broadcast %cst_11 : bf16 to vector<2x8x32xbf16>
    %c0_12 = arith.constant 0 : index
    %c0_13 = arith.constant 0 : index
    %c0_14 = arith.constant 0 : index
    %29 = vector.load %arg9[%c0_12, %c0_13, %c0_14] : memref<20x8x32xbf16, #tpu.memory_space<vmem>>, vector<2x8x32xbf16>
    tpu.vector_store %arg9[%c0_12, %c0_13, %c0_14], %28 {strides = array<i32>} : memref<20x8x32xbf16, #tpu.memory_space<vmem>>, vector<2x8x32xbf16>,
    %cst_15 = arith.constant 0.000000e+00 : bf16
    %30 = vector.broadcast %cst_15 : bf16 to vector<2x8x32xbf16>
    %c18 = arith.constant 18 : index
    %c0_16 = arith.constant 0 : index
    %c0_17 = arith.constant 0 : index
    %31 = vector.load %arg9[%c18, %c0_16, %c0_17] : memref<20x8x32xbf16, #tpu.memory_space<vmem>>, vector<2x8x32xbf16>
    tpu.vector_store %arg9[%c18, %c0_16, %c0_17], %30 {strides = array<i32>} : memref<20x8x32xbf16, #tpu.memory_space<vmem>>, vector<2x8x32xbf16>,
    %32 = arith.truncf %27 : vector<16x8x32xf32> to vector<16x8x32xbf16>
    %c2 = arith.constant 2 : index
    %c0_18 = arith.constant 0 : index
    %c0_19 = arith.constant 0 : index
    %33 = vector.load %arg9[%c2, %c0_18, %c0_19] : memref<20x8x32xbf16, #tpu.memory_space<vmem>>, vector<16x8x32xbf16>
    tpu.vector_store %arg9[%c2, %c0_18, %c0_19], %32 {strides = array<i32>} : memref<20x8x32xbf16, #tpu.memory_space<vmem>>, vector<16x8x32xbf16>,
    %c0_20 = arith.constant 0 : index
    %c0_21 = arith.constant 0 : index
    %c0_22 = arith.constant 0 : index
    %34 = vector.load %arg9[%c0_20, %c0_21, %c0_22] : memref<20x8x32xbf16, #tpu.memory_space<vmem>>, vector<16x8x32xbf16>
    %35 = vector.shape_cast %34 : vector<16x8x32xbf16> to vector<128x32xbf16>
    %c0_23 = arith.constant 0 : index
    %c0_24 = arith.constant 0 : index
    %c0_25 = arith.constant 0 : index
    %36 = vector.load %arg5[%c0_23, %c0_24, %c0_25] : memref<5x32x32xbf16, #tpu.memory_space<vmem>>, vector<1x32x32xbf16>
    %37 = vector.shape_cast %36 : vector<1x32x32xbf16> to vector<32x32xbf16>
    %cst_26 = arith.constant dense<0.000000e+00> : vector<128x32xf32>
    %38 = tpu.matmul %35, %37, %cst_26 {dimension_numbers = #tpu.dot_dimension_numbers<[1], [0], [0], [1], [0, 0, 1, 1], [], []>} : vector<128x32xbf16>, vector<32x32xbf16>, vector<128x32xf32> -> vector<128x32xf32>
    %c1 = arith.constant 1 : index
    %c0_27 = arith.constant 0 : index
    %c0_28 = arith.constant 0 : index
    %39 = vector.load %arg9[%c1, %c0_27, %c0_28] : memref<20x8x32xbf16, #tpu.memory_space<vmem>>, vector<16x8x32xbf16>
    %40 = vector.shape_cast %39 : vector<16x8x32xbf16> to vector<128x32xbf16>
    %c1_29 = arith.constant 1 : index
    %c0_30 = arith.constant 0 : index
    %c0_31 = arith.constant 0 : index
    %41 = vector.load %arg5[%c1_29, %c0_30, %c0_31] : memref<5x32x32xbf16, #tpu.memory_space<vmem>>, vector<1x32x32xbf16>
    %42 = vector.shape_cast %41 : vector<1x32x32xbf16> to vector<32x32xbf16>
    %cst_32 = arith.constant dense<0.000000e+00> : vector<128x32xf32>
    %43 = tpu.matmul %40, %42, %cst_32 {dimension_numbers = #tpu.dot_dimension_numbers<[1], [0], [0], [1], [0, 0, 1, 1], [], []>} : vector<128x32xbf16>, vector<32x32xbf16>, vector<128x32xf32> -> vector<128x32xf32>
    %44 = arith.addf %38, %43 : vector<128x32xf32>
    %c2_33 = arith.constant 2 : index
    %c0_34 = arith.constant 0 : index
    %c0_35 = arith.constant 0 : index
    %45 = vector.load %arg9[%c2_33, %c0_34, %c0_35] : memref<20x8x32xbf16, #tpu.memory_space<vmem>>, vector<16x8x32xbf16>
    %46 = vector.shape_cast %45 : vector<16x8x32xbf16> to vector<128x32xbf16>
    %c2_36 = arith.constant 2 : index
    %c0_37 = arith.constant 0 : index
    %c0_38 = arith.constant 0 : index
    %47 = vector.load %arg5[%c2_36, %c0_37, %c0_38] : memref<5x32x32xbf16, #tpu.memory_space<vmem>>, vector<1x32x32xbf16>
    %48 = vector.shape_cast %47 : vector<1x32x32xbf16> to vector<32x32xbf16>
    %cst_39 = arith.constant dense<0.000000e+00> : vector<128x32xf32>
    %49 = tpu.matmul %46, %48, %cst_39 {dimension_numbers = #tpu.dot_dimension_numbers<[1], [0], [0], [1], [0, 0, 1, 1], [], []>} : vector<128x32xbf16>, vector<32x32xbf16>, vector<128x32xf32> -> vector<128x32xf32>
    %50 = arith.addf %44, %49 : vector<128x32xf32>
    %c3 = arith.constant 3 : index
    %c0_40 = arith.constant 0 : index
    %c0_41 = arith.constant 0 : index
    %51 = vector.load %arg9[%c3, %c0_40, %c0_41] : memref<20x8x32xbf16, #tpu.memory_space<vmem>>, vector<16x8x32xbf16>
    %52 = vector.shape_cast %51 : vector<16x8x32xbf16> to vector<128x32xbf16>
    %c3_42 = arith.constant 3 : index
    %c0_43 = arith.constant 0 : index
    %c0_44 = arith.constant 0 : index
    %53 = vector.load %arg5[%c3_42, %c0_43, %c0_44] : memref<5x32x32xbf16, #tpu.memory_space<vmem>>, vector<1x32x32xbf16>
    %54 = vector.shape_cast %53 : vector<1x32x32xbf16> to vector<32x32xbf16>
    %cst_45 = arith.constant dense<0.000000e+00> : vector<128x32xf32>
    %55 = tpu.matmul %52, %54, %cst_45 {dimension_numbers = #tpu.dot_dimension_numbers<[1], [0], [0], [1], [0, 0, 1, 1], [], []>} : vector<128x32xbf16>, vector<32x32xbf16>, vector<128x32xf32> -> vector<128x32xf32>
    %56 = arith.addf %50, %55 : vector<128x32xf32>
    %c4 = arith.constant 4 : index
    %c0_46 = arith.constant 0 : index
    %c0_47 = arith.constant 0 : index
    %57 = vector.load %arg9[%c4, %c0_46, %c0_47] : memref<20x8x32xbf16, #tpu.memory_space<vmem>>, vector<16x8x32xbf16>
    %58 = vector.shape_cast %57 : vector<16x8x32xbf16> to vector<128x32xbf16>
    %c4_48 = arith.constant 4 : index
    %c0_49 = arith.constant 0 : index
    %c0_50 = arith.constant 0 : index
    %59 = vector.load %arg5[%c4_48, %c0_49, %c0_50] : memref<5x32x32xbf16, #tpu.memory_space<vmem>>, vector<1x32x32xbf16>
    %60 = vector.shape_cast %59 : vector<1x32x32xbf16> to vector<32x32xbf16>
    %cst_51 = arith.constant dense<0.000000e+00> : vector<128x32xf32>
    %61 = tpu.matmul %58, %60, %cst_51 {dimension_numbers = #tpu.dot_dimension_numbers<[1], [0], [0], [1], [0, 0, 1, 1], [], []>} : vector<128x32xbf16>, vector<32x32xbf16>, vector<128x32xf32> -> vector<128x32xf32>
    %62 = arith.addf %56, %61 : vector<128x32xf32>
    %c0_52 = arith.constant 0 : index
    %c0_53 = arith.constant 0 : index
    %63 = vector.load %arg6[%c0_52, %c0_53] : memref<1x32xf32, #tpu.memory_space<vmem>>, vector<1x32xf32>
    %64 = vector.broadcast %63 : vector<1x32xf32> to vector<128x32xf32>
    %65 = arith.addf %62, %64 : vector<128x32xf32>
    %c0_54 = arith.constant 0 : index
    %c0_55 = arith.constant 0 : index
    %66 = vector.load %arg7[%c0_54, %c0_55] : memref<1x32xf32, #tpu.memory_space<vmem>>, vector<1x32xf32>
    %cst_56 = arith.constant 0.000000e+00 : f32
    %67 = vector.broadcast %cst_56 : f32 to vector<128x32xf32>
    %68 = arith.cmpf oge, %65, %67 : vector<128x32xf32>
    %69 = vector.broadcast %66 : vector<1x32xf32> to vector<128x32xf32>
    %70 = arith.mulf %69, %65 : vector<128x32xf32>
    %71 = arith.select %68, %65, %70 : vector<128x32xi1>, vector<128x32xf32>
    %72 = vector.shape_cast %71 : vector<128x32xf32> to vector<16x8x32xf32>
    %73 = arith.addf %1, %72 : vector<16x8x32xf32>
    %c0_57 = arith.constant 0 : index
    %c0_58 = arith.constant 0 : index
    %c0_59 = arith.constant 0 : index
    %c0_60 = arith.constant 0 : index
    %74 = vector.load %arg8[%c0_57, %c0_58, %c0_59, %c0_60] : memref<1x16x8x32xf32, #tpu.memory_space<vmem>>, vector<1x16x8x32xf32>
    %75 = vector.shape_cast %74 : vector<1x16x8x32xf32> to vector<16x8x32xf32>
    %76 = vector.shape_cast %73 : vector<16x8x32xf32> to vector<1x16x8x32xf32>
    tpu.vector_store %arg8[%c0_57, %c0_58, %c0_59, %c0_60], %76 {strides = array<i32>} : memref<1x16x8x32xf32, #tpu.memory_space<vmem>>, vector<1x16x8x32xf32>,
    return
  }
  func.func @transform_0(%arg0: i32, %arg1: i32) -> (i32, i32, i32, i32) {
    %c0_i32 = arith.constant 0 : i32
    %c0_i32_0 = arith.constant 0 : i32
    %c0_i32_1 = arith.constant 0 : i32
    return %arg0, %c0_i32, %arg1, %c0_i32_0 : i32, i32, i32, i32
  }
  func.func @transform_1(%arg0: i32, %arg1: i32) -> (i32, i32) {
    %c0_i32 = arith.constant 0 : i32
    %c0_i32_0 = arith.constant 0 : i32
    %c0_i32_1 = arith.constant 0 : i32
    return %c0_i32, %c0_i32_0 : i32, i32
  }
  func.func @transform_2(%arg0: i32, %arg1: i32) -> (i32, i32) {
    %c0_i32 = arith.constant 0 : i32
    %c0_i32_0 = arith.constant 0 : i32
    %c0_i32_1 = arith.constant 0 : i32
    return %c0_i32, %c0_i32_0 : i32, i32
  }
  func.func @transform_3(%arg0: i32, %arg1: i32) -> (i32, i32, i32) {
    %c0_i32 = arith.constant 0 : i32
    %c0_i32_0 = arith.constant 0 : i32
    %c0_i32_1 = arith.constant 0 : i32
    %c0_i32_2 = arith.constant 0 : i32
    return %c0_i32, %c0_i32_0, %c0_i32_1 : i32, i32, i32
  }
  func.func @transform_4(%arg0: i32, %arg1: i32) -> (i32, i32) {
    %c0_i32 = arith.constant 0 : i32
    %c0_i32_0 = arith.constant 0 : i32
    %c0_i32_1 = arith.constant 0 : i32
    return %c0_i32, %c0_i32_0 : i32, i32
  }
  func.func @transform_5(%arg0: i32, %arg1: i32) -> (i32, i32) {
    %c0_i32 = arith.constant 0 : i32
    %c0_i32_0 = arith.constant 0 : i32
    %c0_i32_1 = arith.constant 0 : i32
    return %c0_i32, %c0_i32_0 : i32, i32
  }
  func.func @transform_6(%arg0: i32, %arg1: i32) -> (i32, i32, i32, i32) {
    %c0_i32 = arith.constant 0 : i32
    %c0_i32_0 = arith.constant 0 : i32
    %c0_i32_1 = arith.constant 0 : i32
    return %arg0, %c0_i32, %arg1, %c0_i32_0 : i32, i32, i32, i32
  }
}

module attributes {stable_mosaic.version = 11 : i64} {
  func.func @_ln_mm_silu_kernel(%arg0: i32, %arg1: memref<256x32xf32, #tpu.memory_space<vmem>>, %arg2: memref<1x32xf32, #tpu.memory_space<vmem>>, %arg3: memref<1x32xf32, #tpu.memory_space<vmem>>, %arg4: memref<32x8xbf16, #tpu.memory_space<vmem>>, %arg5: memref<1x8xf32, #tpu.memory_space<vmem>>, %arg6: memref<256x8xbf16, #tpu.memory_space<vmem>>) attributes {dimension_semantics = [#tpu.dimension_semantics<parallel>], iteration_bounds = array<i64: 1>, scalar_prefetch = 0 : i64, scratch_operands = 0 : i64, tpu.core_type = #tpu.core_type<tc>, window_params = [{transform_indices = @transform_0, window_bounds = array<i64: 256, 32>}, {pipeline_mode = #tpu.pipeline_mode<synchronous>, transform_indices = @transform_1, window_bounds = array<i64: 1, 32>}, {pipeline_mode = #tpu.pipeline_mode<synchronous>, transform_indices = @transform_2, window_bounds = array<i64: 1, 32>}, {pipeline_mode = #tpu.pipeline_mode<synchronous>, transform_indices = @transform_3, window_bounds = array<i64: 32, 8>}, {pipeline_mode = #tpu.pipeline_mode<synchronous>, transform_indices = @transform_4, window_bounds = array<i64: 1, 8>}, {transform_indices = @transform_5, window_bounds = array<i64: 256, 8>}]} {
    %c0 = arith.constant 0 : index
    %c0_0 = arith.constant 0 : index
    %0 = vector.load %arg1[%c0, %c0_0] : memref<256x32xf32, #tpu.memory_space<vmem>>, vector<256x32xf32>
    %c0_1 = arith.constant 0 : index
    %c0_2 = arith.constant 0 : index
    %1 = vector.load %arg2[%c0_1, %c0_2] : memref<1x32xf32, #tpu.memory_space<vmem>>, vector<1x32xf32>
    %c0_3 = arith.constant 0 : index
    %c0_4 = arith.constant 0 : index
    %2 = vector.load %arg3[%c0_3, %c0_4] : memref<1x32xf32, #tpu.memory_space<vmem>>, vector<1x32xf32>
    %cst = arith.constant dense<0.000000e+00> : vector<256xf32>
    %3 = vector.multi_reduction <add>, %0, %cst [1] : vector<256x32xf32> to vector<256xf32>
    %4 = vector.shape_cast %3 : vector<256xf32> to vector<256x1xf32>
    %cst_5 = arith.constant 3.200000e+01 : f32
    %5 = vector.broadcast %cst_5 : f32 to vector<256x1xf32>
    %6 = arith.divf %4, %5 : vector<256x1xf32>
    %7 = vector.broadcast %6 : vector<256x1xf32> to vector<256x32xf32>
    %8 = arith.subf %0, %7 : vector<256x32xf32>
    %9 = arith.mulf %8, %8 : vector<256x32xf32>
    %cst_6 = arith.constant dense<0.000000e+00> : vector<256xf32>
    %10 = vector.multi_reduction <add>, %9, %cst_6 [1] : vector<256x32xf32> to vector<256xf32>
    %11 = vector.shape_cast %10 : vector<256xf32> to vector<256x1xf32>
    %cst_7 = arith.constant 3.200000e+01 : f32
    %12 = vector.broadcast %cst_7 : f32 to vector<256x1xf32>
    %13 = arith.divf %11, %12 : vector<256x1xf32>
    %14 = vector.broadcast %6 : vector<256x1xf32> to vector<256x32xf32>
    %15 = arith.subf %0, %14 : vector<256x32xf32>
    %cst_8 = arith.constant 9.99999974E-6 : f32
    %16 = vector.broadcast %cst_8 : f32 to vector<256x1xf32>
    %17 = arith.addf %13, %16 : vector<256x1xf32>
    %18 = math.rsqrt %17 : vector<256x1xf32>
    %19 = vector.broadcast %18 : vector<256x1xf32> to vector<256x32xf32>
    %20 = arith.mulf %15, %19 : vector<256x32xf32>
    %21 = vector.broadcast %1 : vector<1x32xf32> to vector<256x32xf32>
    %22 = arith.mulf %20, %21 : vector<256x32xf32>
    %23 = vector.broadcast %2 : vector<1x32xf32> to vector<256x32xf32>
    %24 = arith.addf %22, %23 : vector<256x32xf32>
    %25 = arith.truncf %24 : vector<256x32xf32> to vector<256x32xbf16>
    %c0_9 = arith.constant 0 : index
    %c0_10 = arith.constant 0 : index
    %26 = vector.load %arg4[%c0_9, %c0_10] : memref<32x8xbf16, #tpu.memory_space<vmem>>, vector<32x8xbf16>
    %cst_11 = arith.constant dense<0.000000e+00> : vector<256x8xf32>
    %27 = tpu.matmul %25, %26, %cst_11 {dimension_numbers = #tpu.dot_dimension_numbers<[1], [0], [0], [1], [0, 0, 1, 1], [], []>} : vector<256x32xbf16>, vector<32x8xbf16>, vector<256x8xf32> -> vector<256x8xf32>
    %c0_12 = arith.constant 0 : index
    %c0_13 = arith.constant 0 : index
    %28 = vector.load %arg5[%c0_12, %c0_13] : memref<1x8xf32, #tpu.memory_space<vmem>>, vector<1x8xf32>
    %29 = vector.broadcast %28 : vector<1x8xf32> to vector<256x8xf32>
    %30 = arith.addf %27, %29 : vector<256x8xf32>
    %31 = arith.negf %30 : vector<256x8xf32>
    %32 = math.exp %31 : vector<256x8xf32>
    %cst_14 = arith.constant 1.000000e+00 : f32
    %33 = vector.broadcast %cst_14 : f32 to vector<256x8xf32>
    %34 = arith.addf %33, %32 : vector<256x8xf32>
    %35 = arith.divf %33, %34 : vector<256x8xf32>
    %36 = arith.mulf %30, %35 : vector<256x8xf32>
    %37 = arith.truncf %36 : vector<256x8xf32> to vector<256x8xbf16>
    %c0_15 = arith.constant 0 : index
    %c0_16 = arith.constant 0 : index
    %38 = vector.load %arg6[%c0_15, %c0_16] : memref<256x8xbf16, #tpu.memory_space<vmem>>, vector<256x8xbf16>
    tpu.vector_store %arg6[%c0_15, %c0_16], %37 {strides = array<i32>} : memref<256x8xbf16, #tpu.memory_space<vmem>>, vector<256x8xbf16>,
    return
  }
  func.func @transform_0(%arg0: i32) -> (i32, i32) {
    %c0_i32 = arith.constant 0 : i32
    %c0_i32_0 = arith.constant 0 : i32
    return %arg0, %c0_i32 : i32, i32
  }
  func.func @transform_1(%arg0: i32) -> (i32, i32) {
    %c0_i32 = arith.constant 0 : i32
    %c0_i32_0 = arith.constant 0 : i32
    %c0_i32_1 = arith.constant 0 : i32
    return %c0_i32, %c0_i32_0 : i32, i32
  }
  func.func @transform_2(%arg0: i32) -> (i32, i32) {
    %c0_i32 = arith.constant 0 : i32
    %c0_i32_0 = arith.constant 0 : i32
    %c0_i32_1 = arith.constant 0 : i32
    return %c0_i32, %c0_i32_0 : i32, i32
  }
  func.func @transform_3(%arg0: i32) -> (i32, i32) {
    %c0_i32 = arith.constant 0 : i32
    %c0_i32_0 = arith.constant 0 : i32
    %c0_i32_1 = arith.constant 0 : i32
    return %c0_i32, %c0_i32_0 : i32, i32
  }
  func.func @transform_4(%arg0: i32) -> (i32, i32) {
    %c0_i32 = arith.constant 0 : i32
    %c0_i32_0 = arith.constant 0 : i32
    %c0_i32_1 = arith.constant 0 : i32
    return %c0_i32, %c0_i32_0 : i32, i32
  }
  func.func @transform_5(%arg0: i32) -> (i32, i32) {
    %c0_i32 = arith.constant 0 : i32
    %c0_i32_0 = arith.constant 0 : i32
    return %arg0, %c0_i32 : i32, i32
  }
}

module attributes {stable_mosaic.version = 11 : i64} {
  func.func @_lingroup_kernel(%arg0: i32, %arg1: i32, %arg2: memref<1x16x16xbf16, #tpu.memory_space<vmem>>, %arg3: memref<1x16x16xbf16, #tpu.memory_space<vmem>>, %arg4: memref<1x16x1xf32, #tpu.memory_space<vmem>>, %arg5: memref<1x16x16xbf16, #tpu.memory_space<vmem>>) attributes {dimension_semantics = [#tpu.dimension_semantics<parallel>, #tpu.dimension_semantics<parallel>], iteration_bounds = array<i64: 8, 1>, scalar_prefetch = 0 : i64, scratch_operands = 0 : i64, tpu.core_type = #tpu.core_type<tc>, window_params = [{transform_indices = @transform_0, window_bounds = array<i64: 1, 16, 16>}, {transform_indices = @transform_1, window_bounds = array<i64: 1, 16, 16>}, {transform_indices = @transform_2, window_bounds = array<i64: 1, 16, 1>}, {transform_indices = @transform_3, window_bounds = array<i64: 1, 16, 16>}]} {
    %c0 = arith.constant 0 : index
    %c0_0 = arith.constant 0 : index
    %c0_1 = arith.constant 0 : index
    %0 = vector.load %arg2[%c0, %c0_0, %c0_1] : memref<1x16x16xbf16, #tpu.memory_space<vmem>>, vector<1x16x16xbf16>
    %1 = vector.shape_cast %0 : vector<1x16x16xbf16> to vector<16x16xbf16>
    %c0_2 = arith.constant 0 : index
    %c0_3 = arith.constant 0 : index
    %c0_4 = arith.constant 0 : index
    %2 = vector.load %arg3[%c0_2, %c0_3, %c0_4] : memref<1x16x16xbf16, #tpu.memory_space<vmem>>, vector<1x16x16xbf16>
    %3 = vector.shape_cast %2 : vector<1x16x16xbf16> to vector<16x16xbf16>
    %cst = arith.constant dense<0.000000e+00> : vector<16x16xf32>
    %4 = tpu.matmul %1, %3, %cst {dimension_numbers = #tpu.dot_dimension_numbers<[1], [0], [0], [1], [0, 0, 1, 1], [], []>} : vector<16x16xbf16>, vector<16x16xbf16>, vector<16x16xf32> -> vector<16x16xf32>
    %c0_5 = arith.constant 0 : index
    %c0_6 = arith.constant 0 : index
    %c0_7 = arith.constant 0 : index
    %5 = vector.load %arg4[%c0_5, %c0_6, %c0_7] : memref<1x16x1xf32, #tpu.memory_space<vmem>>, vector<1x16x1xf32>
    %6 = vector.shape_cast %5 : vector<1x16x1xf32> to vector<16x1xf32>
    %7 = vector.broadcast %6 : vector<16x1xf32> to vector<16x16xf32>
    %8 = arith.addf %4, %7 : vector<16x16xf32>
    %9 = arith.truncf %8 : vector<16x16xf32> to vector<16x16xbf16>
    %c0_8 = arith.constant 0 : index
    %c0_9 = arith.constant 0 : index
    %c0_10 = arith.constant 0 : index
    %10 = vector.load %arg5[%c0_8, %c0_9, %c0_10] : memref<1x16x16xbf16, #tpu.memory_space<vmem>>, vector<1x16x16xbf16>
    %11 = vector.shape_cast %10 : vector<1x16x16xbf16> to vector<16x16xbf16>
    %12 = vector.shape_cast %9 : vector<16x16xbf16> to vector<1x16x16xbf16>
    tpu.vector_store %arg5[%c0_8, %c0_9, %c0_10], %12 {strides = array<i32>} : memref<1x16x16xbf16, #tpu.memory_space<vmem>>, vector<1x16x16xbf16>,
    return
  }
  func.func @transform_0(%arg0: i32, %arg1: i32) -> (i32, i32, i32) {
    %c0_i32 = arith.constant 0 : i32
    %c0_i32_0 = arith.constant 0 : i32
    %c0_i32_1 = arith.constant 0 : i32
    return %arg0, %c0_i32, %c0_i32_0 : i32, i32, i32
  }
  func.func @transform_1(%arg0: i32, %arg1: i32) -> (i32, i32, i32) {
    %c0_i32 = arith.constant 0 : i32
    %c0_i32_0 = arith.constant 0 : i32
    return %arg0, %c0_i32, %arg1 : i32, i32, i32
  }
  func.func @transform_2(%arg0: i32, %arg1: i32) -> (i32, i32, i32) {
    %c0_i32 = arith.constant 0 : i32
    %c0_i32_0 = arith.constant 0 : i32
    %c0_i32_1 = arith.constant 0 : i32
    return %arg0, %c0_i32, %c0_i32_0 : i32, i32, i32
  }
  func.func @transform_3(%arg0: i32, %arg1: i32) -> (i32, i32, i32) {
    %c0_i32 = arith.constant 0 : i32
    %c0_i32_0 = arith.constant 0 : i32
    return %arg0, %c0_i32, %arg1 : i32, i32, i32
  }
}

module attributes {stable_mosaic.version = 11 : i64} {
  func.func @_unsq_residual_kernel(%arg0: i32, %arg1: memref<256x8xbf16, #tpu.memory_space<vmem>>, %arg2: memref<256x32xf32, #tpu.memory_space<vmem>>, %arg3: memref<8x32xbf16, #tpu.memory_space<vmem>>, %arg4: memref<1x32xf32, #tpu.memory_space<vmem>>, %arg5: memref<256x32xf32, #tpu.memory_space<vmem>>) attributes {dimension_semantics = [#tpu.dimension_semantics<parallel>], iteration_bounds = array<i64: 1>, scalar_prefetch = 0 : i64, scratch_operands = 0 : i64, tpu.core_type = #tpu.core_type<tc>, window_params = [{transform_indices = @transform_0, window_bounds = array<i64: 256, 8>}, {transform_indices = @transform_1, window_bounds = array<i64: 256, 32>}, {pipeline_mode = #tpu.pipeline_mode<synchronous>, transform_indices = @transform_2, window_bounds = array<i64: 8, 32>}, {pipeline_mode = #tpu.pipeline_mode<synchronous>, transform_indices = @transform_3, window_bounds = array<i64: 1, 32>}, {transform_indices = @transform_4, window_bounds = array<i64: 256, 32>}]} {
    %c0 = arith.constant 0 : index
    %c0_0 = arith.constant 0 : index
    %0 = vector.load %arg1[%c0, %c0_0] : memref<256x8xbf16, #tpu.memory_space<vmem>>, vector<256x8xbf16>
    %c0_1 = arith.constant 0 : index
    %c0_2 = arith.constant 0 : index
    %1 = vector.load %arg3[%c0_1, %c0_2] : memref<8x32xbf16, #tpu.memory_space<vmem>>, vector<8x32xbf16>
    %cst = arith.constant dense<0.000000e+00> : vector<256x32xf32>
    %2 = tpu.matmul %0, %1, %cst {dimension_numbers = #tpu.dot_dimension_numbers<[1], [0], [0], [1], [0, 0, 1, 1], [], []>} : vector<256x8xbf16>, vector<8x32xbf16>, vector<256x32xf32> -> vector<256x32xf32>
    %c0_3 = arith.constant 0 : index
    %c0_4 = arith.constant 0 : index
    %3 = vector.load %arg2[%c0_3, %c0_4] : memref<256x32xf32, #tpu.memory_space<vmem>>, vector<256x32xf32>
    %c0_5 = arith.constant 0 : index
    %c0_6 = arith.constant 0 : index
    %4 = vector.load %arg4[%c0_5, %c0_6] : memref<1x32xf32, #tpu.memory_space<vmem>>, vector<1x32xf32>
    %5 = vector.broadcast %4 : vector<1x32xf32> to vector<256x32xf32>
    %6 = arith.addf %2, %5 : vector<256x32xf32>
    %7 = arith.negf %6 : vector<256x32xf32>
    %8 = math.exp %7 : vector<256x32xf32>
    %cst_7 = arith.constant 1.000000e+00 : f32
    %9 = vector.broadcast %cst_7 : f32 to vector<256x32xf32>
    %10 = arith.addf %9, %8 : vector<256x32xf32>
    %11 = arith.divf %9, %10 : vector<256x32xf32>
    %12 = arith.mulf %6, %11 : vector<256x32xf32>
    %13 = arith.addf %3, %12 : vector<256x32xf32>
    %c0_8 = arith.constant 0 : index
    %c0_9 = arith.constant 0 : index
    %14 = vector.load %arg5[%c0_8, %c0_9] : memref<256x32xf32, #tpu.memory_space<vmem>>, vector<256x32xf32>
    tpu.vector_store %arg5[%c0_8, %c0_9], %13 {strides = array<i32>} : memref<256x32xf32, #tpu.memory_space<vmem>>, vector<256x32xf32>,
    return
  }
  func.func @transform_0(%arg0: i32) -> (i32, i32) {
    %c0_i32 = arith.constant 0 : i32
    %c0_i32_0 = arith.constant 0 : i32
    return %arg0, %c0_i32 : i32, i32
  }
  func.func @transform_1(%arg0: i32) -> (i32, i32) {
    %c0_i32 = arith.constant 0 : i32
    %c0_i32_0 = arith.constant 0 : i32
    return %arg0, %c0_i32 : i32, i32
  }
  func.func @transform_2(%arg0: i32) -> (i32, i32) {
    %c0_i32 = arith.constant 0 : i32
    %c0_i32_0 = arith.constant 0 : i32
    %c0_i32_1 = arith.constant 0 : i32
    return %c0_i32, %c0_i32_0 : i32, i32
  }
  func.func @transform_3(%arg0: i32) -> (i32, i32) {
    %c0_i32 = arith.constant 0 : i32
    %c0_i32_0 = arith.constant 0 : i32
    %c0_i32_1 = arith.constant 0 : i32
    return %c0_i32, %c0_i32_0 : i32, i32
  }
  func.func @transform_4(%arg0: i32) -> (i32, i32) {
    %c0_i32 = arith.constant 0 : i32
    %c0_i32_0 = arith.constant 0 : i32
    return %arg0, %c0_i32 : i32, i32
  }
}

module attributes {stable_mosaic.version = 11 : i64} {
  func.func @_tsa_kernel(%arg0: i32, %arg1: memref<1x8x32xf32, #tpu.memory_space<vmem>>, %arg2: memref<1x32xf32, #tpu.memory_space<vmem>>, %arg3: memref<1x32xf32, #tpu.memory_space<vmem>>, %arg4: memref<32x96xbf16, #tpu.memory_space<vmem>>, %arg5: memref<1x96xf32, #tpu.memory_space<vmem>>, %arg6: memref<32x32xbf16, #tpu.memory_space<vmem>>, %arg7: memref<1x32xf32, #tpu.memory_space<vmem>>, %arg8: memref<1x8x32xf32, #tpu.memory_space<vmem>>) attributes {dimension_semantics = [#tpu.dimension_semantics<parallel>], iteration_bounds = array<i64: 32>, scalar_prefetch = 0 : i64, scratch_operands = 0 : i64, tpu.core_type = #tpu.core_type<tc>, window_params = [{transform_indices = @transform_0, window_bounds = array<i64: 1, 8, 32>}, {pipeline_mode = #tpu.pipeline_mode<synchronous>, transform_indices = @transform_1, window_bounds = array<i64: 1, 32>}, {pipeline_mode = #tpu.pipeline_mode<synchronous>, transform_indices = @transform_2, window_bounds = array<i64: 1, 32>}, {pipeline_mode = #tpu.pipeline_mode<synchronous>, transform_indices = @transform_3, window_bounds = array<i64: 32, 96>}, {pipeline_mode = #tpu.pipeline_mode<synchronous>, transform_indices = @transform_4, window_bounds = array<i64: 1, 96>}, {pipeline_mode = #tpu.pipeline_mode<synchronous>, transform_indices = @transform_5, window_bounds = array<i64: 32, 32>}, {pipeline_mode = #tpu.pipeline_mode<synchronous>, transform_indices = @transform_6, window_bounds = array<i64: 1, 32>}, {transform_indices = @transform_7, window_bounds = array<i64: 1, 8, 32>}]} {
    %c0 = arith.constant 0 : index
    %c0_0 = arith.constant 0 : index
    %c0_1 = arith.constant 0 : index
    %0 = vector.load %arg1[%c0, %c0_0, %c0_1] : memref<1x8x32xf32, #tpu.memory_space<vmem>>, vector<1x8x32xf32>
    %1 = vector.shape_cast %0 : vector<1x8x32xf32> to vector<8x32xf32>
    %c0_2 = arith.constant 0 : index
    %c0_3 = arith.constant 0 : index
    %2 = vector.load %arg2[%c0_2, %c0_3] : memref<1x32xf32, #tpu.memory_space<vmem>>, vector<1x32xf32>
    %c0_4 = arith.constant 0 : index
    %c0_5 = arith.constant 0 : index
    %3 = vector.load %arg3[%c0_4, %c0_5] : memref<1x32xf32, #tpu.memory_space<vmem>>, vector<1x32xf32>
    %cst = arith.constant dense<0.000000e+00> : vector<8xf32>
    %4 = vector.multi_reduction <add>, %1, %cst [1] : vector<8x32xf32> to vector<8xf32>
    %5 = vector.shape_cast %4 : vector<8xf32> to vector<8x1xf32>
    %cst_6 = arith.constant 3.200000e+01 : f32
    %6 = vector.broadcast %cst_6 : f32 to vector<8x1xf32>
    %7 = arith.divf %5, %6 : vector<8x1xf32>
    %8 = vector.broadcast %7 : vector<8x1xf32> to vector<8x32xf32>
    %9 = arith.subf %1, %8 : vector<8x32xf32>
    %10 = arith.mulf %9, %9 : vector<8x32xf32>
    %cst_7 = arith.constant dense<0.000000e+00> : vector<8xf32>
    %11 = vector.multi_reduction <add>, %10, %cst_7 [1] : vector<8x32xf32> to vector<8xf32>
    %12 = vector.shape_cast %11 : vector<8xf32> to vector<8x1xf32>
    %cst_8 = arith.constant 3.200000e+01 : f32
    %13 = vector.broadcast %cst_8 : f32 to vector<8x1xf32>
    %14 = arith.divf %12, %13 : vector<8x1xf32>
    %15 = vector.broadcast %7 : vector<8x1xf32> to vector<8x32xf32>
    %16 = arith.subf %1, %15 : vector<8x32xf32>
    %cst_9 = arith.constant 9.99999974E-6 : f32
    %17 = vector.broadcast %cst_9 : f32 to vector<8x1xf32>
    %18 = arith.addf %14, %17 : vector<8x1xf32>
    %19 = math.rsqrt %18 : vector<8x1xf32>
    %20 = vector.broadcast %19 : vector<8x1xf32> to vector<8x32xf32>
    %21 = arith.mulf %16, %20 : vector<8x32xf32>
    %22 = vector.broadcast %2 : vector<1x32xf32> to vector<8x32xf32>
    %23 = arith.mulf %21, %22 : vector<8x32xf32>
    %24 = vector.broadcast %3 : vector<1x32xf32> to vector<8x32xf32>
    %25 = arith.addf %23, %24 : vector<8x32xf32>
    %26 = arith.truncf %25 : vector<8x32xf32> to vector<8x32xbf16>
    %c0_10 = arith.constant 0 : index
    %c0_11 = arith.constant 0 : index
    %27 = vector.load %arg4[%c0_10, %c0_11] : memref<32x96xbf16, #tpu.memory_space<vmem>>, vector<32x96xbf16>
    %cst_12 = arith.constant dense<0.000000e+00> : vector<8x96xf32>
    %28 = tpu.matmul %26, %27, %cst_12 {dimension_numbers = #tpu.dot_dimension_numbers<[1], [0], [0], [1], [0, 0, 1, 1], [], []>} : vector<8x32xbf16>, vector<32x96xbf16>, vector<8x96xf32> -> vector<8x96xf32>
    %c0_13 = arith.constant 0 : index
    %c0_14 = arith.constant 0 : index
    %29 = vector.load %arg5[%c0_13, %c0_14] : memref<1x96xf32, #tpu.memory_space<vmem>>, vector<1x96xf32>
    %30 = vector.broadcast %29 : vector<1x96xf32> to vector<8x96xf32>
    %31 = arith.addf %28, %30 : vector<8x96xf32>
    %32 = tpu.iota {dimensions = array<i32: 0>} : vector<8x8xi32>
    %33 = tpu.iota {dimensions = array<i32: 1>} : vector<8x8xi32>
    %34 = arith.cmpi sge, %32, %33 : vector<8x8xi32>
    %35 = arith.subi %32, %33 : vector<8x8xi32>
    %c251_i32 = arith.constant 251 : i32
    %36 = vector.broadcast %c251_i32 : i32 to vector<8x8xi32>
    %37 = arith.cmpi slt, %35, %36 : vector<8x8xi32>
    %38 = arith.andi %34, %37 : vector<8x8xi1>
    %cst_15 = arith.constant 0.000000e+00 : f32
    %39 = vector.broadcast %cst_15 : f32 to vector<8x32xf32>
    %40 = vector.extract_strided_slice %31 {offsets = [0, 0], sizes = [8, 16], strides = [1, 1]} : vector<8x96xf32> to vector<8x16xf32>
    %cst_16 = arith.constant 2.500000e-01 : f32
    %41 = vector.broadcast %cst_16 : f32 to vector<8x16xf32>
    %42 = arith.mulf %40, %41 : vector<8x16xf32>
    %43 = vector.extract_strided_slice %31 {offsets = [0, 32], sizes = [8, 16], strides = [1, 1]} : vector<8x96xf32> to vector<8x16xf32>
    %44 = vector.extract_strided_slice %31 {offsets = [0, 64], sizes = [8, 16], strides = [1, 1]} : vector<8x96xf32> to vector<8x16xf32>
    %45 = arith.truncf %42 : vector<8x16xf32> to vector<8x16xbf16>
    %46 = arith.truncf %43 : vector<8x16xf32> to vector<8x16xbf16>
    %cst_17 = arith.constant dense<0.000000e+00> : vector<8x8xf32>
    %47 = tpu.matmul %45, %46, %cst_17 {dimension_numbers = #tpu.dot_dimension_numbers<[1], [1], [0], [0], [0, 0, 1, 0], [], []>} : vector<8x16xbf16>, vector<8x16xbf16>, vector<8x8xf32> -> vector<8x8xf32>
    %cst_18 = arith.constant -1.000000e+30 : f32
    %48 = vector.broadcast %cst_18 : f32 to vector<8x8xf32>
    %49 = arith.select %38, %47, %48 : vector<8x8xi1>, vector<8x8xf32>
    %cst_19 = arith.constant dense<0xFF800000> : vector<8xf32>
    %50 = vector.multi_reduction <maximumf>, %49, %cst_19 [1] : vector<8x8xf32> to vector<8xf32>
    %51 = vector.shape_cast %50 : vector<8xf32> to vector<8x1xf32>
    %52 = vector.broadcast %51 : vector<8x1xf32> to vector<8x8xf32>
    %53 = arith.subf %49, %52 : vector<8x8xf32>
    %54 = math.exp %53 : vector<8x8xf32>
    %cst_20 = arith.constant dense<0.000000e+00> : vector<8xf32>
    %55 = vector.multi_reduction <add>, %54, %cst_20 [1] : vector<8x8xf32> to vector<8xf32>
    %56 = vector.shape_cast %55 : vector<8xf32> to vector<8x1xf32>
    %57 = tpu.reciprocal %56 {approx = true} : vector<8x1xf32> -> vector<8x1xf32>
    %58 = arith.truncf %54 : vector<8x8xf32> to vector<8x8xbf16>
    %59 = arith.truncf %44 : vector<8x16xf32> to vector<8x16xbf16>
    %cst_21 = arith.constant dense<0.000000e+00> : vector<8x16xf32>
    %60 = tpu.matmul %58, %59, %cst_21 {dimension_numbers = #tpu.dot_dimension_numbers<[1], [0], [0], [1], [0, 0, 1, 1], [], []>} : vector<8x8xbf16>, vector<8x16xbf16>, vector<8x16xf32> -> vector<8x16xf32>
    %61 = vector.broadcast %57 : vector<8x1xf32> to vector<8x16xf32>
    %62 = arith.mulf %60, %61 : vector<8x16xf32>
    %63 = arith.truncf %62 : vector<8x16xf32> to vector<8x16xbf16>
    %c0_22 = arith.constant 0 : index
    %c0_23 = arith.constant 0 : index
    %64 = vector.load %arg6[%c0_22, %c0_23] : memref<32x32xbf16, #tpu.memory_space<vmem>>, vector<16x32xbf16>
    %cst_24 = arith.constant dense<0.000000e+00> : vector<8x32xf32>
    %65 = tpu.matmul %63, %64, %cst_24 {dimension_numbers = #tpu.dot_dimension_numbers<[1], [0], [0], [1], [0, 0, 1, 1], [], []>} : vector<8x16xbf16>, vector<16x32xbf16>, vector<8x32xf32> -> vector<8x32xf32>
    %66 = arith.addf %39, %65 : vector<8x32xf32>
    %67 = vector.extract_strided_slice %31 {offsets = [0, 16], sizes = [8, 16], strides = [1, 1]} : vector<8x96xf32> to vector<8x16xf32>
    %cst_25 = arith.constant 2.500000e-01 : f32
    %68 = vector.broadcast %cst_25 : f32 to vector<8x16xf32>
    %69 = arith.mulf %67, %68 : vector<8x16xf32>
    %70 = vector.extract_strided_slice %31 {offsets = [0, 48], sizes = [8, 16], strides = [1, 1]} : vector<8x96xf32> to vector<8x16xf32>
    %71 = vector.extract_strided_slice %31 {offsets = [0, 80], sizes = [8, 16], strides = [1, 1]} : vector<8x96xf32> to vector<8x16xf32>
    %72 = arith.truncf %69 : vector<8x16xf32> to vector<8x16xbf16>
    %73 = arith.truncf %70 : vector<8x16xf32> to vector<8x16xbf16>
    %cst_26 = arith.constant dense<0.000000e+00> : vector<8x8xf32>
    %74 = tpu.matmul %72, %73, %cst_26 {dimension_numbers = #tpu.dot_dimension_numbers<[1], [1], [0], [0], [0, 0, 1, 0], [], []>} : vector<8x16xbf16>, vector<8x16xbf16>, vector<8x8xf32> -> vector<8x8xf32>
    %cst_27 = arith.constant -1.000000e+30 : f32
    %75 = vector.broadcast %cst_27 : f32 to vector<8x8xf32>
    %76 = arith.select %38, %74, %75 : vector<8x8xi1>, vector<8x8xf32>
    %cst_28 = arith.constant dense<0xFF800000> : vector<8xf32>
    %77 = vector.multi_reduction <maximumf>, %76, %cst_28 [1] : vector<8x8xf32> to vector<8xf32>
    %78 = vector.shape_cast %77 : vector<8xf32> to vector<8x1xf32>
    %79 = vector.broadcast %78 : vector<8x1xf32> to vector<8x8xf32>
    %80 = arith.subf %76, %79 : vector<8x8xf32>
    %81 = math.exp %80 : vector<8x8xf32>
    %cst_29 = arith.constant dense<0.000000e+00> : vector<8xf32>
    %82 = vector.multi_reduction <add>, %81, %cst_29 [1] : vector<8x8xf32> to vector<8xf32>
    %83 = vector.shape_cast %82 : vector<8xf32> to vector<8x1xf32>
    %84 = tpu.reciprocal %83 {approx = true} : vector<8x1xf32> -> vector<8x1xf32>
    %85 = arith.truncf %81 : vector<8x8xf32> to vector<8x8xbf16>
    %86 = arith.truncf %71 : vector<8x16xf32> to vector<8x16xbf16>
    %cst_30 = arith.constant dense<0.000000e+00> : vector<8x16xf32>
    %87 = tpu.matmul %85, %86, %cst_30 {dimension_numbers = #tpu.dot_dimension_numbers<[1], [0], [0], [1], [0, 0, 1, 1], [], []>} : vector<8x8xbf16>, vector<8x16xbf16>, vector<8x16xf32> -> vector<8x16xf32>
    %88 = vector.broadcast %84 : vector<8x1xf32> to vector<8x16xf32>
    %89 = arith.mulf %87, %88 : vector<8x16xf32>
    %90 = arith.truncf %89 : vector<8x16xf32> to vector<8x16xbf16>
    %c16 = arith.constant 16 : index
    %c0_31 = arith.constant 0 : index
    %91 = vector.load %arg6[%c16, %c0_31] : memref<32x32xbf16, #tpu.memory_space<vmem>>, vector<16x32xbf16>
    %cst_32 = arith.constant dense<0.000000e+00> : vector<8x32xf32>
    %92 = tpu.matmul %90, %91, %cst_32 {dimension_numbers = #tpu.dot_dimension_numbers<[1], [0], [0], [1], [0, 0, 1, 1], [], []>} : vector<8x16xbf16>, vector<16x32xbf16>, vector<8x32xf32> -> vector<8x32xf32>
    %93 = arith.addf %66, %92 : vector<8x32xf32>
    %94 = arith.addf %1, %93 : vector<8x32xf32>
    %c0_33 = arith.constant 0 : index
    %c0_34 = arith.constant 0 : index
    %95 = vector.load %arg7[%c0_33, %c0_34] : memref<1x32xf32, #tpu.memory_space<vmem>>, vector<1x32xf32>
    %96 = vector.broadcast %95 : vector<1x32xf32> to vector<8x32xf32>
    %97 = arith.addf %94, %96 : vector<8x32xf32>
    %c0_35 = arith.constant 0 : index
    %c0_36 = arith.constant 0 : index
    %c0_37 = arith.constant 0 : index
    %98 = vector.load %arg8[%c0_35, %c0_36, %c0_37] : memref<1x8x32xf32, #tpu.memory_space<vmem>>, vector<1x8x32xf32>
    %99 = vector.shape_cast %98 : vector<1x8x32xf32> to vector<8x32xf32>
    %100 = vector.shape_cast %97 : vector<8x32xf32> to vector<1x8x32xf32>
    tpu.vector_store %arg8[%c0_35, %c0_36, %c0_37], %100 {strides = array<i32>} : memref<1x8x32xf32, #tpu.memory_space<vmem>>, vector<1x8x32xf32>,
    return
  }
  func.func @transform_0(%arg0: i32) -> (i32, i32, i32) {
    %c0_i32 = arith.constant 0 : i32
    %c0_i32_0 = arith.constant 0 : i32
    %c0_i32_1 = arith.constant 0 : i32
    return %arg0, %c0_i32, %c0_i32_0 : i32, i32, i32
  }
  func.func @transform_1(%arg0: i32) -> (i32, i32) {
    %c0_i32 = arith.constant 0 : i32
    %c0_i32_0 = arith.constant 0 : i32
    %c0_i32_1 = arith.constant 0 : i32
    return %c0_i32, %c0_i32_0 : i32, i32
  }
  func.func @transform_2(%arg0: i32) -> (i32, i32) {
    %c0_i32 = arith.constant 0 : i32
    %c0_i32_0 = arith.constant 0 : i32
    %c0_i32_1 = arith.constant 0 : i32
    return %c0_i32, %c0_i32_0 : i32, i32
  }
  func.func @transform_3(%arg0: i32) -> (i32, i32) {
    %c0_i32 = arith.constant 0 : i32
    %c0_i32_0 = arith.constant 0 : i32
    %c0_i32_1 = arith.constant 0 : i32
    return %c0_i32, %c0_i32_0 : i32, i32
  }
  func.func @transform_4(%arg0: i32) -> (i32, i32) {
    %c0_i32 = arith.constant 0 : i32
    %c0_i32_0 = arith.constant 0 : i32
    %c0_i32_1 = arith.constant 0 : i32
    return %c0_i32, %c0_i32_0 : i32, i32
  }
  func.func @transform_5(%arg0: i32) -> (i32, i32) {
    %c0_i32 = arith.constant 0 : i32
    %c0_i32_0 = arith.constant 0 : i32
    %c0_i32_1 = arith.constant 0 : i32
    return %c0_i32, %c0_i32_0 : i32, i32
  }
  func.func @transform_6(%arg0: i32) -> (i32, i32) {
    %c0_i32 = arith.constant 0 : i32
    %c0_i32_0 = arith.constant 0 : i32
    %c0_i32_1 = arith.constant 0 : i32
    return %c0_i32, %c0_i32_0 : i32, i32
  }
  func.func @transform_7(%arg0: i32) -> (i32, i32, i32) {
    %c0_i32 = arith.constant 0 : i32
    %c0_i32_0 = arith.constant 0 : i32
    %c0_i32_1 = arith.constant 0 : i32
    return %arg0, %c0_i32, %c0_i32_0 : i32, i32, i32
  }
}

module attributes {stable_mosaic.version = 11 : i64} {
  func.func @_tff_gn_kernel(%arg0: i32, %arg1: i32, %arg2: memref<1x16x8x64xbf16, #tpu.memory_space<vmem>>, %arg3: memref<64x8xf32, #tpu.memory_space<vmem>>, %arg4: memref<8x64xf32, #tpu.memory_space<vmem>>, %arg5: memref<1x64xf32, #tpu.memory_space<vmem>>, %arg6: memref<1x64xf32, #tpu.memory_space<vmem>>, %arg7: memref<1x16x8x64xbf16, #tpu.memory_space<vmem>>) attributes {dimension_semantics = [#tpu.dimension_semantics<parallel>, #tpu.dimension_semantics<parallel>], iteration_bounds = array<i64: 2, 1>, scalar_prefetch = 0 : i64, scratch_operands = 0 : i64, tpu.core_type = #tpu.core_type<tc>, window_params = [{transform_indices = @transform_0, window_bounds = array<i64: 1, 16, 8, 64>}, {pipeline_mode = #tpu.pipeline_mode<synchronous>, transform_indices = @transform_1, window_bounds = array<i64: 64, 8>}, {pipeline_mode = #tpu.pipeline_mode<synchronous>, transform_indices = @transform_2, window_bounds = array<i64: 8, 64>}, {pipeline_mode = #tpu.pipeline_mode<synchronous>, transform_indices = @transform_3, window_bounds = array<i64: 1, 64>}, {pipeline_mode = #tpu.pipeline_mode<synchronous>, transform_indices = @transform_4, window_bounds = array<i64: 1, 64>}, {transform_indices = @transform_5, window_bounds = array<i64: 1, 16, 8, 64>}]} {
    %c0 = arith.constant 0 : index
    %c0_0 = arith.constant 0 : index
    %c0_1 = arith.constant 0 : index
    %c0_2 = arith.constant 0 : index
    %0 = vector.load %arg2[%c0, %c0_0, %c0_1, %c0_2] : memref<1x16x8x64xbf16, #tpu.memory_space<vmem>>, vector<1x16x8x64xbf16>
    %1 = vector.shape_cast %0 : vector<1x16x8x64xbf16> to vector<16x8x64xbf16>
    %2 = arith.extf %1 : vector<16x8x64xbf16> to vector<16x8x64xf32>
    %cst = arith.constant dense<0.000000e+00> : vector<8x64xf32>
    %3 = vector.multi_reduction <add>, %2, %cst [0] : vector<16x8x64xf32> to vector<8x64xf32>
    %4 = arith.mulf %2, %2 : vector<16x8x64xf32>
    %cst_3 = arith.constant dense<0.000000e+00> : vector<8x64xf32>
    %5 = vector.multi_reduction <add>, %4, %cst_3 [0] : vector<16x8x64xf32> to vector<8x64xf32>
    %c0_4 = arith.constant 0 : index
    %c0_5 = arith.constant 0 : index
    %6 = vector.load %arg3[%c0_4, %c0_5] : memref<64x8xf32, #tpu.memory_space<vmem>>, vector<64x8xf32>
    %cst_6 = arith.constant dense<0.000000e+00> : vector<8x8xf32>
    %7 = tpu.matmul %3, %6, %cst_6 {dimension_numbers = #tpu.dot_dimension_numbers<[1], [0], [0], [1], [0, 0, 1, 1], [], []>} : vector<8x64xf32>, vector<64x8xf32>, vector<8x8xf32> -> vector<8x8xf32>
    %c0_7 = arith.constant 0 : index
    %c0_8 = arith.constant 0 : index
    %8 = vector.load %arg3[%c0_7, %c0_8] : memref<64x8xf32, #tpu.memory_space<vmem>>, vector<64x8xf32>
    %cst_9 = arith.constant dense<0.000000e+00> : vector<8x8xf32>
    %9 = tpu.matmul %5, %8, %cst_9 {dimension_numbers = #tpu.dot_dimension_numbers<[1], [0], [0], [1], [0, 0, 1, 1], [], []>} : vector<8x64xf32>, vector<64x8xf32>, vector<8x8xf32> -> vector<8x8xf32>
    %c0_10 = arith.constant 0 : index
    %c0_11 = arith.constant 0 : index
    %10 = vector.load %arg4[%c0_10, %c0_11] : memref<8x64xf32, #tpu.memory_space<vmem>>, vector<8x64xf32>
    %cst_12 = arith.constant dense<0.000000e+00> : vector<8x64xf32>
    %11 = tpu.matmul %7, %10, %cst_12 {dimension_numbers = #tpu.dot_dimension_numbers<[1], [0], [0], [1], [0, 0, 1, 1], [], []>} : vector<8x8xf32>, vector<8x64xf32>, vector<8x64xf32> -> vector<8x64xf32>
    %c0_13 = arith.constant 0 : index
    %c0_14 = arith.constant 0 : index
    %12 = vector.load %arg4[%c0_13, %c0_14] : memref<8x64xf32, #tpu.memory_space<vmem>>, vector<8x64xf32>
    %cst_15 = arith.constant dense<0.000000e+00> : vector<8x64xf32>
    %13 = tpu.matmul %9, %12, %cst_15 {dimension_numbers = #tpu.dot_dimension_numbers<[1], [0], [0], [1], [0, 0, 1, 1], [], []>} : vector<8x8xf32>, vector<8x64xf32>, vector<8x64xf32> -> vector<8x64xf32>
    %14 = arith.mulf %11, %11 : vector<8x64xf32>
    %15 = arith.subf %13, %14 : vector<8x64xf32>
    %cst_16 = arith.constant 0.000000e+00 : f32
    %16 = vector.broadcast %cst_16 : f32 to vector<8x64xf32>
    %17 = arith.maximumf %15, %16 : vector<8x64xf32>
    %18 = vector.shape_cast %11 : vector<8x64xf32> to vector<1x8x64xf32>
    %19 = vector.broadcast %18 : vector<1x8x64xf32> to vector<16x8x64xf32>
    %20 = arith.subf %2, %19 : vector<16x8x64xf32>
    %cst_17 = arith.constant 9.99999974E-6 : f32
    %21 = vector.broadcast %cst_17 : f32 to vector<8x64xf32>
    %22 = arith.addf %17, %21 : vector<8x64xf32>
    %23 = math.rsqrt %22 : vector<8x64xf32>
    %24 = vector.shape_cast %23 : vector<8x64xf32> to vector<1x8x64xf32>
    %25 = vector.broadcast %24 : vector<1x8x64xf32> to vector<16x8x64xf32>
    %26 = arith.mulf %20, %25 : vector<16x8x64xf32>
    %c0_18 = arith.constant 0 : index
    %c0_19 = arith.constant 0 : index
    %27 = vector.load %arg5[%c0_18, %c0_19] : memref<1x64xf32, #tpu.memory_space<vmem>>, vector<1x64xf32>
    %28 = vector.shape_cast %27 : vector<1x64xf32> to vector<1x1x64xf32>
    %29 = vector.broadcast %28 : vector<1x1x64xf32> to vector<16x8x64xf32>
    %30 = arith.mulf %26, %29 : vector<16x8x64xf32>
    %c0_20 = arith.constant 0 : index
    %c0_21 = arith.constant 0 : index
    %31 = vector.load %arg6[%c0_20, %c0_21] : memref<1x64xf32, #tpu.memory_space<vmem>>, vector<1x64xf32>
    %32 = vector.shape_cast %31 : vector<1x64xf32> to vector<1x1x64xf32>
    %33 = vector.broadcast %32 : vector<1x1x64xf32> to vector<16x8x64xf32>
    %34 = arith.addf %30, %33 : vector<16x8x64xf32>
    %35 = arith.negf %34 : vector<16x8x64xf32>
    %36 = math.exp %35 : vector<16x8x64xf32>
    %cst_22 = arith.constant 1.000000e+00 : f32
    %37 = vector.broadcast %cst_22 : f32 to vector<16x8x64xf32>
    %38 = arith.addf %37, %36 : vector<16x8x64xf32>
    %39 = arith.divf %37, %38 : vector<16x8x64xf32>
    %40 = arith.mulf %34, %39 : vector<16x8x64xf32>
    %41 = arith.truncf %40 : vector<16x8x64xf32> to vector<16x8x64xbf16>
    %c0_23 = arith.constant 0 : index
    %c0_24 = arith.constant 0 : index
    %c0_25 = arith.constant 0 : index
    %c0_26 = arith.constant 0 : index
    %42 = vector.load %arg7[%c0_23, %c0_24, %c0_25, %c0_26] : memref<1x16x8x64xbf16, #tpu.memory_space<vmem>>, vector<1x16x8x64xbf16>
    %43 = vector.shape_cast %42 : vector<1x16x8x64xbf16> to vector<16x8x64xbf16>
    %44 = vector.shape_cast %41 : vector<16x8x64xbf16> to vector<1x16x8x64xbf16>
    tpu.vector_store %arg7[%c0_23, %c0_24, %c0_25, %c0_26], %44 {strides = array<i32>} : memref<1x16x8x64xbf16, #tpu.memory_space<vmem>>, vector<1x16x8x64xbf16>,
    return
  }
  func.func @transform_0(%arg0: i32, %arg1: i32) -> (i32, i32, i32, i32) {
    %c0_i32 = arith.constant 0 : i32
    %c0_i32_0 = arith.constant 0 : i32
    %c0_i32_1 = arith.constant 0 : i32
    return %arg0, %c0_i32, %arg1, %c0_i32_0 : i32, i32, i32, i32
  }
  func.func @transform_1(%arg0: i32, %arg1: i32) -> (i32, i32) {
    %c0_i32 = arith.constant 0 : i32
    %c0_i32_0 = arith.constant 0 : i32
    %c0_i32_1 = arith.constant 0 : i32
    return %c0_i32, %c0_i32_0 : i32, i32
  }
  func.func @transform_2(%arg0: i32, %arg1: i32) -> (i32, i32) {
    %c0_i32 = arith.constant 0 : i32
    %c0_i32_0 = arith.constant 0 : i32
    %c0_i32_1 = arith.constant 0 : i32
    return %c0_i32, %c0_i32_0 : i32, i32
  }
  func.func @transform_3(%arg0: i32, %arg1: i32) -> (i32, i32) {
    %c0_i32 = arith.constant 0 : i32
    %c0_i32_0 = arith.constant 0 : i32
    %c0_i32_1 = arith.constant 0 : i32
    return %c0_i32, %c0_i32_0 : i32, i32
  }
  func.func @transform_4(%arg0: i32, %arg1: i32) -> (i32, i32) {
    %c0_i32 = arith.constant 0 : i32
    %c0_i32_0 = arith.constant 0 : i32
    %c0_i32_1 = arith.constant 0 : i32
    return %c0_i32, %c0_i32_0 : i32, i32
  }
  func.func @transform_5(%arg0: i32, %arg1: i32) -> (i32, i32, i32, i32) {
    %c0_i32 = arith.constant 0 : i32
    %c0_i32_0 = arith.constant 0 : i32
    %c0_i32_1 = arith.constant 0 : i32
    return %arg0, %c0_i32, %arg1, %c0_i32_0 : i32, i32, i32, i32
  }
}

module attributes {stable_mosaic.version = 11 : i64} {
  func.func @_tff_in_kernel(%arg0: i32, %arg1: memref<8x8x32xf32, #tpu.memory_space<vmem>>, %arg2: memref<1x32xf32, #tpu.memory_space<vmem>>, %arg3: memref<1x32xf32, #tpu.memory_space<vmem>>, %arg4: memref<32x64xbf16, #tpu.memory_space<vmem>>, %arg5: memref<1x64xf32, #tpu.memory_space<vmem>>, %arg6: memref<3x64x64xbf16, #tpu.memory_space<vmem>>, %arg7: memref<1x64xf32, #tpu.memory_space<vmem>>, %arg8: memref<3x64x64xbf16, #tpu.memory_space<vmem>>, %arg9: memref<1x64xf32, #tpu.memory_space<vmem>>, %arg10: memref<8x8x64xbf16, #tpu.memory_space<vmem>>, %arg11: memref<8x10x64xbf16, #tpu.memory_space<vmem>>) attributes {dimension_semantics = [#tpu.dimension_semantics<parallel>], iteration_bounds = array<i64: 4>, scalar_prefetch = 0 : i64, scratch_operands = 1 : i64, tpu.core_type = #tpu.core_type<tc>, window_params = [{transform_indices = @transform_0, window_bounds = array<i64: 8, 8, 32>}, {pipeline_mode = #tpu.pipeline_mode<synchronous>, transform_indices = @transform_1, window_bounds = array<i64: 1, 32>}, {pipeline_mode = #tpu.pipeline_mode<synchronous>, transform_indices = @transform_2, window_bounds = array<i64: 1, 32>}, {pipeline_mode = #tpu.pipeline_mode<synchronous>, transform_indices = @transform_3, window_bounds = array<i64: 32, 64>}, {pipeline_mode = #tpu.pipeline_mode<synchronous>, transform_indices = @transform_4, window_bounds = array<i64: 1, 64>}, {pipeline_mode = #tpu.pipeline_mode<synchronous>, transform_indices = @transform_5, window_bounds = array<i64: 3, 64, 64>}, {pipeline_mode = #tpu.pipeline_mode<synchronous>, transform_indices = @transform_6, window_bounds = array<i64: 1, 64>}, {pipeline_mode = #tpu.pipeline_mode<synchronous>, transform_indices = @transform_7, window_bounds = array<i64: 3, 64, 64>}, {pipeline_mode = #tpu.pipeline_mode<synchronous>, transform_indices = @transform_8, window_bounds = array<i64: 1, 64>}, {transform_indices = @transform_9, window_bounds = array<i64: 8, 8, 64>}]} {
    %c0 = arith.constant 0 : index
    %c0_0 = arith.constant 0 : index
    %c0_1 = arith.constant 0 : index
    %0 = vector.load %arg1[%c0, %c0_0, %c0_1] : memref<8x8x32xf32, #tpu.memory_space<vmem>>, vector<8x8x32xf32>
    %c0_2 = arith.constant 0 : index
    %c0_3 = arith.constant 0 : index
    %1 = vector.load %arg2[%c0_2, %c0_3] : memref<1x32xf32, #tpu.memory_space<vmem>>, vector<1x32xf32>
    %c0_4 = arith.constant 0 : index
    %c0_5 = arith.constant 0 : index
    %2 = vector.load %arg3[%c0_4, %c0_5] : memref<1x32xf32, #tpu.memory_space<vmem>>, vector<1x32xf32>
    %cst = arith.constant dense<0.000000e+00> : vector<8x8xf32>
    %3 = vector.multi_reduction <add>, %0, %cst [2] : vector<8x8x32xf32> to vector<8x8xf32>
    %4 = vector.shape_cast %3 : vector<8x8xf32> to vector<8x8x1xf32>
    %cst_6 = arith.constant 3.200000e+01 : f32
    %5 = vector.broadcast %cst_6 : f32 to vector<8x8x1xf32>
    %6 = arith.divf %4, %5 : vector<8x8x1xf32>
    %7 = vector.broadcast %6 : vector<8x8x1xf32> to vector<8x8x32xf32>
    %8 = arith.subf %0, %7 : vector<8x8x32xf32>
    %9 = arith.mulf %8, %8 : vector<8x8x32xf32>
    %cst_7 = arith.constant dense<0.000000e+00> : vector<8x8xf32>
    %10 = vector.multi_reduction <add>, %9, %cst_7 [2] : vector<8x8x32xf32> to vector<8x8xf32>
    %11 = vector.shape_cast %10 : vector<8x8xf32> to vector<8x8x1xf32>
    %cst_8 = arith.constant 3.200000e+01 : f32
    %12 = vector.broadcast %cst_8 : f32 to vector<8x8x1xf32>
    %13 = arith.divf %11, %12 : vector<8x8x1xf32>
    %14 = vector.broadcast %6 : vector<8x8x1xf32> to vector<8x8x32xf32>
    %15 = arith.subf %0, %14 : vector<8x8x32xf32>
    %cst_9 = arith.constant 9.99999974E-6 : f32
    %16 = vector.broadcast %cst_9 : f32 to vector<8x8x1xf32>
    %17 = arith.addf %13, %16 : vector<8x8x1xf32>
    %18 = math.rsqrt %17 : vector<8x8x1xf32>
    %19 = vector.broadcast %18 : vector<8x8x1xf32> to vector<8x8x32xf32>
    %20 = arith.mulf %15, %19 : vector<8x8x32xf32>
    %21 = vector.shape_cast %1 : vector<1x32xf32> to vector<1x1x32xf32>
    %22 = vector.broadcast %21 : vector<1x1x32xf32> to vector<8x8x32xf32>
    %23 = arith.mulf %20, %22 : vector<8x8x32xf32>
    %24 = vector.shape_cast %2 : vector<1x32xf32> to vector<1x1x32xf32>
    %25 = vector.broadcast %24 : vector<1x1x32xf32> to vector<8x8x32xf32>
    %26 = arith.addf %23, %25 : vector<8x8x32xf32>
    %27 = vector.shape_cast %26 : vector<8x8x32xf32> to vector<64x32xf32>
    %28 = arith.truncf %27 : vector<64x32xf32> to vector<64x32xbf16>
    %c0_10 = arith.constant 0 : index
    %c0_11 = arith.constant 0 : index
    %29 = vector.load %arg4[%c0_10, %c0_11] : memref<32x64xbf16, #tpu.memory_space<vmem>>, vector<32x64xbf16>
    %cst_12 = arith.constant dense<0.000000e+00> : vector<64x64xf32>
    %30 = tpu.matmul %28, %29, %cst_12 {dimension_numbers = #tpu.dot_dimension_numbers<[1], [0], [0], [1], [0, 0, 1, 1], [], []>} : vector<64x32xbf16>, vector<32x64xbf16>, vector<64x64xf32> -> vector<64x64xf32>
    %c0_13 = arith.constant 0 : index
    %c0_14 = arith.constant 0 : index
    %31 = vector.load %arg5[%c0_13, %c0_14] : memref<1x64xf32, #tpu.memory_space<vmem>>, vector<1x64xf32>
    %32 = vector.broadcast %31 : vector<1x64xf32> to vector<64x64xf32>
    %33 = arith.addf %30, %32 : vector<64x64xf32>
    %34 = arith.negf %33 : vector<64x64xf32>
    %35 = math.exp %34 : vector<64x64xf32>
    %cst_15 = arith.constant 1.000000e+00 : f32
    %36 = vector.broadcast %cst_15 : f32 to vector<64x64xf32>
    %37 = arith.addf %36, %35 : vector<64x64xf32>
    %38 = arith.divf %36, %37 : vector<64x64xf32>
    %39 = arith.mulf %33, %38 : vector<64x64xf32>
    %cst_16 = arith.constant 0.000000e+00 : bf16
    %40 = vector.broadcast %cst_16 : bf16 to vector<8x2x64xbf16>
    %c0_17 = arith.constant 0 : index
    %c0_18 = arith.constant 0 : index
    %c0_19 = arith.constant 0 : index
    %41 = vector.load %arg11[%c0_17, %c0_18, %c0_19] : memref<8x10x64xbf16, #tpu.memory_space<vmem>>, vector<8x2x64xbf16>
    tpu.vector_store %arg11[%c0_17, %c0_18, %c0_19], %40 {strides = array<i32>} : memref<8x10x64xbf16, #tpu.memory_space<vmem>>, vector<8x2x64xbf16>,
    %42 = vector.shape_cast %39 : vector<64x64xf32> to vector<8x8x64xf32>
    %43 = arith.truncf %42 : vector<8x8x64xf32> to vector<8x8x64xbf16>
    %c0_20 = arith.constant 0 : index
    %c2 = arith.constant 2 : index
    %c0_21 = arith.constant 0 : index
    %44 = vector.load %arg11[%c0_20, %c2, %c0_21] : memref<8x10x64xbf16, #tpu.memory_space<vmem>>, vector<8x8x64xbf16>
    tpu.vector_store %arg11[%c0_20, %c2, %c0_21], %43 {strides = array<i32>} : memref<8x10x64xbf16, #tpu.memory_space<vmem>>, vector<8x8x64xbf16>,
    %c0_22 = arith.constant 0 : index
    %c0_23 = arith.constant 0 : index
    %c0_24 = arith.constant 0 : index
    %45 = vector.load %arg11[%c0_22, %c0_23, %c0_24] : memref<8x10x64xbf16, #tpu.memory_space<vmem>>, vector<8x8x64xbf16>
    %46 = vector.shape_cast %45 : vector<8x8x64xbf16> to vector<64x64xbf16>
    %c0_25 = arith.constant 0 : index
    %c0_26 = arith.constant 0 : index
    %c0_27 = arith.constant 0 : index
    %47 = vector.load %arg6[%c0_25, %c0_26, %c0_27] : memref<3x64x64xbf16, #tpu.memory_space<vmem>>, vector<1x64x64xbf16>
    %48 = vector.shape_cast %47 : vector<1x64x64xbf16> to vector<64x64xbf16>
    %cst_28 = arith.constant dense<0.000000e+00> : vector<64x64xf32>
    %49 = tpu.matmul %46, %48, %cst_28 {dimension_numbers = #tpu.dot_dimension_numbers<[1], [0], [0], [1], [0, 0, 1, 1], [], []>} : vector<64x64xbf16>, vector<64x64xbf16>, vector<64x64xf32> -> vector<64x64xf32>
    %c0_29 = arith.constant 0 : index
    %c1 = arith.constant 1 : index
    %c0_30 = arith.constant 0 : index
    %50 = vector.load %arg11[%c0_29, %c1, %c0_30] : memref<8x10x64xbf16, #tpu.memory_space<vmem>>, vector<8x8x64xbf16>
    %51 = vector.shape_cast %50 : vector<8x8x64xbf16> to vector<64x64xbf16>
    %c1_31 = arith.constant 1 : index
    %c0_32 = arith.constant 0 : index
    %c0_33 = arith.constant 0 : index
    %52 = vector.load %arg6[%c1_31, %c0_32, %c0_33] : memref<3x64x64xbf16, #tpu.memory_space<vmem>>, vector<1x64x64xbf16>
    %53 = vector.shape_cast %52 : vector<1x64x64xbf16> to vector<64x64xbf16>
    %cst_34 = arith.constant dense<0.000000e+00> : vector<64x64xf32>
    %54 = tpu.matmul %51, %53, %cst_34 {dimension_numbers = #tpu.dot_dimension_numbers<[1], [0], [0], [1], [0, 0, 1, 1], [], []>} : vector<64x64xbf16>, vector<64x64xbf16>, vector<64x64xf32> -> vector<64x64xf32>
    %55 = arith.addf %49, %54 : vector<64x64xf32>
    %c0_35 = arith.constant 0 : index
    %c2_36 = arith.constant 2 : index
    %c0_37 = arith.constant 0 : index
    %56 = vector.load %arg11[%c0_35, %c2_36, %c0_37] : memref<8x10x64xbf16, #tpu.memory_space<vmem>>, vector<8x8x64xbf16>
    %57 = vector.shape_cast %56 : vector<8x8x64xbf16> to vector<64x64xbf16>
    %c2_38 = arith.constant 2 : index
    %c0_39 = arith.constant 0 : index
    %c0_40 = arith.constant 0 : index
    %58 = vector.load %arg6[%c2_38, %c0_39, %c0_40] : memref<3x64x64xbf16, #tpu.memory_space<vmem>>, vector<1x64x64xbf16>
    %59 = vector.shape_cast %58 : vector<1x64x64xbf16> to vector<64x64xbf16>
    %cst_41 = arith.constant dense<0.000000e+00> : vector<64x64xf32>
    %60 = tpu.matmul %57, %59, %cst_41 {dimension_numbers = #tpu.dot_dimension_numbers<[1], [0], [0], [1], [0, 0, 1, 1], [], []>} : vector<64x64xbf16>, vector<64x64xbf16>, vector<64x64xf32> -> vector<64x64xf32>
    %61 = arith.addf %55, %60 : vector<64x64xf32>
    %c0_42 = arith.constant 0 : index
    %c0_43 = arith.constant 0 : index
    %62 = vector.load %arg7[%c0_42, %c0_43] : memref<1x64xf32, #tpu.memory_space<vmem>>, vector<1x64xf32>
    %63 = vector.broadcast %62 : vector<1x64xf32> to vector<64x64xf32>
    %64 = arith.addf %61, %63 : vector<64x64xf32>
    %65 = arith.negf %64 : vector<64x64xf32>
    %66 = math.exp %65 : vector<64x64xf32>
    %cst_44 = arith.constant 1.000000e+00 : f32
    %67 = vector.broadcast %cst_44 : f32 to vector<64x64xf32>
    %68 = arith.addf %67, %66 : vector<64x64xf32>
    %69 = arith.divf %67, %68 : vector<64x64xf32>
    %70 = arith.mulf %64, %69 : vector<64x64xf32>
    %71 = vector.shape_cast %70 : vector<64x64xf32> to vector<8x8x64xf32>
    %72 = arith.truncf %71 : vector<8x8x64xf32> to vector<8x8x64xbf16>
    %c0_45 = arith.constant 0 : index
    %c2_46 = arith.constant 2 : index
    %c0_47 = arith.constant 0 : index
    %73 = vector.load %arg11[%c0_45, %c2_46, %c0_47] : memref<8x10x64xbf16, #tpu.memory_space<vmem>>, vector<8x8x64xbf16>
    tpu.vector_store %arg11[%c0_45, %c2_46, %c0_47], %72 {strides = array<i32>} : memref<8x10x64xbf16, #tpu.memory_space<vmem>>, vector<8x8x64xbf16>,
    %c0_48 = arith.constant 0 : index
    %c0_49 = arith.constant 0 : index
    %c0_50 = arith.constant 0 : index
    %74 = vector.load %arg11[%c0_48, %c0_49, %c0_50] : memref<8x10x64xbf16, #tpu.memory_space<vmem>>, vector<8x8x64xbf16>
    %75 = vector.shape_cast %74 : vector<8x8x64xbf16> to vector<64x64xbf16>
    %c0_51 = arith.constant 0 : index
    %c0_52 = arith.constant 0 : index
    %c0_53 = arith.constant 0 : index
    %76 = vector.load %arg8[%c0_51, %c0_52, %c0_53] : memref<3x64x64xbf16, #tpu.memory_space<vmem>>, vector<1x64x64xbf16>
    %77 = vector.shape_cast %76 : vector<1x64x64xbf16> to vector<64x64xbf16>
    %cst_54 = arith.constant dense<0.000000e+00> : vector<64x64xf32>
    %78 = tpu.matmul %75, %77, %cst_54 {dimension_numbers = #tpu.dot_dimension_numbers<[1], [0], [0], [1], [0, 0, 1, 1], [], []>} : vector<64x64xbf16>, vector<64x64xbf16>, vector<64x64xf32> -> vector<64x64xf32>
    %c0_55 = arith.constant 0 : index
    %c1_56 = arith.constant 1 : index
    %c0_57 = arith.constant 0 : index
    %79 = vector.load %arg11[%c0_55, %c1_56, %c0_57] : memref<8x10x64xbf16, #tpu.memory_space<vmem>>, vector<8x8x64xbf16>
    %80 = vector.shape_cast %79 : vector<8x8x64xbf16> to vector<64x64xbf16>
    %c1_58 = arith.constant 1 : index
    %c0_59 = arith.constant 0 : index
    %c0_60 = arith.constant 0 : index
    %81 = vector.load %arg8[%c1_58, %c0_59, %c0_60] : memref<3x64x64xbf16, #tpu.memory_space<vmem>>, vector<1x64x64xbf16>
    %82 = vector.shape_cast %81 : vector<1x64x64xbf16> to vector<64x64xbf16>
    %cst_61 = arith.constant dense<0.000000e+00> : vector<64x64xf32>
    %83 = tpu.matmul %80, %82, %cst_61 {dimension_numbers = #tpu.dot_dimension_numbers<[1], [0], [0], [1], [0, 0, 1, 1], [], []>} : vector<64x64xbf16>, vector<64x64xbf16>, vector<64x64xf32> -> vector<64x64xf32>
    %84 = arith.addf %78, %83 : vector<64x64xf32>
    %c0_62 = arith.constant 0 : index
    %c2_63 = arith.constant 2 : index
    %c0_64 = arith.constant 0 : index
    %85 = vector.load %arg11[%c0_62, %c2_63, %c0_64] : memref<8x10x64xbf16, #tpu.memory_space<vmem>>, vector<8x8x64xbf16>
    %86 = vector.shape_cast %85 : vector<8x8x64xbf16> to vector<64x64xbf16>
    %c2_65 = arith.constant 2 : index
    %c0_66 = arith.constant 0 : index
    %c0_67 = arith.constant 0 : index
    %87 = vector.load %arg8[%c2_65, %c0_66, %c0_67] : memref<3x64x64xbf16, #tpu.memory_space<vmem>>, vector<1x64x64xbf16>
    %88 = vector.shape_cast %87 : vector<1x64x64xbf16> to vector<64x64xbf16>
    %cst_68 = arith.constant dense<0.000000e+00> : vector<64x64xf32>
    %89 = tpu.matmul %86, %88, %cst_68 {dimension_numbers = #tpu.dot_dimension_numbers<[1], [0], [0], [1], [0, 0, 1, 1], [], []>} : vector<64x64xbf16>, vector<64x64xbf16>, vector<64x64xf32> -> vector<64x64xf32>
    %90 = arith.addf %84, %89 : vector<64x64xf32>
    %c0_69 = arith.constant 0 : index
    %c0_70 = arith.constant 0 : index
    %91 = vector.load %arg9[%c0_69, %c0_70] : memref<1x64xf32, #tpu.memory_space<vmem>>, vector<1x64xf32>
    %92 = vector.broadcast %91 : vector<1x64xf32> to vector<64x64xf32>
    %93 = arith.addf %90, %92 : vector<64x64xf32>
    %94 = vector.shape_cast %93 : vector<64x64xf32> to vector<8x8x64xf32>
    %95 = arith.truncf %94 : vector<8x8x64xf32> to vector<8x8x64xbf16>
    %c0_71 = arith.constant 0 : index
    %c0_72 = arith.constant 0 : index
    %c0_73 = arith.constant 0 : index
    %96 = vector.load %arg10[%c0_71, %c0_72, %c0_73] : memref<8x8x64xbf16, #tpu.memory_space<vmem>>, vector<8x8x64xbf16>
    tpu.vector_store %arg10[%c0_71, %c0_72, %c0_73], %95 {strides = array<i32>} : memref<8x8x64xbf16, #tpu.memory_space<vmem>>, vector<8x8x64xbf16>,
    return
  }
  func.func @transform_0(%arg0: i32) -> (i32, i32, i32) {
    %c0_i32 = arith.constant 0 : i32
    %c0_i32_0 = arith.constant 0 : i32
    %c0_i32_1 = arith.constant 0 : i32
    return %arg0, %c0_i32, %c0_i32_0 : i32, i32, i32
  }
  func.func @transform_1(%arg0: i32) -> (i32, i32) {
    %c0_i32 = arith.constant 0 : i32
    %c0_i32_0 = arith.constant 0 : i32
    %c0_i32_1 = arith.constant 0 : i32
    return %c0_i32, %c0_i32_0 : i32, i32
  }
  func.func @transform_2(%arg0: i32) -> (i32, i32) {
    %c0_i32 = arith.constant 0 : i32
    %c0_i32_0 = arith.constant 0 : i32
    %c0_i32_1 = arith.constant 0 : i32
    return %c0_i32, %c0_i32_0 : i32, i32
  }
  func.func @transform_3(%arg0: i32) -> (i32, i32) {
    %c0_i32 = arith.constant 0 : i32
    %c0_i32_0 = arith.constant 0 : i32
    %c0_i32_1 = arith.constant 0 : i32
    return %c0_i32, %c0_i32_0 : i32, i32
  }
  func.func @transform_4(%arg0: i32) -> (i32, i32) {
    %c0_i32 = arith.constant 0 : i32
    %c0_i32_0 = arith.constant 0 : i32
    %c0_i32_1 = arith.constant 0 : i32
    return %c0_i32, %c0_i32_0 : i32, i32
  }
  func.func @transform_5(%arg0: i32) -> (i32, i32, i32) {
    %c0_i32 = arith.constant 0 : i32
    %c0_i32_0 = arith.constant 0 : i32
    %c0_i32_1 = arith.constant 0 : i32
    %c0_i32_2 = arith.constant 0 : i32
    return %c0_i32, %c0_i32_0, %c0_i32_1 : i32, i32, i32
  }
  func.func @transform_6(%arg0: i32) -> (i32, i32) {
    %c0_i32 = arith.constant 0 : i32
    %c0_i32_0 = arith.constant 0 : i32
    %c0_i32_1 = arith.constant 0 : i32
    return %c0_i32, %c0_i32_0 : i32, i32
  }
  func.func @transform_7(%arg0: i32) -> (i32, i32, i32) {
    %c0_i32 = arith.constant 0 : i32
    %c0_i32_0 = arith.constant 0 : i32
    %c0_i32_1 = arith.constant 0 : i32
    %c0_i32_2 = arith.constant 0 : i32
    return %c0_i32, %c0_i32_0, %c0_i32_1 : i32, i32, i32
  }
  func.func @transform_8(%arg0: i32) -> (i32, i32) {
    %c0_i32 = arith.constant 0 : i32
    %c0_i32_0 = arith.constant 0 : i32
    %c0_i32_1 = arith.constant 0 : i32
    return %c0_i32, %c0_i32_0 : i32, i32
  }
  func.func @transform_9(%arg0: i32) -> (i32, i32, i32) {
    %c0_i32 = arith.constant 0 : i32
    %c0_i32_0 = arith.constant 0 : i32
    %c0_i32_1 = arith.constant 0 : i32
    return %arg0, %c0_i32, %c0_i32_0 : i32, i32, i32
  }
}

module attributes {stable_mosaic.version = 11 : i64} {
  func.func @_dense_kernel(%arg0: i32, %arg1: memref<256x32xf32, #tpu.memory_space<vmem>>, %arg2: memref<32x2xbf16, #tpu.memory_space<vmem>>, %arg3: memref<1x2xf32, #tpu.memory_space<vmem>>, %arg4: memref<256x2xf32, #tpu.memory_space<vmem>>) attributes {dimension_semantics = [#tpu.dimension_semantics<parallel>], iteration_bounds = array<i64: 1>, scalar_prefetch = 0 : i64, scratch_operands = 0 : i64, tpu.core_type = #tpu.core_type<tc>, window_params = [{transform_indices = @transform_0, window_bounds = array<i64: 256, 32>}, {pipeline_mode = #tpu.pipeline_mode<synchronous>, transform_indices = @transform_1, window_bounds = array<i64: 32, 2>}, {pipeline_mode = #tpu.pipeline_mode<synchronous>, transform_indices = @transform_2, window_bounds = array<i64: 1, 2>}, {transform_indices = @transform_3, window_bounds = array<i64: 256, 2>}]} {
    %c0 = arith.constant 0 : index
    %c0_0 = arith.constant 0 : index
    %0 = vector.load %arg1[%c0, %c0_0] : memref<256x32xf32, #tpu.memory_space<vmem>>, vector<256x32xf32>
    %1 = arith.truncf %0 : vector<256x32xf32> to vector<256x32xbf16>
    %c0_1 = arith.constant 0 : index
    %c0_2 = arith.constant 0 : index
    %2 = vector.load %arg2[%c0_1, %c0_2] : memref<32x2xbf16, #tpu.memory_space<vmem>>, vector<32x2xbf16>
    %cst = arith.constant dense<0.000000e+00> : vector<256x2xf32>
    %3 = tpu.matmul %1, %2, %cst {dimension_numbers = #tpu.dot_dimension_numbers<[1], [0], [0], [1], [0, 0, 1, 1], [], []>} : vector<256x32xbf16>, vector<32x2xbf16>, vector<256x2xf32> -> vector<256x2xf32>
    %c0_3 = arith.constant 0 : index
    %c0_4 = arith.constant 0 : index
    %4 = vector.load %arg3[%c0_3, %c0_4] : memref<1x2xf32, #tpu.memory_space<vmem>>, vector<1x2xf32>
    %5 = vector.broadcast %4 : vector<1x2xf32> to vector<256x2xf32>
    %6 = arith.addf %3, %5 : vector<256x2xf32>
    %c0_5 = arith.constant 0 : index
    %c0_6 = arith.constant 0 : index
    %7 = vector.load %arg4[%c0_5, %c0_6] : memref<256x2xf32, #tpu.memory_space<vmem>>, vector<256x2xf32>
    tpu.vector_store %arg4[%c0_5, %c0_6], %6 {strides = array<i32>} : memref<256x2xf32, #tpu.memory_space<vmem>>, vector<256x2xf32>,
    return
  }
  func.func @transform_0(%arg0: i32) -> (i32, i32) {
    %c0_i32 = arith.constant 0 : i32
    %c0_i32_0 = arith.constant 0 : i32
    return %arg0, %c0_i32 : i32, i32
  }
  func.func @transform_1(%arg0: i32) -> (i32, i32) {
    %c0_i32 = arith.constant 0 : i32
    %c0_i32_0 = arith.constant 0 : i32
    %c0_i32_1 = arith.constant 0 : i32
    return %c0_i32, %c0_i32_0 : i32, i32
  }
  func.func @transform_2(%arg0: i32) -> (i32, i32) {
    %c0_i32 = arith.constant 0 : i32
    %c0_i32_0 = arith.constant 0 : i32
    %c0_i32_1 = arith.constant 0 : i32
    return %c0_i32, %c0_i32_0 : i32, i32
  }
  func.func @transform_3(%arg0: i32) -> (i32, i32) {
    %c0_i32 = arith.constant 0 : i32
    %c0_i32_0 = arith.constant 0 : i32
    return %arg0, %c0_i32 : i32, i32
  }
}

module attributes {stable_mosaic.version = 11 : i64} {
  func.func @_tff_out_kernel(%arg0: i32, %arg1: memref<8x8x64xbf16, #tpu.memory_space<vmem>>, %arg2: memref<8x8x32xf32, #tpu.memory_space<vmem>>, %arg3: memref<3x64x64xbf16, #tpu.memory_space<vmem>>, %arg4: memref<1x64xf32, #tpu.memory_space<vmem>>, %arg5: memref<64x32xbf16, #tpu.memory_space<vmem>>, %arg6: memref<1x32xf32, #tpu.memory_space<vmem>>, %arg7: memref<8x8x32xf32, #tpu.memory_space<vmem>>, %arg8: memref<8x10x64xbf16, #tpu.memory_space<vmem>>) attributes {dimension_semantics = [#tpu.dimension_semantics<parallel>], iteration_bounds = array<i64: 4>, scalar_prefetch = 0 : i64, scratch_operands = 1 : i64, tpu.core_type = #tpu.core_type<tc>, window_params = [{transform_indices = @transform_0, window_bounds = array<i64: 8, 8, 64>}, {transform_indices = @transform_1, window_bounds = array<i64: 8, 8, 32>}, {pipeline_mode = #tpu.pipeline_mode<synchronous>, transform_indices = @transform_2, window_bounds = array<i64: 3, 64, 64>}, {pipeline_mode = #tpu.pipeline_mode<synchronous>, transform_indices = @transform_3, window_bounds = array<i64: 1, 64>}, {pipeline_mode = #tpu.pipeline_mode<synchronous>, transform_indices = @transform_4, window_bounds = array<i64: 64, 32>}, {pipeline_mode = #tpu.pipeline_mode<synchronous>, transform_indices = @transform_5, window_bounds = array<i64: 1, 32>}, {transform_indices = @transform_6, window_bounds = array<i64: 8, 8, 32>}]} {
    %cst = arith.constant 0.000000e+00 : bf16
    %0 = vector.broadcast %cst : bf16 to vector<8x2x64xbf16>
    %c0 = arith.constant 0 : index
    %c0_0 = arith.constant 0 : index
    %c0_1 = arith.constant 0 : index
    %1 = vector.load %arg8[%c0, %c0_0, %c0_1] : memref<8x10x64xbf16, #tpu.memory_space<vmem>>, vector<8x2x64xbf16>
    tpu.vector_store %arg8[%c0, %c0_0, %c0_1], %0 {strides = array<i32>} : memref<8x10x64xbf16, #tpu.memory_space<vmem>>, vector<8x2x64xbf16>,
    %c0_2 = arith.constant 0 : index
    %c0_3 = arith.constant 0 : index
    %c0_4 = arith.constant 0 : index
    %2 = vector.load %arg1[%c0_2, %c0_3, %c0_4] : memref<8x8x64xbf16, #tpu.memory_space<vmem>>, vector<8x8x64xbf16>
    %c0_5 = arith.constant 0 : index
    %c2 = arith.constant 2 : index
    %c0_6 = arith.constant 0 : index
    %3 = vector.load %arg8[%c0_5, %c2, %c0_6] : memref<8x10x64xbf16, #tpu.memory_space<vmem>>, vector<8x8x64xbf16>
    tpu.vector_store %arg8[%c0_5, %c2, %c0_6], %2 {strides = array<i32>} : memref<8x10x64xbf16, #tpu.memory_space<vmem>>, vector<8x8x64xbf16>,
    %c0_7 = arith.constant 0 : index
    %c0_8 = arith.constant 0 : index
    %c0_9 = arith.constant 0 : index
    %4 = vector.load %arg8[%c0_7, %c0_8, %c0_9] : memref<8x10x64xbf16, #tpu.memory_space<vmem>>, vector<8x8x64xbf16>
    %5 = vector.shape_cast %4 : vector<8x8x64xbf16> to vector<64x64xbf16>
    %c0_10 = arith.constant 0 : index
    %c0_11 = arith.constant 0 : index
    %c0_12 = arith.constant 0 : index
    %6 = vector.load %arg3[%c0_10, %c0_11, %c0_12] : memref<3x64x64xbf16, #tpu.memory_space<vmem>>, vector<1x64x64xbf16>
    %7 = vector.shape_cast %6 : vector<1x64x64xbf16> to vector<64x64xbf16>
    %cst_13 = arith.constant dense<0.000000e+00> : vector<64x64xf32>
    %8 = tpu.matmul %5, %7, %cst_13 {dimension_numbers = #tpu.dot_dimension_numbers<[1], [0], [0], [1], [0, 0, 1, 1], [], []>} : vector<64x64xbf16>, vector<64x64xbf16>, vector<64x64xf32> -> vector<64x64xf32>
    %c0_14 = arith.constant 0 : index
    %c1 = arith.constant 1 : index
    %c0_15 = arith.constant 0 : index
    %9 = vector.load %arg8[%c0_14, %c1, %c0_15] : memref<8x10x64xbf16, #tpu.memory_space<vmem>>, vector<8x8x64xbf16>
    %10 = vector.shape_cast %9 : vector<8x8x64xbf16> to vector<64x64xbf16>
    %c1_16 = arith.constant 1 : index
    %c0_17 = arith.constant 0 : index
    %c0_18 = arith.constant 0 : index
    %11 = vector.load %arg3[%c1_16, %c0_17, %c0_18] : memref<3x64x64xbf16, #tpu.memory_space<vmem>>, vector<1x64x64xbf16>
    %12 = vector.shape_cast %11 : vector<1x64x64xbf16> to vector<64x64xbf16>
    %cst_19 = arith.constant dense<0.000000e+00> : vector<64x64xf32>
    %13 = tpu.matmul %10, %12, %cst_19 {dimension_numbers = #tpu.dot_dimension_numbers<[1], [0], [0], [1], [0, 0, 1, 1], [], []>} : vector<64x64xbf16>, vector<64x64xbf16>, vector<64x64xf32> -> vector<64x64xf32>
    %14 = arith.addf %8, %13 : vector<64x64xf32>
    %c0_20 = arith.constant 0 : index
    %c2_21 = arith.constant 2 : index
    %c0_22 = arith.constant 0 : index
    %15 = vector.load %arg8[%c0_20, %c2_21, %c0_22] : memref<8x10x64xbf16, #tpu.memory_space<vmem>>, vector<8x8x64xbf16>
    %16 = vector.shape_cast %15 : vector<8x8x64xbf16> to vector<64x64xbf16>
    %c2_23 = arith.constant 2 : index
    %c0_24 = arith.constant 0 : index
    %c0_25 = arith.constant 0 : index
    %17 = vector.load %arg3[%c2_23, %c0_24, %c0_25] : memref<3x64x64xbf16, #tpu.memory_space<vmem>>, vector<1x64x64xbf16>
    %18 = vector.shape_cast %17 : vector<1x64x64xbf16> to vector<64x64xbf16>
    %cst_26 = arith.constant dense<0.000000e+00> : vector<64x64xf32>
    %19 = tpu.matmul %16, %18, %cst_26 {dimension_numbers = #tpu.dot_dimension_numbers<[1], [0], [0], [1], [0, 0, 1, 1], [], []>} : vector<64x64xbf16>, vector<64x64xbf16>, vector<64x64xf32> -> vector<64x64xf32>
    %20 = arith.addf %14, %19 : vector<64x64xf32>
    %c0_27 = arith.constant 0 : index
    %c0_28 = arith.constant 0 : index
    %21 = vector.load %arg4[%c0_27, %c0_28] : memref<1x64xf32, #tpu.memory_space<vmem>>, vector<1x64xf32>
    %22 = vector.broadcast %21 : vector<1x64xf32> to vector<64x64xf32>
    %23 = arith.addf %20, %22 : vector<64x64xf32>
    %24 = arith.negf %23 : vector<64x64xf32>
    %25 = math.exp %24 : vector<64x64xf32>
    %cst_29 = arith.constant 1.000000e+00 : f32
    %26 = vector.broadcast %cst_29 : f32 to vector<64x64xf32>
    %27 = arith.addf %26, %25 : vector<64x64xf32>
    %28 = arith.divf %26, %27 : vector<64x64xf32>
    %29 = arith.mulf %23, %28 : vector<64x64xf32>
    %30 = arith.truncf %29 : vector<64x64xf32> to vector<64x64xbf16>
    %c0_30 = arith.constant 0 : index
    %c0_31 = arith.constant 0 : index
    %31 = vector.load %arg5[%c0_30, %c0_31] : memref<64x32xbf16, #tpu.memory_space<vmem>>, vector<64x32xbf16>
    %cst_32 = arith.constant dense<0.000000e+00> : vector<64x32xf32>
    %32 = tpu.matmul %30, %31, %cst_32 {dimension_numbers = #tpu.dot_dimension_numbers<[1], [0], [0], [1], [0, 0, 1, 1], [], []>} : vector<64x64xbf16>, vector<64x32xbf16>, vector<64x32xf32> -> vector<64x32xf32>
    %c0_33 = arith.constant 0 : index
    %c0_34 = arith.constant 0 : index
    %33 = vector.load %arg6[%c0_33, %c0_34] : memref<1x32xf32, #tpu.memory_space<vmem>>, vector<1x32xf32>
    %34 = vector.broadcast %33 : vector<1x32xf32> to vector<64x32xf32>
    %35 = arith.addf %32, %34 : vector<64x32xf32>
    %c0_35 = arith.constant 0 : index
    %c0_36 = arith.constant 0 : index
    %c0_37 = arith.constant 0 : index
    %36 = vector.load %arg2[%c0_35, %c0_36, %c0_37] : memref<8x8x32xf32, #tpu.memory_space<vmem>>, vector<8x8x32xf32>
    %37 = vector.shape_cast %35 : vector<64x32xf32> to vector<8x8x32xf32>
    %38 = arith.addf %36, %37 : vector<8x8x32xf32>
    %c0_38 = arith.constant 0 : index
    %c0_39 = arith.constant 0 : index
    %c0_40 = arith.constant 0 : index
    %39 = vector.load %arg7[%c0_38, %c0_39, %c0_40] : memref<8x8x32xf32, #tpu.memory_space<vmem>>, vector<8x8x32xf32>
    tpu.vector_store %arg7[%c0_38, %c0_39, %c0_40], %38 {strides = array<i32>} : memref<8x8x32xf32, #tpu.memory_space<vmem>>, vector<8x8x32xf32>,
    return
  }
  func.func @transform_0(%arg0: i32) -> (i32, i32, i32) {
    %c0_i32 = arith.constant 0 : i32
    %c0_i32_0 = arith.constant 0 : i32
    %c0_i32_1 = arith.constant 0 : i32
    return %arg0, %c0_i32, %c0_i32_0 : i32, i32, i32
  }
  func.func @transform_1(%arg0: i32) -> (i32, i32, i32) {
    %c0_i32 = arith.constant 0 : i32
    %c0_i32_0 = arith.constant 0 : i32
    %c0_i32_1 = arith.constant 0 : i32
    return %arg0, %c0_i32, %c0_i32_0 : i32, i32, i32
  }
  func.func @transform_2(%arg0: i32) -> (i32, i32, i32) {
    %c0_i32 = arith.constant 0 : i32
    %c0_i32_0 = arith.constant 0 : i32
    %c0_i32_1 = arith.constant 0 : i32
    %c0_i32_2 = arith.constant 0 : i32
    return %c0_i32, %c0_i32_0, %c0_i32_1 : i32, i32, i32
  }
  func.func @transform_3(%arg0: i32) -> (i32, i32) {
    %c0_i32 = arith.constant 0 : i32
    %c0_i32_0 = arith.constant 0 : i32
    %c0_i32_1 = arith.constant 0 : i32
    return %c0_i32, %c0_i32_0 : i32, i32
  }
  func.func @transform_4(%arg0: i32) -> (i32, i32) {
    %c0_i32 = arith.constant 0 : i32
    %c0_i32_0 = arith.constant 0 : i32
    %c0_i32_1 = arith.constant 0 : i32
    return %c0_i32, %c0_i32_0 : i32, i32
  }
  func.func @transform_5(%arg0: i32) -> (i32, i32) {
    %c0_i32 = arith.constant 0 : i32
    %c0_i32_0 = arith.constant 0 : i32
    %c0_i32_1 = arith.constant 0 : i32
    return %c0_i32, %c0_i32_0 : i32, i32
  }
  func.func @transform_6(%arg0: i32) -> (i32, i32, i32) {
    %c0_i32 = arith.constant 0 : i32
    %c0_i32_0 = arith.constant 0 : i32
    %c0_i32_1 = arith.constant 0 : i32
    return %arg0, %c0_i32, %c0_i32_0 : i32, i32, i32
  }
}

</mosaic_0001>

<bundles_post_ra>
// kernel: _lambda_.20
= control target key start
LH: loop header
LB: loop body
LE: loop exit
PB: predicated region body
PF: predicated region fallthrough
CT: control target
= control target key end

     0   :  { %s669_s12 = smov 0   ;;  %s786_s0 = inlined_call_operand.vmem [shape: f32[32,8,4], index: 0, kind: input, shape index: {}]   ;;  %s787_s1 = inlined_call_operand.vmem [shape: bf16[5,4,32], index: 1, kind: input, shape index: {}]   ;;  %s788_s2 = inlined_call_operand.vmem [shape: f32[1,32], index: 2, kind: input, shape index: {}]   ;;  %s789_s3 = inlined_call_operand.vmem [shape: f32[32,8,32], index: 3, kind: output, shape index: {}]  }
   0x1 LB: > { %s592_s13 = sadd.s32 4294967295, %s646_s12   ;;  %p596_p0 = scmp.ge.s32.totalorder %s646_s12, 1  ;;  %s646_s12 = sphi %s669_s12, %s13_s12  }
   0x2   : > { %p138_p1 = scmp.lt.s32.totalorder %s646_s12, 5 }
   0x4   : > { %p139_p2 = pnand %p596_p0, %p138_p1 }
   0x5   : > { %s597_s16 = sshll.u32 (!%p139_p2), %s592_s13, 3 }
   0x6   : > { %142 = sbr.rel (%p139_p2) target bundleno = 246 (0xf6), region = 32  ;;  %p163_p3 = scmp.lt.s32.totalorder (!%p139_p2), %s597_s16, 31 }
   0xb   : > { %v601_v0 = vld [vmem:[%s787_s1 + $0x2] sm:$0x3]  ;;  %vm240_vm0 = vcmask 1041408   ;;  %vm175_vm1 = vcmask 27648   ;;  %v648_v2 = vmov 0.0   ;;  %s791_s16 = smov (!%p163_p3, %s597_s16), 31 }
   0xc   : > { %v242_v1 = vsel %vm240_vm0, %v601_v0, 0  ;;  %178 = vst.msk [vmem:[#allocation2 + $0x20] sm:$0xf] %vm175_vm1, %v648_v2  ;;  %v610_v3 = vld [vmem:[%s787_s1 + $0x4] sm:$0x3]  ;;  %s598_s25 = sshll.u32 %s791_s16, 3 }
   0xd   : > { %627 = vmatpush.bf16.msra.mxu1 %v242_v1  ;;  %628 = vmatpush.bf16.msra.mxu2 %v242_v1  ;;  %179 = vst.msk [vmem:[#allocation2 + $0x30] sm:$0xf] %vm175_vm1, %v648_v2  ;;  %v615_v4 = vld [vmem:[%s787_s1 + $0x6] sm:$0x3]  ;;  %v344_v5 = vsel %vm240_vm0, %v610_v3, 0  ;;  %vm192_vm2 = vcmask 31744   ;;  %s166_s28 = scalar_lea.vmem %s786_s0, %s598_s25  ;;  %s755_s6 = scalar_lea.vmem %s789_s3, %s598_s25 }
   0xe   : > { %629 = vmatpush.bf16.msra.mxu3 %v242_v1  ;;  %251 = vmatpush.bf16.msra.mxu0 %v242_v1  ;;  %176 = vst.msk [vmem:[#allocation2] sm:$0xf] %vm175_vm1, %v648_v2  ;;  %v410_v6 = vsel %vm240_vm0, %v615_v4, 0  ;;  %v213_v7 = vld [vmem:[%s787_s1] sm:$0x3]  ;;  %v186_v11 = vld [vmem:[%s166_s28 + $0x10] sm:$0xff] }
   0xf   : > { %177 = vst.msk [vmem:[#allocation2 + $0x10] sm:$0xf] %vm175_vm1, %v648_v2  ;;  %v620_v8 = vld [vmem:[%s787_s1 + $0x8] sm:$0x3]  ;;  %v286_v9 = vsel %vm240_vm0, %v213_v7, 0  ;;  %v187_v12 = vld [vmem:[%s166_s28 + $0x18] sm:$0xff] }
  0x10   : > { %180 = vst.msk [vmem:[#allocation2 + $0x40] sm:$0xf] %vm175_vm1, %v648_v2  ;;  %v476_v10 = vsel %vm240_vm0, %v620_v8, 0  ;;  %v188_v13 = vld [vmem:[%s166_s28 + $0x20] sm:$0xff]  ;;  %v189_v14 = vld [vmem:[%s166_s28 + $0x28] sm:$0xff]  ;;  %v190_v15 = vld [vmem:[%s166_s28 + $0x30] sm:$0xff] }
  0x11   : > { %353 = vmatpush.bf16.msrb.mxu2 %v344_v5  ;;  %181 = vst.msk [vmem:[#allocation2 + $0x50] sm:$0xf] %vm175_vm1, %v648_v2  ;;  %295 = vmatpush.bf16.msrb.mxu1 %v286_v9  ;;  %v191_v16 = vld [vmem:[%s166_s28 + $0x38] sm:$0xff]  ;;  %v184_v17 = vld [vmem:[%s166_s28] sm:$0xff]  ;;  %v185_v18 = vld [vmem:[%s166_s28 + $0x8] sm:$0xff]  ;;  %vm527_vm3 = vcmask 261120  }
  0x12   : > { %419 = vmatpush.bf16.msrb.mxu3 %v410_v6  ;;  %485 = vmatpush.bf16.msrb.mxu0 %v476_v10  ;;  %182 = vst.msk [vmem:[#allocation2 + $0x60] sm:$0xf] %vm175_vm1, %v648_v2 }
  0x13   : > { %195 = vst.msk [vmem:[#allocation2 + $0x24] sm:$0xff] %vm192_vm2, %v186_v11 }
  0x14   : > { %196 = vst.msk [vmem:[#allocation2 + $0x34] sm:$0xff] %vm192_vm2, %v187_v12 }
  0x15   : > { %183 = vst.msk [vmem:[#allocation2 + $0x70] sm:$0xf] %vm175_vm1, %v648_v2 }
  0x16   : > { %197 = vst.msk [vmem:[#allocation2 + $0x44] sm:$0xff] %vm192_vm2, %v188_v13 }
  0x17   : > { %198 = vst.msk [vmem:[#allocation2 + $0x54] sm:$0xff] %vm192_vm2, %v189_v14 }
  0x18   : > { %199 = vst.msk [vmem:[#allocation2 + $0x64] sm:$0xff] %vm192_vm2, %v190_v15 }
  0x19   : > { %200 = vst.msk [vmem:[#allocation2 + $0x74] sm:$0xff] %vm192_vm2, %v191_v16 }
  0x1a   : > { %v216_v19 = vld [vmem:[#allocation2 + $0x21] sm:$0xff]  ;;  %193 = vst.msk [vmem:[#allocation2 + $0x4] sm:$0xff] %vm192_vm2, %v184_v17 }
  0x1b   : > { %v217_v20 = vld [vmem:[#allocation2 + $0x31] sm:$0xff]  ;;  %194 = vst.msk [vmem:[#allocation2 + $0x14] sm:$0xff] %vm192_vm2, %v185_v18  ;;  %v203_v43 = vld [vmem:[#allocation2 + $0x20] sm:$0xff] }
  0x1c   : > { %v223_v21 = vpack.c.bf16 %v217_v20, %v216_v19  ;;  %v204_v44 = vld [vmem:[#allocation2 + $0x30] sm:$0xff]  ;;  %v319_v46 = vld [vmem:[#allocation2 + $0x22] sm:$0xff] }
  0x1d   : > { %v218_v22 = vld [vmem:[#allocation2 + $0x41] sm:$0xff]  ;;  %v210_v45 = vpack.c.bf16 %v204_v44, %v203_v43  ;;  %v320_v47 = vld [vmem:[#allocation2 + $0x32] sm:$0xff] }
  0x1e   : > { %603 = vmatmul.msk.bf16.vlgmr.msra.gmra.mxu1 %vm192_vm2, %v223_v21  ;;  %v219_v23 = vld [vmem:[#allocation2 + $0x51] sm:$0xff]  ;;  %v385_v48 = vld [vmem:[#allocation2 + $0x23] sm:$0xff]  ;;  %v326_v50 = vpack.c.bf16 %v320_v47, %v319_v46 }
  0x1f   : > { %v224_v24 = vpack.c.bf16 %v219_v23, %v218_v22  ;;  %v220_v25 = vld [vmem:[#allocation2 + $0x61] sm:$0xff]  ;;  %v386_v49 = vld [vmem:[#allocation2 + $0x33] sm:$0xff] }
  0x20   : > { %v221_v26 = vld [vmem:[#allocation2 + $0x71] sm:$0xff]  ;;  %v451_v51 = vld [vmem:[#allocation2 + $0x24] sm:$0xff]  ;;  %v392_v53 = vpack.c.bf16 %v386_v49, %v385_v48 }
  0x21   : > { %604 = vmatmul.msk.bf16.vlgmr.msra.gmra.mxu2 %vm192_vm2, %v224_v24  ;;  %v225_v27 = vpack.c.bf16 %v221_v26, %v220_v25  ;;  %v214_v28 = vld [vmem:[#allocation2 + $0x1] sm:$0xff]  ;;  %v452_v52 = vld [vmem:[#allocation2 + $0x34] sm:$0xff] }
  0x22   : > { %v215_v29 = vld [vmem:[#allocation2 + $0x11] sm:$0xff]  ;;  %v201_v31 = vld [vmem:[#allocation2] sm:$0xff]  ;;  %v458_v54 = vpack.c.bf16 %v452_v52, %v451_v51 }
  0x23   : > { %605 = vmatmul.msk.bf16.vlgmr.msra.gmra.mxu3 %vm192_vm2, %v225_v27  ;;  %v222_v30 = vpack.c.bf16 %v215_v29, %v214_v28  ;;  %v202_v32 = vld [vmem:[#allocation2 + $0x10] sm:$0xff]  ;;  %v317_v34 = vld [vmem:[#allocation2 + $0x2] sm:$0xff] }
  0x24   : > { %v209_v33 = vpack.c.bf16 %v202_v32, %v201_v31  ;;  %v318_v35 = vld [vmem:[#allocation2 + $0x12] sm:$0xff]  ;;  %v383_v36 = vld [vmem:[#allocation2 + $0x3] sm:$0xff]  ;;  %v748_v31 = vld [vmem:[%s788_s2] ss:$0 sm:$0xff] }
  0x25   : > { %602 = vmatmul.msk.bf16.vlgmr.msra.gmra.mxu0 %vm192_vm2, %v222_v30  ;;  %v384_v37 = vld [vmem:[#allocation2 + $0x13] sm:$0xff]  ;;  %v325_v38 = vpack.c.bf16 %v318_v35, %v317_v34  ;;  %v449_v39 = vld [vmem:[#allocation2 + $0x4] sm:$0xff] }
  0x26   : > { %v450_v40 = vld [vmem:[#allocation2 + $0x14] sm:$0xff]  ;;  %v391_v41 = vpack.c.bf16 %v384_v37, %v383_v36  ;;  %v205_v55 = vld [vmem:[#allocation2 + $0x40] sm:$0xff] }
  0x27   : > { %v457_v42 = vpack.c.bf16 %v450_v40, %v449_v39  ;;  %v206_v56 = vld [vmem:[#allocation2 + $0x50] sm:$0xff]  ;;  %v321_v58 = vld [vmem:[#allocation2 + $0x42] sm:$0xff] }
  0x28   : > { %v211_v57 = vpack.c.bf16 %v206_v56, %v205_v55  ;;  %v322_v59 = vld [vmem:[#allocation2 + $0x52] sm:$0xff]  ;;  %v387_v60 = vld [vmem:[#allocation2 + $0x43] sm:$0xff] }
  0x29   : > { %v388_v61 = vld [vmem:[#allocation2 + $0x53] sm:$0xff]  ;;  %v327_v62 = vpack.c.bf16 %v322_v59, %v321_v58  ;;  %v453_v63 = vld [vmem:[#allocation2 + $0x44] sm:$0xff] }
  0x2a   : > { %v454_v0 = vld [vmem:[#allocation2 + $0x54] sm:$0xff]  ;;  %v393_v1 = vpack.c.bf16 %v388_v61, %v387_v60  ;;  %v207_v3 = vld [vmem:[#allocation2 + $0x60] sm:$0xff] }
  0x2b   : > { %v459_v2 = vpack.c.bf16 %v454_v0, %v453_v63  ;;  %v208_v4 = vld [vmem:[#allocation2 + $0x70] sm:$0xff]  ;;  %v323_v6 = vld [vmem:[#allocation2 + $0x62] sm:$0xff] }
  0x2c   : > { %v212_v5 = vpack.c.bf16 %v208_v4, %v207_v3  ;;  %v324_v7 = vld [vmem:[#allocation2 + $0x72] sm:$0xff]  ;;  %v389_v8 = vld [vmem:[#allocation2 + $0x63] sm:$0xff] }
  0x2d   : > { %v390_v9 = vld [vmem:[#allocation2 + $0x73] sm:$0xff]  ;;  %v328_v10 = vpack.c.bf16 %v324_v7, %v323_v6  ;;  %v455_v11 = vld [vmem:[#allocation2 + $0x64] sm:$0xff] }
  0x2e   : > { %606 = vmatmul.msk.bf16.vlgmr.msrb.gmra.mxu1 %vm192_vm2, %v209_v33  ;;  %v456_v12 = vld [vmem:[#allocation2 + $0x74] sm:$0xff]  ;;  %v394_v13 = vpack.c.bf16 %v390_v9, %v389_v8 }
  0x2f   : > { %v460_v14 = vpack.c.bf16 %v456_v12, %v455_v11 }
  0x31   : > { %611 = vmatmul.msk.bf16.vlgmr.msrb.gmra.mxu2 %vm192_vm2, %v325_v38 }
  0x33   : > { %616 = vmatmul.msk.bf16.vlgmr.msrb.gmra.mxu3 %vm192_vm2, %v391_v41 }
  0x35   : > { %621 = vmatmul.msk.bf16.vlgmr.msrb.gmra.mxu0 %vm192_vm2, %v457_v42 }
  0x3e   : > { %607 = vmatmul.msk.bf16.gmra.mxu1 %vm192_vm2, %v210_v45 }
  0x41   : > { %612 = vmatmul.msk.bf16.gmra.mxu2 %vm192_vm2, %v326_v50 }
  0x43   : > { %617 = vmatmul.msk.bf16.gmra.mxu3 %vm192_vm2, %v392_v53 }
  0x45   : > { %622 = vmatmul.msk.bf16.gmra.mxu0 %vm192_vm2, %v458_v54 }
  0x4e   : > { %608 = vmatmul.msk.bf16.gmra.mxu1 %vm192_vm2, %v211_v57 }
  0x51   : > { %613 = vmatmul.msk.bf16.gmra.mxu2 %vm192_vm2, %v327_v62 }
  0x53   : > { %618 = vmatmul.msk.bf16.gmra.mxu3 %vm192_vm2, %v393_v1 }
  0x55   : > { %623 = vmatmul.msk.bf16.gmra.mxu0 %vm192_vm2, %v459_v2 }
  0x5e   : > { %609 = vmatmul.msk.bf16.gmra.mxu1 %vm192_vm2, %v212_v5 }
  0x61   : > { %614 = vmatmul.msk.bf16.gmra.mxu2 %vm192_vm2, %v328_v10 }
  0x63   : > { %619 = vmatmul.msk.bf16.gmra.mxu3 %vm192_vm2, %v394_v13 }
  0x65   : > { %624 = vmatmul.msk.bf16.gmra.mxu0 %vm192_vm2, %v460_v14 }
  0x9b   : > { %v258_v15 = vpop.f32.mrf.mxu1 }
  0xa2   : > { %v253_v16 = vpop.f32.mrf.mxu0 }
  0xa3   : > { %v260_v17 = vpop.f32.mrf.mxu1 }
  0xa4   : > { %v263_v18 = vpop.f32.mrf.mxu2 }
  0xa6   : > { %v741_v19 = vpop.f32.mrf.mxu3 }
  0xaa   : > { %v255_v20 = vpop.f32.mrf.mxu0 }
  0xab   : > { %v297_v21 = vpop.f32.mrf.mxu1 }
  0xac   : > { %v265_v22 = vpop.f32.mrf.mxu2  ;;  %v298_v25 = vadd.f32 %v297_v21, %v253_v16 }
  0xae   : > { %v743_v23 = vpop.f32.mrf.mxu3 }
  0xb2   : > { %v487_v24 = vpop.f32.mrf.mxu0 }
  0xb3   : > { %v299_v26 = vpop.f32.mrf.mxu1 }
  0xb4   : > { %v355_v27 = vpop.f32.mrf.mxu2  ;;  %v300_v35 = vadd.f32 %v299_v26, %v255_v20 }
  0xb5   : > { %v375_v28 = vadd.f32 %v355_v27, %v298_v25 }
  0xb6   : > { %v421_v29 = vpop.f32.mrf.mxu3 }
  0xb7   : > { %v441_v30 = vadd.f32 %v421_v29, %v375_v28 }
  0xb9   : > { %v507_v32 = vadd.f32 %v487_v24, %v441_v30 }
  0xba   : > { %v489_v33 = vpop.f32.mrf.mxu0 }
  0xbb   : > { %v519_v34 = vadd.f32 %v748_v31, %v507_v32  ;;  %v302_v36 = vpop.f32.mrf.mxu1 }
  0xbc   : > { %v357_v37 = vpop.f32.mrf.mxu2  ;;  %v303_v44 = vadd.f32 %v302_v36, %v258_v15 }
  0xbd   : > { %528 = vst.msk [vmem:[%s755_s6] sm:$0xff] %vm527_vm3, %v519_v34  ;;  %v376_v38 = vadd.f32 %v357_v37, %v300_v35 }
  0xbe   : > { %v423_v39 = vpop.f32.mrf.mxu3 }
  0xbf   : > { %v442_v40 = vadd.f32 %v423_v39, %v376_v38 }
  0xc1   : > { %v508_v41 = vadd.f32 %v489_v33, %v442_v40 }
  0xc2   : > { %v492_v42 = vpop.f32.mrf.mxu0 }
  0xc3   : > { %v520_v43 = vadd.f32 %v748_v31, %v508_v41  ;;  %v304_v45 = vpop.f32.mrf.mxu1 }
  0xc4   : > { %v360_v46 = vpop.f32.mrf.mxu2  ;;  %v305_v53 = vadd.f32 %v304_v45, %v260_v17 }
  0xc5   : > { %529 = vst.msk [vmem:[%s755_s6 + $0x8] sm:$0xff] %vm527_vm3, %v520_v43  ;;  %v377_v47 = vadd.f32 %v360_v46, %v303_v44 }
  0xc6   : > { %v426_v48 = vpop.f32.mrf.mxu3 }
  0xc7   : > { %v443_v49 = vadd.f32 %v426_v48, %v377_v47 }
  0xc9   : > { %v509_v50 = vadd.f32 %v492_v42, %v443_v49 }
  0xca   : > { %v494_v51 = vpop.f32.mrf.mxu0 }
  0xcb   : > { %v521_v52 = vadd.f32 %v748_v31, %v509_v50  ;;  %v307_v54 = vpop.f32.mrf.mxu1 }
  0xcc   : > { %v362_v55 = vpop.f32.mrf.mxu2  ;;  %v308_v62 = vadd.f32 %v307_v54, %v263_v18 }
  0xcd   : > { %530 = vst.msk [vmem:[%s755_s6 + $0x10] sm:$0xff] %vm527_vm3, %v521_v52  ;;  %v378_v56 = vadd.f32 %v362_v55, %v305_v53 }
  0xce   : > { %v428_v57 = vpop.f32.mrf.mxu3 }
  0xcf   : > { %v444_v58 = vadd.f32 %v428_v57, %v378_v56 }
  0xd1   : > { %v510_v59 = vadd.f32 %v494_v51, %v444_v58 }
  0xd2   : > { %v497_v60 = vpop.f32.mrf.mxu0 }
  0xd3   : > { %v522_v61 = vadd.f32 %v748_v31, %v510_v59  ;;  %v309_v0 = vpop.f32.mrf.mxu1 }
  0xd4   : > { %v365_v63 = vpop.f32.mrf.mxu2  ;;  %v310_v6 = vadd.f32 %v309_v0, %v265_v22 }
  0xd5   : > { %531 = vst.msk [vmem:[%s755_s6 + $0x18] sm:$0xff] %vm527_vm3, %v522_v61  ;;  %v379_v1 = vadd.f32 %v365_v63, %v308_v62 }
  0xd6   : > { %v431_v2 = vpop.f32.mrf.mxu3 }
  0xd7   : > { %v445_v3 = vadd.f32 %v431_v2, %v379_v1 }
  0xd9   : > { %v511_v4 = vadd.f32 %v497_v60, %v445_v3 }
  0xda   : > { %v499_v7 = vpop.f32.mrf.mxu0 }
  0xdb   : > { %v523_v5 = vadd.f32 %v748_v31, %v511_v4  ;;  %v312_v11 = vpop.f32.mrf.mxu1 }
  0xdc   : > { %v367_v8 = vpop.f32.mrf.mxu2  ;;  %v313_v15 = vadd.f32 %v312_v11, %v741_v19 }
  0xdd   : > { %532 = vst.msk [vmem:[%s755_s6 + $0x20] sm:$0xff] %vm527_vm3, %v523_v5  ;;  %v380_v9 = vadd.f32 %v367_v8, %v310_v6 }
  0xde   : > { %v433_v10 = vpop.f32.mrf.mxu3 }
  0xdf   : > { %v446_v12 = vadd.f32 %v433_v10, %v380_v9 }
  0xe1   : > { %v512_v13 = vadd.f32 %v499_v7, %v446_v12 }
  0xe2   : > { %v502_v18 = vpop.f32.mrf.mxu0 }
  0xe3   : > { %v524_v14 = vadd.f32 %v748_v31, %v512_v13  ;;  %v314_v22 = vpop.f32.mrf.mxu1 }
  0xe4   : > { %v370_v16 = vpop.f32.mrf.mxu2  ;;  %v315_v26 = vadd.f32 %v314_v22, %v743_v23 }
  0xe5   : > { %533 = vst.msk [vmem:[%s755_s6 + $0x28] sm:$0xff] %vm527_vm3, %v524_v14  ;;  %v381_v17 = vadd.f32 %v370_v16, %v313_v15 }
  0xe6   : > { %v436_v20 = vpop.f32.mrf.mxu3 }
  0xe7   : > { %v447_v21 = vadd.f32 %v436_v20, %v381_v17 }
  0xe9   : > { %v513_v24 = vadd.f32 %v502_v18, %v447_v21 }
  0xea   : > { %v504_v30 = vpop.f32.mrf.mxu0 }
  0xeb   : > { %v525_v25 = vadd.f32 %v748_v31, %v513_v24 }
  0xec   : > { %v372_v27 = vpop.f32.mrf.mxu2 }
  0xed   : > { %534 = vst.msk [vmem:[%s755_s6 + $0x30] sm:$0xff] %vm527_vm3, %v525_v25  ;;  %v382_v28 = vadd.f32 %v372_v27, %v315_v26 }
  0xee   : > { %v438_v29 = vpop.f32.mrf.mxu3 }
  0xef   : > { %v448_v19 = vadd.f32 %v438_v29, %v382_v28 }
  0xf1   : > { %v514_v32 = vadd.f32 %v504_v30, %v448_v19 }
  0xf3   : > { %v526_v33 = vadd.f32 %v748_v31, %v514_v32 }
  0xf5   : > { %535 = vst.msk [vmem:[%s755_s6 + $0x38] sm:$0xff] %vm527_vm3, %v526_v33 }
  0xf6 PF: > { %s13_s12 = sadd.s32 1, %s646_s12  }
  0xf7   : > { %p10_p4 = scmp.ge.s32.totalorder %s13_s12, 6  }
  0xf9   :  { %12 = sbr.rel (!%p10_p4) target bundleno = 1 (0x1), region = 66 }

// kernel: _lambda_.21
= control target key start
LH: loop header
LB: loop body
LE: loop exit
PB: predicated region body
PF: predicated region fallthrough
CT: control target
= control target key end

     0   :  { %s2172_s21 = smov 0   ;;  %s2174_s22 = smov 0   ;;  %s2917_s0 = inlined_call_operand.vmem [shape: f32[2,16,8,32], index: 0, kind: input, shape index: {}]   ;;  %s2918_s1 = inlined_call_operand.vmem [shape: f32[1,32], index: 1, kind: input, shape index: {}]   ;;  %s2919_s2 = inlined_call_operand.vmem [shape: f32[1,32], index: 2, kind: input, shape index: {}]   ;;  %s2920_s3 = inlined_call_operand.vmem [shape: bf16[5,32,32], index: 3, kind: input, shape index: {}]   ;;  %s2921_s4 = inlined_call_operand.vmem [shape: f32[1,32], index: 4, kind: input, shape index: {}]   ;;  %s2922_s5 = inlined_call_operand.vmem [shape: f32[1,32], index: 5, kind: input, shape index: {}]   ;;  %s2923_s6 = inlined_call_operand.vmem [shape: f32[2,16,8,32], index: 6, kind: output, shape index: {}]  }
   0x1   :  { %s2176_s23 = smov 0  }
   0x2 LB: > { %s28_s24 = sadd.s32 1, %s2129_s22  ;;  %p1710_p0 = scmp.ge.s32.totalorder %s2133_s23, 1  ;;  %s2133_s23 = sphi %s2176_s23, %s16_s23   ;;  %s2129_s22 = sphi %s2174_s22, %s2935_s22   ;;  %s2125_s21 = sphi %s2172_s21, %s2934_s21  }
   0x3   : > { %p30_p1 = scmp.ge.s32.totalorder %s28_s24, 2  ;;  %p231_p2 = scmp.lt.s32.totalorder %s2133_s23, 3 }
   0x5   : > { %s2937_s24 = smov (%p30_p1, %s28_s24), 0  ;;  %p232_p3 = pnand %p1710_p0, %p231_p2 }
   0x6   : > { %p267_p4 = scmp.lt.s32.totalorder (!%p232_p3), %s2125_s21, 1 }
   0x7   : > { %235 = sbr.rel (%p232_p3) target bundleno = 629 (0x275), region = 44 }
   0xc   : > { %s2939_s21 = smov (!%p267_p4, %s2125_s21), 1  ;;  %vm302_vm0 = vcmask 261120   ;;  %v2135_v30 = vmov 32.0   ;;  %vm700_vm6 = vcmask 257024  }
   0xd   : > { %s1973_s25 = sshll.u32 %s2939_s21, 7  ;;  %2061 = vrcp.f32 %v2135_v30 }
   0xe   : > { %s2198_s28 = scalar_lea.vmem %s2917_s0, %s1973_s25  ;;  %s2816_s17 = scalar_lea.vmem %s2923_s6, %s1973_s25 }
   0xf   : > { %v295_v0 = vld [vmem:[%s2198_s28 + $0x58] sm:$0xff]  ;;  %v2210_v6 = vld [vmem:[%s2198_s28 + $0x60] sm:$0xff]  ;;  %v2228_v13 = vld [vmem:[%s2198_s28 + $0x48] sm:$0xff] }
  0x10   : > { %v291_v1 = vld [vmem:[%s2198_s28 + $0x38] sm:$0xff]  ;;  %v336_v3 = vsel %vm302_vm0, %v295_v0, 0.0  ;;  %v2213_v7 = vld [vmem:[%s2198_s28 + $0x40] sm:$0xff]  ;;  %v339_v9 = vsel %vm302_vm0, %v2210_v6, 0.0  ;;  %v2231_v14 = vld [vmem:[%s2198_s28 + $0x50] sm:$0xff]  ;;  %v330_v16 = vsel %vm302_vm0, %v2228_v13, 0.0 }
  0x11   : > { %v2203_v2 = vld [vmem:[%s2198_s28 + $0x18] sm:$0xff]  ;;  %v324_v4 = vsel %vm302_vm0, %v291_v1, 0.0  ;;  %337 = vadd.xlane.f32.xlu1 %v336_v3  ;;  %v2216_v8 = vld [vmem:[%s2198_s28 + $0x20] sm:$0xff]  ;;  %v327_v10 = vsel %vm302_vm0, %v2213_v7, 0.0  ;;  %v333_v17 = vsel %vm302_vm0, %v2231_v14, 0.0  ;;  %v2240_v18 = vld [vmem:[%s2198_s28 + $0x68] sm:$0xff] }
  0x12   : > { %v312_v5 = vsel %vm302_vm0, %v2203_v2, 0.0  ;;  %325 = vadd.xlane.f32.xlu0 %v324_v4  ;;  %v315_v11 = vsel %vm302_vm0, %v2216_v8, 0.0  ;;  %v2225_v12 = vld [vmem:[%s2198_s28] sm:$0xff]  ;;  %v2243_v19 = vld [vmem:[%s2198_s28 + $0x70] sm:$0xff]  ;;  %v2246_v20 = vld [vmem:[%s2198_s28 + $0x28] sm:$0xff]  ;;  %v342_v21 = vsel %vm302_vm0, %v2240_v18, 0.0 }
  0x13   : > { %313 = vadd.xlane.f32.xlu2 %v312_v5  ;;  %v303_v15 = vsel %vm302_vm0, %v2225_v12, 0.0  ;;  %v345_v22 = vsel %vm302_vm0, %v2243_v19, 0.0  ;;  %v318_v23 = vsel %vm302_vm0, %v2246_v20, 0.0  ;;  %v2255_v24 = vld [vmem:[%s2198_s28 + $0x30] sm:$0xff]  ;;  %v2258_v25 = vld [vmem:[%s2198_s28 + $0x8] sm:$0xff]  ;;  %v2062_v31 = vpop.eup %2061 }
  0x14   : > { %v2261_v26 = vld [vmem:[%s2198_s28 + $0x10] sm:$0xff]  ;;  %v321_v27 = vsel %vm302_vm0, %v2255_v24, 0.0  ;;  %v306_v28 = vsel %vm302_vm0, %v2258_v25, 0.0  ;;  %v352_v32 = vmul.f32 32.0, %v2062_v31  ;;  %vm356_vm1 = vweird.f32 %v2062_v31 }
  0x15   : > { %v309_v29 = vsel %vm302_vm0, %v2261_v26, 0.0 }
  0x16   : > { %v353_v33 = vsub.f32 1.0, %v352_v32 }
  0x18   : > { %v354_v34 = vmul.f32 %v2062_v31, %v353_v33 }
  0x19   : > { %340 = vadd.xlane.f32.xlu1 %v339_v9 }
  0x1a   : > { %328 = vadd.xlane.f32.xlu0 %v327_v10  ;;  %v355_v35 = vadd.f32 %v2062_v31, %v354_v34 }
  0x1b   : > { %316 = vadd.xlane.f32.xlu2 %v315_v11 }
  0x1c   : > { %v2269_v36 = vsel %vm356_vm1, %v2062_v31, %v355_v35 }
  0x21   : > { %331 = vadd.xlane.f32.xlu1 %v330_v16 }
  0x22   : > { %304 = vadd.xlane.f32.xlu0 %v303_v15 }
  0x23   : > { %334 = vadd.xlane.f32.xlu2 %v333_v17 }
  0x29   : > { %346 = vadd.xlane.f32.xlu1 %v345_v22 }
  0x2a   : > { %343 = vadd.xlane.f32.xlu0 %v342_v21 }
  0x2b   : > { %319 = vadd.xlane.f32.xlu2 %v318_v23 }
  0x31   : > { %307 = vadd.xlane.f32.xlu1 %v306_v28 }
  0x32   : > { %322 = vadd.xlane.f32.xlu0 %v321_v27 }
  0x33   : > { %310 = vadd.xlane.f32.xlu2 %v309_v29 }
  0x84   : > { %v338_v37 = vpop.xlane.xlu1 %337 }
  0x85   : > { %v326_v38 = vpop.xlane.xlu0 %325  ;;  %v369_v39 = vmul.f32 %v2269_v36, %v338_v37 }
  0x86   : > { %v365_v40 = vmul.f32 %v2269_v36, %v326_v38  ;;  %v314_v41 = vpop.xlane.xlu2 %313 }
  0x87   : > { %v2273_v42 = vsub.f32 %v295_v0, %v369_v39  ;;  %v361_v50 = vmul.f32 %v2269_v36, %v314_v41 }
  0x88   : > { %v2275_v43 = vsub.f32 %v291_v1, %v365_v40 }
  0x89   : > { %v401_v44 = vmul.f32 %v2273_v42, %v2273_v42  ;;  %v2297_v58 = vsub.f32 %v2203_v2, %v361_v50 }
  0x8a   : > { %v397_v45 = vmul.f32 %v2275_v43, %v2275_v43 }
  0x8b   : > { %v439_v46 = vsel %vm302_vm0, %v401_v44, 0.0 }
  0x8c   : > { %v427_v47 = vsel %vm302_vm0, %v397_v45, 0.0  ;;  %v341_v48 = vpop.xlane.xlu1 %340  ;;  %440 = vadd.xlane.f32.xlu2 %v439_v46 }
  0x8d   : > { %v329_v49 = vpop.xlane.xlu0 %328  ;;  %428 = vadd.xlane.f32.xlu0 %v427_v47  ;;  %v370_v51 = vmul.f32 %v2269_v36, %v341_v48 }
  0x8e   : > { %v366_v52 = vmul.f32 %v2269_v36, %v329_v49  ;;  %v317_v53 = vpop.xlane.xlu2 %316 }
  0x8f   : > { %v362_v54 = vmul.f32 %v2269_v36, %v317_v53  ;;  %v2288_v55 = vsub.f32 %v2210_v6, %v370_v51  ;;  %v393_v6 = vmul.f32 %v2297_v58, %v2297_v58 }
  0x90   : > { %v2291_v56 = vsub.f32 %v2213_v7, %v366_v52 }
  0x91   : > { %v2294_v57 = vsub.f32 %v2216_v8, %v362_v54  ;;  %v402_v60 = vmul.f32 %v2288_v55, %v2288_v55  ;;  %v415_v11 = vsel %vm302_vm0, %v393_v6, 0.0 }
  0x92   : > { %v398_v59 = vmul.f32 %v2291_v56, %v2291_v56 }
  0x93   : > { %v394_v61 = vmul.f32 %v2294_v57, %v2294_v57  ;;  %v442_v63 = vsel %vm302_vm0, %v402_v60, 0.0 }
  0x94   : > { %v430_v62 = vsel %vm302_vm0, %v398_v59, 0.0  ;;  %v332_v2 = vpop.xlane.xlu1 %331 }
  0x95   : > { %v418_v0 = vsel %vm302_vm0, %v394_v61, 0.0  ;;  %431 = vadd.xlane.f32.xlu1 %v430_v62  ;;  %443 = vadd.xlane.f32.xlu0 %v442_v63  ;;  %v305_v1 = vpop.xlane.xlu0 %304  ;;  %v367_v5 = vmul.f32 %v2269_v36, %v332_v2 }
  0x96   : > { %v335_v3 = vpop.xlane.xlu2 %334  ;;  %419 = vadd.xlane.f32.xlu2 %v418_v0  ;;  %v358_v4 = vmul.f32 %v2269_v36, %v305_v1 }
  0x97   : > { %v368_v7 = vmul.f32 %v2269_v36, %v335_v3  ;;  %v2320_v10 = vsub.f32 %v2228_v13, %v367_v5 }
  0x98   : > { %v2314_v8 = vsub.f32 %v2225_v12, %v358_v4 }
  0x99   : > { %v2317_v9 = vsub.f32 %v2231_v14, %v368_v7  ;;  %v399_v27 = vmul.f32 %v2320_v10, %v2320_v10 }
  0x9a   : > { %v390_v15 = vmul.f32 %v2314_v8, %v2314_v8 }
  0x9b   : > { %v400_v16 = vmul.f32 %v2317_v9, %v2317_v9  ;;  %v433_v32 = vsel %vm302_vm0, %v399_v27, 0.0 }
  0x9c   : > { %v406_v17 = vsel %vm302_vm0, %v390_v15, 0.0  ;;  %v347_v14 = vpop.xlane.xlu1 %346 }
  0x9d   : > { %v436_v21 = vsel %vm302_vm0, %v400_v16, 0.0  ;;  %416 = vadd.xlane.f32.xlu1 %v415_v11  ;;  %407 = vadd.xlane.f32.xlu0 %v406_v17  ;;  %v344_v12 = vpop.xlane.xlu0 %343  ;;  %v372_v23 = vmul.f32 %v2269_v36, %v347_v14 }
  0x9e   : > { %v320_v22 = vpop.xlane.xlu2 %319  ;;  %437 = vadd.xlane.f32.xlu2 %v436_v21  ;;  %v371_v13 = vmul.f32 %v2269_v36, %v344_v12 }
  0x9f   : > { %v363_v28 = vmul.f32 %v2269_v36, %v320_v22  ;;  %v2341_v31 = vsub.f32 %v2243_v19, %v372_v23 }
  0xa0   : > { %v2335_v29 = vsub.f32 %v2240_v18, %v371_v13 }
  0xa1   : > { %v2338_v30 = vsub.f32 %v2246_v20, %v363_v28  ;;  %v404_v39 = vmul.f32 %v2341_v31, %v2341_v31 }
  0xa2   : > { %v403_v33 = vmul.f32 %v2335_v29, %v2335_v29 }
  0xa3   : > { %v395_v34 = vmul.f32 %v2338_v30, %v2338_v30  ;;  %v448_v46 = vsel %vm302_vm0, %v404_v39, 0.0 }
  0xa4   : > { %v445_v35 = vsel %vm302_vm0, %v403_v33, 0.0  ;;  %v308_v20 = vpop.xlane.xlu1 %307 }
  0xa5   : > { %v421_v37 = vsel %vm302_vm0, %v395_v34, 0.0  ;;  %434 = vadd.xlane.f32.xlu1 %v433_v32  ;;  %446 = vadd.xlane.f32.xlu0 %v445_v35  ;;  %v323_v18 = vpop.xlane.xlu0 %322  ;;  %v359_v40 = vmul.f32 %v2269_v36, %v308_v20 }
  0xa6   : > { %422 = vadd.xlane.f32.xlu2 %v421_v37  ;;  %v311_v38 = vpop.xlane.xlu2 %310  ;;  %v364_v19 = vmul.f32 %v2269_v36, %v323_v18 }
  0xa7   : > { %v360_v41 = vmul.f32 %v2269_v36, %v311_v38  ;;  %v2363_v47 = vsub.f32 %v2258_v25, %v359_v40  ;;  %v1994_v40 = vld [vmem:[%s2920_s3 + $0x18] sm:$0xff] }
  0xa8   : > { %v2356_v44 = vsub.f32 %v2255_v24, %v364_v19  ;;  %2026 = vmatpush.bf16.msra.mxu2 %v1994_v40  ;;  %2027 = vmatpush.bf16.msra.mxu3 %v1994_v40 }
  0xa9   : > { %v2359_v45 = vsub.f32 %v2261_v26, %v360_v41  ;;  %v391_v24 = vmul.f32 %v2363_v47, %v2363_v47  ;;  %v2374_v26 = vld [vmem:[%s2198_s28 + $0x78] sm:$0xff]  ;;  %863 = vmatpush.bf16.msra.mxu0 %v1994_v40  ;;  %2025 = vmatpush.bf16.msra.mxu1 %v1994_v40 }
  0xaa   : > { %v396_v48 = vmul.f32 %v2356_v44, %v2356_v44  ;;  %v348_v52 = vsel %vm302_vm0, %v2374_v26, 0.0 }
  0xab   : > { %v392_v49 = vmul.f32 %v2359_v45, %v2359_v45  ;;  %v409_v25 = vsel %vm302_vm0, %v391_v24, 0.0 }
  0xac   : > { %v424_v50 = vsel %vm302_vm0, %v396_v48, 0.0 }
  0xad   : > { %v412_v51 = vsel %vm302_vm0, %v392_v49, 0.0  ;;  %449 = vadd.xlane.f32.xlu1 %v448_v46  ;;  %425 = vadd.xlane.f32.xlu0 %v424_v50  ;;  %v2416_v46 = vld [vmem:[%s2918_s1] ss:$0 sm:$0xff] }
  0xae   : > { %413 = vadd.xlane.f32.xlu2 %v412_v51 }
  0xb5   : > { %410 = vadd.xlane.f32.xlu1 %v409_v25  ;;  %349 = vadd.xlane.f32.xlu0 %v348_v52  ;;  %v2434_v52 = vld [vmem:[%s2919_s2] ss:$0 sm:$0xff] }
  0xff   : > { %v441_v53 = vpop.xlane.xlu2 %440 }
 0x100   : > { %v429_v54 = vpop.xlane.xlu0 %428  ;;  %v465_v59 = vmul.f32 %v441_v53, %v2269_v36 }
 0x101   : > { %v461_v60 = vmul.f32 %v429_v54, %v2269_v36 }
 0x102   : > { %v481_v61 = vadd.f32 1e-05, %v465_v59 }
 0x103   : > { %v477_v62 = vadd.f32 1e-05, %v461_v60 }
 0x104   : > { %2063 = vrsqrt.f32 %v481_v61  ;;  %vm602_vm2 = vweird.f32 %v481_v61 }
 0x105   : > { %2065 = vrsqrt.f32 %v477_v62  ;;  %vm562_vm4 = vweird.f32 %v477_v62 }
 0x108   : > { %v432_v63 = vpop.xlane.xlu1 %431  ;;  %v444_v0 = vpop.xlane.xlu0 %443 }
 0x109   : > { %v420_v1 = vpop.xlane.xlu2 %419  ;;  %v462_v2 = vmul.f32 %v432_v63, %v2269_v36  ;;  %v466_v3 = vmul.f32 %v444_v0, %v2269_v36  ;;  %v1993_v63 = vld [vmem:[%s2920_s3 + $0x10] sm:$0xff] }
 0x10a   : > { %v458_v4 = vmul.f32 %v420_v1, %v2269_v36  ;;  %v2064_v5 = vpop.eup %2063  ;;  %2029 = vmatpush.bf16.msra.mxu2 %v1993_v63  ;;  %2030 = vmatpush.bf16.msra.mxu3 %v1993_v63 }
 0x10b   : > { %v2384_v6 = vadd.f32 1e-05, %v462_v2  ;;  %v2386_v7 = vadd.f32 1e-05, %v466_v3  ;;  %v2066_v11 = vpop.eup %2065  ;;  %v597_v15 = vmul.f32 %v2064_v5, %v481_v61  ;;  %vm603_vm3 = vweird.f32 %v2064_v5  ;;  %864 = vmatpush.bf16.msra.mxu0 %v1993_v63  ;;  %2028 = vmatpush.bf16.msra.mxu1 %v1993_v63 }
 0x10c   : > { %v2388_v16 = vadd.f32 1e-05, %v458_v4  ;;  %v557_v17 = vmul.f32 %v2066_v11, %v477_v62  ;;  %vm563_vm5 = vweird.f32 %v2066_v11  ;;  %vm604_vm9 = vmor %vm602_vm2, %vm603_vm3 }
 0x10d   : > { %2067 = vrsqrt.f32 %v2384_v6  ;;  %v598_v21 = vmul.f32 %v2064_v5, %v597_v15  ;;  %vm572_vm8 = vweird.f32 %v2384_v6  ;;  %vm564_vm10 = vmor %vm562_vm4, %vm563_vm5  ;;  %vm612_vm11 = vweird.f32 %v2386_v7 }
 0x10e   : > { %2069 = vrsqrt.f32 %v2388_v16  ;;  %v558_v12 = vmul.f32 %v2066_v11, %v557_v17  ;;  %vm532_vm7 = vweird.f32 %v2388_v16 }
 0x10f   : > { %2071 = vrsqrt.f32 %v2386_v7  ;;  %v599_v14 = vmul.f32 0.5, %v598_v21 }
 0x110   : > { %v417_v22 = vpop.xlane.xlu1 %416  ;;  %v408_v13 = vpop.xlane.xlu0 %407  ;;  %v559_v23 = vmul.f32 0.5, %v558_v12 }
 0x111   : > { %v438_v27 = vpop.xlane.xlu2 %437  ;;  %v457_v28 = vmul.f32 %v417_v22, %v2269_v36  ;;  %v454_v32 = vmul.f32 %v408_v13, %v2269_v36  ;;  %v600_v33 = vsub.f32 1.5, %v599_v14 }
 0x112   : > { %v464_v34 = vmul.f32 %v438_v27, %v2269_v36  ;;  %v560_v37 = vsub.f32 1.5, %v559_v23 }
 0x113   : > { %v2396_v35 = vpop.eup %2067  ;;  %v2398_v18 = vadd.f32 1e-05, %v457_v28  ;;  %v601_v38 = vmul.f32 %v2064_v5, %v600_v33  ;;  %v2423_v50 = vadd.f32 1e-05, %v454_v32 }
 0x114   : > { %v2400_v20 = vpop.eup %2069  ;;  %v567_v19 = vmul.f32 %v2396_v35, %v2384_v6  ;;  %v2406_v39 = vadd.f32 1e-05, %v464_v34  ;;  %v561_v48 = vmul.f32 %v2066_v11, %v560_v37  ;;  %vm573_vm12 = vweird.f32 %v2396_v35 }
 0x115   : > { %v2411_v41 = vpop.eup %2071  ;;  %v527_v49 = vmul.f32 %v2400_v20, %v2388_v16  ;;  %2073 = vrsqrt.f32 %v2398_v18  ;;  %v605_v51 = vsel %vm604_vm9, %v2064_v5, %v601_v38  ;;  %vm533_vm13 = vweird.f32 %v2400_v20  ;;  %vm574_vm2 = vmor %vm572_vm8, %vm573_vm12 }
 0x116   : > { %v568_v24 = vmul.f32 %v2396_v35, %v567_v19  ;;  %v607_v25 = vmul.f32 %v2411_v41, %v2386_v7  ;;  %v657_v53 = vmul.f32 %v605_v51, %v2273_v42  ;;  %v565_v54 = vsel %vm564_vm10, %v2066_v11, %v561_v48  ;;  %vm2460_vm1 = vmor %vm532_vm7, %vm533_vm13 }
 0x117   : > { %v528_v59 = vmul.f32 %v2400_v20, %v527_v49  ;;  %2075 = vrsqrt.f32 %v2406_v39  ;;  %v653_v60 = vmul.f32 %v565_v54, %v2275_v43  ;;  %vm613_vm14 = vweird.f32 %v2411_v41 }
 0x118   : > { %v569_v61 = vmul.f32 0.5, %v568_v24  ;;  %v608_v62 = vmul.f32 %v2411_v41, %v607_v25  ;;  %v676_v42 = vmul.f32 %v2416_v46, %v657_v53  ;;  %2077 = vrsqrt.f32 %v2423_v50  ;;  %v435_v4 = vpop.xlane.xlu1 %434  ;;  %v447_v21 = vpop.xlane.xlu0 %446  ;;  %vm614_vm4 = vmor %vm612_vm11, %vm613_vm14 }
 0x119   : > { %v529_v0 = vmul.f32 0.5, %v528_v59  ;;  %v423_v1 = vpop.xlane.xlu2 %422  ;;  %v672_v2 = vmul.f32 %v2416_v46, %v653_v60  ;;  %vm592_vm15 = vweird.f32 %v2406_v39  ;;  %vm522_vm3 = vweird.f32 %v2398_v18 }
 0x11a   : > { %v570_v43 = vsub.f32 1.5, %v569_v61  ;;  %v609_v3 = vmul.f32 0.5, %v608_v62  ;;  %v695_v11 = vadd.f32 %v2434_v52, %v676_v42  ;;  %v459_v17 = vmul.f32 %v423_v1, %v2269_v36 }
 0x11b   : > { %v2450_v5 = vpop.eup %2073  ;;  %v530_v15 = vsub.f32 1.5, %v529_v0  ;;  %v691_v12 = vadd.f32 %v2434_v52, %v672_v2  ;;  %v463_v33 = vmul.f32 %v435_v4, %v2269_v36  ;;  %vm492_vm11 = vweird.f32 %v2423_v50 }
 0x11c   : > { %v571_v22 = vmul.f32 %v2396_v35, %v570_v43  ;;  %v610_v13 = vsub.f32 1.5, %v609_v3  ;;  %v517_v23 = vmul.f32 %v2450_v5, %v2398_v18  ;;  %v717_v28 = vpack.c.bf16 %v695_v11, %v695_v11 }
 0x11d   : > { %v2467_v27 = vpop.eup %2075  ;;  %v531_v32 = vmul.f32 %v2400_v20, %v530_v15  ;;  %v2475_v16 = vadd.f32 1e-05, %v459_v17  ;;  %v713_v34 = vpack.c.bf16 %v691_v12, %v691_v12  ;;  %vm523_vm5 = vweird.f32 %v2450_v5 }
 0x11e   : > { %v575_v37 = vsel %vm574_vm2, %v2396_v35, %v571_v22  ;;  %v611_v38 = vmul.f32 %v2411_v41, %v610_v13  ;;  %v587_v19 = vmul.f32 %v2467_v27, %v2406_v39  ;;  %v2482_v40 = vpop.eup %2077  ;;  %734 = vst.msk [vmem:[#allocation2 + $0x34] sm:$0xf] %vm700_vm6, %v717_v28  ;;  %v518_v35 = vmul.f32 %v2450_v5, %v517_v23  ;;  %vm524_vm10 = vmor %vm522_vm3, %vm523_vm5 }
 0x11f   : > { %v535_v6 = vsel %vm2460_vm1, %v2400_v20, %v531_v32  ;;  %v654_v48 = vmul.f32 %v575_v37, %v2291_v56  ;;  %730 = vst.msk [vmem:[#allocation2 + $0x24] sm:$0xf] %vm700_vm6, %v713_v34  ;;  %v487_v56 = vmul.f32 %v2482_v40, %v2423_v50  ;;  %vm593_vm7 = vweird.f32 %v2467_v27 }
 0x120   : > { %v650_v49 = vmul.f32 %v535_v6, %v2294_v57  ;;  %v615_v51 = vsel %vm614_vm4, %v2411_v41, %v611_v38  ;;  %v588_v24 = vmul.f32 %v2467_v27, %v587_v19  ;;  %v519_v25 = vmul.f32 0.5, %v518_v35  ;;  %v450_v42 = vpop.xlane.xlu1 %449  ;;  %vm2518_vm9 = vmor %vm592_vm15, %vm593_vm7  ;;  %v426_v11 = vpop.xlane.xlu0 %425 }
 0x121   : > { %v673_v20 = vmul.f32 %v2416_v46, %v654_v48  ;;  %v658_v7 = vmul.f32 %v615_v51, %v2288_v55  ;;  %v488_v59 = vmul.f32 %v2482_v40, %v487_v56  ;;  %2079 = vrsqrt.f32 %v2475_v16  ;;  %v414_v4 = vpop.xlane.xlu2 %413 }
 0x122   : > { %v669_v53 = vmul.f32 %v2416_v46, %v650_v49  ;;  %v589_v54 = vmul.f32 0.5, %v588_v24  ;;  %v520_v60 = vsub.f32 1.5, %v519_v25  ;;  %vm493_vm8 = vweird.f32 %v2482_v40 }
 0x123   : > { %v692_v57 = vadd.f32 %v2434_v52, %v673_v20  ;;  %v677_v41 = vmul.f32 %v2416_v46, %v658_v7  ;;  %v489_v62 = vmul.f32 0.5, %v488_v59  ;;  %v2511_v63 = vadd.f32 1e-05, %v463_v33  ;;  %vm494_vm12 = vmor %vm492_vm11, %vm493_vm8 }
 0x124   : > { %v688_v61 = vadd.f32 %v2434_v52, %v669_v53  ;;  %v590_v55 = vsub.f32 1.5, %v589_v54  ;;  %v521_v43 = vmul.f32 %v2450_v5, %v520_v60  ;;  %v467_v3 = vmul.f32 %v447_v21, %v2269_v36 }
 0x125   : > { %v714_v0 = vpack.c.bf16 %v692_v57, %v692_v57  ;;  %v696_v1 = vadd.f32 %v2434_v52, %v677_v41  ;;  %v490_v12 = vsub.f32 1.5, %v489_v62  ;;  %2081 = vrsqrt.f32 %v2511_v63 }
 0x126   : > { %v710_v15 = vpack.c.bf16 %v688_v61, %v688_v61  ;;  %v591_v17 = vmul.f32 %v2467_v27, %v590_v55  ;;  %v525_v14 = vsel %vm524_vm10, %v2450_v5, %v521_v43  ;;  %v2533_v21 = vadd.f32 1e-05, %v467_v3  ;;  %v2004_v61 = vld [vmem:[%s2920_s3 + $0x28] sm:$0xff]  ;;  %v2014_v55 = vld [vmem:[%s2920_s3 + $0x38] sm:$0xff] }
 0x127   : > { %731 = vst.msk [vmem:[#allocation2 + $0x28] sm:$0xf] %vm700_vm6, %v714_v0  ;;  %v718_v39 = vpack.c.bf16 %v696_v1, %v696_v1  ;;  %v2535_v22 = vpop.eup %2079  ;;  %v649_v13 = vmul.f32 %v525_v14, %v2297_v58  ;;  %v491_v23 = vmul.f32 %v2482_v40, %v490_v12  ;;  %v456_v28 = vmul.f32 %v414_v4, %v2269_v36  ;;  %v1984_v1 = vld [vmem:[%s2920_s3 + $0x8] sm:$0xff] }
 0x128   : > { %727 = vst.msk [vmem:[#allocation2 + $0x18] sm:$0xf] %vm700_vm6, %v710_v15  ;;  %v595_v18 = vsel %vm2518_vm9, %v2467_v27, %v591_v17  ;;  %v537_v5 = vmul.f32 %v2535_v22, %v2475_v16  ;;  %2083 = vrsqrt.f32 %v2533_v21  ;;  %vm542_vm13 = vweird.f32 %v2475_v16  ;;  %v411_v57 = vpop.xlane.xlu1 %410  ;;  %v350_v41 = vpop.xlane.xlu0 %349  ;;  %1134 = vmatpush.bf16.msrb.mxu2 %v2004_v61  ;;  %1297 = vmatpush.bf16.msrb.mxu3 %v2014_v55 }
 0x129   : > { %735 = vst.msk [vmem:[#allocation2 + $0x38] sm:$0xf] %vm700_vm6, %v718_v39  ;;  %v656_v50 = vmul.f32 %v595_v18, %v2317_v9  ;;  %v668_v27 = vmul.f32 %v2416_v46, %v649_v13  ;;  %v495_v58 = vsel %vm494_vm12, %v2482_v40, %v491_v23  ;;  %v2554_v32 = vadd.f32 1e-05, %v456_v28  ;;  %988 = vmatpush.bf16.msrb.mxu1 %v1984_v1  ;;  %v2024_v18 = vld [vmem:[%s2920_s3 + $0x48] sm:$0xff] }
 0x12a   : > { %v646_v9 = vmul.f32 %v495_v58, %v2314_v8  ;;  %v538_v34 = vmul.f32 %v2535_v22, %v537_v5  ;;  %v468_v37 = vmul.f32 %v450_v42, %v2269_v36  ;;  %vm543_vm14 = vweird.f32 %v2535_v22  ;;  %1460 = vmatpush.bf16.msrb.mxu0 %v2024_v18 }
 0x12b   : > { %v675_v33 = vmul.f32 %v2416_v46, %v656_v50  ;;  %v2560_v38 = vpop.eup %2081  ;;  %v687_v19 = vadd.f32 %v2434_v52, %v668_v27  ;;  %2085 = vrsqrt.f32 %v2554_v32  ;;  %v460_v40 = vmul.f32 %v426_v11, %v2269_v36  ;;  %vm2581_vm15 = vmor %vm542_vm13, %vm543_vm14 }
 0x12c   : > { %v665_v48 = vmul.f32 %v2416_v46, %v646_v9  ;;  %v539_v35 = vmul.f32 0.5, %v538_v34  ;;  %v577_v8 = vmul.f32 %v2560_v38, %v2511_v63  ;;  %v2570_v51 = vadd.f32 1e-05, %v468_v37 }
 0x12d   : > { %v694_v6 = vadd.f32 %v2434_v52, %v675_v33  ;;  %v709_v49 = vpack.c.bf16 %v687_v19, %v687_v19  ;;  %v2572_v24 = vadd.f32 1e-05, %v460_v40  ;;  %vm582_vm1 = vweird.f32 %v2511_v63 }
 0x12e   : > { %v1989_v56 = vld [vmem:[#allocation2 + $0x24] sm:$0xff]  ;;  %v2574_v20 = vpop.eup %2083  ;;  %v684_v25 = vadd.f32 %v2434_v52, %v665_v48  ;;  %v540_v53 = vsub.f32 1.5, %v539_v35  ;;  %v578_v59 = vmul.f32 %v2560_v38, %v577_v8  ;;  %2087 = vrsqrt.f32 %v2570_v51 }
 0x12f   : > { %v716_v7 = vpack.c.bf16 %v694_v6, %v694_v6  ;;  %726 = vst.msk [vmem:[#allocation2 + $0x14] sm:$0xf] %vm700_vm6, %v709_v49  ;;  %v617_v60 = vmul.f32 %v2574_v20, %v2533_v21  ;;  %1763 = vmatmul.msk.bf16.vlgmr.msra.gmra.mxu2 %vm302_vm0, %v1989_v56  ;;  %2089 = vrsqrt.f32 %v2572_v24  ;;  %vm622_vm2 = vweird.f32 %v2533_v21  ;;  %v1983_v8 = vld [vmem:[%s2920_s3] sm:$0xff] }
 0x130   : > { %v1991_v16 = vld [vmem:[#allocation2 + $0x34] sm:$0xff]  ;;  %v706_v62 = vpack.c.bf16 %v684_v25, %v684_v25  ;;  %v541_v42 = vmul.f32 %v2535_v22, %v540_v53  ;;  %v579_v0 = vmul.f32 0.5, %v578_v59  ;;  %v455_v3 = vmul.f32 %v411_v57, %v2269_v36  ;;  %989 = vmatpush.bf16.msrb.mxu1 %v1983_v8 }
 0x131   : > { %733 = vst.msk [vmem:[#allocation2 + $0x30] sm:$0xf] %vm700_vm6, %v716_v7  ;;  %v2604_v2 = vpop.eup %2085  ;;  %v618_v43 = vmul.f32 %v2574_v20, %v617_v60  ;;  %v373_v4 = vmul.f32 %v2269_v36, %v350_v41  ;;  %1765 = vmatmul.msk.bf16.vlgmr.msra.gmra.mxu3 %vm302_vm0, %v1991_v16  ;;  %vm583_vm3 = vweird.f32 %v2560_v38  ;;  %vm512_vm4 = vweird.f32 %v2554_v32 }
 0x132   : > { %723 = vst.msk [vmem:[#allocation2 + $0x8] sm:$0xf] %vm700_vm6, %v706_v62  ;;  %v545_v11 = vsel %vm2581_vm15, %v2535_v22, %v541_v42  ;;  %v580_v15 = vsub.f32 1.5, %v579_v0  ;;  %v507_v17 = vmul.f32 %v2604_v2, %v2554_v32  ;;  %v2620_v14 = vadd.f32 1e-05, %v455_v3  ;;  %v2003_v22 = vld [vmem:[%s2920_s3 + $0x20] sm:$0xff]  ;;  %vm2640_vm5 = vmor %vm582_vm1, %vm583_vm3 }
 0x133   : > { %v651_v12 = vmul.f32 %v545_v11, %v2338_v30  ;;  %v619_v39 = vmul.f32 0.5, %v618_v43  ;;  %v2631_v28 = vsub.f32 %v2374_v26, %v373_v4  ;;  %vm623_vm7 = vweird.f32 %v2574_v20  ;;  %1135 = vmatpush.bf16.msrb.mxu2 %v2003_v22 }
 0x134   : > { %v581_v13 = vmul.f32 %v2560_v38, %v580_v15  ;;  %v508_v23 = vmul.f32 %v2604_v2, %v507_v17  ;;  %v2633_v30 = vpop.eup %2087  ;;  %2091 = vrsqrt.f32 %v2620_v14  ;;  %v2136_v58 = vmov 0   ;;  %vm624_vm9 = vmor %vm622_vm2, %vm623_vm7 }
 0x135   : > { %v670_v50 = vmul.f32 %v2416_v46, %v651_v12  ;;  %v620_v27 = vsub.f32 1.5, %v619_v39  ;;  %702 = vst.msk [vmem:[#allocation2 + $0x4] sm:$0xf] %vm700_vm6, %v2136_v58  ;;  %v2647_v26 = vpop.eup %2089  ;;  %vm513_vm8 = vweird.f32 %v2604_v2  ;;  %v627_v9 = vmul.f32 %v2633_v30, %v2570_v51 }
 0x136   : > { %v585_v63 = vsel %vm2640_vm5, %v2560_v38, %v581_v13  ;;  %v509_v33 = vmul.f32 0.5, %v508_v23  ;;  %701 = vst.msk [vmem:[#allocation2] sm:$0xf] %vm700_vm6, %v2136_v58  ;;  %v1987_v34 = vld [vmem:[#allocation2 + $0x14] sm:$0xff]  ;;  %v547_v6 = vmul.f32 %v2647_v26, %v2572_v24  ;;  %v405_v35 = vmul.f32 %v2631_v28, %v2631_v28  ;;  %vm2683_vm10 = vmor %vm512_vm4, %vm513_vm8  ;;  %v2023_v13 = vld [vmem:[%s2920_s3 + $0x40] sm:$0xff] }
 0x137   : > { %v689_v37 = vadd.f32 %v2434_v52, %v670_v50  ;;  %v655_v19 = vmul.f32 %v585_v63, %v2320_v10  ;;  %v621_v40 = vmul.f32 %v2574_v20, %v620_v27  ;;  %704 = vst.msk [vmem:[#allocation2 + $0x48] sm:$0xf] %vm700_vm6, %v2136_v58  ;;  %v628_v48 = vmul.f32 %v2633_v30, %v627_v9  ;;  %v2013_v10 = vld [vmem:[%s2920_s3 + $0x30] sm:$0xff] }
 0x138   : > { %v510_v38 = vsub.f32 1.5, %v509_v33  ;;  %705 = vst.msk [vmem:[#allocation2 + $0x4c] sm:$0xf] %vm700_vm6, %v2136_v58  ;;  %1761 = vmatmul.msk.bf16.vlgmr.msra.gmra.mxu1 %vm302_vm0, %v1987_v34  ;;  %v548_v25 = vmul.f32 %v2647_v26, %v547_v6  ;;  %v451_v57 = vsel %vm302_vm0, %v405_v35, 0.0  ;;  %1298 = vmatpush.bf16.msrb.mxu3 %v2013_v10  ;;  %vm632_vm11 = vweird.f32 %v2570_v51 }
 0x139   : > { %v711_v21 = vpack.c.bf16 %v689_v37, %v689_v37  ;;  %v674_v49 = vmul.f32 %v2416_v46, %v655_v19  ;;  %v625_v56 = vsel %vm624_vm9, %v2574_v20, %v621_v40  ;;  %v629_v59 = vmul.f32 0.5, %v628_v48  ;;  %452 = vadd.xlane.f32.xlu1 %v451_v57  ;;  %1461 = vmatpush.bf16.msrb.mxu0 %v2023_v13  ;;  %v2006_v48 = vld [vmem:[#allocation2 + $0x14] sm:$0xff] }
 0x13a   : > { %v659_v53 = vmul.f32 %v625_v56, %v2335_v29  ;;  %v511_v54 = vmul.f32 %v2604_v2, %v510_v38  ;;  %v2092_v20 = vpop.eup %2091  ;;  %vm633_vm12 = vweird.f32 %v2633_v30  ;;  %v549_v41 = vmul.f32 0.5, %v548_v25  ;;  %v2008_v25 = vld [vmem:[#allocation2 + $0x24] sm:$0xff] }
 0x13b   : > { %728 = vst.msk [vmem:[#allocation2 + $0x1c] sm:$0xf] %vm700_vm6, %v711_v21  ;;  %v693_v32 = vadd.f32 %v2434_v52, %v674_v49  ;;  %v630_v16 = vsub.f32 1.5, %v629_v59  ;;  %v497_v61 = vmul.f32 %v2092_v20, %v2620_v14  ;;  %vm553_vm13 = vweird.f32 %v2647_v26  ;;  %vm634_vm14 = vmor %vm632_vm11, %vm633_vm12 }
 0x13c   : > { %v678_v29 = vmul.f32 %v2416_v46, %v659_v53  ;;  %v515_v60 = vsel %vm2683_vm10, %v2604_v2, %v511_v54  ;;  %v1985_v55 = vld [vmem:[#allocation2 + $0x4] sm:$0xff]  ;;  %v550_v0 = vsub.f32 1.5, %v549_v41  ;;  %vm552_vm15 = vweird.f32 %v2572_v24  ;;  %v2019_v41 = vld [vmem:[#allocation2 + $0x30] sm:$0xff] }
 0x13d   : > { %v715_v62 = vpack.c.bf16 %v693_v32, %v693_v32  ;;  %v648_v42 = vmul.f32 %v515_v60, %v2359_v45  ;;  %v631_v43 = vmul.f32 %v2633_v30, %v630_v16  ;;  %v498_v3 = vmul.f32 %v2092_v20, %v497_v61  ;;  %1759 = vmatmul.msk.bf16.vlgmr.msra.gmra.mxu0 %vm302_vm0, %v1985_v55  ;;  %vm554_vm1 = vmor %vm552_vm15, %vm553_vm13  ;;  %v1975_v19 = vld [vmem:[#allocation2] sm:$0xff]  ;;  %v2000_v32 = vld [vmem:[#allocation2 + $0x30] sm:$0xff] }
 0x13e   : > { %v697_v1 = vadd.f32 %v2434_v52, %v678_v29  ;;  %v551_v45 = vmul.f32 %v2647_v26, %v550_v0  ;;  %vm502_vm2 = vweird.f32 %v2620_v14  ;;  %vm503_vm3 = vweird.f32 %v2092_v20  ;;  %v2010_v16 = vld [vmem:[#allocation2 + $0x34] sm:$0xff] }
 0x13f   : > { %732 = vst.msk [vmem:[#allocation2 + $0x2c] sm:$0xf] %vm700_vm6, %v715_v62  ;;  %v667_v2 = vmul.f32 %v2416_v46, %v648_v42  ;;  %v635_v11 = vsel %vm634_vm14, %v2633_v30, %v631_v43  ;;  %v499_v15 = vmul.f32 0.5, %v498_v3  ;;  %vm504_vm4 = vmor %vm502_vm2, %vm503_vm3 }
 0x140   : > { %v719_v4 = vpack.c.bf16 %v697_v1, %v697_v1  ;;  %v660_v12 = vmul.f32 %v635_v11, %v2341_v31  ;;  %v555_v39 = vsel %vm554_vm1, %v2647_v26, %v551_v45  ;;  %v1981_v11 = vld [vmem:[#allocation2 + $0x30] sm:$0xff] }
 0x141   : > { %v686_v17 = vadd.f32 %v2434_v52, %v667_v2  ;;  %v652_v51 = vmul.f32 %v555_v39, %v2356_v44  ;;  %v500_v18 = vsub.f32 1.5, %v499_v15 }
 0x142   : > { %736 = vst.msk [vmem:[#allocation2 + $0x3c] sm:$0xf] %vm700_vm6, %v719_v4  ;;  %v679_v22 = vmul.f32 %v2416_v46, %v660_v12  ;;  %v1997_v10 = vld [vmem:[#allocation2 + $0x18] sm:$0xff] }
 0x143   : > { %v708_v24 = vpack.c.bf16 %v686_v17, %v686_v17  ;;  %v671_v23 = vmul.f32 %v2416_v46, %v652_v51  ;;  %v501_v31 = vmul.f32 %v2092_v20, %v500_v18  ;;  %v2016_v8 = vld [vmem:[#allocation2 + $0x18] sm:$0xff] }
 0x144   : > { %v698_v30 = vadd.f32 %v2434_v52, %v679_v22  ;;  %v1978_v53 = vld [vmem:[#allocation2 + $0x18] sm:$0xff] }
 0x145   : > { %725 = vst.msk [vmem:[#allocation2 + $0x10] sm:$0xf] %vm700_vm6, %v708_v24  ;;  %v690_v44 = vadd.f32 %v2434_v52, %v671_v23  ;;  %v505_v14 = vsel %vm504_vm4, %v2092_v20, %v501_v31 }
 0x146   : > { %v1990_v50 = vld [vmem:[#allocation2 + $0x2c] sm:$0xff]  ;;  %v720_v5 = vpack.c.bf16 %v698_v30, %v698_v30  ;;  %v647_v27 = vmul.f32 %v505_v14, %v2363_v47 }
 0x147   : > { %v712_v58 = vpack.c.bf16 %v690_v44, %v690_v44  ;;  %1764 = vmatmul.msk.bf16.gmra.mxu2 %vm302_vm0, %v1990_v50  ;;  %v1999_v54 = vld [vmem:[#allocation2 + $0x28] sm:$0xff] }
 0x148   : > { %737 = vst.msk [vmem:[#allocation2 + $0x40] sm:$0xf] %vm700_vm6, %v720_v5  ;;  %v666_v26 = vmul.f32 %v2416_v46, %v647_v27  ;;  %v2018_v59 = vld [vmem:[#allocation2 + $0x28] sm:$0xff] }
 0x149   : > { %729 = vst.msk [vmem:[#allocation2 + $0x20] sm:$0xf] %vm700_vm6, %v712_v58  ;;  %v2009_v57 = vld [vmem:[#allocation2 + $0x2c] sm:$0xff]  ;;  %v2001_v62 = vld [vmem:[#allocation2 + $0x38] sm:$0xff] }
 0x14a   : > { %v685_v63 = vadd.f32 %v2434_v52, %v666_v26  ;;  %v1980_v55 = vld [vmem:[#allocation2 + $0x28] sm:$0xff]  ;;  %v2020_v42 = vld [vmem:[#allocation2 + $0x38] sm:$0xff] }
 0x14b   : > { %v1982_v50 = vld [vmem:[#allocation2 + $0x38] sm:$0xff] }
 0x14c   : > { %v707_v33 = vpack.c.bf16 %v685_v63, %v685_v63  ;;  %v1996_v6 = vld [vmem:[#allocation2 + $0x10] sm:$0xff] }
 0x14d   : > { %v2015_v38 = vld [vmem:[#allocation2 + $0x10] sm:$0xff] }
 0x14e   : > { %724 = vst.msk [vmem:[#allocation2 + $0xc] sm:$0xf] %vm700_vm6, %v707_v33  ;;  %v1977_v49 = vld [vmem:[#allocation2 + $0x10] sm:$0xff] }
 0x14f   : > { %v1992_v9 = vld [vmem:[#allocation2 + $0x3c] sm:$0xff] }
 0x150   : > { %v1988_v34 = vld [vmem:[#allocation2 + $0x1c] sm:$0xff]  ;;  %1766 = vmatmul.msk.bf16.gmra.mxu3 %vm302_vm0, %v1992_v9 }
 0x151   : > { %1762 = vmatmul.msk.bf16.gmra.mxu1 %vm302_vm0, %v1988_v34  ;;  %v2007_v21 = vld [vmem:[#allocation2 + $0x1c] sm:$0xff] }
 0x152   : > { %v1998_v56 = vld [vmem:[#allocation2 + $0x20] sm:$0xff] }
 0x153   : > { %v2017_v7 = vld [vmem:[#allocation2 + $0x20] sm:$0xff] }
 0x154   : > { %v1979_v20 = vld [vmem:[#allocation2 + $0x20] sm:$0xff] }
 0x155   : > { %v1986_v47 = vld [vmem:[#allocation2 + $0xc] sm:$0xff]  ;;  %v2011_v4 = vld [vmem:[#allocation2 + $0x3c] sm:$0xff] }
 0x156   : > { %v1995_v37 = vld [vmem:[#allocation2 + $0x8] sm:$0xff]  ;;  %1760 = vmatmul.msk.bf16.gmra.mxu0 %vm302_vm0, %v1986_v47 }
 0x157   : > { %1859 = vmatmul.msk.bf16.vlgmr.msrb.gmra.mxu2 %vm302_vm0, %v1995_v37  ;;  %v2005_v40 = vld [vmem:[#allocation2 + $0xc] sm:$0xff] }
 0x158   : > { %v1976_v35 = vld [vmem:[#allocation2 + $0x8] sm:$0xff] }
 0x160   : > { %1911 = vmatmul.msk.bf16.vlgmr.msrb.gmra.mxu3 %vm302_vm0, %v2005_v40 }
 0x161   : > { %1807 = vmatmul.msk.bf16.vlgmr.msrb.gmra.mxu1 %vm302_vm0, %v1975_v19  ;;  %v2022_v19 = vld [vmem:[#allocation2 + $0x48] sm:$0xff] }
 0x166   : > { %1963 = vmatmul.msk.bf16.vlgmr.msrb.gmra.mxu0 %vm302_vm0, %v2015_v38 }
 0x167   : > { %1860 = vmatmul.msk.bf16.gmra.mxu2 %vm302_vm0, %v1996_v6 }
 0x170   : > { %1912 = vmatmul.msk.bf16.gmra.mxu3 %vm302_vm0, %v2006_v48 }
 0x171   : > { %1808 = vmatmul.msk.bf16.gmra.mxu1 %vm302_vm0, %v1976_v35  ;;  %v2801_v35 = vld [vmem:[%s2921_s4] ss:$0 sm:$0xff] }
 0x176   : > { %1964 = vmatmul.msk.bf16.gmra.mxu0 %vm302_vm0, %v2016_v8 }
 0x177   : > { %1861 = vmatmul.msk.bf16.gmra.mxu2 %vm302_vm0, %v1997_v10 }
 0x180   : > { %1913 = vmatmul.msk.bf16.gmra.mxu3 %vm302_vm0, %v2007_v21  ;;  %v2807_v21 = vld [vmem:[%s2922_s5] ss:$0 sm:$0xff] }
 0x181   : > { %1809 = vmatmul.msk.bf16.gmra.mxu1 %vm302_vm0, %v1977_v49 }
 0x186   : > { %1965 = vmatmul.msk.bf16.gmra.mxu0 %vm302_vm0, %v2017_v7 }
 0x187   : > { %1862 = vmatmul.msk.bf16.gmra.mxu2 %vm302_vm0, %v1998_v56 }
 0x190   : > { %1914 = vmatmul.msk.bf16.gmra.mxu3 %vm302_vm0, %v2008_v25 }
 0x191   : > { %1810 = vmatmul.msk.bf16.gmra.mxu1 %vm302_vm0, %v1978_v53 }
 0x196   : > { %1966 = vmatmul.msk.bf16.gmra.mxu0 %vm302_vm0, %v2018_v59 }
 0x197   : > { %1863 = vmatmul.msk.bf16.gmra.mxu2 %vm302_vm0, %v1999_v54 }
 0x1a0   : > { %1915 = vmatmul.msk.bf16.gmra.mxu3 %vm302_vm0, %v2009_v57 }
 0x1a1   : > { %1811 = vmatmul.msk.bf16.gmra.mxu1 %vm302_vm0, %v1979_v20 }
 0x1a6   : > { %1967 = vmatmul.msk.bf16.gmra.mxu0 %vm302_vm0, %v2019_v41 }
 0x1a7   : > { %1864 = vmatmul.msk.bf16.gmra.mxu2 %vm302_vm0, %v2000_v32  ;;  %v2095_v32 = vld [vmem:[%s2198_s28] sm:$0xff] }
 0x1ac   : > { %v453_v29 = vpop.xlane.xlu1 %452 }
 0x1ad   : > { %v469_v60 = vmul.f32 %v453_v29, %v2269_v36 }
 0x1af   : > { %v485_v61 = vadd.f32 1e-05, %v469_v60 }
 0x1b0   : > { %1916 = vmatmul.msk.bf16.gmra.mxu3 %vm302_vm0, %v2010_v16 }
 0x1b1   : > { %2093 = vrsqrt.f32 %v485_v61  ;;  %1812 = vmatmul.msk.bf16.gmra.mxu1 %vm302_vm0, %v1980_v55  ;;  %vm642_vm7 = vweird.f32 %v485_v61 }
 0x1b2   : > { %v2762_v0 = vpop.f32.mrf.mxu2 }
 0x1b4   : > { %v2771_v12 = vpop.f32.mrf.mxu3 }
 0x1b5   : > { %v2766_v36 = vpop.f32.mrf.mxu1 }
 0x1b6   : > { %1968 = vmatmul.msk.bf16.gmra.mxu0 %vm302_vm0, %v2020_v42 }
 0x1b7   : > { %1865 = vmatmul.msk.bf16.gmra.mxu2 %vm302_vm0, %v2001_v62  ;;  %v2094_v1 = vpop.eup %2093 }
 0x1b8   : > { %v637_v43 = vmul.f32 %v2094_v1, %v485_v61  ;;  %vm643_vm5 = vweird.f32 %v2094_v1 }
 0x1b9   : > { %vm644_vm8 = vmor %vm642_vm7, %vm643_vm5 }
 0x1ba   : > { %v638_v3 = vmul.f32 %v2094_v1, %v637_v43  ;;  %v2768_v15 = vpop.f32.mrf.mxu2  ;;  %v866_v39 = vpop.f32.mrf.mxu0 }
 0x1bc   : > { %v639_v2 = vmul.f32 0.5, %v638_v3  ;;  %v2782_v30 = vpop.f32.mrf.mxu3 }
 0x1bd   : > { %v2775_v24 = vpop.f32.mrf.mxu1 }
 0x1be   : > { %v640_v45 = vsub.f32 1.5, %v639_v2 }
 0x1c0   : > { %v641_v17 = vmul.f32 %v2094_v1, %v640_v45  ;;  %1917 = vmatmul.msk.bf16.gmra.mxu3 %vm302_vm0, %v2011_v4  ;;  %v2096_v45 = vld [vmem:[%s2198_s28 + $0x8] sm:$0xff] }
 0x1c1   : > { %1813 = vmatmul.msk.bf16.gmra.mxu1 %vm302_vm0, %v1981_v11 }
 0x1c2   : > { %v645_v51 = vsel %vm644_vm8, %v2094_v1, %v641_v17  ;;  %v868_v44 = vpop.f32.mrf.mxu0 }
 0x1c3   : > { %v661_v18 = vmul.f32 %v645_v51, %v2631_v28 }
 0x1c5   : > { %v680_v22 = vmul.f32 %v2416_v46, %v661_v18 }
 0x1c7   : > { %v699_v13 = vadd.f32 %v2434_v52, %v680_v22 }
 0x1c9   : > { %v721_v23 = vpack.c.bf16 %v699_v13, %v699_v13 }
 0x1ca   : > { %v2779_v31 = vpop.f32.mrf.mxu2 }
 0x1cb   : > { %738 = vst.msk [vmem:[#allocation2 + $0x44] sm:$0xf] %vm700_vm6, %v721_v23 }
 0x1ce   : > { %v2784_v14 = vpop.f32.mrf.mxu1 }
 0x1d1   : > { %1814 = vmatmul.msk.bf16.gmra.mxu1 %vm302_vm0, %v1982_v50 }
 0x1d2   : > { %v2787_v28 = vpop.f32.mrf.mxu2  ;;  %v2002_v5 = vld [vmem:[#allocation2 + $0x40] sm:$0xff] }
 0x1d3   : > { %v2012_v27 = vld [vmem:[#allocation2 + $0x44] sm:$0xff]  ;;  %v2789_v58 = vpop.f32.mrf.mxu3  ;;  %v871_v52 = vpop.f32.mrf.mxu0  ;;  %1866 = vmatmul.msk.bf16.gmra.mxu2 %vm302_vm0, %v2002_v5 }
 0x1d4   : > { %v2021_v46 = vld [vmem:[#allocation2 + $0x40] sm:$0xff]  ;;  %1918 = vmatmul.msk.bf16.gmra.mxu3 %vm302_vm0, %v2012_v27  ;;  %v2097_v27 = vld [vmem:[%s2198_s28 + $0x10] sm:$0xff] }
 0x1d5   : > { %1969 = vmatmul.msk.bf16.gmra.mxu0 %vm302_vm0, %v2021_v46 }
 0x1d6   : > { %v2794_v26 = vpop.f32.mrf.mxu1 }
 0x1da   : > { %v1137_v63 = vpop.f32.mrf.mxu2 }
 0x1db   : > { %v2796_v33 = vpop.f32.mrf.mxu3  ;;  %v873_v9 = vpop.f32.mrf.mxu0 }
 0x1de   : > { %v991_v34 = vpop.f32.mrf.mxu1 }
 0x1df   : > { %v992_v47 = vadd.f32 %v991_v34, %v866_v39 }
 0x1e1   : > { %v1177_v40 = vadd.f32 %v1137_v63, %v992_v47 }
 0x1e2   : > { %v1139_v37 = vpop.f32.mrf.mxu2 }
 0x1e3   : > { %v1300_v6 = vpop.f32.mrf.mxu3  ;;  %v1463_v38 = vpop.f32.mrf.mxu0 }
 0x1e4   : > { %v1340_v48 = vadd.f32 %v1300_v6, %v1177_v40 }
 0x1e5   : > { %1970 = vmatmul.msk.bf16.gmra.mxu0 %vm302_vm0, %v2022_v19 }
 0x1e6   : > { %v993_v10 = vpop.f32.mrf.mxu1  ;;  %v1503_v8 = vadd.f32 %v1463_v38, %v1340_v48 }
 0x1e7   : > { %v994_v49 = vadd.f32 %v993_v10, %v868_v44  ;;  %v2098_v10 = vld [vmem:[%s2198_s28 + $0x18] sm:$0xff] }
 0x1e8   : > { %v1523_v56 = vadd.f32 %v2801_v35, %v1503_v8 }
 0x1e9   : > { %v1178_v53 = vadd.f32 %v1139_v37, %v994_v49 }
 0x1ea   : > { %v1142_v7 = vpop.f32.mrf.mxu2  ;;  %vm1540_vm6 = vcmp.ge.f32.partialorder %v1523_v56, 0.0  ;;  %v1559_v25 = vmul.f32 %v2807_v21, %v1523_v56 }
 0x1eb   : > { %v1302_v54 = vpop.f32.mrf.mxu3  ;;  %v1465_v59 = vpop.f32.mrf.mxu0 }
 0x1ec   : > { %v1575_v57 = vsel %vm1540_vm6, %v1523_v56, %v1559_v25  ;;  %v1341_v20 = vadd.f32 %v1302_v54, %v1178_v53 }
 0x1ed   : > { %v1591_v41 = vadd.f32 %v2095_v32, %v1575_v57 }
 0x1ee   : > { %v996_v29 = vpop.f32.mrf.mxu1  ;;  %v1504_v60 = vadd.f32 %v1465_v59, %v1341_v20 }
 0x1ef   : > { %1607 = vst.msk [vmem:[%s2816_s17] sm:$0xff] %vm302_vm0, %v1591_v41  ;;  %v997_v16 = vadd.f32 %v996_v29, %v871_v52  ;;  %v2099_v41 = vld [vmem:[%s2198_s28 + $0x20] sm:$0xff] }
 0x1f0   : > { %v1524_v61 = vadd.f32 %v2801_v35, %v1504_v60 }
 0x1f1   : > { %v1179_v42 = vadd.f32 %v1142_v7, %v997_v16 }
 0x1f2   : > { %v1144_v55 = vpop.f32.mrf.mxu2  ;;  %vm1541_vm9 = vcmp.ge.f32.partialorder %v1524_v61, 0.0  ;;  %v1560_v62 = vmul.f32 %v2807_v21, %v1524_v61 }
 0x1f3   : > { %v1305_v1 = vpop.f32.mrf.mxu3  ;;  %v1468_v43 = vpop.f32.mrf.mxu0 }
 0x1f4   : > { %v1576_v3 = vsel %vm1541_vm9, %v1524_v61, %v1560_v62  ;;  %v1342_v2 = vadd.f32 %v1305_v1, %v1179_v42 }
 0x1f5   : > { %v1592_v4 = vadd.f32 %v2096_v45, %v1576_v3  ;;  %v2100_v45 = vld [vmem:[%s2198_s28 + $0x28] sm:$0xff] }
 0x1f6   : > { %v998_v11 = vpop.f32.mrf.mxu1  ;;  %v1505_v17 = vadd.f32 %v1468_v43, %v1342_v2 }
 0x1f7   : > { %1608 = vst.msk [vmem:[%s2816_s17 + $0x8] sm:$0xff] %vm302_vm0, %v1592_v4  ;;  %v999_v39 = vadd.f32 %v998_v11, %v873_v9 }
 0x1f8   : > { %v1525_v51 = vadd.f32 %v2801_v35, %v1505_v17 }
 0x1f9   : > { %v1180_v13 = vadd.f32 %v1144_v55, %v999_v39 }
 0x1fa   : > { %v1147_v18 = vpop.f32.mrf.mxu2  ;;  %vm1542_vm10 = vcmp.ge.f32.partialorder %v1525_v51, 0.0  ;;  %v1561_v22 = vmul.f32 %v2807_v21, %v1525_v51 }
 0x1fb   : > { %v1307_v23 = vpop.f32.mrf.mxu3  ;;  %v1470_v44 = vpop.f32.mrf.mxu0 }
 0x1fc   : > { %v1577_v50 = vsel %vm1542_vm10, %v1525_v51, %v1561_v22  ;;  %v1343_v5 = vadd.f32 %v1307_v23, %v1180_v13 }
 0x1fd   : > { %v1593_v46 = vadd.f32 %v2097_v27, %v1577_v50 }
 0x1fe   : > { %v1001_v52 = vpop.f32.mrf.mxu1  ;;  %v1506_v63 = vadd.f32 %v1470_v44, %v1343_v5  ;;  %v2101_v5 = vld [vmem:[%s2198_s28 + $0x30] sm:$0xff] }
 0x1ff   : > { %1609 = vst.msk [vmem:[%s2816_s17 + $0x10] sm:$0xff] %vm302_vm0, %v1593_v46  ;;  %v1002_v9 = vadd.f32 %v1001_v52, %v2766_v36 }
 0x200   : > { %v1526_v34 = vadd.f32 %v2801_v35, %v1506_v63 }
 0x201   : > { %v1181_v19 = vadd.f32 %v1147_v18, %v1002_v9 }
 0x202   : > { %v1149_v47 = vpop.f32.mrf.mxu2  ;;  %vm1543_vm11 = vcmp.ge.f32.partialorder %v1526_v34, 0.0  ;;  %v1562_v37 = vmul.f32 %v2807_v21, %v1526_v34 }
 0x203   : > { %v1310_v40 = vpop.f32.mrf.mxu3  ;;  %v1473_v6 = vpop.f32.mrf.mxu0 }
 0x204   : > { %v1578_v38 = vsel %vm1543_vm11, %v1526_v34, %v1562_v37  ;;  %v1344_v48 = vadd.f32 %v1310_v40, %v1181_v19 }
 0x205   : > { %v1594_v8 = vadd.f32 %v2098_v10, %v1578_v38 }
 0x206   : > { %v1003_v49 = vpop.f32.mrf.mxu1  ;;  %v1507_v56 = vadd.f32 %v1473_v6, %v1344_v48  ;;  %v2102_v6 = vld [vmem:[%s2198_s28 + $0x38] sm:$0xff] }
 0x207   : > { %1610 = vst.msk [vmem:[%s2816_s17 + $0x18] sm:$0xff] %vm302_vm0, %v1594_v8  ;;  %v1004_v36 = vadd.f32 %v1003_v49, %v2775_v24 }
 0x208   : > { %v1527_v7 = vadd.f32 %v2801_v35, %v1507_v56 }
 0x209   : > { %v1182_v54 = vadd.f32 %v1149_v47, %v1004_v36 }
 0x20a   : > { %v1152_v25 = vpop.f32.mrf.mxu2  ;;  %vm1544_vm12 = vcmp.ge.f32.partialorder %v1527_v7, 0.0  ;;  %v1563_v53 = vmul.f32 %v2807_v21, %v1527_v7 }
 0x20b   : > { %v1312_v59 = vpop.f32.mrf.mxu3  ;;  %v1475_v57 = vpop.f32.mrf.mxu0 }
 0x20c   : > { %v1579_v20 = vsel %vm1544_vm12, %v1527_v7, %v1563_v53  ;;  %v1345_v32 = vadd.f32 %v1312_v59, %v1182_v54  ;;  %v2103_v59 = vld [vmem:[%s2198_s28 + $0x40] sm:$0xff] }
 0x20d   : > { %v1595_v29 = vadd.f32 %v2099_v41, %v1579_v20 }
 0x20e   : > { %v1006_v60 = vpop.f32.mrf.mxu1  ;;  %v1508_v16 = vadd.f32 %v1475_v57, %v1345_v32 }
 0x20f   : > { %1611 = vst.msk [vmem:[%s2816_s17 + $0x20] sm:$0xff] %vm302_vm0, %v1595_v29  ;;  %v1007_v24 = vadd.f32 %v1006_v60, %v2784_v14 }
 0x210   : > { %v1528_v61 = vadd.f32 %v2801_v35, %v1508_v16 }
 0x211   : > { %v1183_v42 = vadd.f32 %v1152_v25, %v1007_v24 }
 0x212   : > { %v1154_v55 = vpop.f32.mrf.mxu2  ;;  %vm1545_vm13 = vcmp.ge.f32.partialorder %v1528_v61, 0.0  ;;  %v1564_v62 = vmul.f32 %v2807_v21, %v1528_v61 }
 0x213   : > { %v1315_v1 = vpop.f32.mrf.mxu3  ;;  %v1478_v43 = vpop.f32.mrf.mxu0 }
 0x214   : > { %v1580_v3 = vsel %vm1545_vm13, %v1528_v61, %v1564_v62  ;;  %v1346_v2 = vadd.f32 %v1315_v1, %v1183_v42  ;;  %v2104_v42 = vld [vmem:[%s2198_s28 + $0x48] sm:$0xff] }
 0x215   : > { %v1596_v4 = vadd.f32 %v2100_v45, %v1580_v3 }
 0x216   : > { %v1008_v11 = vpop.f32.mrf.mxu1  ;;  %v1509_v17 = vadd.f32 %v1478_v43, %v1346_v2 }
 0x217   : > { %1612 = vst.msk [vmem:[%s2816_s17 + $0x28] sm:$0xff] %vm302_vm0, %v1596_v4  ;;  %v1009_v14 = vadd.f32 %v1008_v11, %v2794_v26 }
 0x218   : > { %v1529_v39 = vadd.f32 %v2801_v35, %v1509_v17 }
 0x219   : > { %v1184_v22 = vadd.f32 %v1154_v55, %v1009_v14 }
 0x21a   : > { %vm1546_vm14 = vcmp.ge.f32.partialorder %v1529_v39, 0.0  ;;  %v1565_v51 = vmul.f32 %v2807_v21, %v1529_v39  ;;  %v1157_v18 = vpop.f32.mrf.mxu2 }
 0x21b   : > { %v1317_v13 = vpop.f32.mrf.mxu3  ;;  %v1480_v23 = vpop.f32.mrf.mxu0 }
 0x21c   : > { %v1581_v44 = vsel %vm1546_vm14, %v1529_v39, %v1565_v51  ;;  %v1347_v50 = vadd.f32 %v1317_v13, %v1184_v22 }
 0x21d   : > { %v1597_v27 = vadd.f32 %v2101_v5, %v1581_v44  ;;  %v2106_v5 = vld [vmem:[%s2198_s28 + $0x58] sm:$0xff] }
 0x21e   : > { %v1011_v46 = vpop.f32.mrf.mxu1  ;;  %v1510_v52 = vadd.f32 %v1480_v23, %v1347_v50 }
 0x21f   : > { %1613 = vst.msk [vmem:[%s2816_s17 + $0x30] sm:$0xff] %vm302_vm0, %v1597_v27  ;;  %v1012_v26 = vadd.f32 %v1011_v46, %v2762_v0 }
 0x220   : > { %v1530_v63 = vadd.f32 %v2801_v35, %v1510_v52 }
 0x221   : > { %v1185_v34 = vadd.f32 %v1157_v18, %v1012_v26  ;;  %v2105_v18 = vld [vmem:[%s2198_s28 + $0x50] sm:$0xff] }
 0x222   : > { %vm1547_vm15 = vcmp.ge.f32.partialorder %v1530_v63, 0.0  ;;  %v1566_v9 = vmul.f32 %v2807_v21, %v1530_v63  ;;  %v1159_v48 = vpop.f32.mrf.mxu2 }
 0x223   : > { %v1320_v47 = vpop.f32.mrf.mxu3  ;;  %v1483_v37 = vpop.f32.mrf.mxu0 }
 0x224   : > { %v1582_v19 = vsel %vm1547_vm15, %v1530_v63, %v1566_v9  ;;  %v1348_v40 = vadd.f32 %v1320_v47, %v1185_v34 }
 0x225   : > { %v1598_v38 = vadd.f32 %v2102_v6, %v1582_v19 }
 0x226   : > { %v1013_v10 = vpop.f32.mrf.mxu1  ;;  %v1511_v8 = vadd.f32 %v1483_v37, %v1348_v40 }
 0x227   : > { %1614 = vst.msk [vmem:[%s2816_s17 + $0x38] sm:$0xff] %vm302_vm0, %v1598_v38  ;;  %v1014_v0 = vadd.f32 %v1013_v10, %v2768_v15 }
 0x228   : > { %v1531_v49 = vadd.f32 %v2801_v35, %v1511_v8 }
 0x229   : > { %v1186_v36 = vadd.f32 %v1159_v48, %v1014_v0 }
 0x22a   : > { %vm1548_vm1 = vcmp.ge.f32.partialorder %v1531_v49, 0.0  ;;  %v1567_v56 = vmul.f32 %v2807_v21, %v1531_v49  ;;  %v1162_v41 = vpop.f32.mrf.mxu2 }
 0x22b   : > { %v1322_v7 = vpop.f32.mrf.mxu3  ;;  %v1485_v25 = vpop.f32.mrf.mxu0 }
 0x22c   : > { %v1583_v53 = vsel %vm1548_vm1, %v1531_v49, %v1567_v56  ;;  %v1349_v54 = vadd.f32 %v1322_v7, %v1186_v36  ;;  %v2107_v56 = vld [vmem:[%s2198_s28 + $0x60] sm:$0xff] }
 0x22d   : > { %v1599_v57 = vadd.f32 %v2103_v59, %v1583_v53 }
 0x22e   : > { %v1016_v20 = vpop.f32.mrf.mxu1  ;;  %v1512_v32 = vadd.f32 %v1485_v25, %v1349_v54 }
 0x22f   : > { %1615 = vst.msk [vmem:[%s2816_s17 + $0x40] sm:$0xff] %vm302_vm0, %v1599_v57  ;;  %v1017_v15 = vadd.f32 %v1016_v20, %v2779_v31 }
 0x230   : > { %v1532_v29 = vadd.f32 %v2801_v35, %v1512_v32 }
 0x231   : > { %v1187_v16 = vadd.f32 %v1162_v41, %v1017_v15  ;;  %v2108_v15 = vld [vmem:[%s2198_s28 + $0x68] sm:$0xff] }
 0x232   : > { %vm1549_vm2 = vcmp.ge.f32.partialorder %v1532_v29, 0.0  ;;  %v1568_v60 = vmul.f32 %v2807_v21, %v1532_v29  ;;  %v1164_v45 = vpop.f32.mrf.mxu2 }
 0x233   : > { %v1325_v24 = vpop.f32.mrf.mxu3  ;;  %v1488_v61 = vpop.f32.mrf.mxu0 }
 0x234   : > { %v1584_v55 = vsel %vm1549_vm2, %v1532_v29, %v1568_v60  ;;  %v1350_v62 = vadd.f32 %v1325_v24, %v1187_v16 }
 0x235   : > { %v1600_v1 = vadd.f32 %v2104_v42, %v1584_v55 }
 0x236   : > { %v1018_v43 = vpop.f32.mrf.mxu1  ;;  %v1513_v3 = vadd.f32 %v1488_v61, %v1350_v62 }
 0x237   : > { %1616 = vst.msk [vmem:[%s2816_s17 + $0x48] sm:$0xff] %vm302_vm0, %v1600_v1  ;;  %v1019_v31 = vadd.f32 %v1018_v43, %v2787_v28 }
 0x238   : > { %v1533_v2 = vadd.f32 %v2801_v35, %v1513_v3  ;;  %v2109_v3 = vld [vmem:[%s2198_s28 + $0x70] sm:$0xff] }
 0x239   : > { %v1188_v11 = vadd.f32 %v1164_v45, %v1019_v31 }
 0x23a   : > { %vm1550_vm3 = vcmp.ge.f32.partialorder %v1533_v2, 0.0  ;;  %v1569_v4 = vmul.f32 %v2807_v21, %v1533_v2  ;;  %v1167_v46 = vpop.f32.mrf.mxu2 }
 0x23b   : > { %v1327_v17 = vpop.f32.mrf.mxu3  ;;  %v1490_v14 = vpop.f32.mrf.mxu0 }
 0x23c   : > { %v1585_v39 = vsel %vm1550_vm3, %v1533_v2, %v1569_v4  ;;  %v1351_v51 = vadd.f32 %v1327_v17, %v1188_v11  ;;  %v2110_v17 = vld [vmem:[%s2198_s28 + $0x78] sm:$0xff] }
 0x23d   : > { %v1601_v22 = vadd.f32 %v2105_v18, %v1585_v39 }
 0x23e   : > { %v1514_v13 = vadd.f32 %v1490_v14, %v1351_v51  ;;  %v1021_v23 = vpop.f32.mrf.mxu1 }
 0x23f   : > { %1617 = vst.msk [vmem:[%s2816_s17 + $0x50] sm:$0xff] %vm302_vm0, %v1601_v22  ;;  %v1022_v52 = vadd.f32 %v1021_v23, %v2771_v12 }
 0x240   : > { %v1534_v28 = vadd.f32 %v2801_v35, %v1514_v13 }
 0x241   : > { %v1189_v9 = vadd.f32 %v1167_v46, %v1022_v52 }
 0x242   : > { %vm1551_vm4 = vcmp.ge.f32.partialorder %v1534_v28, 0.0  ;;  %v1570_v44 = vmul.f32 %v2807_v21, %v1534_v28  ;;  %v1169_v34 = vpop.f32.mrf.mxu2 }
 0x243   : > { %v1330_v26 = vpop.f32.mrf.mxu3 }
 0x244   : > { %v1586_v50 = vsel %vm1551_vm4, %v1534_v28, %v1570_v44  ;;  %v1352_v47 = vadd.f32 %v1330_v26, %v1189_v9 }
 0x245   : > { %v1602_v27 = vadd.f32 %v2106_v5, %v1586_v50 }
 0x246   : > { %v1023_v63 = vpop.f32.mrf.mxu1 }
 0x247   : > { %1618 = vst.msk [vmem:[%s2816_s17 + $0x58] sm:$0xff] %vm302_vm0, %v1602_v27  ;;  %v1024_v19 = vadd.f32 %v1023_v63, %v2782_v30 }
 0x249   : > { %v1190_v10 = vadd.f32 %v1169_v34, %v1024_v19 }
 0x24b   : > { %v1332_v38 = vpop.f32.mrf.mxu3 }
 0x24c   : > { %v1353_v0 = vadd.f32 %v1332_v38, %v1190_v10 }
 0x24e   : > { %v1026_v48 = vpop.f32.mrf.mxu1 }
 0x24f   : > { %v1027_v25 = vadd.f32 %v1026_v48, %v2789_v58 }
 0x252   : > { %v1493_v37 = vpop.f32.mrf.mxu0 }
 0x253   : > { %v1515_v40 = vadd.f32 %v1493_v37, %v1352_v47 }
 0x255   : > { %v1535_v6 = vadd.f32 %v2801_v35, %v1515_v40 }
 0x256   : > { %v1172_v12 = vpop.f32.mrf.mxu2  ;;  %v1028_v20 = vpop.f32.mrf.mxu1 }
 0x257   : > { %vm1552_vm5 = vcmp.ge.f32.partialorder %v1535_v6, 0.0  ;;  %v1571_v8 = vmul.f32 %v2807_v21, %v1535_v6  ;;  %v1191_v53 = vadd.f32 %v1172_v12, %v1027_v25  ;;  %v1335_v59 = vpop.f32.mrf.mxu3  ;;  %v1029_v16 = vadd.f32 %v1028_v20, %v2796_v33 }
 0x259   : > { %v1587_v49 = vsel %vm1552_vm5, %v1535_v6, %v1571_v8  ;;  %v1354_v32 = vadd.f32 %v1335_v59, %v1191_v53 }
 0x25a   : > { %v1603_v36 = vadd.f32 %v2107_v56, %v1587_v49  ;;  %v1495_v7 = vpop.f32.mrf.mxu0 }
 0x25b   : > { %v1516_v30 = vadd.f32 %v1495_v7, %v1353_v0 }
 0x25c   : > { %1619 = vst.msk [vmem:[%s2816_s17 + $0x60] sm:$0xff] %vm302_vm0, %v1603_v36 }
 0x25d   : > { %v1536_v54 = vadd.f32 %v2801_v35, %v1516_v30 }
 0x25e   : > { %v1174_v60 = vpop.f32.mrf.mxu2 }
 0x25f   : > { %vm1553_vm7 = vcmp.ge.f32.partialorder %v1536_v54, 0.0  ;;  %v1572_v57 = vmul.f32 %v2807_v21, %v1536_v54  ;;  %v1192_v61 = vadd.f32 %v1174_v60, %v1029_v16  ;;  %v1337_v42 = vpop.f32.mrf.mxu3 }
 0x261   : > { %v1588_v41 = vsel %vm1553_vm7, %v1536_v54, %v1572_v57  ;;  %v1355_v1 = vadd.f32 %v1337_v42, %v1192_v61 }
 0x262   : > { %v1604_v29 = vadd.f32 %v2108_v15, %v1588_v41  ;;  %v1498_v58 = vpop.f32.mrf.mxu0 }
 0x263   : > { %v1517_v24 = vadd.f32 %v1498_v58, %v1354_v32 }
 0x264   : > { %1620 = vst.msk [vmem:[%s2816_s17 + $0x68] sm:$0xff] %vm302_vm0, %v1604_v29 }
 0x265   : > { %v1537_v55 = vadd.f32 %v2801_v35, %v1517_v24 }
 0x267   : > { %vm1554_vm8 = vcmp.ge.f32.partialorder %v1537_v55, 0.0  ;;  %v1573_v62 = vmul.f32 %v2807_v21, %v1537_v55 }
 0x269   : > { %v1589_v43 = vsel %vm1554_vm8, %v1537_v55, %v1573_v62 }
 0x26a   : > { %v1605_v31 = vadd.f32 %v2109_v3, %v1589_v43  ;;  %v1500_v2 = vpop.f32.mrf.mxu0 }
 0x26b   : > { %v1518_v45 = vadd.f32 %v1500_v2, %v1355_v1 }
 0x26c   : > { %1621 = vst.msk [vmem:[%s2816_s17 + $0x70] sm:$0xff] %vm302_vm0, %v1605_v31 }
 0x26d   : > { %v1538_v33 = vadd.f32 %v2801_v35, %v1518_v45 }
 0x26f   : > { %vm1555_vm6 = vcmp.ge.f32.partialorder %v1538_v33, 0.0  ;;  %v1574_v4 = vmul.f32 %v2807_v21, %v1538_v33 }
 0x271   : > { %v1590_v11 = vsel %vm1555_vm6, %v1538_v33, %v1574_v4 }
 0x272   : > { %v1606_v14 = vadd.f32 %v2110_v17, %v1590_v11 }
 0x274   : > { %1622 = vst.msk [vmem:[%s2816_s17 + $0x78] sm:$0xff] %vm302_vm0, %v1606_v14 }
 0x275 PF: > { %s16_s23 = sadd.s32 1, %s2133_s23   ;;  %s2934_s21 = smov %s2129_s22 }
 0x276   : > { %p13_p5 = scmp.ge.s32.totalorder %s16_s23, 4   ;;  %s2935_s22 = smov %s2937_s24 }
 0x278   :  { %15 = sbr.rel (!%p13_p5) target bundleno = 2 (0x2), region = 83 }

// kernel: _lambda_.22
= control target key start
LH: loop header
LB: loop body
LE: loop exit
PB: predicated region body
PF: predicated region fallthrough
CT: control target
= control target key end

     0   :  { %vm55_vm0 = vcmask 261120   ;;  %s3980_s0 = inlined_call_operand.vmem [shape: f32[256,32], index: 0, kind: input, shape index: {}]   ;;  %s3981_s1 = inlined_call_operand.vmem [shape: f32[1,32], index: 1, kind: input, shape index: {}]   ;;  %s3982_s2 = inlined_call_operand.vmem [shape: f32[1,32], index: 2, kind: input, shape index: {}]   ;;  %s3983_s3 = inlined_call_operand.vmem [shape: bf16[32,8], index: 3, kind: input, shape index: {}]   ;;  %s3984_s4 = inlined_call_operand.vmem [shape: f32[1,8], index: 4, kind: input, shape index: {}]   ;;  %s3985_s5 = inlined_call_operand.vmem [shape: bf16[256,8], index: 5, kind: output, shape index: {}]  }
   0x1   :  { %v2016_v0 = vld [vmem:[%s3980_s0 + $0xc0] sm:$0xff]  ;;  %v2037_v6 = vld [vmem:[%s3980_s0 + $0xc8] sm:$0xff]  ;;  %v2068_v14 = vld [vmem:[%s3980_s0 + $0x90] sm:$0xff] }
   0x2   :  { %v2021_v1 = vld [vmem:[%s3980_s0 + $0x80] sm:$0xff]  ;;  %v128_v3 = vsel %vm55_vm0, %v2016_v0, 0.0  ;;  %v2042_v7 = vld [vmem:[%s3980_s0 + $0x88] sm:$0xff]  ;;  %v131_v9 = vsel %vm55_vm0, %v2037_v6, 0.0  ;;  %v110_v17 = vsel %vm55_vm0, %v2068_v14, 0.0  ;;  %v2079_v18 = vld [vmem:[%s3980_s0 + $0xd0] sm:$0xff] }
   0x3   :  { %v2026_v2 = vld [vmem:[%s3980_s0] sm:$0xff]  ;;  %v104_v4 = vsel %vm55_vm0, %v2021_v1, 0.0  ;;  %129 = vadd.xlane.f32.xlu1 %v128_v3  ;;  %v2047_v8 = vld [vmem:[%s3980_s0 + $0x8] sm:$0xff]  ;;  %v107_v10 = vsel %vm55_vm0, %v2042_v7, 0.0  ;;  %v2084_v19 = vld [vmem:[%s3980_s0 + $0x98] sm:$0xff]  ;;  %v134_v21 = vsel %vm55_vm0, %v2079_v18, 0.0 }
   0x4   :  { %v56_v5 = vsel %vm55_vm0, %v2026_v2, 0.0  ;;  %105 = vadd.xlane.f32.xlu0 %v104_v4  ;;  %v59_v11 = vsel %vm55_vm0, %v2047_v8, 0.0  ;;  %v2058_v12 = vld [vmem:[%s3980_s0 + $0x48] sm:$0xff]  ;;  %v2063_v13 = vld [vmem:[%s3980_s0 + $0x40] sm:$0xff]  ;;  %v2089_v20 = vld [vmem:[%s3980_s0 + $0xd8] sm:$0xff]  ;;  %v113_v22 = vsel %vm55_vm0, %v2084_v19, 0.0 }
   0x5   :  { %57 = vadd.xlane.f32.xlu2 %v56_v5  ;;  %v83_v15 = vsel %vm55_vm0, %v2058_v12, 0.0  ;;  %v80_v16 = vsel %vm55_vm0, %v2063_v13, 0.0  ;;  %v137_v23 = vsel %vm55_vm0, %v2089_v20, 0.0  ;;  %v2100_v24 = vld [vmem:[%s3980_s0 + $0x18] sm:$0xff]  ;;  %v2105_v25 = vld [vmem:[%s3980_s0 + $0x10] sm:$0xff]  ;;  %v2121_v30 = vld [vmem:[%s3980_s0 + $0xa0] sm:$0xff] }
   0x6   :  { %v2110_v26 = vld [vmem:[%s3980_s0 + $0x50] sm:$0xff]  ;;  %v65_v27 = vsel %vm55_vm0, %v2100_v24, 0.0  ;;  %v62_v28 = vsel %vm55_vm0, %v2105_v25, 0.0  ;;  %v2126_v31 = vld [vmem:[%s3980_s0 + $0x58] sm:$0xff]  ;;  %v2131_v32 = vld [vmem:[%s3980_s0 + $0xa8] sm:$0xff]  ;;  %v116_v33 = vsel %vm55_vm0, %v2121_v30, 0.0 }
   0x7   :  { %v86_v29 = vsel %vm55_vm0, %v2110_v26, 0.0  ;;  %v89_v34 = vsel %vm55_vm0, %v2126_v31, 0.0  ;;  %v119_v35 = vsel %vm55_vm0, %v2131_v32, 0.0  ;;  %v2142_v36 = vld [vmem:[%s3980_s0 + $0xe8] sm:$0xff]  ;;  %v2147_v37 = vld [vmem:[%s3980_s0 + $0xe0] sm:$0xff]  ;;  %v2184_v48 = vld [vmem:[%s3980_s0 + $0xb0] sm:$0xff] }
   0x8   :  { %v2152_v38 = vld [vmem:[%s3980_s0 + $0x20] sm:$0xff]  ;;  %v143_v39 = vsel %vm55_vm0, %v2142_v36, 0.0  ;;  %v140_v40 = vsel %vm55_vm0, %v2147_v37, 0.0  ;;  %v2168_v43 = vld [vmem:[%s3980_s0 + $0x28] sm:$0xff]  ;;  %v2189_v49 = vld [vmem:[%s3980_s0 + $0xf0] sm:$0xff]  ;;  %v122_v51 = vsel %vm55_vm0, %v2184_v48, 0.0 }
   0x9   :  { %v68_v41 = vsel %vm55_vm0, %v2152_v38, 0.0  ;;  %v2163_v42 = vld [vmem:[%s3980_s0 + $0x60] sm:$0xff]  ;;  %v2173_v44 = vld [vmem:[%s3980_s0 + $0x68] sm:$0xff]  ;;  %v71_v46 = vsel %vm55_vm0, %v2168_v43, 0.0  ;;  %v2194_v50 = vld [vmem:[%s3980_s0 + $0xb8] sm:$0xff]  ;;  %v146_v52 = vsel %vm55_vm0, %v2189_v49, 0.0 }
   0xa   :  { %v92_v45 = vsel %vm55_vm0, %v2163_v42, 0.0  ;;  %v95_v47 = vsel %vm55_vm0, %v2173_v44, 0.0  ;;  %v125_v53 = vsel %vm55_vm0, %v2194_v50, 0.0  ;;  %v2205_v54 = vld [vmem:[%s3980_s0 + $0xf8] sm:$0xff]  ;;  %v2210_v55 = vld [vmem:[%s3980_s0 + $0x30] sm:$0xff]  ;;  %v1982_v3 = vmov 32.0  }
   0xb   :  { %132 = vadd.xlane.f32.xlu1 %v131_v9  ;;  %v2215_v56 = vld [vmem:[%s3980_s0 + $0x70] sm:$0xff]  ;;  %v149_v57 = vsel %vm55_vm0, %v2205_v54, 0.0  ;;  %v74_v58 = vsel %vm55_vm0, %v2210_v55, 0.0  ;;  %v2226_v60 = vld [vmem:[%s3980_s0 + $0x38] sm:$0xff]  ;;  %1787 = vrcp.f32 %v1982_v3 }
   0xc   :  { %108 = vadd.xlane.f32.xlu0 %v107_v10  ;;  %v98_v59 = vsel %vm55_vm0, %v2215_v56, 0.0  ;;  %v2231_v61 = vld [vmem:[%s3980_s0 + $0x78] sm:$0xff]  ;;  %v77_v62 = vsel %vm55_vm0, %v2226_v60, 0.0 }
   0xd   :  { %60 = vadd.xlane.f32.xlu2 %v59_v11  ;;  %v101_v63 = vsel %vm55_vm0, %v2231_v61, 0.0 }
  0x11   :  { %v1788_v4 = vpop.eup %1787 }
  0x12   :  { %v153_v5 = vmul.f32 32.0, %v1788_v4  ;;  %vm157_vm1 = vweird.f32 %v1788_v4 }
  0x13   :  { %84 = vadd.xlane.f32.xlu1 %v83_v15 }
  0x14   :  { %81 = vadd.xlane.f32.xlu0 %v80_v16  ;;  %v154_v9 = vsub.f32 1.0, %v153_v5 }
  0x15   :  { %111 = vadd.xlane.f32.xlu2 %v110_v17 }
  0x16   :  { %v155_v10 = vmul.f32 %v1788_v4, %v154_v9 }
  0x18   :  { %v156_v11 = vadd.f32 %v1788_v4, %v155_v10 }
  0x1a   :  { %v2237_v15 = vsel %vm157_vm1, %v1788_v4, %v156_v11 }
  0x1b   :  { %135 = vadd.xlane.f32.xlu1 %v134_v21 }
  0x1c   :  { %114 = vadd.xlane.f32.xlu0 %v113_v22 }
  0x1d   :  { %138 = vadd.xlane.f32.xlu2 %v137_v23 }
  0x23   :  { %66 = vadd.xlane.f32.xlu1 %v65_v27 }
  0x24   :  { %63 = vadd.xlane.f32.xlu0 %v62_v28 }
  0x25   :  { %87 = vadd.xlane.f32.xlu2 %v86_v29 }
  0x2b   :  { %117 = vadd.xlane.f32.xlu1 %v116_v33 }
  0x2c   :  { %90 = vadd.xlane.f32.xlu0 %v89_v34 }
  0x2d   :  { %120 = vadd.xlane.f32.xlu2 %v119_v35 }
  0x33   :  { %144 = vadd.xlane.f32.xlu1 %v143_v39 }
  0x34   :  { %141 = vadd.xlane.f32.xlu0 %v140_v40 }
  0x35   :  { %69 = vadd.xlane.f32.xlu2 %v68_v41 }
  0x3b   :  { %93 = vadd.xlane.f32.xlu1 %v92_v45 }
  0x3c   :  { %72 = vadd.xlane.f32.xlu0 %v71_v46 }
  0x3d   :  { %96 = vadd.xlane.f32.xlu2 %v95_v47 }
  0x43   :  { %123 = vadd.xlane.f32.xlu1 %v122_v51 }
  0x44   :  { %147 = vadd.xlane.f32.xlu0 %v146_v52 }
  0x45   :  { %126 = vadd.xlane.f32.xlu2 %v125_v53 }
  0x4b   :  { %150 = vadd.xlane.f32.xlu1 %v149_v57 }
  0x4c   :  { %75 = vadd.xlane.f32.xlu0 %v74_v58 }
  0x4d   :  { %99 = vadd.xlane.f32.xlu2 %v98_v59 }
  0x53   :  { %78 = vadd.xlane.f32.xlu1 %v77_v62 }
  0x54   :  { %102 = vadd.xlane.f32.xlu0 %v101_v63 }
  0x76   :  { %v130_v16 = vpop.xlane.xlu1 %129 }
  0x77   :  { %v106_v17 = vpop.xlane.xlu0 %105  ;;  %v183_v21 = vmul.f32 %v2237_v15, %v130_v16 }
  0x78   :  { %v175_v22 = vmul.f32 %v2237_v15, %v106_v17  ;;  %v58_v23 = vpop.xlane.xlu2 %57 }
  0x79   :  { %v2242_v27 = vsub.f32 %v2016_v0, %v183_v21  ;;  %v159_v29 = vmul.f32 %v2237_v15, %v58_v23 }
  0x7a   :  { %v2245_v28 = vsub.f32 %v2021_v1, %v175_v22 }
  0x7b   :  { %v247_v34 = vmul.f32 %v2242_v27, %v2242_v27  ;;  %v2255_v40 = vsub.f32 %v2026_v2, %v159_v29 }
  0x7c   :  { %v239_v33 = vmul.f32 %v2245_v28, %v2245_v28 }
  0x7d   :  { %v327_v39 = vsel %vm55_vm0, %v247_v34, 0.0  ;;  %v223_v2 = vmul.f32 %v2255_v40, %v2255_v40 }
  0x7e   :  { %v303_v35 = vsel %vm55_vm0, %v239_v33, 0.0  ;;  %v133_v0 = vpop.xlane.xlu1 %132  ;;  %328 = vadd.xlane.f32.xlu2 %v327_v39 }
  0x7f   :  { %v109_v41 = vpop.xlane.xlu0 %108  ;;  %304 = vadd.xlane.f32.xlu0 %v303_v35  ;;  %v184_v1 = vmul.f32 %v2237_v15, %v133_v0  ;;  %v255_v63 = vsel %vm55_vm0, %v223_v2, 0.0 }
  0x80   :  { %v176_v45 = vmul.f32 %v2237_v15, %v109_v41  ;;  %v61_v46 = vpop.xlane.xlu2 %60 }
  0x81   :  { %v2260_v47 = vsub.f32 %v2037_v6, %v184_v1  ;;  %v160_v52 = vmul.f32 %v2237_v15, %v61_v46 }
  0x82   :  { %v2263_v51 = vsub.f32 %v2042_v7, %v176_v45 }
  0x83   :  { %v248_v57 = vmul.f32 %v2260_v47, %v2260_v47  ;;  %v2273_v58 = vsub.f32 %v2047_v8, %v160_v52 }
  0x84   :  { %v240_v53 = vmul.f32 %v2263_v51, %v2263_v51 }
  0x85   :  { %v330_v59 = vsel %vm55_vm0, %v248_v57, 0.0  ;;  %v224_v11 = vmul.f32 %v2273_v58, %v2273_v58 }
  0x86   :  { %v306_v6 = vsel %vm55_vm0, %v240_v53, 0.0  ;;  %v85_v7 = vpop.xlane.xlu1 %84  ;;  %256 = vadd.xlane.f32.xlu2 %v255_v63 }
  0x87   :  { %v82_v62 = vpop.xlane.xlu0 %81  ;;  %307 = vadd.xlane.f32.xlu1 %v306_v6  ;;  %331 = vadd.xlane.f32.xlu0 %v330_v59  ;;  %v168_v3 = vmul.f32 %v2237_v15, %v85_v7 }
  0x88   :  { %v167_v4 = vmul.f32 %v2237_v15, %v82_v62  ;;  %v112_v5 = vpop.xlane.xlu2 %111 }
  0x89   :  { %v2281_v9 = vsub.f32 %v2058_v12, %v168_v3  ;;  %v177_v10 = vmul.f32 %v2237_v15, %v112_v5 }
  0x8a   :  { %v2284_v8 = vsub.f32 %v2063_v13, %v167_v4  ;;  %v258_v13 = vsel %vm55_vm0, %v224_v11, 0.0 }
  0x8b   :  { %v232_v17 = vmul.f32 %v2281_v9, %v2281_v9  ;;  %v2294_v21 = vsub.f32 %v2068_v14, %v177_v10 }
  0x8c   :  { %v231_v16 = vmul.f32 %v2284_v8, %v2284_v8 }
  0x8d   :  { %v282_v22 = vsel %vm55_vm0, %v232_v17, 0.0  ;;  %v241_v41 = vmul.f32 %v2294_v21, %v2294_v21 }
  0x8e   :  { %v279_v12 = vsel %vm55_vm0, %v231_v16, 0.0  ;;  %v136_v23 = vpop.xlane.xlu1 %135  ;;  %283 = vadd.xlane.f32.xlu2 %v282_v22 }
  0x8f   :  { %v115_v29 = vpop.xlane.xlu0 %114  ;;  %280 = vadd.xlane.f32.xlu1 %v279_v12  ;;  %259 = vadd.xlane.f32.xlu0 %v258_v13  ;;  %v185_v33 = vmul.f32 %v2237_v15, %v136_v23 }
  0x90   :  { %v178_v34 = vmul.f32 %v2237_v15, %v115_v29  ;;  %v139_v35 = vpop.xlane.xlu2 %138 }
  0x91   :  { %v2302_v39 = vsub.f32 %v2079_v18, %v185_v33  ;;  %v186_v0 = vmul.f32 %v2237_v15, %v139_v35 }
  0x92   :  { %v2305_v14 = vsub.f32 %v2084_v19, %v178_v34  ;;  %v309_v19 = vsel %vm55_vm0, %v241_v41, 0.0 }
  0x93   :  { %v249_v45 = vmul.f32 %v2302_v39, %v2302_v39  ;;  %v2315_v46 = vsub.f32 %v2089_v20, %v186_v0 }
  0x94   :  { %v242_v1 = vmul.f32 %v2305_v14, %v2305_v14 }
  0x95   :  { %v333_v52 = vsel %vm55_vm0, %v249_v45, 0.0  ;;  %v250_v63 = vmul.f32 %v2315_v46, %v2315_v46 }
  0x96   :  { %v312_v18 = vsel %vm55_vm0, %v242_v1, 0.0  ;;  %v67_v2 = vpop.xlane.xlu1 %66 }
  0x97   :  { %v64_v53 = vpop.xlane.xlu0 %63  ;;  %334 = vadd.xlane.f32.xlu0 %v333_v52  ;;  %310 = vadd.xlane.f32.xlu1 %v309_v19  ;;  %v162_v57 = vmul.f32 %v2237_v15, %v67_v2 }
  0x98   :  { %v161_v6 = vmul.f32 %v2237_v15, %v64_v53  ;;  %313 = vadd.xlane.f32.xlu2 %v312_v18  ;;  %v88_v59 = vpop.xlane.xlu2 %87 }
  0x99   :  { %v2323_v7 = vsub.f32 %v2100_v24, %v162_v57  ;;  %v169_v62 = vmul.f32 %v2237_v15, %v88_v59 }
  0x9a   :  { %v2326_v20 = vsub.f32 %v2105_v25, %v161_v6  ;;  %v336_v25 = vsel %vm55_vm0, %v250_v63, 0.0 }
  0x9b   :  { %v226_v4 = vmul.f32 %v2323_v7, %v2323_v7  ;;  %v2336_v5 = vsub.f32 %v2110_v26, %v169_v62 }
  0x9c   :  { %v225_v3 = vmul.f32 %v2326_v20, %v2326_v20 }
  0x9d   :  { %v264_v10 = vsel %vm55_vm0, %v226_v4, 0.0  ;;  %v233_v29 = vmul.f32 %v2336_v5, %v2336_v5 }
  0x9e   :  { %v261_v24 = vsel %vm55_vm0, %v225_v3, 0.0  ;;  %v118_v11 = vpop.xlane.xlu1 %117 }
  0x9f   :  { %v91_v16 = vpop.xlane.xlu0 %90  ;;  %265 = vadd.xlane.f32.xlu0 %v264_v10  ;;  %337 = vadd.xlane.f32.xlu1 %v336_v25  ;;  %v179_v17 = vmul.f32 %v2237_v15, %v118_v11 }
  0xa0   :  { %v170_v12 = vmul.f32 %v2237_v15, %v91_v16  ;;  %262 = vadd.xlane.f32.xlu2 %v261_v24  ;;  %v121_v22 = vpop.xlane.xlu2 %120 }
  0xa1   :  { %v2344_v13 = vsub.f32 %v2121_v30, %v179_v17  ;;  %v180_v23 = vmul.f32 %v2237_v15, %v121_v22 }
  0xa2   :  { %v2347_v26 = vsub.f32 %v2126_v31, %v170_v12  ;;  %v285_v31 = vsel %vm55_vm0, %v233_v29, 0.0 }
  0xa3   :  { %v243_v34 = vmul.f32 %v2344_v13, %v2344_v13  ;;  %v2357_v35 = vsub.f32 %v2131_v32, %v180_v23 }
  0xa4   :  { %v234_v33 = vmul.f32 %v2347_v26, %v2347_v26 }
  0xa5   :  { %v315_v0 = vsel %vm55_vm0, %v243_v34, 0.0  ;;  %v244_v53 = vmul.f32 %v2357_v35, %v2357_v35 }
  0xa6   :  { %v288_v30 = vsel %vm55_vm0, %v234_v33, 0.0  ;;  %v145_v41 = vpop.xlane.xlu1 %144 }
  0xa7   :  { %v142_v1 = vpop.xlane.xlu0 %141  ;;  %316 = vadd.xlane.f32.xlu0 %v315_v0  ;;  %286 = vadd.xlane.f32.xlu1 %v285_v31  ;;  %v188_v45 = vmul.f32 %v2237_v15, %v145_v41 }
  0xa8   :  { %v187_v18 = vmul.f32 %v2237_v15, %v142_v1  ;;  %289 = vadd.xlane.f32.xlu2 %v288_v30  ;;  %v70_v52 = vpop.xlane.xlu2 %69 }
  0xa9   :  { %v2365_v19 = vsub.f32 %v2142_v36, %v188_v45  ;;  %v163_v2 = vmul.f32 %v2237_v15, %v70_v52 }
  0xaa   :  { %v2368_v32 = vsub.f32 %v2147_v37, %v187_v18  ;;  %v318_v37 = vsel %vm55_vm0, %v244_v53, 0.0 }
  0xab   :  { %v252_v6 = vmul.f32 %v2365_v19, %v2365_v19  ;;  %v2378_v59 = vsub.f32 %v2152_v38, %v163_v2 }
  0xac   :  { %v251_v57 = vmul.f32 %v2368_v32, %v2368_v32 }
  0xad   :  { %v342_v62 = vsel %vm55_vm0, %v252_v6, 0.0  ;;  %v227_v16 = vmul.f32 %v2378_v59, %v2378_v59 }
  0xae   :  { %v339_v36 = vsel %vm55_vm0, %v251_v57, 0.0  ;;  %v94_v63 = vpop.xlane.xlu1 %93 }
  0xaf   :  { %v73_v3 = vpop.xlane.xlu0 %72  ;;  %343 = vadd.xlane.f32.xlu0 %v342_v62  ;;  %319 = vadd.xlane.f32.xlu1 %v318_v37  ;;  %v171_v4 = vmul.f32 %v2237_v15, %v94_v63 }
  0xb0   :  { %v164_v24 = vmul.f32 %v2237_v15, %v73_v3  ;;  %340 = vadd.xlane.f32.xlu2 %v339_v36  ;;  %v97_v10 = vpop.xlane.xlu2 %96 }
  0xb1   :  { %v2386_v25 = vsub.f32 %v2163_v42, %v171_v4  ;;  %v172_v11 = vmul.f32 %v2237_v15, %v97_v10 }
  0xb2   :  { %v2389_v38 = vsub.f32 %v2168_v43, %v164_v24  ;;  %v267_v43 = vsel %vm55_vm0, %v227_v16, 0.0 }
  0xb3   :  { %v235_v12 = vmul.f32 %v2386_v25, %v2386_v25  ;;  %v2399_v22 = vsub.f32 %v2173_v44, %v172_v11 }
  0xb4   :  { %v228_v17 = vmul.f32 %v2389_v38, %v2389_v38 }
  0xb5   :  { %v291_v23 = vsel %vm55_vm0, %v235_v12, 0.0  ;;  %v236_v41 = vmul.f32 %v2399_v22, %v2399_v22 }
  0xb6   :  { %v270_v42 = vsel %vm55_vm0, %v228_v17, 0.0  ;;  %v124_v29 = vpop.xlane.xlu1 %123 }
  0xb7   :  { %v148_v33 = vpop.xlane.xlu0 %147  ;;  %292 = vadd.xlane.f32.xlu0 %v291_v23  ;;  %268 = vadd.xlane.f32.xlu1 %v267_v43  ;;  %v181_v34 = vmul.f32 %v2237_v15, %v124_v29  ;;  %v294_v2 = vsel %vm55_vm0, %v236_v41, 0.0 }
  0xb8   :  { %271 = vadd.xlane.f32.xlu2 %v270_v42  ;;  %v127_v30 = vpop.xlane.xlu2 %126  ;;  %v189_v44 = vmul.f32 %v2237_v15, %v148_v33 }
  0xb9   :  { %v182_v0 = vmul.f32 %v2237_v15, %v127_v30  ;;  %v2407_v31 = vsub.f32 %v2184_v48, %v181_v34 }
  0xba   :  { %v2420_v52 = vsub.f32 %v2189_v49, %v189_v44 }
  0xbb   :  { %v2413_v1 = vsub.f32 %v2194_v50, %v182_v0  ;;  %v245_v45 = vmul.f32 %v2407_v31, %v2407_v31 }
  0xbc   :  { %v253_v3 = vmul.f32 %v2420_v52, %v2420_v52 }
  0xbd   :  { %v246_v18 = vmul.f32 %v2413_v1, %v2413_v1  ;;  %v321_v48 = vsel %vm55_vm0, %v245_v45, 0.0 }
  0xbe   :  { %v151_v53 = vpop.xlane.xlu1 %150 }
  0xbf   :  { %v76_v57 = vpop.xlane.xlu0 %75  ;;  %295 = vadd.xlane.f32.xlu1 %v294_v2  ;;  %v324_v6 = vsel %vm55_vm0, %v246_v18, 0.0  ;;  %v190_v50 = vmul.f32 %v2237_v15, %v151_v53 }
  0xc0   :  { %v165_v36 = vmul.f32 %v2237_v15, %v76_v57  ;;  %322 = vadd.xlane.f32.xlu2 %v321_v48  ;;  %325 = vadd.xlane.f32.xlu0 %v324_v6  ;;  %v100_v62 = vpop.xlane.xlu2 %99  ;;  %v1776_v48 = vld [vmem:[%s3983_s3 + $0x8] sm:$0xff] }
  0xc1   :  { %v173_v37 = vmul.f32 %v2237_v15, %v100_v62  ;;  %v2429_v49 = vsub.f32 %v2205_v54, %v190_v50  ;;  %v345_v54 = vsel %vm55_vm0, %v253_v3, 0.0  ;;  %1778 = vmatpush.bf16.msra.mxu2 %v1776_v48  ;;  %1779 = vmatpush.bf16.msra.mxu3 %v1776_v48  ;;  %v1775_v62 = vld [vmem:[%s3983_s3] sm:$0xff] }
  0xc2   :  { %v2432_v63 = vsub.f32 %v2210_v55, %v165_v36  ;;  %927 = vmatpush.bf16.msra.mxu0 %v1776_v48  ;;  %1777 = vmatpush.bf16.msra.mxu1 %v1776_v48 }
  0xc3   :  { %v254_v4 = vmul.f32 %v2429_v49, %v2429_v49  ;;  %v2441_v10 = vsub.f32 %v2215_v56, %v173_v37 }
  0xc4   :  { %3990 = vst [vmem:[#allocation2_spill] sm:$0xff] %v2432_v63  ;;  %v229_v24 = vmul.f32 %v2432_v63, %v2432_v63 }
  0xc5   :  { %3991 = vst [vmem:[#allocation3_spill] sm:$0xff] %v2441_v10  ;;  %v348_v11 = vsel %vm55_vm0, %v254_v4, 0.0  ;;  %v237_v23 = vmul.f32 %v2441_v10, %v2441_v10  ;;  %1781 = vmatpush.bf16.msra.mxu2 %v1775_v62  ;;  %1782 = vmatpush.bf16.msra.mxu3 %v1775_v62 }
  0xc6   :  { %v273_v16 = vsel %vm55_vm0, %v229_v24, 0.0  ;;  %v79_v55 = vpop.xlane.xlu1 %78  ;;  %928 = vmatpush.bf16.msra.mxu0 %v1775_v62  ;;  %1780 = vmatpush.bf16.msra.mxu1 %v1775_v62 }
  0xc7   :  { %v103_v17 = vpop.xlane.xlu0 %102  ;;  %346 = vadd.xlane.f32.xlu1 %v345_v54  ;;  %v166_v12 = vmul.f32 %v2237_v15, %v79_v55  ;;  %v297_v34 = vsel %vm55_vm0, %v237_v23, 0.0 }
  0xc8   :  { %v174_v42 = vmul.f32 %v2237_v15, %v103_v17  ;;  %349 = vadd.xlane.f32.xlu2 %v348_v11  ;;  %274 = vadd.xlane.f32.xlu0 %v273_v16 }
  0xc9   :  { %v2451_v56 = vsub.f32 %v2226_v60, %v166_v12 }
  0xca   :  { %v2454_v43 = vsub.f32 %v2231_v61, %v174_v42 }
  0xcb   :  { %3992 = vst [vmem:[#allocation4_spill] sm:$0xff] %v2451_v56  ;;  %v230_v29 = vmul.f32 %v2451_v56, %v2451_v56 }
  0xcc   :  { %3993 = vst [vmem:[#allocation5_spill] sm:$0xff] %v2454_v43  ;;  %v238_v33 = vmul.f32 %v2454_v43, %v2454_v43 }
  0xcd   :  { %v276_v30 = vsel %vm55_vm0, %v230_v29, 0.0 }
  0xce   :  { %v300_v0 = vsel %vm55_vm0, %v238_v33, 0.0 }
  0xcf   :  { %277 = vadd.xlane.f32.xlu1 %v276_v30 }
  0xd0   :  { %301 = vadd.xlane.f32.xlu0 %v300_v0  ;;  %298 = vadd.xlane.f32.xlu2 %v297_v34 }
  0xf1   :  { %v329_v44 = vpop.xlane.xlu2 %328 }
  0xf2   :  { %v305_v60 = vpop.xlane.xlu0 %304  ;;  %v375_v41 = vmul.f32 %v329_v44, %v2237_v15 }
  0xf3   :  { %v367_v61 = vmul.f32 %v305_v60, %v2237_v15 }
  0xf4   :  { %v2467_v18 = vadd.f32 1e-05, %v375_v41 }
  0xf5   :  { %v2465_v45 = vadd.f32 1e-05, %v367_v61 }
  0xf6   :  { %vm661_vm7 = vweird.f32 %v2467_v18 }
  0xf7   :  { %1789 = vrsqrt.f32 %v2465_v45  ;;  %vm581_vm2 = vweird.f32 %v2465_v45 }
  0xf8   :  { %1791 = vrsqrt.f32 %v2467_v18 }
  0xf9   :  { %v257_v50 = vpop.xlane.xlu2 %256 }
  0xfa   :  { %v308_v2 = vpop.xlane.xlu1 %307  ;;  %v332_v53 = vpop.xlane.xlu0 %331  ;;  %v351_v36 = vmul.f32 %v257_v50, %v2237_v15 }
  0xfb   :  { %v368_v57 = vmul.f32 %v308_v2, %v2237_v15  ;;  %v376_v6 = vmul.f32 %v332_v53, %v2237_v15 }
  0xfc   :  { %v2490_v54 = vadd.f32 1e-05, %v351_v36 }
  0xfd   :  { %v2480_v37 = vpop.eup %1789  ;;  %v2482_v3 = vadd.f32 1e-05, %v368_v57  ;;  %v2484_v4 = vadd.f32 1e-05, %v376_v6 }
  0xfe   :  { %v2486_v24 = vpop.eup %1791  ;;  %v576_v11 = vmul.f32 %v2480_v37, %v2465_v45  ;;  %vm582_vm3 = vweird.f32 %v2480_v37  ;;  %vm421_vm13 = vweird.f32 %v2490_v54 }
  0xff   :  { %v656_v16 = vmul.f32 %v2486_v24, %v2467_v18  ;;  %1793 = vrsqrt.f32 %v2482_v3  ;;  %vm662_vm4 = vweird.f32 %v2486_v24  ;;  %vm2535_vm6 = vmor %vm581_vm2, %vm582_vm3  ;;  %vm591_vm9 = vweird.f32 %v2482_v3 }
 0x100   :  { %v577_v55 = vmul.f32 %v2480_v37, %v576_v11  ;;  %1795 = vrsqrt.f32 %v2484_v4  ;;  %vm2543_vm8 = vmor %vm661_vm7, %vm662_vm4  ;;  %vm671_vm12 = vweird.f32 %v2484_v4 }
 0x101   :  { %v657_v17 = vmul.f32 %v2486_v24, %v656_v16  ;;  %1797 = vrsqrt.f32 %v2490_v54  ;;  %v284_v34 = vpop.xlane.xlu2 %283 }
 0x102   :  { %v281_v12 = vpop.xlane.xlu1 %280  ;;  %v260_v42 = vpop.xlane.xlu0 %259  ;;  %v578_v23 = vmul.f32 0.5, %v577_v55  ;;  %v360_v0 = vmul.f32 %v284_v34, %v2237_v15 }
 0x103   :  { %v359_v29 = vmul.f32 %v281_v12, %v2237_v15  ;;  %v352_v33 = vmul.f32 %v260_v42, %v2237_v15  ;;  %v658_v30 = vmul.f32 0.5, %v657_v17 }
 0x104   :  { %v579_v53 = vsub.f32 1.5, %v578_v23  ;;  %v2514_v6 = vadd.f32 1e-05, %v360_v0 }
 0x105   :  { %v1794_v60 = vpop.eup %1793  ;;  %v2502_v44 = vadd.f32 1e-05, %v359_v29  ;;  %v2507_v48 = vadd.f32 1e-05, %v352_v33  ;;  %v659_v50 = vsub.f32 1.5, %v658_v30 }
 0x106   :  { %v2504_v61 = vpop.eup %1795  ;;  %v586_v41 = vmul.f32 %v1794_v60, %v2482_v3  ;;  %v580_v42 = vmul.f32 %v2480_v37, %v579_v53  ;;  %vm592_vm5 = vweird.f32 %v1794_v60 }
 0x107   :  { %v2509_v2 = vpop.eup %1797  ;;  %v666_v57 = vmul.f32 %v2504_v61, %v2484_v4  ;;  %1799 = vrsqrt.f32 %v2502_v44  ;;  %v660_v33 = vmul.f32 %v2486_v24, %v659_v50  ;;  %vm2554_vm10 = vmor %vm591_vm9, %vm592_vm5  ;;  %vm672_vm11 = vweird.f32 %v2504_v61  ;;  %v2589_v4 = vld [vmem:[%s3981_s1] ss:$0 sm:$0xff] }
 0x108   :  { %v587_v36 = vmul.f32 %v1794_v60, %v586_v41  ;;  %v416_v62 = vmul.f32 %v2509_v2, %v2490_v54  ;;  %1801 = vrsqrt.f32 %v2507_v48  ;;  %v584_v18 = vsel %vm2535_vm6, %v2480_v37, %v580_v42  ;;  %vm2594_vm14 = vmor %vm671_vm12, %vm672_vm11 }
 0x109   :  { %v667_v11 = vmul.f32 %v2504_v61, %v666_v57  ;;  %1803 = vrsqrt.f32 %v2514_v6  ;;  %v664_v3 = vsel %vm2543_vm8, %v2486_v24, %v660_v33  ;;  %v751_v33 = vmul.f32 %v584_v18, %v2245_v28 }
 0x10a   :  { %v588_v16 = vmul.f32 0.5, %v587_v36  ;;  %v417_v55 = vmul.f32 %v2509_v2, %v416_v62  ;;  %v335_v17 = vpop.xlane.xlu0 %334  ;;  %v311_v12 = vpop.xlane.xlu1 %310  ;;  %vm422_vm15 = vweird.f32 %v2509_v2  ;;  %vm501_vm1 = vweird.f32 %v2502_v44 }
 0x10b   :  { %v668_v23 = vmul.f32 0.5, %v667_v11  ;;  %v314_v29 = vpop.xlane.xlu2 %313  ;;  %v377_v30 = vmul.f32 %v335_v17, %v2237_v15  ;;  %v369_v0 = vmul.f32 %v311_v12, %v2237_v15  ;;  %vm2622_vm2 = vmor %vm421_vm13, %vm422_vm15  ;;  %vm431_vm3 = vweird.f32 %v2507_v48 }
 0x10c   :  { %v589_v34 = vsub.f32 1.5, %v588_v16  ;;  %v418_v36 = vmul.f32 0.5, %v417_v55  ;;  %v370_v50 = vmul.f32 %v314_v29, %v2237_v15  ;;  %vm511_vm5 = vweird.f32 %v2514_v6 }
 0x10d   :  { %v2529_v41 = vpop.eup %1799  ;;  %v669_v57 = vsub.f32 1.5, %v668_v23  ;;  %v2559_v55 = vadd.f32 1e-05, %v377_v30  ;;  %v2569_v42 = vadd.f32 1e-05, %v369_v0 }
 0x10e   :  { %v590_v11 = vmul.f32 %v1794_v60, %v589_v34  ;;  %v496_v45 = vmul.f32 %v2529_v41, %v2502_v44  ;;  %v2561_v17 = vpop.eup %1801  ;;  %v419_v34 = vsub.f32 1.5, %v418_v36  ;;  %v2576_v53 = vadd.f32 1e-05, %v370_v50 }
 0x10f   :  { %v2571_v23 = vpop.eup %1803  ;;  %v670_v29 = vmul.f32 %v2504_v61, %v669_v57  ;;  %v426_v30 = vmul.f32 %v2561_v17, %v2507_v48  ;;  %1805 = vrsqrt.f32 %v2559_v55  ;;  %v759_v50 = vmul.f32 %v664_v3, %v2242_v27 }
 0x110   :  { %v594_v12 = vsel %vm2554_vm10, %v1794_v60, %v590_v11  ;;  %v497_v37 = vmul.f32 %v2529_v41, %v496_v45  ;;  %v506_v60 = vmul.f32 %v2571_v23, %v2514_v6  ;;  %1807 = vrsqrt.f32 %v2569_v42 }
 0x111   :  { %v752_v0 = vmul.f32 %v594_v12, %v2263_v51  ;;  %v427_v57 = vmul.f32 %v2561_v17, %v426_v30  ;;  %v674_v45 = vsel %vm2594_vm14, %v2504_v61, %v670_v29  ;;  %v420_v18 = vmul.f32 %v2509_v2, %v419_v34  ;;  %v2615_v61 = vld [vmem:[%s3982_s2] ss:$0 sm:$0xff] }
 0x112   :  { %v498_v24 = vmul.f32 0.5, %v497_v37  ;;  %v266_v36 = vpop.xlane.xlu0 %265  ;;  %v338_v62 = vpop.xlane.xlu1 %337  ;;  %v507_v28 = vmul.f32 %v2571_v23, %v506_v60  ;;  %1809 = vrsqrt.f32 %v2576_v53  ;;  %v786_v60 = vmul.f32 %v2589_v4, %v751_v33 }
 0x113   :  { %v263_v51 = vpop.xlane.xlu2 %262  ;;  %v428_v16 = vmul.f32 0.5, %v427_v57  ;;  %v354_v3 = vmul.f32 %v266_v36, %v2237_v15  ;;  %v378_v12 = vmul.f32 %v338_v62, %v2237_v15  ;;  %v787_v11 = vmul.f32 %v2589_v4, %v752_v0 }
 0x114   :  { %v499_v27 = vsub.f32 1.5, %v498_v24  ;;  %v508_v37 = vmul.f32 0.5, %v507_v28  ;;  %v353_v30 = vmul.f32 %v263_v51, %v2237_v15  ;;  %v760_v29 = vmul.f32 %v674_v45, %v2260_v47 }
 0x115   :  { %v2627_v24 = vadd.f32 1e-05, %v354_v3  ;;  %v794_v33 = vmul.f32 %v2589_v4, %v759_v50  ;;  %v2630_v0 = vpop.eup %1805  ;;  %v424_v47 = vsel %vm2622_vm2, %v2509_v2, %v420_v18  ;;  %vm502_vm4 = vweird.f32 %v2529_v41 }
 0x116   :  { %v500_v57 = vmul.f32 %v2529_v41, %v499_v27  ;;  %v2638_v54 = vadd.f32 1e-05, %v378_v12  ;;  %v2640_v36 = vpop.eup %1807  ;;  %v429_v62 = vsub.f32 1.5, %v428_v16  ;;  %v676_v50 = vmul.f32 %v2630_v0, %v2559_v55  ;;  %vm2665_vm7 = vmor %vm501_vm1, %vm502_vm4 }
 0x117   :  { %1811 = vrsqrt.f32 %v2627_v24  ;;  %v2645_v28 = vadd.f32 1e-05, %v353_v30  ;;  %v509_v2 = vsub.f32 1.5, %v508_v37  ;;  %v596_v45 = vmul.f32 %v2640_v36, %v2569_v42 }
 0x118   :  { %v2647_v51 = vpop.eup %1809  ;;  %v821_v18 = vadd.f32 %v2615_v61, %v786_v60  ;;  %v822_v27 = vadd.f32 %v2615_v61, %v787_v11  ;;  %vm432_vm6 = vweird.f32 %v2561_v17  ;;  %v677_v16 = vmul.f32 %v2630_v0, %v676_v50 }
 0x119   :  { %v606_v3 = vmul.f32 %v2647_v51, %v2576_v53  ;;  %v795_v12 = vmul.f32 %v2589_v4, %v760_v29  ;;  %v2659_v30 = vmul.f32 %v424_v47, %v2255_v40  ;;  %vm512_vm8 = vweird.f32 %v2571_v23  ;;  %vm2688_vm9 = vmor %vm431_vm3, %vm432_vm6 }
 0x11a   :  { %v597_v60 = vmul.f32 %v2640_v36, %v596_v45  ;;  %1813 = vrsqrt.f32 %v2638_v54  ;;  %v317_v11 = vpop.xlane.xlu0 %316  ;;  %v504_v40 = vsel %vm2665_vm7, %v2529_v41, %v500_v57  ;;  %v430_v29 = vmul.f32 %v2561_v17, %v429_v62  ;;  %v287_v44 = vpop.xlane.xlu1 %286  ;;  %vm2706_vm12 = vmor %vm511_vm5, %vm512_vm8 }
 0x11b   :  { %v607_v34 = vmul.f32 %v2647_v51, %v606_v3  ;;  %1815 = vrsqrt.f32 %v2645_v28  ;;  %v510_v47 = vmul.f32 %v2571_v23, %v509_v2  ;;  %v678_v50 = vmul.f32 0.5, %v677_v16  ;;  %v290_v57 = vpop.xlane.xlu2 %289 }
 0x11c   :  { %v598_v10 = vmul.f32 0.5, %v597_v60  ;;  %v845_v43 = vpack.c.bf16 %v822_v27, %v821_v18  ;;  %v829_v63 = vadd.f32 %v2615_v61, %v794_v33  ;;  %v830_v37 = vadd.f32 %v2615_v61, %v795_v12 }
 0x11d   :  { %v2679_v45 = vpop.eup %1811  ;;  %v608_v56 = vmul.f32 0.5, %v607_v34  ;;  %v371_v41 = vmul.f32 %v317_v11, %v2237_v15  ;;  %vm681_vm10 = vweird.f32 %v2559_v55  ;;  %vm601_vm11 = vweird.f32 %v2569_v42 }
 0x11e   :  { %v446_v33 = vmul.f32 %v2679_v45, %v2627_v24  ;;  %1735 = vmatmul.msk.bf16.vlgmr.msra.gmra.mxu2 %vm55_vm0, %v845_v43  ;;  %v361_v2 = vmul.f32 %v287_v44, %v2237_v15  ;;  %v743_v18 = vmul.f32 %v504_v40, %v2284_v8  ;;  %v434_v48 = vsel %vm2688_vm9, %v2561_v17, %v430_v29 }
 0x11f   :  { %v599_v16 = vsub.f32 1.5, %v598_v10  ;;  %vm611_vm13 = vweird.f32 %v2576_v53  ;;  %v849_v43 = vpack.c.bf16 %v830_v37, %v829_v63  ;;  %v514_v8 = vsel %vm2706_vm12, %v2571_v23, %v510_v47 }
 0x120   :  { %v2711_v3 = vpop.eup %1813  ;;  %v679_v12 = vsub.f32 1.5, %v678_v50  ;;  %v447_v17 = vmul.f32 %v2679_v45, %v446_v33  ;;  %v2717_v60 = vadd.f32 1e-05, %v371_v41  ;;  %vm682_vm14 = vweird.f32 %v2630_v0 }
 0x121   :  { %v2719_v6 = vpop.eup %1815  ;;  %v609_v11 = vsub.f32 1.5, %v608_v56  ;;  %v686_v10 = vmul.f32 %v2711_v3, %v2638_v54  ;;  %1739 = vmatmul.msk.bf16.vlgmr.msra.gmra.mxu3 %vm55_vm0, %v849_v43  ;;  %v2725_v63 = vadd.f32 1e-05, %v361_v2  ;;  %v736_v40 = vmul.f32 %v434_v48, %v2273_v58  ;;  %vm2761_vm5 = vmor %vm681_vm10, %vm682_vm14 }
 0x122   :  { %vm602_vm15 = vweird.f32 %v2640_v36  ;;  %v436_v23 = vmul.f32 %v2719_v6, %v2645_v28  ;;  %v362_v29 = vmul.f32 %v290_v57, %v2237_v15  ;;  %v744_v34 = vmul.f32 %v514_v8, %v2281_v9  ;;  %v344_v2 = vpop.xlane.xlu0 %343  ;;  %v320_v43 = vpop.xlane.xlu1 %319 }
 0x123   :  { %v600_v56 = vmul.f32 %v2640_v36, %v599_v16  ;;  %vm612_vm1 = vweird.f32 %v2647_v51  ;;  %v687_v44 = vmul.f32 %v2711_v3, %v686_v10  ;;  %v2737_v47 = vmul.f32 %v2630_v0, %v679_v12  ;;  %vm2748_vm3 = vmor %vm601_vm11, %vm602_vm15  ;;  %v341_v8 = vpop.xlane.xlu2 %340 }
 0x124   :  { %v448_v50 = vmul.f32 0.5, %v447_v17  ;;  %v437_v58 = vmul.f32 %v2719_v6, %v436_v23  ;;  %1817 = vrsqrt.f32 %v2717_v60  ;;  %v610_v37 = vmul.f32 %v2647_v51, %v609_v11  ;;  %vm2780_vm7 = vmor %vm611_vm13, %vm612_vm1 }
 0x125   :  { %v688_v41 = vmul.f32 0.5, %v687_v44  ;;  %vm441_vm2 = vweird.f32 %v2645_v28  ;;  %1819 = vrsqrt.f32 %v2725_v63  ;;  %vm452_vm4 = vweird.f32 %v2679_v45 }
 0x126   :  { %v438_v57 = vmul.f32 0.5, %v437_v58  ;;  %v2753_v62 = vadd.f32 1e-05, %v362_v29  ;;  %v770_v33 = vmul.f32 %v2589_v4, %v2659_v30  ;;  %v604_v42 = vsel %vm2748_vm3, %v2640_v36, %v600_v56 }
 0x127   :  { %vm451_vm6 = vweird.f32 %v2627_v24  ;;  %v771_v27 = vmul.f32 %v2589_v4, %v736_v40  ;;  %v778_v16 = vmul.f32 %v2589_v4, %v743_v18  ;;  %v779_v30 = vmul.f32 %v2589_v4, %v744_v34 }
 0x128   :  { %v684_v55 = vsel %vm2761_vm5, %v2630_v0, %v2737_v47  ;;  %v449_v12 = vsub.f32 1.5, %v448_v50  ;;  %vm691_vm8 = vweird.f32 %v2638_v54  ;;  %v439_v18 = vsub.f32 1.5, %v438_v57  ;;  %vm2839_vm12 = vmor %vm451_vm6, %vm452_vm4 }
 0x129   :  { %1821 = vrsqrt.f32 %v2753_v62  ;;  %v614_v17 = vsel %vm2780_vm7, %v2647_v51, %v610_v37  ;;  %v689_v11 = vsub.f32 1.5, %v688_v41  ;;  %v805_v0 = vadd.f32 %v2615_v61, %v770_v33 }
 0x12a   :  { %v806_v10 = vadd.f32 %v2615_v61, %v771_v27  ;;  %v2791_v53 = vpop.eup %1817  ;;  %v753_v40 = vmul.f32 %v604_v42, %v2294_v21  ;;  %v813_v23 = vadd.f32 %v2615_v61, %v778_v16  ;;  %v814_v29 = vadd.f32 %v2615_v61, %v779_v30 }
 0x12b   :  { %v380_v34 = vmul.f32 %v344_v2, %v2237_v15  ;;  %v2797_v56 = vpop.eup %1819  ;;  %v440_v44 = vmul.f32 %v2719_v6, %v439_v18  ;;  %vm442_vm9 = vweird.f32 %v2719_v6  ;;  %v616_v51 = vmul.f32 %v2791_v53, %v2717_v60  ;;  %v293_v18 = vpop.xlane.xlu0 %292 }
 0x12c   :  { %v837_v47 = vpack.c.bf16 %v806_v10, %v805_v0  ;;  %v754_v50 = vmul.f32 %v614_v17, %v2305_v14  ;;  %v450_v21 = vmul.f32 %v2679_v45, %v449_v12  ;;  %vm692_vm10 = vweird.f32 %v2711_v3  ;;  %vm2817_vm11 = vmor %vm441_vm2, %vm442_vm9  ;;  %v272_v0 = vpop.xlane.xlu2 %271 }
 0x12d   :  { %v516_v58 = vmul.f32 %v2797_v56, %v2725_v63  ;;  %v690_v37 = vmul.f32 %v2711_v3, %v689_v11  ;;  %v617_v41 = vmul.f32 %v2791_v53, %v616_v51  ;;  %v841_v9 = vpack.c.bf16 %v814_v29, %v813_v23  ;;  %vm2851_vm13 = vmor %vm691_vm8, %vm692_vm10  ;;  %v269_v11 = vpop.xlane.xlu1 %268 }
 0x12e   :  { %1727 = vmatmul.msk.bf16.vlgmr.msra.gmra.mxu0 %vm55_vm0, %v837_v47  ;;  %v2811_v57 = vadd.f32 1e-05, %v380_v34  ;;  %v372_v48 = vmul.f32 %v320_v43, %v2237_v15  ;;  %v379_v42 = vmul.f32 %v341_v8, %v2237_v15  ;;  %v788_v27 = vmul.f32 %v2589_v4, %v753_v40 }
 0x12f   :  { %v2813_v33 = vpop.eup %1821  ;;  %v517_v2 = vmul.f32 %v2797_v56, %v516_v58  ;;  %v444_v16 = vsel %vm2817_vm11, %v2719_v6, %v440_v44  ;;  %v618_v30 = vmul.f32 0.5, %v617_v41  ;;  %1731 = vmatmul.msk.bf16.vlgmr.msra.gmra.mxu1 %vm55_vm0, %v841_v9  ;;  %v2833_v36 = vmul.f32 %v684_v55, %v2302_v39 }
 0x130   :  { %v526_v28 = vmul.f32 %v2813_v33, %v2753_v62  ;;  %1823 = vrsqrt.f32 %v2811_v57  ;;  %v2843_v8 = vadd.f32 1e-05, %v372_v48  ;;  %v2845_v12 = vadd.f32 1e-05, %v379_v42 }
 0x131   :  { %v518_v6 = vmul.f32 0.5, %v517_v2  ;;  %vm621_vm14 = vweird.f32 %v2717_v60  ;;  %v789_v55 = vmul.f32 %v2589_v4, %v754_v50  ;;  %v823_v17 = vadd.f32 %v2615_v61, %v788_v27 }
 0x132   :  { %v527_v24 = vmul.f32 %v2813_v33, %v526_v28  ;;  %v454_v10 = vsel %vm2839_vm12, %v2679_v45, %v450_v21  ;;  %v694_v54 = vsel %vm2851_vm13, %v2711_v3, %v690_v37  ;;  %v737_v40 = vmul.f32 %v444_v16, %v2326_v20 }
 0x133   :  { %1825 = vrsqrt.f32 %v2843_v8  ;;  %v619_v23 = vsub.f32 1.5, %v618_v30  ;;  %v824_v34 = vadd.f32 %v2615_v61, %v789_v55  ;;  %v519_v44 = vsub.f32 1.5, %v518_v6 }
 0x134   :  { %v528_v29 = vmul.f32 0.5, %v527_v24  ;;  %1827 = vrsqrt.f32 %v2845_v12  ;;  %v363_v51 = vmul.f32 %v293_v18, %v2237_v15  ;;  %v355_v47 = vmul.f32 %v269_v11, %v2237_v15 }
 0x135   :  { %v356_v45 = vmul.f32 %v272_v0, %v2237_v15  ;;  %v738_v3 = vmul.f32 %v454_v10, %v2323_v7  ;;  %vm521_vm15 = vweird.f32 %v2725_v63  ;;  %vm531_vm1 = vweird.f32 %v2753_v62  ;;  %v326_v63 = vpop.xlane.xlu0 %325 }
 0x136   :  { %v2872_v50 = vpop.eup %1823  ;;  %v846_v20 = vpack.c.bf16 %v824_v34, %v823_v17  ;;  %v762_v21 = vmul.f32 %v694_v54, %v2315_v46  ;;  %vm622_vm2 = vweird.f32 %v2791_v53  ;;  %v529_v58 = vsub.f32 1.5, %v528_v29  ;;  %v296_v17 = vpop.xlane.xlu1 %295 }
 0x137   :  { %v706_v37 = vmul.f32 %v2872_v50, %v2811_v57  ;;  %v620_v41 = vmul.f32 %v2791_v53, %v619_v23  ;;  %v2883_v9 = vadd.f32 1e-05, %v363_v51  ;;  %v2885_v7 = vadd.f32 1e-05, %v355_v47  ;;  %vm2906_vm5 = vmor %vm621_vm14, %vm622_vm2 }
 0x138   :  { %1736 = vmatmul.msk.bf16.gmra.mxu2 %vm55_vm0, %v846_v20  ;;  %v772_v14 = vmul.f32 %v2589_v4, %v737_v40  ;;  %v520_v46 = vmul.f32 %v2797_v56, %v519_v44  ;;  %vm522_vm3 = vweird.f32 %v2797_v56  ;;  %v2893_v42 = vadd.f32 1e-05, %v356_v45 }
 0x139   :  { %v2888_v2 = vpop.eup %1825  ;;  %v707_v48 = vmul.f32 %v2872_v50, %v706_v37  ;;  %vm532_vm4 = vweird.f32 %v2813_v33  ;;  %1829 = vrsqrt.f32 %v2883_v9  ;;  %v773_v30 = vmul.f32 %v2589_v4, %v738_v3  ;;  %vm2919_vm7 = vmor %vm521_vm15, %vm522_vm3 }
 0x13a   :  { %v2895_v27 = vpop.eup %1827  ;;  %v626_v16 = vmul.f32 %v2888_v2, %v2843_v8  ;;  %v530_v43 = vmul.f32 %v2813_v33, %v529_v58  ;;  %vm711_vm6 = vweird.f32 %v2811_v57  ;;  %v624_v39 = vsel %vm2906_vm5, %v2791_v53, %v620_v41  ;;  %vm2935_vm8 = vmor %vm531_vm1, %vm532_vm4 }
 0x13b   :  { %v708_v6 = vmul.f32 0.5, %v707_v48  ;;  %v696_v18 = vmul.f32 %v2895_v27, %v2845_v12  ;;  %1831 = vrsqrt.f32 %v2885_v7  ;;  %v807_v55 = vadd.f32 %v2615_v61, %v772_v14 }
 0x13c   :  { %v627_v24 = vmul.f32 %v2888_v2, %v626_v16  ;;  %v524_v11 = vsel %vm2919_vm7, %v2797_v56, %v520_v46  ;;  %1833 = vrsqrt.f32 %v2893_v42  ;;  %vm631_vm9 = vweird.f32 %v2843_v8 }
 0x13d   :  { %v709_v0 = vsub.f32 1.5, %v708_v6  ;;  %v697_v53 = vmul.f32 %v2895_v27, %v696_v18  ;;  %v808_v40 = vadd.f32 %v2615_v61, %v773_v30  ;;  %v796_v56 = vmul.f32 %v2589_v4, %v2833_v36 }
 0x13e   :  { %v628_v54 = vmul.f32 0.5, %v627_v24  ;;  %v797_v23 = vmul.f32 %v2589_v4, %v762_v21  ;;  %v2945_v29 = vmul.f32 %v624_v39, %v2344_v13  ;;  %v534_v62 = vsel %vm2935_vm8, %v2813_v33, %v530_v43  ;;  %v323_v21 = vpop.xlane.xlu2 %322 }
 0x13f   :  { %v698_v34 = vmul.f32 0.5, %v697_v53  ;;  %v364_v44 = vmul.f32 %v296_v17, %v2237_v15  ;;  %v2951_v51 = vpop.eup %1829  ;;  %v838_v45 = vpack.c.bf16 %v808_v40, %v807_v55  ;;  %v831_v3 = vadd.f32 %v2615_v61, %v796_v56  ;;  %v347_v53 = vpop.xlane.xlu1 %346 }
 0x140   :  { %v629_v47 = vsub.f32 1.5, %v628_v54  ;;  %v832_v36 = vadd.f32 %v2615_v61, %v797_v23  ;;  %v745_v20 = vmul.f32 %v524_v11, %v2336_v5  ;;  %v710_v13 = vmul.f32 %v2872_v50, %v709_v0 }
 0x141   :  { %vm712_vm10 = vweird.f32 %v2872_v50  ;;  %vm701_vm11 = vweird.f32 %v2845_v12  ;;  %v536_v33 = vmul.f32 %v2951_v51, %v2883_v9  ;;  %v2961_v58 = vpop.eup %1831  ;;  %v699_v37 = vsub.f32 1.5, %v698_v34  ;;  %1728 = vmatmul.msk.bf16.gmra.mxu0 %vm55_vm0, %v838_v45 }
 0x142   :  { %v850_v41 = vpack.c.bf16 %v832_v36, %v831_v3  ;;  %v2964_v14 = vadd.f32 1e-05, %v364_v44  ;;  %v374_v5 = vmul.f32 %v326_v63, %v2237_v15  ;;  %v2967_v46 = vpop.eup %1833  ;;  %v746_v48 = vmul.f32 %v534_v62, %v2347_v26  ;;  %vm2978_vm13 = vmor %vm711_vm6, %vm712_vm10  ;;  %v275_v63 = vpop.xlane.xlu0 %274 }
 0x143   :  { %vm632_vm12 = vweird.f32 %v2888_v2  ;;  %v537_v16 = vmul.f32 %v2951_v51, %v536_v33  ;;  %v456_v30 = vmul.f32 %v2961_v58, %v2885_v7  ;;  %v630_v43 = vmul.f32 %v2888_v2, %v629_v47 }
 0x144   :  { %vm702_vm14 = vweird.f32 %v2895_v27  ;;  %v466_v26 = vmul.f32 %v2967_v46, %v2893_v42  ;;  %1740 = vmatmul.msk.bf16.gmra.mxu3 %vm55_vm0, %v850_v41  ;;  %1835 = vrsqrt.f32 %v2964_v14  ;;  %v714_v6 = vsel %vm2978_vm13, %v2872_v50, %v710_v13  ;;  %vm3003_vm3 = vmor %vm631_vm9, %vm632_vm12 }
 0x145   :  { %v538_v57 = vmul.f32 0.5, %v537_v16  ;;  %vm541_vm15 = vweird.f32 %v2883_v9  ;;  %v457_v18 = vmul.f32 %v2961_v58, %v456_v30  ;;  %v700_v39 = vmul.f32 %v2895_v27, %v699_v37  ;;  %vm3025_vm5 = vmor %vm701_vm11, %vm702_vm14 }
 0x146   :  { %vm542_vm1 = vweird.f32 %v2951_v51  ;;  %vm461_vm2 = vweird.f32 %v2885_v7  ;;  %v467_v60 = vmul.f32 %v2967_v46, %v466_v26  ;;  %v2997_v24 = vadd.f32 1e-05, %v374_v5  ;;  %v350_v13 = vpop.xlane.xlu2 %349 }
 0x147   :  { %v539_v55 = vsub.f32 1.5, %v538_v57  ;;  %v458_v17 = vmul.f32 0.5, %v457_v18  ;;  %v373_v11 = vmul.f32 %v323_v21, %v2237_v15  ;;  %v780_v0 = vmul.f32 %v2589_v4, %v745_v20  ;;  %vm3044_vm7 = vmor %vm541_vm15, %vm542_vm1  ;;  %v278_v50 = vpop.xlane.xlu1 %277 }
 0x148   :  { %v634_v10 = vsel %vm3003_vm3, %v2888_v2, %v630_v43  ;;  %v468_v54 = vmul.f32 0.5, %v467_v60  ;;  %vm471_vm4 = vweird.f32 %v2893_v42  ;;  %1837 = vrsqrt.f32 %v2997_v24 }
 0x149   :  { %v781_v8 = vmul.f32 %v2589_v4, %v746_v48  ;;  %v540_v40 = vmul.f32 %v2951_v51, %v539_v55  ;;  %v459_v56 = vsub.f32 1.5, %v458_v17  ;;  %v3016_v23 = vadd.f32 1e-05, %v373_v11 }
 0x14a   :  { %v815_v62 = vadd.f32 %v2615_v61, %v780_v0  ;;  %v3019_v34 = vpop.eup %1835  ;;  %v469_v44 = vsub.f32 1.5, %v468_v54  ;;  %v381_v45 = vmul.f32 %v347_v53, %v2237_v15  ;;  %v357_v3 = vmul.f32 %v275_v63, %v2237_v15 }
 0x14b   :  { %v816_v47 = vadd.f32 %v2615_v61, %v781_v8  ;;  %v764_v36 = vmul.f32 %v714_v6, %v2365_v19  ;;  %v704_v20 = vsel %vm3025_vm5, %v2895_v27, %v700_v39  ;;  %vm462_vm6 = vweird.f32 %v2961_v58 }
 0x14c   :  { %v546_v12 = vmul.f32 %v3019_v34, %v2964_v14  ;;  %v756_v33 = vmul.f32 %v634_v10, %v2357_v35  ;;  %v460_v19 = vmul.f32 %v2961_v58, %v459_v56  ;;  %vm472_vm8 = vweird.f32 %v2967_v46  ;;  %vm3068_vm9 = vmor %vm461_vm2, %vm462_vm6  ;;  %v302_v56 = vpop.xlane.xlu0 %301 }
 0x14d   :  { %1839 = vrsqrt.f32 %v3016_v23  ;;  %v544_v27 = vsel %vm3044_vm7, %v2951_v51, %v540_v40  ;;  %v842_v37 = vpack.c.bf16 %v816_v47, %v815_v62  ;;  %v3055_v41 = vadd.f32 1e-05, %v381_v45  ;;  %vm3090_vm12 = vmor %vm471_vm4, %vm472_vm8 }
 0x14e   :  { %v547_v35 = vmul.f32 %v3019_v34, %v546_v12  ;;  %v3057_v9 = vpop.eup %1837  ;;  %v763_v5 = vmul.f32 %v704_v20, %v2368_v32  ;;  %v470_v48 = vmul.f32 %v2967_v46, %v469_v44  ;;  %v3061_v16 = vadd.f32 1e-05, %v357_v3 }
 0x14f   :  { %v382_v30 = vmul.f32 %v350_v13, %v2237_v15  ;;  %vm551_vm10 = vweird.f32 %v2964_v14  ;;  %vm552_vm11 = vweird.f32 %v3019_v34  ;;  %v646_v32 = vmul.f32 %v3057_v9, %v2997_v24  ;;  %1732 = vmatmul.msk.bf16.gmra.mxu1 %vm55_vm0, %v842_v37 }
 0x150   :  { %v548_v28 = vmul.f32 0.5, %v547_v35  ;;  %v3078_v43 = vmul.f32 %v544_v27, %v2386_v25  ;;  %v464_v7 = vsel %vm3068_vm9, %v2961_v58, %v460_v19  ;;  %1841 = vrsqrt.f32 %v3055_v41  ;;  %vm3121_vm15 = vmor %vm551_vm10, %vm552_vm11  ;;  %v299_v35 = vpop.xlane.xlu2 %298 }
 0x151   :  { %v3084_v26 = vadd.f32 1e-05, %v382_v30  ;;  %v647_v25 = vmul.f32 %v3057_v9, %v646_v32  ;;  %vm651_vm13 = vweird.f32 %v2997_v24  ;;  %1843 = vrsqrt.f32 %v3061_v16 }
 0x152   :  { %v549_v57 = vsub.f32 1.5, %v548_v28  ;;  %v790_v58 = vmul.f32 %v2589_v4, %v2945_v29  ;;  %v474_v42 = vsel %vm3090_vm12, %v2967_v46, %v470_v48  ;;  %v791_v39 = vmul.f32 %v2589_v4, %v756_v33 }
 0x153   :  { %v3099_v18 = vpop.eup %1839  ;;  %1845 = vrsqrt.f32 %v3084_v26  ;;  %v798_v60 = vmul.f32 %v2589_v4, %v763_v5  ;;  %v739_v55 = vmul.f32 %v464_v7, %v2378_v59  ;;  %v648_v11 = vmul.f32 0.5, %v647_v25 }
 0x154   :  { %v550_v17 = vmul.f32 %v3019_v34, %v549_v57  ;;  %v636_v29 = vmul.f32 %v3099_v18, %v3016_v23  ;;  %vm641_vm14 = vweird.f32 %v3016_v23  ;;  %v825_v0 = vadd.f32 %v2615_v61, %v790_v58 }
 0x155   :  { %v826_v46 = vadd.f32 %v2615_v61, %v791_v39  ;;  %v799_v53 = vmul.f32 %v2589_v4, %v764_v36  ;;  %v833_v63 = vadd.f32 %v2615_v61, %v798_v60  ;;  %v740_v10 = vmul.f32 %v474_v42, %v2389_v38 }
 0x156   :  { %v649_v54 = vsub.f32 1.5, %v648_v11  ;;  %v637_v8 = vmul.f32 %v3099_v18, %v636_v29  ;;  %v358_v40 = vmul.f32 %v278_v50, %v2237_v15  ;;  %v1842_v62 = vpop.eup %1841  ;;  %v554_v2 = vsel %vm3121_vm15, %v3019_v34, %v550_v17 }
 0x157   :  { %vm652_vm1 = vweird.f32 %v3057_v9  ;;  %v847_v38 = vpack.c.bf16 %v826_v46, %v825_v0  ;;  %v834_v14 = vadd.f32 %v2615_v61, %v799_v53  ;;  %v3132_v44 = vpop.eup %1843  ;;  %vm642_vm2 = vweird.f32 %v3099_v18 }
 0x158   :  { %v650_v47 = vmul.f32 %v3057_v9, %v649_v54  ;;  %v638_v45 = vmul.f32 0.5, %v637_v8  ;;  %v716_v3 = vmul.f32 %v1842_v62, %v3055_v41  ;;  %vm721_vm3 = vweird.f32 %v3055_v41  ;;  %vm3151_vm5 = vmor %vm651_vm13, %vm652_vm1 }
 0x159   :  { %v1846_v36 = vpop.eup %1845  ;;  %v476_v34 = vmul.f32 %v3132_v44, %v3061_v16  ;;  %1737 = vmatmul.msk.bf16.gmra.mxu2 %vm55_vm0, %v847_v38  ;;  %v851_v20 = vpack.c.bf16 %v834_v14, %v833_v63  ;;  %v3141_v12 = vadd.f32 1e-05, %v358_v40  ;;  %v366_v13 = vmul.f32 %v302_v56, %v2237_v15  ;;  %vm3167_vm8 = vmor %vm641_vm14, %vm642_vm2 }
 0x15a   :  { %v748_v33 = vmul.f32 %v554_v2, %v2399_v22  ;;  %v639_v21 = vsub.f32 1.5, %v638_v45  ;;  %v717_v19 = vmul.f32 %v1842_v62, %v716_v3  ;;  %v726_v27 = vmul.f32 %v1846_v36, %v3084_v26 }
 0x15b   :  { %vm731_vm4 = vweird.f32 %v3084_v26  ;;  %vm722_vm6 = vweird.f32 %v1842_v62  ;;  %v477_v5 = vmul.f32 %v3132_v44, %v476_v34  ;;  %vm482_vm7 = vweird.f32 %v3132_v44  ;;  %1741 = vmatmul.msk.bf16.gmra.mxu3 %vm55_vm0, %v851_v20 }
 0x15c   :  { %1847 = vrsqrt.f32 %v3141_v12  ;;  %v654_v22 = vsel %vm3151_vm5, %v3057_v9, %v650_v47  ;;  %v640_v48 = vmul.f32 %v3099_v18, %v639_v21  ;;  %v718_v24 = vmul.f32 0.5, %v717_v19  ;;  %vm723_vm10 = vmor %vm721_vm3, %vm722_vm6 }
 0x15d   :  { %v727_v30 = vmul.f32 %v1846_v36, %v726_v27  ;;  %v478_v28 = vmul.f32 0.5, %v477_v5  ;;  %v3171_v32 = vadd.f32 1e-05, %v366_v13  ;;  %v365_v7 = vmul.f32 %v299_v35, %v2237_v15 }
 0x15e   :  { %v774_v6 = vmul.f32 %v2589_v4, %v739_v55  ;;  %v644_v9 = vsel %vm3167_vm8, %v3099_v18, %v640_v48  ;;  %v719_v57 = vsub.f32 1.5, %v718_v24  ;;  %v775_v58 = vmul.f32 %v2589_v4, %v740_v10  ;;  %v4049_v48 = vld [vmem:[#allocation4_spill] sm:$0xff] }
 0x15f   :  { %v728_v25 = vmul.f32 0.5, %v727_v30  ;;  %v758_v23 = vmul.f32 %v654_v22, %v2413_v1  ;;  %v479_v42 = vsub.f32 1.5, %v478_v28  ;;  %vm732_vm9 = vweird.f32 %v1846_v36 }
 0x160   :  { %1849 = vrsqrt.f32 %v3171_v32  ;;  %v720_v39 = vmul.f32 %v1842_v62, %v719_v57  ;;  %v3181_v50 = vadd.f32 1e-05, %v365_v7  ;;  %v809_v15 = vadd.f32 %v2615_v61, %v774_v6  ;;  %vm733_vm11 = vmor %vm731_vm4, %vm732_vm9 }
 0x161   :  { %v729_v60 = vsub.f32 1.5, %v728_v25  ;;  %v757_v17 = vmul.f32 %v644_v9, %v2407_v31  ;;  %v810_v18 = vadd.f32 %v2615_v61, %v775_v58  ;;  %v782_v1 = vmul.f32 %v2589_v4, %v3078_v43  ;;  %v4050_v9 = vld [vmem:[#allocation5_spill] sm:$0xff] }
 0x162   :  { %v1848_v55 = vpop.eup %1847  ;;  %v783_v11 = vmul.f32 %v2589_v4, %v748_v33  ;;  %v724_v29 = vsel %vm723_vm10, %v1842_v62, %v720_v39  ;;  %v480_v0 = vmul.f32 %v3132_v44, %v479_v42  ;;  %1851 = vrsqrt.f32 %v3181_v50 }
 0x163   :  { %v730_v46 = vmul.f32 %v1846_v36, %v729_v60  ;;  %v486_v53 = vmul.f32 %v1848_v55, %v3141_v12  ;;  %v765_v63 = vmul.f32 %v724_v29, %v2420_v52  ;;  %vm481_vm12 = vweird.f32 %v3061_v16  ;;  %v4051_v60 = vld [vmem:[#allocation3_spill] sm:$0xff] }
 0x164   :  { %v839_v43 = vpack.c.bf16 %v810_v18, %v809_v15  ;;  %vm3202_vm13 = vmor %vm481_vm12, %vm482_vm7  ;;  %v817_v54 = vadd.f32 %v2615_v61, %v782_v1  ;;  %v818_v26 = vadd.f32 %v2615_v61, %v783_v11  ;;  %v792_v8 = vmul.f32 %v2589_v4, %v757_v17 }
 0x165   :  { %v734_v31 = vsel %vm733_vm11, %v1846_v36, %v730_v46  ;;  %v487_v41 = vmul.f32 %v1848_v55, %v486_v53  ;;  %v484_v16 = vsel %vm3202_vm13, %v3132_v44, %v480_v0  ;;  %v793_v62 = vmul.f32 %v2589_v4, %v758_v23  ;;  %v4048_v36 = vld [vmem:[#allocation2_spill] sm:$0xff] }
 0x166   :  { %v1850_v10 = vpop.eup %1849  ;;  %v766_v52 = vmul.f32 %v734_v31, %v2429_v49  ;;  %1729 = vmatmul.msk.bf16.gmra.mxu0 %vm55_vm0, %v839_v43  ;;  %v843_v2 = vpack.c.bf16 %v818_v26, %v817_v54  ;;  %v827_v49 = vadd.f32 %v2615_v61, %v792_v8  ;;  %v800_v38 = vmul.f32 %v2589_v4, %v765_v63 }
 0x167   :  { %v488_v40 = vmul.f32 0.5, %v487_v41  ;;  %v566_v56 = vmul.f32 %v1850_v10, %v3171_v32  ;;  %vm492_vm14 = vweird.f32 %v1848_v55  ;;  %v828_v3 = vadd.f32 %v2615_v61, %v793_v62 }
 0x168   :  { %v801_v14 = vmul.f32 %v2589_v4, %v766_v52  ;;  %v1852_v44 = vpop.eup %1851  ;;  %v741_v34 = vmul.f32 %v484_v16, %v4048_v36  ;;  %1733 = vmatmul.msk.bf16.gmra.mxu1 %vm55_vm0, %v843_v2  ;;  %v835_v20 = vadd.f32 %v2615_v61, %v800_v38  ;;  %vm491_vm15 = vweird.f32 %v3141_v12 }
 0x169   :  { %v489_v47 = vsub.f32 1.5, %v488_v40  ;;  %v567_v45 = vmul.f32 %v1850_v10, %v566_v56  ;;  %v556_v19 = vmul.f32 %v1852_v44, %v3181_v50  ;;  %vm493_vm1 = vmor %vm491_vm15, %vm492_vm14  ;;  %v848_v27 = vpack.c.bf16 %v828_v3, %v827_v49 }
 0x16a   :  { %v836_v13 = vadd.f32 %v2615_v61, %v801_v14  ;;  %vm572_vm2 = vweird.f32 %v1850_v10  ;;  %v776_v30 = vmul.f32 %v2589_v4, %v741_v34  ;;  %vm571_vm3 = vweird.f32 %v3171_v32 }
 0x16b   :  { %v490_v33 = vmul.f32 %v1848_v55, %v489_v47  ;;  %v568_v21 = vmul.f32 0.5, %v567_v45  ;;  %v557_v22 = vmul.f32 %v1852_v44, %v556_v19  ;;  %1738 = vmatmul.msk.bf16.gmra.mxu2 %vm55_vm0, %v848_v27  ;;  %vm573_vm4 = vmor %vm571_vm3, %vm572_vm2  ;;  %vm562_vm5 = vweird.f32 %v1852_v44 }
 0x16c   :  { %v852_v35 = vpack.c.bf16 %v836_v13, %v835_v20  ;;  %v811_v25 = vadd.f32 %v2615_v61, %v776_v30  ;;  %vm561_vm6 = vweird.f32 %v3181_v50  ;;  %v3246_v50 = vld [vmem:[%s3984_s4] ss:$0 sm:$0xff]  ;;  %vm1682_vm10 = vcmask 60416  }
 0x16d   :  { %v494_v37 = vsel %vm493_vm1, %v1848_v55, %v490_v33  ;;  %v569_v5 = vsub.f32 1.5, %v568_v21  ;;  %v558_v12 = vmul.f32 0.5, %v557_v22  ;;  %vm563_vm7 = vmor %vm561_vm6, %vm562_vm5 }
 0x16e   :  { %v742_v24 = vmul.f32 %v494_v37, %v4049_v48  ;;  %1742 = vmatmul.msk.bf16.gmra.mxu3 %vm55_vm0, %v852_v35 }
 0x16f   :  { %v570_v51 = vmul.f32 %v1850_v10, %v569_v5  ;;  %v559_v6 = vsub.f32 1.5, %v558_v12 }
 0x170   :  { %v777_v28 = vmul.f32 %v2589_v4, %v742_v24 }
 0x171   :  { %v574_v7 = vsel %vm573_vm4, %v1850_v10, %v570_v51  ;;  %v560_v23 = vmul.f32 %v1852_v44, %v559_v6 }
 0x172   :  { %v750_v57 = vmul.f32 %v574_v7, %v4050_v9  ;;  %v812_v58 = vadd.f32 %v2615_v61, %v777_v28 }
 0x173   :  { %v564_v39 = vsel %vm563_vm7, %v1852_v44, %v560_v23 }
 0x174   :  { %v840_v42 = vpack.c.bf16 %v812_v58, %v811_v25  ;;  %v785_v32 = vmul.f32 %v2589_v4, %v750_v57  ;;  %v749_v15 = vmul.f32 %v564_v39, %v4051_v60 }
 0x176   :  { %1730 = vmatmul.msk.bf16.gmra.mxu0 %vm55_vm0, %v840_v42  ;;  %v784_v55 = vmul.f32 %v2589_v4, %v749_v15  ;;  %v820_v17 = vadd.f32 %v2615_v61, %v785_v32 }
 0x178   :  { %v819_v18 = vadd.f32 %v2615_v61, %v784_v55 }
 0x17a   :  { %v844_v1 = vpack.c.bf16 %v820_v17, %v819_v18 }
 0x17c   :  { %1734 = vmatmul.msk.bf16.gmra.mxu1 %vm55_vm0, %v844_v1 }
 0x1a1   :  { %v970_v11 = vpop.f32.mrf.mxu2 }
 0x1a2   :  { %v3249_v29 = vadd.f32 %v3246_v50, %v970_v11 }
 0x1a4   :  { %v1759_v0 = vmul.f32 -1.442695, %v3249_v29  ;;  %v990_v46 = vpop.f32.mrf.mxu3 }
 0x1a5   :  { %v3253_v4 = vadd.f32 %v3246_v50, %v990_v46 }
 0x1a6   :  { %1853 = vpow2.f32 %v1759_v0 }
 0x1a7   :  { %v1767_v61 = vmul.f32 -1.442695, %v3253_v4 }
 0x1a9   :  { %1855 = vpow2.f32 %v1767_v61  ;;  %v972_v53 = vpop.f32.mrf.mxu2 }
 0x1aa   :  { %v3257_v31 = vadd.f32 %v3246_v50, %v972_v53 }
 0x1ab   :  { %v930_v63 = vpop.f32.mrf.mxu0 }
 0x1ac   :  { %v3260_v41 = vadd.f32 %v3246_v50, %v930_v63  ;;  %v1854_v43 = vpop.eup %1853  ;;  %v950_v10 = vpop.f32.mrf.mxu1  ;;  %v1760_v59 = vmul.f32 -1.442695, %v3257_v31 }
 0x1ad   :  { %v992_v52 = vpop.f32.mrf.mxu3  ;;  %v1122_v54 = vadd.f32 1.0, %v1854_v43  ;;  %v3265_v8 = vadd.f32 %v3246_v50, %v950_v10 }
 0x1ae   :  { %v1743_v26 = vmul.f32 -1.442695, %v3260_v41  ;;  %v3268_v16 = vadd.f32 %v3246_v50, %v992_v52  ;;  %1857 = vpow2.f32 %v1760_v59 }
 0x1af   :  { %v1856_v40 = vpop.eup %1855  ;;  %1859 = vrcp.f32 %v1122_v54  ;;  %v1751_v62 = vmul.f32 -1.442695, %v3265_v8  ;;  %v1387_v47 = vand.u32 2147483647, %v1122_v54  ;;  %v1389_v45 = vand.u32 2147483648, %v1122_v54 }
 0x1b0   :  { %v3270_v56 = vadd.f32 1.0, %v1856_v40  ;;  %1861 = vpow2.f32 %v1743_v26  ;;  %v1768_v2 = vmul.f32 -1.442695, %v3268_v16  ;;  %vm1383_vm0 = vweird.f32 %v1122_v54 }
 0x1b1   :  { %vm3286_vm8 = vcmp.eq.f32.partialorder %v1387_v47, 8.507059e+37  ;;  %v1390_v5 = vor.u32 1.1754944e-38, %v1389_v45 }
 0x1b2   :  { %1863 = vrcp.f32 %v3270_v56  ;;  %v1507_v44 = vand.u32 2147483647, %v3270_v56  ;;  %v1509_v36 = vand.u32 2147483648, %v3270_v56  ;;  %vm1503_vm9 = vweird.f32 %v3270_v56 }
 0x1b3   :  { %v932_v49 = vpop.f32.mrf.mxu0  ;;  %1865 = vpow2.f32 %v1751_v62 }
 0x1b4   :  { %v3276_v38 = vadd.f32 %v3246_v50, %v932_v49  ;;  %v1858_v14 = vpop.eup %1857  ;;  %1867 = vpow2.f32 %v1768_v2  ;;  %v952_v33 = vpop.f32.mrf.mxu1  ;;  %vm3292_vm11 = vcmp.eq.f32.partialorder %v1507_v44, 8.507059e+37  ;;  %v1510_v30 = vor.u32 1.1754944e-38, %v1509_v36 }
 0x1b5   :  { %v1860_v3 = vpop.eup %1859  ;;  %v3280_v34 = vadd.f32 1.0, %v1858_v14  ;;  %v3298_v51 = vadd.f32 %v3246_v50, %v952_v33 }
 0x1b6   :  { %v1862_v20 = vpop.eup %1861  ;;  %v1379_v13 = vmul.f32 %v1860_v3, %v1122_v54  ;;  %v1744_v19 = vmul.f32 -1.442695, %v3276_v38  ;;  %vm1384_vm12 = vweird.f32 %v1860_v3 }
 0x1b7   :  { %v3282_v21 = vadd.f32 1.0, %v1862_v20  ;;  %1869 = vrcp.f32 %v3280_v34  ;;  %v1402_v6 = vand.u32 2147483647, %v3280_v34  ;;  %v1404_v57 = vand.u32 2147483648, %v3280_v34  ;;  %vm1385_vm14 = vmor %vm1383_vm0, %vm1384_vm12 }
 0x1b8   :  { %v1864_v27 = vpop.eup %1863  ;;  %v1380_v35 = vsub.f32 1.0, %v1379_v13  ;;  %vm1398_vm13 = vweird.f32 %v3280_v34  ;;  %v1752_v15 = vmul.f32 -1.442695, %v3298_v51 }
 0x1b9   :  { %v1866_v22 = vpop.eup %1865  ;;  %v1499_v48 = vmul.f32 %v1864_v27, %v3270_v56  ;;  %1871 = vrcp.f32 %v3282_v21  ;;  %v1147_v23 = vand.u32 2147483647, %v3282_v21  ;;  %v1149_v42 = vand.u32 2147483648, %v3282_v21 }
 0x1ba   :  { %v1868_v12 = vpop.eup %1867  ;;  %v1381_v28 = vmul.f32 %v1860_v3, %v1380_v35  ;;  %v3300_v7 = vadd.f32 1.0, %v1866_v22  ;;  %1873 = vpow2.f32 %v1744_v19  ;;  %vm1504_vm15 = vweird.f32 %v1864_v27 }
 0x1bb   :  { %v1500_v9 = vsub.f32 1.0, %v1499_v48  ;;  %v3304_v25 = vadd.f32 1.0, %v1868_v12  ;;  %vm1143_vm1 = vweird.f32 %v3282_v21  ;;  %vm3315_vm2 = vcmp.eq.f32.partialorder %v1402_v6, 8.507059e+37  ;;  %v3320_v1 = vpop.f32.mrf.mxu2  ;;  %vm1505_vm3 = vmor %vm1503_vm9, %vm1504_vm15 }
 0x1bc   :  { %v1382_v58 = vadd.f32 %v1860_v3, %v1381_v28  ;;  %1875 = vrcp.f32 %v3300_v7  ;;  %v1269_v60 = vand.u32 2147483648, %v3300_v7  ;;  %v1267_v61 = vand.u32 2147483647, %v3300_v7 }
 0x1bd   :  { %v1870_v32 = vpop.eup %1869  ;;  %v1501_v39 = vmul.f32 %v1864_v27, %v1500_v9  ;;  %1877 = vrcp.f32 %v3304_v25  ;;  %v1405_v53 = vor.u32 1.1754944e-38, %v1404_v57  ;;  %vm3330_vm4 = vcmp.eq.f32.partialorder %v1147_v23, 8.507059e+37 }
 0x1be   :  { %v1386_v55 = vsel %vm1385_vm14, %v1860_v3, %v1382_v58  ;;  %v1394_v17 = vmul.f32 %v1870_v32, %v3280_v34  ;;  %v1150_v59 = vor.u32 1.1754944e-38, %v1149_v42  ;;  %vm1263_vm5 = vweird.f32 %v3300_v7  ;;  %v935_v44 = vpop.f32.mrf.mxu0 }
 0x1bf   :  { %v1872_v11 = vpop.eup %1871  ;;  %v1391_v0 = vsel %vm3286_vm8, %v1390_v5, %v1386_v55  ;;  %v1502_v46 = vadd.f32 %v1864_v27, %v1501_v39  ;;  %v1270_v40 = vor.u32 1.1754944e-38, %v1269_v60  ;;  %vm1399_vm6 = vweird.f32 %v1870_v32 }
 0x1c0   :  { %v1634_v63 = vmul.f32 %v1391_v0, %v3249_v29  ;;  %v1139_v43 = vmul.f32 %v1872_v11, %v3282_v21  ;;  %v1395_v52 = vsub.f32 1.0, %v1394_v17  ;;  %v1874_v54 = vpop.eup %1873  ;;  %vm1144_vm7 = vweird.f32 %v1872_v11  ;;  %vm1400_vm8 = vmor %vm1398_vm13, %vm1399_vm6 }
 0x1c1   :  { %v1506_v26 = vsel %vm1505_vm3, %v1864_v27, %v1502_v46  ;;  %vm3339_vm0 = vcmp.eq.f32.partialorder %v1267_v61, 8.507059e+37  ;;  %v1522_v3 = vand.u32 2147483647, %v3304_v25  ;;  %v3349_v33 = vadd.f32 1.0, %v1874_v54  ;;  %vm1145_vm12 = vmor %vm1143_vm1, %vm1144_vm7 }
 0x1c2   :  { %v1876_v62 = vpop.eup %1875  ;;  %v1666_v29 = vpack.c.bf16 %v1634_v63, %v1634_v63  ;;  %v1511_v56 = vsel %vm3292_vm11, %v1510_v30, %v1506_v26  ;;  %v1140_v2 = vsub.f32 1.0, %v1139_v43  ;;  %v1396_v49 = vmul.f32 %v1870_v32, %v1395_v52 }
 0x1c3   :  { %v1642_v14 = vmul.f32 %v1511_v56, %v3253_v4  ;;  %v1259_v47 = vmul.f32 %v1876_v62, %v3300_v7  ;;  %v1878_v36 = vpop.eup %1877  ;;  %v1524_v4 = vand.u32 2147483648, %v3304_v25  ;;  %vm1518_vm9 = vweird.f32 %v3304_v25  ;;  %v977_v6 = vpop.f32.mrf.mxu2 }
 0x1c4   :  { %1699 = vst.msk [vmem:[%s3985_s5 + $0x40] sm:$0xf] %vm1682_vm10, %v1666_v29  ;;  %v1141_v20 = vmul.f32 %v1872_v11, %v1140_v2  ;;  %v1397_v13 = vadd.f32 %v1870_v32, %v1396_v49  ;;  %v1514_v35 = vmul.f32 %v1878_v36, %v3304_v25  ;;  %vm1264_vm11 = vweird.f32 %v1876_v62 }
 0x1c5   :  { %v1674_v19 = vpack.c.bf16 %v1642_v14, %v1642_v14  ;;  %v1260_v27 = vsub.f32 1.0, %v1259_v47  ;;  %1879 = vrcp.f32 %v3349_v33  ;;  %vm3366_vm13 = vcmp.eq.f32.partialorder %v1522_v3, 8.507059e+37  ;;  %vm1265_vm15 = vmor %vm1263_vm5, %vm1264_vm11 }
 0x1c6   :  { %v1142_v37 = vadd.f32 %v1872_v11, %v1141_v20  ;;  %v1401_v5 = vsel %vm1400_vm8, %v1870_v32, %v1397_v13  ;;  %v1515_v48 = vsub.f32 1.0, %v1514_v35  ;;  %v1525_v28 = vor.u32 1.1754944e-38, %v1524_v4  ;;  %v937_v63 = vpop.f32.mrf.mxu0 }
 0x1c7   :  { %1707 = vst.msk [vmem:[%s3985_s5 + $0x60] sm:$0xf] %vm1682_vm10, %v1674_v19  ;;  %v1261_v34 = vmul.f32 %v1876_v62, %v1260_v27  ;;  %v1406_v22 = vsel %vm3315_vm2, %v1405_v53, %v1401_v5  ;;  %1881 = vpow2.f32 %v1752_v15  ;;  %v995_v9 = vpop.f32.mrf.mxu3  ;;  %vm1519_vm14 = vweird.f32 %v1878_v36 }
 0x1c8   :  { %v1146_v30 = vsel %vm1145_vm12, %v1872_v11, %v1142_v37  ;;  %v1635_v12 = vmul.f32 %v1406_v22, %v3257_v31  ;;  %v1516_v58 = vmul.f32 %v1878_v36, %v1515_v48  ;;  %v1162_v32 = vand.u32 2147483647, %v3349_v33  ;;  %vm1520_vm1 = vmor %vm1518_vm9, %vm1519_vm14 }
 0x1c9   :  { %v1151_v21 = vsel %vm3330_vm4, %v1150_v59, %v1146_v30  ;;  %v1262_v57 = vadd.f32 %v1876_v62, %v1261_v34  ;;  %v3380_v31 = vadd.f32 %v3246_v50, %v3320_v1  ;;  %v3383_v15 = vadd.f32 %v3246_v50, %v935_v44 }
 0x1ca   :  { %v1618_v23 = vmul.f32 %v1151_v21, %v3260_v41  ;;  %v1667_v42 = vpack.c.bf16 %v1635_v12, %v1635_v12  ;;  %v1517_v60 = vadd.f32 %v1878_v36, %v1516_v58  ;;  %v3386_v55 = vadd.f32 %v3246_v50, %v977_v6 }
 0x1cb   :  { %v1266_v39 = vsel %vm1265_vm15, %v1876_v62, %v1262_v57  ;;  %v1880_v41 = vpop.eup %1879  ;;  %v1761_v18 = vmul.f32 -1.442695, %v3380_v31  ;;  %v3398_v1 = vadd.f32 %v3246_v50, %v995_v9  ;;  %v1164_v53 = vand.u32 2147483648, %v3349_v33 }
 0x1cc   :  { %v1650_v17 = vpack.c.bf16 %v1618_v23, %v1618_v23  ;;  %v1271_v7 = vsel %vm3339_vm0, %v1270_v40, %v1266_v39  ;;  %1700 = vst.msk [vmem:[%s3985_s5 + $0x44] sm:$0xf] %vm1682_vm10, %v1667_v42  ;;  %v955_v11 = vpop.f32.mrf.mxu1  ;;  %v1521_v46 = vsel %vm1520_vm1, %v1878_v36, %v1517_v60  ;;  %v1154_v61 = vmul.f32 %v1880_v41, %v3349_v33 }
 0x1cd   :  { %v1626_v0 = vmul.f32 %v1271_v7, %v3265_v8  ;;  %v1882_v43 = vpop.eup %1881  ;;  %v1526_v25 = vsel %vm3366_vm13, %v1525_v28, %v1521_v46  ;;  %1883 = vpow2.f32 %v1761_v18  ;;  %v1745_v10 = vmul.f32 -1.442695, %v3383_v15 }
 0x1ce   :  { %1683 = vst.msk [vmem:[%s3985_s5] sm:$0xf] %vm1682_vm10, %v1650_v17  ;;  %v1762_v8 = vmul.f32 -1.442695, %v3386_v55  ;;  %v1643_v52 = vmul.f32 %v1526_v25, %v3268_v16  ;;  %v1155_v54 = vsub.f32 1.0, %v1154_v61  ;;  %v3412_v26 = vadd.f32 1.0, %v1882_v43 }
 0x1cf   :  { %v1658_v59 = vpack.c.bf16 %v1626_v0, %v1626_v0  ;;  %1885 = vpow2.f32 %v1745_v10  ;;  %v1769_v40 = vmul.f32 -1.442695, %v3398_v1  ;;  %v3416_v62 = vadd.f32 %v3246_v50, %v937_v63  ;;  %v997_v49 = vpop.f32.mrf.mxu3 }
 0x1d0   :  { %v3419_v29 = vadd.f32 %v3246_v50, %v955_v11  ;;  %v1675_v56 = vpack.c.bf16 %v1643_v52, %v1643_v52  ;;  %v1156_v2 = vmul.f32 %v1880_v41, %v1155_v54  ;;  %vm1159_vm2 = vweird.f32 %v1880_v41 }
 0x1d1   :  { %1691 = vst.msk [vmem:[%s3985_s5 + $0x20] sm:$0xf] %vm1682_vm10, %v1658_v59  ;;  %1887 = vrcp.f32 %v3412_v26  ;;  %v1746_v16 = vmul.f32 -1.442695, %v3416_v62  ;;  %vm1158_vm3 = vweird.f32 %v3349_v33  ;;  %v1165_v3 = vor.u32 1.1754944e-38, %v1164_v53 }
 0x1d2   :  { %1889 = vpow2.f32 %v1762_v8  ;;  %1708 = vst.msk [vmem:[%s3985_s5 + $0x64] sm:$0xf] %vm1682_vm10, %v1675_v56  ;;  %v1157_v14 = vadd.f32 %v1880_v41, %v1156_v2  ;;  %v1753_v47 = vmul.f32 -1.442695, %v3419_v29  ;;  %vm1160_vm4 = vmor %vm1158_vm3, %vm1159_vm2  ;;  %vm1163_vm5 = vcmp.eq.f32.partialorder %v1162_v32, 8.507059e+37 }
 0x1d3   :  { %1891 = vpow2.f32 %v1769_v40  ;;  %v1884_v45 = vpop.eup %1883  ;;  %v3436_v20 = vadd.f32 %v3246_v50, %v997_v49  ;;  %v1282_v35 = vand.u32 2147483647, %v3412_v26  ;;  %v1284_v34 = vand.u32 2147483648, %v3412_v26 }
 0x1d4   :  { %1893 = vpow2.f32 %v1746_v16  ;;  %v1161_v44 = vsel %vm1160_vm4, %v1880_v41, %v1157_v14  ;;  %v3433_v36 = vadd.f32 1.0, %v1884_v45  ;;  %v957_v19 = vpop.f32.mrf.mxu1  ;;  %vm1278_vm6 = vweird.f32 %v3412_v26 }
 0x1d5   :  { %v1886_v13 = vpop.eup %1885  ;;  %v1166_v4 = vsel %vm1163_vm5, %v1165_v3, %v1161_v44  ;;  %1895 = vpow2.f32 %v1753_v47  ;;  %v1770_v12 = vmul.f32 -1.442695, %v3436_v20  ;;  %v3449_v28 = vadd.f32 %v3246_v50, %v957_v19 }
 0x1d6   :  { %v1619_v33 = vmul.f32 %v1166_v4, %v3276_v38  ;;  %1897 = vrcp.f32 %v3433_v36  ;;  %v3443_v22 = vadd.f32 1.0, %v1886_v13  ;;  %v1417_v9 = vand.u32 2147483647, %v3433_v36 }
 0x1d7   :  { %v1888_v27 = vpop.eup %1887  ;;  %v1419_v21 = vand.u32 2147483648, %v3433_v36  ;;  %vm3459_vm7 = vcmp.eq.f32.partialorder %v1282_v35, 8.507059e+37  ;;  %v1285_v42 = vor.u32 1.1754944e-38, %v1284_v34  ;;  %vm1413_vm8 = vweird.f32 %v3433_v36 }
 0x1d8   :  { %v1890_v37 = vpop.eup %1889  ;;  %v1274_v5 = vmul.f32 %v1888_v27, %v3412_v26  ;;  %v1651_v24 = vpack.c.bf16 %v1619_v33, %v1619_v33  ;;  %1899 = vrcp.f32 %v3443_v22  ;;  %vm1279_vm0 = vweird.f32 %v1888_v27 }
 0x1d9   :  { %v1892_v48 = vpop.eup %1891  ;;  %v3445_v30 = vadd.f32 1.0, %v1890_v37  ;;  %v1177_v60 = vand.u32 2147483647, %v3443_v22  ;;  %v3471_v17 = vmul.f32 -1.442695, %v3449_v28  ;;  %vm3474_vm9 = vcmp.eq.f32.partialorder %v1417_v9, 8.507059e+37  ;;  %vm1280_vm11 = vmor %vm1278_vm6, %vm1279_vm0 }
 0x1da   :  { %v1894_v38 = vpop.eup %1893  ;;  %v1275_v6 = vsub.f32 1.0, %v1274_v5  ;;  %1684 = vst.msk [vmem:[%s3985_s5 + $0x4] sm:$0xf] %vm1682_vm10, %v1651_v24  ;;  %v3464_v32 = vadd.f32 1.0, %v1892_v48  ;;  %v1420_v0 = vor.u32 1.1754944e-38, %v1419_v21  ;;  %vm1173_vm12 = vweird.f32 %v3443_v22 }
 0x1db   :  { %1901 = vrcp.f32 %v3445_v30  ;;  %v1896_v58 = vpop.eup %1895  ;;  %v3468_v41 = vadd.f32 1.0, %v1894_v38  ;;  %v1179_v46 = vand.u32 2147483648, %v3443_v22  ;;  %v1432_v61 = vand.u32 2147483647, %v3445_v30 }
 0x1dc   :  { %v1276_v23 = vmul.f32 %v1888_v27, %v1275_v6  ;;  %v1898_v39 = vpop.eup %1897  ;;  %1903 = vpow2.f32 %v1770_v12  ;;  %v1434_v53 = vand.u32 2147483648, %v3445_v30  ;;  %vm1428_vm13 = vweird.f32 %v3445_v30  ;;  %v3504_v3 = vpop.f32.mrf.mxu2 }
 0x1dd   :  { %v1409_v18 = vmul.f32 %v1898_v39, %v3433_v36  ;;  %1905 = vrcp.f32 %v3464_v32  ;;  %v3487_v10 = vadd.f32 1.0, %v1896_v58  ;;  %vm1414_vm14 = vweird.f32 %v1898_v39 }
 0x1de   :  { %v1277_v7 = vadd.f32 %v1888_v27, %v1276_v23  ;;  %v1900_v63 = vpop.eup %1899  ;;  %1907 = vrcp.f32 %v3468_v41  ;;  %vm3492_vm15 = vcmp.eq.f32.partialorder %v1177_v60, 8.507059e+37  ;;  %v1537_v26 = vand.u32 2147483647, %v3464_v32  ;;  %vm1415_vm4 = vmor %vm1413_vm8, %vm1414_vm14  ;;  %v1000_v58 = vpop.f32.mrf.mxu3 }
 0x1df   :  { %v1410_v25 = vsub.f32 1.0, %v1409_v18  ;;  %v1169_v52 = vmul.f32 %v1900_v63, %v3443_v22  ;;  %v1539_v16 = vand.u32 2147483648, %v3464_v32  ;;  %v1180_v14 = vor.u32 1.1754944e-38, %v1179_v46 }
 0x1e0   :  { %v1281_v43 = vsel %vm1280_vm11, %v1888_v27, %v1277_v7  ;;  %vm3500_vm1 = vcmp.eq.f32.partialorder %v1432_v61, 8.507059e+37  ;;  %v1435_v45 = vor.u32 1.1754944e-38, %v1434_v53  ;;  %vm1174_vm2 = vweird.f32 %v1900_v63 }
 0x1e1   :  { %v1902_v8 = vpop.eup %1901  ;;  %v1286_v59 = vsel %vm3459_vm7, %v1285_v42, %v1281_v43  ;;  %v1411_v56 = vmul.f32 %v1898_v39, %v1410_v25  ;;  %v1170_v49 = vsub.f32 1.0, %v1169_v52  ;;  %vm1533_vm3 = vweird.f32 %v3464_v32  ;;  %vm1175_vm0 = vmor %vm1173_vm12, %vm1174_vm2 }
 0x1e2   :  { %v1627_v40 = vmul.f32 %v1286_v59, %v3298_v51  ;;  %v1424_v2 = vmul.f32 %v1902_v8, %v3445_v30  ;;  %v1904_v44 = vpop.eup %1903  ;;  %vm1429_vm5 = vweird.f32 %v1902_v8  ;;  %v1192_v33 = vand.u32 2147483647, %v3468_v41 }
 0x1e3   :  { %v1412_v4 = vadd.f32 %v1898_v39, %v1411_v56  ;;  %v1906_v51 = vpop.eup %1905  ;;  %v1171_v27 = vmul.f32 %v1900_v63, %v1170_v49  ;;  %1909 = vrcp.f32 %v3487_v10  ;;  %vm3517_vm6 = vcmp.eq.f32.partialorder %v1537_v26, 8.507059e+37  ;;  %vm1430_vm8 = vmor %vm1428_vm13, %vm1429_vm5  ;;  %v940_v18 = vpop.f32.mrf.mxu0 }
 0x1e4   :  { %v1659_v13 = vpack.c.bf16 %v1627_v40, %v1627_v40  ;;  %v1425_v19 = vsub.f32 1.0, %v1424_v2  ;;  %v1908_v35 = vpop.eup %1907  ;;  %v1529_v34 = vmul.f32 %v1906_v51, %v3464_v32  ;;  %v1540_v36 = vor.u32 1.1754944e-38, %v1539_v16  ;;  %v982_v52 = vpop.f32.mrf.mxu2 }
 0x1e5   :  { %v1416_v37 = vsel %vm1415_vm4, %v1898_v39, %v1412_v4  ;;  %v1172_v12 = vadd.f32 %v1900_v63, %v1171_v27  ;;  %v1184_v38 = vmul.f32 %v1908_v35, %v3468_v41  ;;  %vm1188_vm7 = vweird.f32 %v3468_v41 }
 0x1e6   :  { %1692 = vst.msk [vmem:[%s3985_s5 + $0x24] sm:$0xf] %vm1682_vm10, %v1659_v13  ;;  %v1426_v5 = vmul.f32 %v1902_v8, %v1425_v19  ;;  %v1421_v24 = vsel %vm3474_vm9, %v1420_v0, %v1416_v37  ;;  %v1530_v21 = vsub.f32 1.0, %v1529_v34  ;;  %v1194_v57 = vand.u32 2147483648, %v3468_v41  ;;  %v960_v13 = vpop.f32.mrf.mxu1 }
 0x1e7   :  { %v1636_v6 = vmul.f32 %v1421_v24, %v3380_v31  ;;  %v1176_v23 = vsel %vm1175_vm0, %v1900_v63, %v1172_v12  ;;  %vm1534_vm9 = vweird.f32 %v1906_v51  ;;  %v1185_v42 = vsub.f32 1.0, %v1184_v38 }
 0x1e8   :  { %v1427_v9 = vadd.f32 %v1902_v8, %v1426_v5  ;;  %vm3533_vm11 = vcmp.eq.f32.partialorder %v1192_v33, 8.507059e+37  ;;  %v1181_v22 = vsel %vm3492_vm15, %v1180_v14, %v1176_v23  ;;  %v1531_v7 = vmul.f32 %v1906_v51, %v1530_v21  ;;  %vm1535_vm13 = vmor %vm1533_vm3, %vm1534_vm9 }
 0x1e9   :  { %v1668_v31 = vpack.c.bf16 %v1636_v6, %v1636_v6  ;;  %v1910_v11 = vpop.eup %1909  ;;  %v1620_v0 = vmul.f32 %v1181_v22, %v3383_v15  ;;  %v1186_v46 = vmul.f32 %v1908_v35, %v1185_v42  ;;  %vm1189_vm12 = vweird.f32 %v1908_v35 }
 0x1ea   :  { %v1431_v60 = vsel %vm1430_vm8, %v1902_v8, %v1427_v9  ;;  %v1532_v53 = vadd.f32 %v1906_v51, %v1531_v7  ;;  %v1195_v63 = vor.u32 1.1754944e-38, %v1194_v57  ;;  %v1289_v43 = vmul.f32 %v1910_v11, %v3487_v10  ;;  %vm1190_vm14 = vmor %vm1188_vm7, %vm1189_vm12 }
 0x1eb   :  { %v1436_v30 = vsel %vm3500_vm1, %v1435_v45, %v1431_v60  ;;  %1701 = vst.msk [vmem:[%s3985_s5 + $0x48] sm:$0xf] %vm1682_vm10, %v1668_v31  ;;  %v1652_v25 = vpack.c.bf16 %v1620_v0, %v1620_v0  ;;  %v1187_v15 = vadd.f32 %v1908_v35, %v1186_v46  ;;  %v1297_v8 = vand.u32 2147483647, %v3487_v10 }
 0x1ec   :  { %v1637_v61 = vmul.f32 %v1436_v30, %v3386_v55  ;;  %v3552_v59 = vadd.f32 1.0, %v1904_v44  ;;  %v1536_v26 = vsel %vm1535_vm13, %v1906_v51, %v1532_v53  ;;  %v1290_v55 = vsub.f32 1.0, %v1289_v43  ;;  %v1002_v44 = vpop.f32.mrf.mxu3 }
 0x1ed   :  { %1911 = vpow2.f32 %v3471_v17  ;;  %1685 = vst.msk [vmem:[%s3985_s5 + $0x8] sm:$0xf] %vm1682_vm10, %v1652_v25  ;;  %v1541_v32 = vsel %vm3517_vm6, %v1540_v36, %v1536_v26  ;;  %v1191_v40 = vsel %vm1190_vm14, %v1908_v35, %v1187_v15  ;;  %v1299_v56 = vand.u32 2147483648, %v3487_v10  ;;  %v942_v35 = vpop.f32.mrf.mxu0 }
 0x1ee   :  { %v1669_v54 = vpack.c.bf16 %v1637_v61, %v1637_v61  ;;  %1913 = vrcp.f32 %v3552_v59  ;;  %v1644_v41 = vmul.f32 %v1541_v32, %v3398_v1  ;;  %v1196_v17 = vsel %vm3533_vm11, %v1195_v63, %v1191_v40  ;;  %v985_v38 = vpop.f32.mrf.mxu2  ;;  %v962_v0 = vpop.f32.mrf.mxu1 }
 0x1ef   :  { %v1291_v2 = vmul.f32 %v1910_v11, %v1290_v55  ;;  %vm1294_vm15 = vweird.f32 %v1910_v11  ;;  %v1621_v16 = vmul.f32 %v1196_v17, %v3416_v62  ;;  %v3575_v49 = vadd.f32 %v3246_v50, %v3504_v3 }
 0x1f0   :  { %1702 = vst.msk [vmem:[%s3985_s5 + $0x4c] sm:$0xf] %vm1682_vm10, %v1669_v54  ;;  %v3578_v14 = vadd.f32 %v3246_v50, %v1000_v58  ;;  %v1676_v47 = vpack.c.bf16 %v1644_v41, %v1644_v41  ;;  %vm1293_vm1 = vweird.f32 %v3487_v10  ;;  %v3582_v1 = vadd.f32 %v3246_v50, %v940_v18 }
 0x1f1   :  { %v1292_v45 = vadd.f32 %v1910_v11, %v1291_v2  ;;  %v1653_v4 = vpack.c.bf16 %v1621_v16, %v1621_v16  ;;  %vm1295_vm2 = vmor %vm1293_vm1, %vm1294_vm15  ;;  %v1300_v19 = vor.u32 1.1754944e-38, %v1299_v56  ;;  %v1763_v62 = vmul.f32 -1.442695, %v3575_v49 }
 0x1f2   :  { %v1771_v3 = vmul.f32 -1.442695, %v3578_v14  ;;  %1709 = vst.msk [vmem:[%s3985_s5 + $0x68] sm:$0xf] %vm1682_vm10, %v1676_v47  ;;  %vm1298_vm3 = vcmp.eq.f32.partialorder %v1297_v8, 8.507059e+37  ;;  %v3592_v33 = vadd.f32 %v3246_v50, %v982_v52  ;;  %v3601_v48 = vadd.f32 %v3246_v50, %v1002_v44 }
 0x1f3   :  { %v1912_v51 = vpop.eup %1911  ;;  %v1296_v27 = vsel %vm1295_vm2, %v1910_v11, %v1292_v45  ;;  %v1747_v10 = vmul.f32 -1.442695, %v3582_v1  ;;  %1686 = vst.msk [vmem:[%s3985_s5 + $0xc] sm:$0xf] %vm1682_vm10, %v1653_v4  ;;  %1915 = vpow2.f32 %v1763_v62  ;;  %v3607_v12 = vadd.f32 %v3246_v50, %v942_v35 }
 0x1f4   :  { %v1914_v37 = vpop.eup %1913  ;;  %v1301_v5 = vsel %vm1298_vm3, %v1300_v19, %v1296_v27  ;;  %v3598_v34 = vadd.f32 1.0, %v1912_v51  ;;  %1917 = vpow2.f32 %v1771_v3  ;;  %v1552_v21 = vand.u32 2147483647, %v3552_v59 }
 0x1f5   :  { %v1628_v36 = vmul.f32 %v1301_v5, %v3419_v29  ;;  %v1544_v24 = vmul.f32 %v1914_v37, %v3552_v59  ;;  %v1764_v57 = vmul.f32 -1.442695, %v3592_v33  ;;  %vm1549_vm4 = vweird.f32 %v1914_v37 }
 0x1f6   :  { %1919 = vrcp.f32 %v3598_v34  ;;  %v1554_v58 = vand.u32 2147483648, %v3552_v59  ;;  %v1772_v29 = vmul.f32 -1.442695, %v3601_v48  ;;  %v1312_v42 = vand.u32 2147483647, %v3598_v34  ;;  %v987_v17 = vpop.f32.mrf.mxu2 }
 0x1f7   :  { %v1660_v6 = vpack.c.bf16 %v1628_v36, %v1628_v36  ;;  %v1545_v9 = vsub.f32 1.0, %v1544_v24  ;;  %1921 = vpow2.f32 %v1747_v10  ;;  %v1314_v39 = vand.u32 2147483648, %v3598_v34 }
 0x1f8   :  { %1923 = vpow2.f32 %v1764_v57  ;;  %vm1548_vm5 = vweird.f32 %v3552_v59  ;;  %v1748_v22 = vmul.f32 -1.442695, %v3607_v12  ;;  %v3624_v11 = vadd.f32 %v3246_v50, %v960_v13 }
 0x1f9   :  { %1693 = vst.msk [vmem:[%s3985_s5 + $0x28] sm:$0xf] %vm1682_vm10, %v1660_v6  ;;  %v1546_v23 = vmul.f32 %v1914_v37, %v1545_v9  ;;  %v1916_v31 = vpop.eup %1915  ;;  %1925 = vpow2.f32 %v1772_v29  ;;  %vm1550_vm6 = vmor %vm1548_vm5, %vm1549_vm4  ;;  %vm1553_vm7 = vcmp.eq.f32.partialorder %v1552_v21, 8.507059e+37  ;;  %v1555_v46 = vor.u32 1.1754944e-38, %v1554_v58 }
 0x1fa   :  { %v1918_v60 = vpop.eup %1917  ;;  %v3621_v18 = vadd.f32 1.0, %v1916_v31  ;;  %vm3630_vm0 = vcmp.eq.f32.partialorder %v1312_v42, 8.507059e+37  ;;  %v1315_v25 = vor.u32 1.1754944e-38, %v1314_v39  ;;  %v3636_v59 = vadd.f32 %v3246_v50, %v985_v38 }
 0x1fb   :  { %v1547_v7 = vadd.f32 %v1914_v37, %v1546_v23  ;;  %v3627_v61 = vadd.f32 1.0, %v1918_v60  ;;  %v3639_v52 = vadd.f32 %v3246_v50, %v962_v0  ;;  %v3644_v32 = vmul.f32 -1.442695, %v3624_v11 }
 0x1fc   :  { %v1920_v30 = vpop.eup %1919  ;;  %1927 = vrcp.f32 %v3621_v18  ;;  %v1447_v40 = vand.u32 2147483647, %v3621_v18  ;;  %v1449_v56 = vand.u32 2147483648, %v3621_v18  ;;  %vm1308_vm9 = vweird.f32 %v3598_v34 }
 0x1fd   :  { %v1551_v53 = vsel %vm1550_vm6, %v1914_v37, %v1547_v7  ;;  %v1304_v63 = vmul.f32 %v1920_v30, %v3598_v34  ;;  %v1922_v15 = vpop.eup %1921  ;;  %1929 = vpow2.f32 %v1748_v22  ;;  %vm1309_vm8 = vweird.f32 %v1920_v30 }
 0x1fe   :  { %v1556_v8 = vsel %vm1553_vm7, %v1555_v46, %v1551_v53  ;;  %v1924_v54 = vpop.eup %1923  ;;  %1931 = vrcp.f32 %v3627_v61  ;;  %v1569_v41 = vand.u32 2147483648, %v3627_v61  ;;  %v3649_v45 = vadd.f32 1.0, %v1922_v15  ;;  %vm1310_vm12 = vmor %vm1308_vm9, %vm1309_vm8 }
 0x1ff   :  { %v1645_v26 = vmul.f32 %v1556_v8, %v3436_v20  ;;  %v1305_v55 = vsub.f32 1.0, %v1304_v63  ;;  %v1926_v2 = vpop.eup %1925  ;;  %v3651_v20 = vadd.f32 1.0, %v1924_v54  ;;  %v1567_v44 = vand.u32 2147483647, %v3627_v61 }
 0x200   :  { %v3656_v13 = vmul.f32 -1.442695, %v3636_v59  ;;  %v3659_v4 = vmul.f32 -1.442695, %v3639_v52  ;;  %vm1443_vm11 = vweird.f32 %v3621_v18  ;;  %1933 = vrcp.f32 %v3649_v45 }
 0x201   :  { %v1677_v16 = vpack.c.bf16 %v1645_v26, %v1645_v26  ;;  %v1306_v47 = vmul.f32 %v1920_v30, %v1305_v55  ;;  %v3668_v3 = vadd.f32 %v3246_v50, %v987_v17  ;;  %vm1563_vm13 = vweird.f32 %v3627_v61 }
 0x202   :  { %v1928_v19 = vpop.eup %1927  ;;  %1935 = vrcp.f32 %v3651_v20  ;;  %v3674_v10 = vadd.f32 1.0, %v1926_v2  ;;  %vm3676_vm14 = vcmp.eq.f32.partialorder %v1447_v40, 8.507059e+37  ;;  %v1450_v34 = vor.u32 1.1754944e-38, %v1449_v56 }
 0x203   :  { %1710 = vst.msk [vmem:[%s3985_s5 + $0x6c] sm:$0xf] %vm1682_vm10, %v1677_v16  ;;  %v1307_v62 = vadd.f32 %v1920_v30, %v1306_v47  ;;  %v1930_v51 = vpop.eup %1929  ;;  %v1439_v27 = vmul.f32 %v1928_v19, %v3621_v18  ;;  %v1570_v50 = vor.u32 1.1754944e-38, %v1569_v41  ;;  %vm3683_vm15 = vcmp.eq.f32.partialorder %v1567_v44, 8.507059e+37 }
 0x204   :  { %v1932_v35 = vpop.eup %1931  ;;  %v1207_v9 = vand.u32 2147483647, %v3649_v45  ;;  %v1209_v57 = vand.u32 2147483648, %v3649_v45  ;;  %v1462_v58 = vand.u32 2147483647, %v3651_v20  ;;  %v3691_v29 = vadd.f32 1.0, %v1930_v51  ;;  %v1005_v51 = vpop.f32.mrf.mxu3 }
 0x205   :  { %v1311_v37 = vsel %vm1310_vm12, %v1920_v30, %v1307_v62  ;;  %v1440_v24 = vsub.f32 1.0, %v1439_v27  ;;  %v1559_v38 = vmul.f32 %v1932_v35, %v3627_v61  ;;  %vm1444_vm1 = vweird.f32 %v1928_v19 }
 0x206   :  { %v1316_v36 = vsel %vm3630_vm0, %v1315_v25, %v1311_v37  ;;  %1937 = vrcp.f32 %v3674_v10  ;;  %v1934_v39 = vpop.eup %1933  ;;  %vm1203_vm2 = vweird.f32 %v3649_v45  ;;  %vm1458_vm3 = vweird.f32 %v3651_v20  ;;  %vm1445_vm6 = vmor %vm1443_vm11, %vm1444_vm1 }
 0x207   :  { %v1629_v21 = vmul.f32 %v1316_v36, %v3449_v28  ;;  %v1441_v23 = vmul.f32 %v1928_v19, %v1440_v24  ;;  %v1560_v42 = vsub.f32 1.0, %v1559_v38  ;;  %v1464_v22 = vand.u32 2147483648, %v3651_v20  ;;  %v945_v36 = vpop.f32.mrf.mxu0 }
 0x208   :  { %v1936_v28 = vpop.eup %1935  ;;  %vm1564_vm4 = vweird.f32 %v1932_v35  ;;  %v1199_v0 = vmul.f32 %v1934_v39, %v3649_v45  ;;  %vm3698_vm5 = vcmp.eq.f32.partialorder %v1207_v9, 8.507059e+37  ;;  %v1210_v46 = vor.u32 1.1754944e-38, %v1209_v57 }
 0x209   :  { %v1661_v31 = vpack.c.bf16 %v1629_v21, %v1629_v21  ;;  %v1442_v60 = vadd.f32 %v1928_v19, %v1441_v23  ;;  %v1561_v7 = vmul.f32 %v1932_v35, %v1560_v42  ;;  %v1454_v53 = vmul.f32 %v1936_v28, %v3651_v20  ;;  %vm1565_vm0 = vmor %vm1563_vm13, %vm1564_vm4 }
 0x20a   :  { %vm3710_vm7 = vcmp.eq.f32.partialorder %v1462_v58, 8.507059e+37  ;;  %v1582_v43 = vand.u32 2147483647, %v3674_v10  ;;  %v1200_v8 = vsub.f32 1.0, %v1199_v0  ;;  %1939 = vrcp.f32 %v3691_v29  ;;  %v3763_v58 = vld [vmem:[%s3984_s4] ss:$0 sm:$0xff]  ;;  %v965_v0 = vpop.f32.mrf.mxu1 }
 0x20b   :  { %1694 = vst.msk [vmem:[%s3985_s5 + $0x2c] sm:$0xf] %vm1682_vm10, %v1661_v31  ;;  %v1446_v25 = vsel %vm1445_vm6, %v1928_v19, %v1442_v60  ;;  %v1562_v15 = vadd.f32 %v1932_v35, %v1561_v7  ;;  %v1455_v18 = vsub.f32 1.0, %v1454_v53  ;;  %v1465_v26 = vor.u32 1.1754944e-38, %v1464_v22 }
 0x20c   :  { %v1451_v54 = vsel %vm3676_vm14, %v1450_v34, %v1446_v25  ;;  %vm1578_vm8 = vweird.f32 %v3674_v10  ;;  %v1584_v55 = vand.u32 2147483648, %v3674_v10  ;;  %v1938_v40 = vpop.eup %1937  ;;  %v1201_v17 = vmul.f32 %v1934_v39, %v1200_v8 }
 0x20d   :  { %v1638_v56 = vmul.f32 %v1451_v54, %v3575_v49  ;;  %v1566_v41 = vsel %vm1565_vm0, %v1932_v35, %v1562_v15  ;;  %vm1204_vm9 = vweird.f32 %v1934_v39  ;;  %v1456_v16 = vmul.f32 %v1936_v28, %v1455_v18 }
 0x20e   :  { %v1571_v2 = vsel %vm3683_vm15, %v1570_v50, %v1566_v41  ;;  %vm1459_vm11 = vweird.f32 %v1936_v28  ;;  %v1574_v61 = vmul.f32 %v1938_v40, %v3674_v10  ;;  %v1202_v19 = vadd.f32 %v1934_v39, %v1201_v17  ;;  %vm1205_vm13 = vmor %vm1203_vm2, %vm1204_vm9 }
 0x20f   :  { %v1670_v47 = vpack.c.bf16 %v1638_v56, %v1638_v56  ;;  %v1646_v44 = vmul.f32 %v1571_v2, %v3578_v14  ;;  %vm3727_vm12 = vcmp.eq.f32.partialorder %v1582_v43, 8.507059e+37  ;;  %v1457_v49 = vadd.f32 %v1936_v28, %v1456_v16  ;;  %vm1460_vm15 = vmor %vm1458_vm3, %vm1459_vm11  ;;  %v1007_v43 = vpop.f32.mrf.mxu3 }
 0x210   :  { %v1575_v27 = vsub.f32 1.0, %v1574_v61  ;;  %vm1579_vm14 = vweird.f32 %v1938_v40  ;;  %1941 = vpow2.f32 %v3644_v32  ;;  %v1940_v35 = vpop.eup %1939  ;;  %v1206_v37 = vsel %vm1205_vm13, %v1934_v39, %v1202_v19 }
 0x211   :  { %1703 = vst.msk [vmem:[%s3985_s5 + $0x50] sm:$0xf] %vm1682_vm10, %v1670_v47  ;;  %v1678_v14 = vpack.c.bf16 %v1646_v44, %v1646_v44  ;;  %1943 = vpow2.f32 %v3656_v13  ;;  %v1766_v45 = vmul.f32 -1.442695, %v3668_v3  ;;  %v1211_v5 = vsel %vm3698_vm5, %v1210_v46, %v1206_v37  ;;  %vm1580_vm1 = vmor %vm1578_vm8, %vm1579_vm14 }
 0x212   :  { %v1461_v32 = vsel %vm1460_vm15, %v1936_v28, %v1457_v49  ;;  %v1576_v34 = vmul.f32 %v1938_v40, %v1575_v27  ;;  %v1214_v50 = vmul.f32 %v1940_v35, %v3691_v29  ;;  %v1622_v20 = vmul.f32 %v1211_v5, %v3582_v1 }
 0x213   :  { %1711 = vst.msk [vmem:[%s3985_s5 + $0x70] sm:$0xf] %vm1682_vm10, %v1678_v14  ;;  %v1466_v13 = vsel %vm3710_vm7, %v1465_v26, %v1461_v32  ;;  %v1585_v24 = vor.u32 1.1754944e-38, %v1584_v55  ;;  %1945 = vpow2.f32 %v3659_v4  ;;  %v1222_v57 = vand.u32 2147483647, %v3691_v29 }
 0x214   :  { %v1639_v38 = vmul.f32 %v1466_v13, %v3592_v33  ;;  %v1577_v6 = vadd.f32 %v1938_v40, %v1576_v34  ;;  %v1215_v9 = vsub.f32 1.0, %v1214_v50  ;;  %1947 = vpow2.f32 %v1766_v45 }
 0x215   :  { %v1654_v21 = vpack.c.bf16 %v1622_v20, %v1622_v20  ;;  %v1224_v1 = vand.u32 2147483648, %v3691_v29  ;;  %v3766_v4 = vadd.f32 %v3763_v58, %v1005_v51  ;;  %vm1219_vm2 = vweird.f32 %v1940_v35 }
 0x216   :  { %v1942_v33 = vpop.eup %1941  ;;  %v1671_v23 = vpack.c.bf16 %v1639_v38, %v1639_v38  ;;  %v1581_v42 = vsel %vm1580_vm1, %v1938_v40, %v1577_v6  ;;  %v1216_v39 = vmul.f32 %v1940_v35, %v1215_v9  ;;  %vm1218_vm3 = vweird.f32 %v3691_v29  ;;  %v947_v40 = vpop.f32.mrf.mxu0 }
 0x217   :  { %v1944_v31 = vpop.eup %1943  ;;  %1687 = vst.msk [vmem:[%s3985_s5 + $0x10] sm:$0xf] %vm1682_vm10, %v1654_v21  ;;  %v1586_v10 = vsel %vm3727_vm12, %v1585_v24, %v1581_v42  ;;  %v3774_v22 = vadd.f32 1.0, %v1942_v33  ;;  %vm1220_vm4 = vmor %vm1218_vm3, %vm1219_vm2  ;;  %v1225_v46 = vor.u32 1.1754944e-38, %v1224_v1  ;;  %v1773_v53 = vmul.f32 -1.442695, %v3766_v4 }
 0x218   :  { %1704 = vst.msk [vmem:[%s3985_s5 + $0x54] sm:$0xf] %vm1682_vm10, %v1671_v23  ;;  %v1647_v28 = vmul.f32 %v1586_v10, %v3601_v48  ;;  %v1217_v60 = vadd.f32 %v1940_v35, %v1216_v39  ;;  %v3782_v7 = vadd.f32 1.0, %v1944_v31  ;;  %v3787_v63 = vadd.f32 %v3763_v58, %v945_v36 }
 0x219   :  { %v1946_v30 = vpop.eup %1945  ;;  %1949 = vrcp.f32 %v3774_v22  ;;  %vm1223_vm5 = vcmp.eq.f32.partialorder %v1222_v57, 8.507059e+37  ;;  %v3791_v8 = vadd.f32 %v3763_v58, %v965_v0  ;;  %v3803_v55 = vadd.f32 %v3763_v58, %v1007_v43 }
 0x21a   :  { %v1948_v25 = vpop.eup %1947  ;;  %v1679_v15 = vpack.c.bf16 %v1647_v28, %v1647_v28  ;;  %v1221_v48 = vsel %vm1220_vm4, %v1940_v35, %v1217_v60  ;;  %1951 = vrcp.f32 %v3782_v7  ;;  %v3798_v18 = vadd.f32 1.0, %v1946_v30 }
 0x21b   :  { %v1226_v29 = vsel %vm1223_vm5, %v1225_v46, %v1221_v48  ;;  %v3800_v26 = vadd.f32 1.0, %v1948_v25  ;;  %v1327_v56 = vand.u32 2147483647, %v3774_v22  ;;  %v1329_v41 = vand.u32 2147483648, %v3774_v22 }
 0x21c   :  { %1712 = vst.msk [vmem:[%s3985_s5 + $0x74] sm:$0xf] %vm1682_vm10, %v1679_v15  ;;  %v1623_v54 = vmul.f32 %v1226_v29, %v3607_v12  ;;  %1953 = vpow2.f32 %v1773_v53  ;;  %v1749_v17 = vmul.f32 -1.442695, %v3787_v63  ;;  %v1477_v16 = vand.u32 2147483647, %v3782_v7 }
 0x21d   :  { %v1479_v12 = vand.u32 2147483648, %v3782_v7  ;;  %1955 = vrcp.f32 %v3798_v18  ;;  %v1757_v47 = vmul.f32 -1.442695, %v3791_v8  ;;  %v3814_v44 = vadd.f32 %v3763_v58, %v947_v40 }
 0x21e   :  { %v1655_v2 = vpack.c.bf16 %v1623_v54, %v1623_v54  ;;  %1957 = vrcp.f32 %v3800_v26  ;;  %vm1323_vm6 = vweird.f32 %v3774_v22  ;;  %vm1473_vm7 = vweird.f32 %v3782_v7 }
 0x21f   :  { %v1950_v61 = vpop.eup %1949  ;;  %vm3823_vm0 = vcmp.eq.f32.partialorder %v1327_v56, 8.507059e+37  ;;  %v1330_v49 = vor.u32 1.1754944e-38, %v1329_v41  ;;  %v1774_v35 = vmul.f32 -1.442695, %v3803_v55  ;;  %vm3829_vm8 = vcmp.eq.f32.partialorder %v1477_v16, 8.507059e+37 }
 0x220   :  { %v1952_v19 = vpop.eup %1951  ;;  %1688 = vst.msk [vmem:[%s3985_s5 + $0x14] sm:$0xf] %vm1682_vm10, %v1655_v2  ;;  %v1319_v62 = vmul.f32 %v1950_v61, %v3774_v22  ;;  %v1480_v45 = vor.u32 1.1754944e-38, %v1479_v12  ;;  %1959 = vpow2.f32 %v1749_v17  ;;  %vm1338_vm9 = vweird.f32 %v3798_v18  ;;  %v967_v17 = vpop.f32.mrf.mxu1 }
 0x221   :  { %v1469_v27 = vmul.f32 %v1952_v19, %v3782_v7  ;;  %v1342_v34 = vand.u32 2147483647, %v3798_v18  ;;  %1961 = vpow2.f32 %v1757_v47  ;;  %v1750_v50 = vmul.f32 -1.442695, %v3814_v44 }
 0x222   :  { %v1320_v14 = vsub.f32 1.0, %v1319_v62  ;;  %v1954_v5 = vpop.eup %1953  ;;  %vm1324_vm11 = vweird.f32 %v1950_v61  ;;  %v1344_v13 = vand.u32 2147483648, %v3798_v18  ;;  %vm1474_vm12 = vweird.f32 %v1952_v19 }
 0x223   :  { %v1470_v32 = vsub.f32 1.0, %v1469_v27  ;;  %v1956_v36 = vpop.eup %1955  ;;  %v3837_v24 = vadd.f32 1.0, %v1954_v5  ;;  %1963 = vpow2.f32 %v1774_v35  ;;  %vm1488_vm13 = vweird.f32 %v3800_v26  ;;  %vm1325_vm14 = vmor %vm1323_vm6, %vm1324_vm11 }
 0x224   :  { %v1321_v20 = vmul.f32 %v1950_v61, %v1320_v14  ;;  %v1958_v38 = vpop.eup %1957  ;;  %v1334_v9 = vmul.f32 %v1956_v36, %v3798_v18  ;;  %v1492_v23 = vand.u32 2147483647, %v3800_v26  ;;  %vm1475_vm15 = vmor %vm1473_vm7, %vm1474_vm12  ;;  %vm3848_vm1 = vcmp.eq.f32.partialorder %v1342_v34, 8.507059e+37 }
 0x225   :  { %v1471_v6 = vmul.f32 %v1952_v19, %v1470_v32  ;;  %v1484_v57 = vmul.f32 %v1958_v38, %v3800_v26  ;;  %1965 = vrcp.f32 %v3837_v24  ;;  %v1494_v28 = vand.u32 2147483648, %v3800_v26 }
 0x226   :  { %v1322_v21 = vadd.f32 %v1950_v61, %v1321_v20  ;;  %v1335_v33 = vsub.f32 1.0, %v1334_v9  ;;  %1967 = vpow2.f32 %v1750_v50  ;;  %v1960_v42 = vpop.eup %1959  ;;  %vm1339_vm2 = vweird.f32 %v1956_v36 }
 0x227   :  { %v1472_v1 = vadd.f32 %v1952_v19, %v1471_v6  ;;  %v1485_v10 = vsub.f32 1.0, %v1484_v57  ;;  %v1962_v60 = vpop.eup %1961  ;;  %vm1489_vm3 = vweird.f32 %v1958_v38  ;;  %v1345_v48 = vor.u32 1.1754944e-38, %v1344_v13  ;;  %vm1340_vm4 = vmor %vm1338_vm9, %vm1339_vm2 }
 0x228   :  { %v1326_v39 = vsel %vm1325_vm14, %v1950_v61, %v1322_v21  ;;  %v1336_v30 = vmul.f32 %v1956_v36, %v1335_v33  ;;  %v3859_v29 = vadd.f32 1.0, %v1960_v42  ;;  %vm3863_vm5 = vcmp.eq.f32.partialorder %v1492_v23, 8.507059e+37  ;;  %vm1490_vm6 = vmor %vm1488_vm13, %vm1489_vm3 }
 0x229   :  { %v1331_v22 = vsel %vm3823_vm0, %v1330_v49, %v1326_v39  ;;  %v1476_v0 = vsel %vm1475_vm15, %v1952_v19, %v1472_v1  ;;  %v1486_v53 = vmul.f32 %v1958_v38, %v1485_v10  ;;  %v1964_v43 = vpop.eup %1963  ;;  %v3867_v41 = vadd.f32 1.0, %v1962_v60 }
 0x22a   :  { %v1630_v46 = vmul.f32 %v1331_v22, %v3624_v11  ;;  %v1481_v7 = vsel %vm3829_vm8, %v1480_v45, %v1476_v0  ;;  %v1337_v15 = vadd.f32 %v1956_v36, %v1336_v30  ;;  %v1495_v12 = vor.u32 1.1754944e-38, %v1494_v28 }
 0x22b   :  { %v1640_v25 = vmul.f32 %v1481_v7, %v3636_v59  ;;  %v1966_v54 = vpop.eup %1965  ;;  %v1487_v56 = vadd.f32 %v1958_v38, %v1486_v53  ;;  %1969 = vrcp.f32 %v3859_v29  ;;  %v3880_v19 = vadd.f32 1.0, %v1964_v43 }
 0x22c   :  { %v1662_v40 = vpack.c.bf16 %v1630_v46, %v1630_v46  ;;  %v1968_v2 = vpop.eup %1967  ;;  %v1341_v59 = vsel %vm1340_vm4, %v1956_v36, %v1337_v15  ;;  %v1589_v61 = vmul.f32 %v1966_v54, %v3837_v24  ;;  %v3890_v49 = vadd.f32 %v3763_v58, %v967_v17 }
 0x22d   :  { %v1672_v16 = vpack.c.bf16 %v1640_v25, %v1640_v25  ;;  %v1346_v18 = vsel %vm3848_vm1, %v1345_v48, %v1341_v59  ;;  %v1491_v47 = vsel %vm1490_vm6, %v1958_v38, %v1487_v56  ;;  %v1599_v35 = vand.u32 2147483648, %v3837_v24 }
 0x22e   :  { %1695 = vst.msk [vmem:[%s3985_s5 + $0x30] sm:$0xf] %vm1682_vm10, %v1662_v40  ;;  %v1631_v26 = vmul.f32 %v1346_v18, %v3639_v52  ;;  %v1496_v62 = vsel %vm3863_vm5, %v1495_v12, %v1491_v47  ;;  %v1590_v51 = vsub.f32 1.0, %v1589_v61  ;;  %1971 = vrcp.f32 %v3867_v41 }
 0x22f   :  { %1705 = vst.msk [vmem:[%s3985_s5 + $0x58] sm:$0xf] %vm1682_vm10, %v1672_v16  ;;  %v1641_v27 = vmul.f32 %v1496_v62, %v3668_v3  ;;  %v3895_v14 = vadd.f32 1.0, %v1968_v2  ;;  %vm1594_vm7 = vweird.f32 %v1966_v54  ;;  %v1597_v52 = vand.u32 2147483647, %v3837_v24 }
 0x230   :  { %v1663_v37 = vpack.c.bf16 %v1631_v26, %v1631_v26  ;;  %v1591_v45 = vmul.f32 %v1966_v54, %v1590_v51  ;;  %1973 = vrcp.f32 %v3880_v19  ;;  %vm1593_vm0 = vweird.f32 %v3837_v24 }
 0x231   :  { %v1673_v5 = vpack.c.bf16 %v1641_v27, %v1641_v27  ;;  %v1237_v58 = vand.u32 2147483647, %v3859_v29  ;;  %v1970_v32 = vpop.eup %1969  ;;  %vm1595_vm8 = vmor %vm1593_vm0, %vm1594_vm7  ;;  %v1600_v34 = vor.u32 1.1754944e-38, %v1599_v35  ;;  %v1239_v50 = vand.u32 2147483648, %v3859_v29 }
 0x232   :  { %1696 = vst.msk [vmem:[%s3985_s5 + $0x34] sm:$0xf] %vm1682_vm10, %v1663_v37  ;;  %v1592_v3 = vadd.f32 %v1966_v54, %v1591_v45  ;;  %1975 = vrcp.f32 %v3895_v14  ;;  %v1758_v36 = vmul.f32 -1.442695, %v3890_v49  ;;  %vm1598_vm9 = vcmp.eq.f32.partialorder %v1597_v52, 8.507059e+37 }
 0x233   :  { %1706 = vst.msk [vmem:[%s3985_s5 + $0x5c] sm:$0xf] %vm1682_vm10, %v1673_v5  ;;  %v1229_v13 = vmul.f32 %v1970_v32, %v3859_v29  ;;  %vm1233_vm11 = vweird.f32 %v3859_v29  ;;  %vm1353_vm12 = vweird.f32 %v3867_v41  ;;  %v1357_v6 = vand.u32 2147483647, %v3867_v41 }
 0x234   :  { %v1596_v20 = vsel %vm1595_vm8, %v1966_v54, %v1592_v3  ;;  %v1972_v24 = vpop.eup %1971  ;;  %vm3917_vm13 = vcmp.eq.f32.partialorder %v1237_v58, 8.507059e+37  ;;  %vm1234_vm14 = vweird.f32 %v1970_v32  ;;  %v1240_v23 = vor.u32 1.1754944e-38, %v1239_v50 }
 0x235   :  { %v1601_v38 = vsel %vm1598_vm9, %v1600_v34, %v1596_v20  ;;  %v1230_v21 = vsub.f32 1.0, %v1229_v13  ;;  %v1349_v1 = vmul.f32 %v1972_v24, %v3867_v41  ;;  %v1359_v42 = vand.u32 2147483648, %v3867_v41  ;;  %vm1235_vm3 = vmor %vm1233_vm11, %vm1234_vm14 }
 0x236   :  { %v1648_v9 = vmul.f32 %v1601_v38, %v3766_v4  ;;  %v1974_v33 = vpop.eup %1973  ;;  %1977 = vpow2.f32 %v1758_v36  ;;  %vm1354_vm15 = vweird.f32 %v1972_v24  ;;  %vm3924_vm1 = vcmp.eq.f32.partialorder %v1357_v6, 8.507059e+37 }
 0x237   :  { %v1231_v31 = vmul.f32 %v1970_v32, %v1230_v21  ;;  %v1350_v10 = vsub.f32 1.0, %v1349_v1  ;;  %v1604_v28 = vmul.f32 %v1974_v33, %v3880_v19  ;;  %vm1608_vm2 = vweird.f32 %v3880_v19  ;;  %vm1355_vm6 = vmor %vm1353_vm12, %vm1354_vm15 }
 0x238   :  { %v1680_v39 = vpack.c.bf16 %v1648_v9, %v1648_v9  ;;  %v1976_v60 = vpop.eup %1975  ;;  %v1612_v22 = vand.u32 2147483647, %v3880_v19  ;;  %v1360_v53 = vor.u32 1.1754944e-38, %v1359_v42  ;;  %vm1609_vm4 = vweird.f32 %v1974_v33 }
 0x239   :  { %v1232_v0 = vadd.f32 %v1970_v32, %v1231_v31  ;;  %v1351_v30 = vmul.f32 %v1972_v24, %v1350_v10  ;;  %v1605_v46 = vsub.f32 1.0, %v1604_v28  ;;  %v1244_v7 = vmul.f32 %v1976_v60, %v3895_v14  ;;  %vm1610_vm0 = vmor %vm1608_vm2, %vm1609_vm4 }
 0x23a   :  { %1713 = vst.msk [vmem:[%s3985_s5 + $0x78] sm:$0xf] %vm1682_vm10, %v1680_v39  ;;  %v1614_v43 = vand.u32 2147483648, %v3880_v19  ;;  %vm1248_vm5 = vweird.f32 %v3895_v14  ;;  %vm1249_vm7 = vweird.f32 %v1976_v60  ;;  %v1252_v29 = vand.u32 2147483647, %v3895_v14 }
 0x23b   :  { %v1236_v25 = vsel %vm1235_vm3, %v1970_v32, %v1232_v0  ;;  %v1352_v15 = vadd.f32 %v1972_v24, %v1351_v30  ;;  %v1606_v48 = vmul.f32 %v1974_v33, %v1605_v46  ;;  %v1245_v54 = vsub.f32 1.0, %v1244_v7  ;;  %vm1250_vm9 = vmor %vm1248_vm5, %vm1249_vm7 }
 0x23c   :  { %v1978_v40 = vpop.eup %1977  ;;  %v1241_v56 = vsel %vm3917_vm13, %v1240_v23, %v1236_v25  ;;  %v1254_v11 = vand.u32 2147483648, %v3895_v14  ;;  %vm1613_vm8 = vcmp.eq.f32.partialorder %v1612_v22, 8.507059e+37  ;;  %v1615_v41 = vor.u32 1.1754944e-38, %v1614_v43 }
 0x23d   :  { %v1624_v17 = vmul.f32 %v1241_v56, %v3787_v63  ;;  %v1356_v2 = vsel %vm1355_vm6, %v1972_v24, %v1352_v15  ;;  %v1607_v16 = vadd.f32 %v1974_v33, %v1606_v48  ;;  %v1246_v59 = vmul.f32 %v1976_v60, %v1245_v54 }
 0x23e   :  { %v1361_v12 = vsel %vm3924_vm1, %v1360_v53, %v1356_v2  ;;  %v1121_v61 = vadd.f32 1.0, %v1978_v40  ;;  %v1255_v63 = vor.u32 1.1754944e-38, %v1254_v11  ;;  %vm1253_vm11 = vcmp.eq.f32.partialorder %v1252_v29, 8.507059e+37 }
 0x23f   :  { %v1656_v18 = vpack.c.bf16 %v1624_v17, %v1624_v17  ;;  %v1632_v47 = vmul.f32 %v1361_v12, %v3791_v8  ;;  %v1611_v26 = vsel %vm1610_vm0, %v1974_v33, %v1607_v16  ;;  %v1247_v62 = vadd.f32 %v1976_v60, %v1246_v59 }
 0x240   :  { %v1616_v51 = vsel %vm1613_vm8, %v1615_v41, %v1611_v26  ;;  %1979 = vrcp.f32 %v1121_v61  ;;  %v1374_v3 = vand.u32 2147483648, %v1121_v61  ;;  %v1372_v32 = vand.u32 2147483647, %v1121_v61 }
 0x241   :  { %1689 = vst.msk [vmem:[%s3985_s5 + $0x18] sm:$0xf] %vm1682_vm10, %v1656_v18  ;;  %v1664_v19 = vpack.c.bf16 %v1632_v47, %v1632_v47  ;;  %v1649_v27 = vmul.f32 %v1616_v51, %v3803_v55  ;;  %v1251_v35 = vsel %vm1250_vm9, %v1976_v60, %v1247_v62  ;;  %vm1368_vm13 = vweird.f32 %v1121_v61 }
 0x242   :  { %v1256_v8 = vsel %vm1253_vm11, %v1255_v63, %v1251_v35  ;;  %vm1373_vm15 = vcmp.eq.f32.partialorder %v1372_v32, 8.507059e+37 }
 0x243   :  { %1697 = vst.msk [vmem:[%s3985_s5 + $0x38] sm:$0xf] %vm1682_vm10, %v1664_v19  ;;  %v1681_v14 = vpack.c.bf16 %v1649_v27, %v1649_v27  ;;  %v1625_v37 = vmul.f32 %v1256_v8, %v3814_v44  ;;  %v1375_v44 = vor.u32 1.1754944e-38, %v1374_v3 }
 0x245   :  { %1714 = vst.msk [vmem:[%s3985_s5 + $0x7c] sm:$0xf] %vm1682_vm10, %v1681_v14  ;;  %v1657_v45 = vpack.c.bf16 %v1625_v37, %v1625_v37 }
 0x246   :  { %v1980_v52 = vpop.eup %1979 }
 0x247   :  { %1690 = vst.msk [vmem:[%s3985_s5 + $0x1c] sm:$0xf] %vm1682_vm10, %v1657_v45  ;;  %v1364_v55 = vmul.f32 %v1980_v52, %v1121_v61  ;;  %vm1369_vm12 = vweird.f32 %v1980_v52 }
 0x248   :  { %vm1370_vm14 = vmor %vm1368_vm13, %vm1369_vm12 }
 0x249   :  { %v1365_v5 = vsub.f32 1.0, %v1364_v55 }
 0x24b   :  { %v1366_v58 = vmul.f32 %v1980_v52, %v1365_v5 }
 0x24d   :  { %v1367_v34 = vadd.f32 %v1980_v52, %v1366_v58 }
 0x24f   :  { %v1371_v50 = vsel %vm1370_vm14, %v1980_v52, %v1367_v34 }
 0x250   :  { %v1376_v36 = vsel %vm1373_vm15, %v1375_v44, %v1371_v50 }
 0x251   :  { %v1633_v20 = vmul.f32 %v1376_v36, %v3890_v49 }
 0x253   :  { %v1665_v13 = vpack.c.bf16 %v1633_v20, %v1633_v20 }
 0x255   :  { %1698 = vst.msk [vmem:[%s3985_s5 + $0x3c] sm:$0xf] %vm1682_vm10, %v1665_v13 }

// kernel: _lambda_.23
= control target key start
LH: loop header
LB: loop body
LE: loop exit
PB: predicated region body
PF: predicated region fallthrough
CT: control target
= control target key end

     0   :  { %s501_s12 = smov 0   ;;  %s503_s13 = smov 0   ;;  %s540_s0 = inlined_call_operand.vmem [shape: bf16[8,16,16], index: 0, kind: input, shape index: {}]   ;;  %s541_s1 = inlined_call_operand.vmem [shape: bf16[8,16,16], index: 1, kind: input, shape index: {}]   ;;  %s542_s2 = inlined_call_operand.vmem [shape: f32[8,16,1], index: 2, kind: input, shape index: {}]   ;;  %s543_s3 = inlined_call_operand.vmem [shape: bf16[8,16,16], index: 3, kind: output, shape index: {}]  }
   0x1   :  { %s505_s14 = smov 0  }
   0x2 LB: > { %s25_s15 = sadd.s32 1, %s474_s13  ;;  %p404_p0 = scmp.ge.s32.totalorder %s478_s14, 1  ;;  %s478_s14 = sphi %s505_s14, %s13_s14   ;;  %s474_s13 = sphi %s503_s13, %s545_s13   ;;  %s470_s12 = sphi %s501_s12, %s544_s12  }
   0x3   : > { %p27_p1 = scmp.ge.s32.totalorder %s25_s15, 8  ;;  %p176_p2 = scmp.lt.s32.totalorder %s478_s14, 9 }
   0x5   : > { %s547_s15 = smov (%p27_p1, %s25_s15), 0  ;;  %p177_p3 = pnand %p404_p0, %p176_p2 }
   0x6   : > { %p216_p4 = scmp.lt.s32.totalorder (!%p177_p3), %s470_s12, 7 }
   0x7   : > { %180 = sbr.rel (%p177_p3) target bundleno = 158 (0x9e), region = 32 }
   0xc   : > { %v480_v0 = vmov 0   ;;  %s549_s12 = smov (!%p216_p4, %s470_s12), 7  ;;  %vm270_vm0 = vcmask 130048   ;;  %vm290_vm1 = vcmask 125952  }
   0xd   : > { %455 = vset.pattern.permute.xlu0 %v480_v0  ;;  %s424_s16 = sshll.u32 %s549_s12, 3  ;;  %s426_s17 = sshll.u32 %s549_s12, 4 }
   0xe   : > { %s228_s20 = scalar_lea.vmem %s541_s1, %s424_s16  ;;  %s220_s23 = scalar_lea.vmem %s540_s0, %s424_s16 }
   0xf   : > { %v429_v1 = vld [vmem:[%s228_s20] sm:$0xff]  ;;  %s233_s26 = scalar_lea.vmem %s542_s2, %s426_s17  ;;  %s241_s29 = scalar_lea.vmem %s543_s3, %s424_s16 }
  0x10   : > { %v428_v2 = vld [vmem:[%s220_s23] sm:$0xff]  ;;  %281 = vmatpush.bf16.msra.mxu0 %v429_v1  ;;  %v248_v4 = vld [vmem:[%s233_s26 + $0x8] sm:$0xff] }
  0x11   : > { %v247_v3 = vld [vmem:[%s233_s26] sm:$0xff] }
  0x12   : > { %251 = vperm.xlu0 %455, %v247_v3  }
  0x13   : > { %421 = vmatmul.msk.bf16.vlgmr.msra.gmra.mxu0 %vm270_vm0, %v428_v2 }
  0x1a   : > { %256 = vperm.xlu0 %455, %v248_v4  }
  0x84   : > { %v252_v5 = vpop.permute.xlu0 %251 }
  0x8c   : > { %v257_v9 = vpop.permute.xlu0 %256 }
  0x90   : > { %v283_v6 = vpop.f32.mrf.mxu0 }
  0x91   : > { %v284_v7 = vadd.f32 %v283_v6, %v252_v5 }
  0x93   : > { %v288_v8 = vpack.c.bf16 %v284_v7, %v284_v7 }
  0x95   : > { %291 = vst.msk [vmem:[%s241_s29] sm:$0xf] %vm290_vm1, %v288_v8 }
  0x98   : > { %v285_v10 = vpop.f32.mrf.mxu0 }
  0x99   : > { %v286_v11 = vadd.f32 %v285_v10, %v257_v9 }
  0x9b   : > { %v289_v12 = vpack.c.bf16 %v286_v11, %v286_v11 }
  0x9d   : > { %292 = vst.msk [vmem:[%s241_s29 + $0x4] sm:$0xf] %vm290_vm1, %v289_v12 }
  0x9e PF: > { %s13_s14 = sadd.s32 1, %s478_s14   ;;  %s544_s12 = smov %s474_s13 }
  0x9f   : > { %p10_p5 = scmp.ge.s32.totalorder %s13_s14, 10   ;;  %s545_s13 = smov %s547_s15 }
  0xa1   :  { %12 = sbr.rel (!%p10_p5) target bundleno = 2 (0x2), region = 68 }

// kernel: _lambda_.24
= control target key start
LH: loop header
LB: loop body
LE: loop exit
PB: predicated region body
PF: predicated region fallthrough
CT: control target
= control target key end

     0   :  { %vm216_vm0 = vcmask 1043456   ;;  %vm167_vm1 = vcmask 64512   ;;  %vm981_vm7 = vcmask 261120   ;;  %s2185_s2 = inlined_call_operand.vmem [shape: bf16[8,32], index: 2, kind: input, shape index: {}]   ;;  %s2186_s0 = inlined_call_operand.vmem [shape: bf16[256,8], index: 0, kind: input, shape index: {}]   ;;  %s2187_s3 = inlined_call_operand.vmem [shape: f32[1,32], index: 3, kind: input, shape index: {}]   ;;  %s2188_s1 = inlined_call_operand.vmem [shape: f32[256,32], index: 1, kind: input, shape index: {}]   ;;  %s2189_s4 = inlined_call_operand.vmem [shape: f32[256,32], index: 4, kind: output, shape index: {}]  }
   0x1   :  { %v50_v0 = vld [vmem:[%s2185_s2] sm:$0xf]  ;;  %v1131_v6 = vld [vmem:[%s2186_s0 + $0x8] sm:$0xff]  ;;  %v1132_v10 = vld [vmem:[%s2186_s0 + $0x10] sm:$0xff] }
   0x2   :  { %v218_v1 = vsel %vm216_vm0, %v50_v0, 0  ;;  %v1130_v2 = vld [vmem:[%s2186_s0] sm:$0xff]  ;;  %v1135_v7 = vld [vmem:[%s2186_s0 + $0x28] sm:$0xff]  ;;  %v1136_v11 = vld [vmem:[%s2186_s0 + $0x30] sm:$0xff] }
   0x3   :  { %v1134_v3 = vld [vmem:[%s2186_s0 + $0x20] sm:$0xff]  ;;  %227 = vmatpush.bf16.msra.mxu0 %v218_v1  ;;  %1146 = vmatpush.bf16.msra.mxu1 %v218_v1  ;;  %v1139_v8 = vld [vmem:[%s2186_s0 + $0x48] sm:$0xff]  ;;  %v1140_v12 = vld [vmem:[%s2186_s0 + $0x50] sm:$0xff] }
   0x4   :  { %v1138_v4 = vld [vmem:[%s2186_s0 + $0x40] sm:$0xff]  ;;  %1147 = vmatpush.bf16.msra.mxu2 %v218_v1  ;;  %1148 = vmatpush.bf16.msra.mxu3 %v218_v1  ;;  %v1143_v9 = vld [vmem:[%s2186_s0 + $0x68] sm:$0xff]  ;;  %v1144_v13 = vld [vmem:[%s2186_s0 + $0x70] sm:$0xff] }
   0x5   :  { %v1142_v5 = vld [vmem:[%s2186_s0 + $0x60] sm:$0xff]  ;;  %v1133_v14 = vld [vmem:[%s2186_s0 + $0x18] sm:$0xff] }
   0x6   :  { %1082 = vmatmul.msk.bf16.vlgmr.msra.gmra.mxu0 %vm167_vm1, %v1130_v2  ;;  %1086 = vmatmul.msk.bf16.vlgmr.msra.gmra.mxu1 %vm167_vm1, %v1134_v3  ;;  %v1137_v15 = vld [vmem:[%s2186_s0 + $0x38] sm:$0xff]  ;;  %v1374_v18 = vld [vmem:[%s2187_s3] ss:$0 sm:$0xff] }
   0x7   :  { %1090 = vmatmul.msk.bf16.vlgmr.msra.gmra.mxu2 %vm167_vm1, %v1138_v4  ;;  %1094 = vmatmul.msk.bf16.vlgmr.msra.gmra.mxu3 %vm167_vm1, %v1142_v5  ;;  %v1141_v16 = vld [vmem:[%s2186_s0 + $0x58] sm:$0xff] }
   0x8   :  { %v1145_v17 = vld [vmem:[%s2186_s0 + $0x78] sm:$0xff] }
  0x16   :  { %1083 = vmatmul.msk.bf16.gmra.mxu0 %vm167_vm1, %v1131_v6  ;;  %1087 = vmatmul.msk.bf16.gmra.mxu1 %vm167_vm1, %v1135_v7 }
  0x17   :  { %1091 = vmatmul.msk.bf16.gmra.mxu2 %vm167_vm1, %v1139_v8  ;;  %1095 = vmatmul.msk.bf16.gmra.mxu3 %vm167_vm1, %v1143_v9 }
  0x26   :  { %1084 = vmatmul.msk.bf16.gmra.mxu0 %vm167_vm1, %v1132_v10  ;;  %1088 = vmatmul.msk.bf16.gmra.mxu1 %vm167_vm1, %v1136_v11 }
  0x27   :  { %1092 = vmatmul.msk.bf16.gmra.mxu2 %vm167_vm1, %v1140_v12  ;;  %1096 = vmatmul.msk.bf16.gmra.mxu3 %vm167_vm1, %v1144_v13 }
  0x36   :  { %1085 = vmatmul.msk.bf16.gmra.mxu0 %vm167_vm1, %v1133_v14  ;;  %1089 = vmatmul.msk.bf16.gmra.mxu1 %vm167_vm1, %v1137_v15 }
  0x37   :  { %1093 = vmatmul.msk.bf16.gmra.mxu2 %vm167_vm1, %v1141_v16  ;;  %1097 = vmatmul.msk.bf16.gmra.mxu3 %vm167_vm1, %v1145_v17 }
  0x83   :  { %v229_v19 = vpop.f32.mrf.mxu0  ;;  %v249_v20 = vpop.f32.mrf.mxu1 }
  0x84   :  { %v1377_v21 = vadd.f32 %v1374_v18, %v229_v19  ;;  %v1380_v22 = vadd.f32 %v1374_v18, %v249_v20 }
  0x86   :  { %v1098_v23 = vmul.f32 -1.442695, %v1377_v21  ;;  %v1106_v24 = vmul.f32 -1.442695, %v1380_v22 }
  0x88   :  { %1150 = vpow2.f32 %v1098_v23 }
  0x89   :  { %1152 = vpow2.f32 %v1106_v24 }
  0x8a   :  { %v269_v25 = vpop.f32.mrf.mxu2  ;;  %v289_v26 = vpop.f32.mrf.mxu3 }
  0x8b   :  { %v1385_v27 = vadd.f32 %v1374_v18, %v269_v25  ;;  %v1388_v28 = vadd.f32 %v1374_v18, %v289_v26  ;;  %v231_v29 = vpop.f32.mrf.mxu0  ;;  %v251_v30 = vpop.f32.mrf.mxu1 }
  0x8c   :  { %v1391_v31 = vadd.f32 %v1374_v18, %v231_v29  ;;  %v1394_v32 = vadd.f32 %v1374_v18, %v251_v30 }
  0x8d   :  { %v1114_v33 = vmul.f32 -1.442695, %v1385_v27  ;;  %v1122_v34 = vmul.f32 -1.442695, %v1388_v28 }
  0x8e   :  { %v1151_v35 = vpop.eup %1150  ;;  %v1099_v38 = vmul.f32 -1.442695, %v1391_v31  ;;  %v1107_v40 = vmul.f32 -1.442695, %v1394_v32 }
  0x8f   :  { %v1153_v36 = vpop.eup %1152  ;;  %v1398_v37 = vadd.f32 1.0, %v1151_v35  ;;  %1154 = vpow2.f32 %v1114_v33  ;;  %v51_v35 = vld [vmem:[%s2188_s1] sm:$0xff] }
  0x90   :  { %v1401_v39 = vadd.f32 1.0, %v1153_v36  ;;  %1156 = vpow2.f32 %v1122_v34 }
  0x91   :  { %1158 = vrcp.f32 %v1398_v37  ;;  %v446_v45 = vand.u32 2147483647, %v1398_v37  ;;  %v448_v46 = vand.u32 2147483648, %v1398_v37  ;;  %vm442_vm2 = vweird.f32 %v1398_v37 }
  0x92   :  { %1160 = vrcp.f32 %v1401_v39  ;;  %v271_v41 = vpop.f32.mrf.mxu2  ;;  %v291_v42 = vpop.f32.mrf.mxu3  ;;  %v566_v49 = vand.u32 2147483647, %v1401_v39  ;;  %v568_v53 = vand.u32 2147483648, %v1401_v39  ;;  %vm562_vm3 = vweird.f32 %v1401_v39 }
  0x93   :  { %1162 = vpow2.f32 %v1099_v38  ;;  %v1407_v43 = vadd.f32 %v1374_v18, %v271_v41  ;;  %v234_v44 = vpop.f32.mrf.mxu0  ;;  %v254_v47 = vpop.f32.mrf.mxu1  ;;  %v1414_v51 = vadd.f32 %v1374_v18, %v291_v42  ;;  %vm1430_vm4 = vcmp.eq.f32.partialorder %v446_v45, 8.507059e+37  ;;  %v59_v42 = vld [vmem:[%s2188_s1 + $0x40] sm:$0xff] }
  0x94   :  { %1164 = vpow2.f32 %v1107_v40  ;;  %v1420_v55 = vadd.f32 %v1374_v18, %v234_v44  ;;  %v1427_v58 = vadd.f32 %v1374_v18, %v254_v47  ;;  %v449_v62 = vor.u32 1.1754944e-38, %v448_v46 }
  0x95   :  { %v1155_v48 = vpop.eup %1154  ;;  %v1115_v50 = vmul.f32 -1.442695, %v1407_v43  ;;  %vm1436_vm5 = vcmp.eq.f32.partialorder %v566_v49, 8.507059e+37  ;;  %v1123_v2 = vmul.f32 -1.442695, %v1414_v51  ;;  %v569_v5 = vor.u32 1.1754944e-38, %v568_v53 }
  0x96   :  { %v1157_v52 = vpop.eup %1156  ;;  %v1417_v54 = vadd.f32 1.0, %v1155_v48  ;;  %v1443_v6 = vmul.f32 -1.442695, %v1420_v55  ;;  %v1447_v9 = vmul.f32 -1.442695, %v1427_v58 }
  0x97   :  { %v1159_v56 = vpop.eup %1158  ;;  %v1424_v57 = vadd.f32 1.0, %v1157_v52 }
  0x98   :  { %v1161_v59 = vpop.eup %1160  ;;  %v438_v60 = vmul.f32 %v1159_v56, %v1398_v37  ;;  %1166 = vrcp.f32 %v1417_v54  ;;  %vm443_vm6 = vweird.f32 %v1159_v56  ;;  %v686_v8 = vand.u32 2147483647, %v1417_v54 }
  0x99   :  { %v1163_v63 = vpop.eup %1162  ;;  %v558_v0 = vmul.f32 %v1161_v59, %v1401_v39  ;;  %1168 = vpow2.f32 %v1115_v50  ;;  %v688_v11 = vand.u32 2147483648, %v1417_v54  ;;  %vm563_vm8 = vweird.f32 %v1161_v59  ;;  %vm444_vm10 = vmor %vm442_vm2, %vm443_vm6 }
  0x9a   :  { %v1165_v3 = vpop.eup %1164  ;;  %v439_v4 = vsub.f32 1.0, %v438_v60  ;;  %1170 = vrcp.f32 %v1424_v57  ;;  %v1450_v12 = vadd.f32 1.0, %v1163_v63  ;;  %v806_v15 = vand.u32 2147483647, %v1424_v57  ;;  %v274_v26 = vpop.f32.mrf.mxu2  ;;  %vm564_vm13 = vmor %vm562_vm3, %vm563_vm8 }
  0x9b   :  { %v559_v7 = vsub.f32 1.0, %v558_v0  ;;  %v1452_v13 = vadd.f32 1.0, %v1165_v3  ;;  %1172 = vpow2.f32 %v1123_v2  ;;  %vm682_vm9 = vweird.f32 %v1417_v54 }
  0x9c   :  { %v440_v10 = vmul.f32 %v1159_v56, %v439_v4  ;;  %v808_v19 = vand.u32 2147483648, %v1424_v57  ;;  %1174 = vrcp.f32 %v1450_v12  ;;  %vm1462_vm11 = vcmp.eq.f32.partialorder %v686_v8, 8.507059e+37 }
  0x9d   :  { %v560_v14 = vmul.f32 %v1161_v59, %v559_v7  ;;  %vm802_vm12 = vweird.f32 %v1424_v57  ;;  %v689_v33 = vor.u32 1.1754944e-38, %v688_v11  ;;  %v461_v34 = vand.u32 2147483647, %v1450_v12 }
  0x9e   :  { %v1167_v16 = vpop.eup %1166  ;;  %v441_v17 = vadd.f32 %v1159_v56, %v440_v10  ;;  %1176 = vrcp.f32 %v1452_v13  ;;  %vm1478_vm14 = vcmp.eq.f32.partialorder %v806_v15, 8.507059e+37  ;;  %v809_v45 = vor.u32 1.1754944e-38, %v808_v19 }
  0x9f   :  { %v1169_v20 = vpop.eup %1168  ;;  %v561_v23 = vadd.f32 %v1161_v59, %v560_v14  ;;  %v678_v24 = vmul.f32 %v1167_v16, %v1417_v54  ;;  %v1489_v46 = vadd.f32 %v1374_v18, %v274_v26  ;;  %vm683_vm15 = vweird.f32 %v1167_v16  ;;  %v67_v54 = vld [vmem:[%s2188_s1 + $0x80] sm:$0xff] }
  0xa0   :  { %v1171_v29 = vpop.eup %1170  ;;  %v445_v30 = vsel %vm444_vm10, %v1159_v56, %v441_v17  ;;  %vm457_vm0 = vweird.f32 %v1450_v12  ;;  %v463_v53 = vand.u32 2147483648, %v1450_v12  ;;  %v1494_v56 = vadd.f32 1.0, %v1169_v20  ;;  %vm684_vm3 = vmor %vm682_vm9, %vm683_vm15 }
  0xa1   :  { %v450_v36 = vsel %vm1430_vm4, %v449_v62, %v445_v30  ;;  %v565_v37 = vsel %vm564_vm13, %v1161_v59, %v561_v23  ;;  %v679_v38 = vsub.f32 1.0, %v678_v24  ;;  %v798_v40 = vmul.f32 %v1171_v29, %v1424_v57  ;;  %v1173_v47 = vpop.eup %1172 }
  0xa2   :  { %v917_v39 = vmul.f32 %v450_v36, %v1377_v21  ;;  %v570_v44 = vsel %vm1436_vm5, %v569_v5, %v565_v37  ;;  %v1175_v21 = vpop.eup %1174  ;;  %vm803_vm1 = vweird.f32 %v1171_v29  ;;  %vm1497_vm2 = vcmp.eq.f32.partialorder %v461_v34, 8.507059e+37  ;;  %v52_v36 = vld [vmem:[%s2188_s1 + $0x8] sm:$0xff] }
  0xa3   :  { %v925_v48 = vmul.f32 %v570_v44, %v1380_v22  ;;  %v680_v49 = vmul.f32 %v1167_v16, %v679_v38  ;;  %v799_v50 = vsub.f32 1.0, %v798_v40  ;;  %v453_v62 = vmul.f32 %v1175_v21, %v1450_v12  ;;  %vm804_vm5 = vmor %vm802_vm12, %vm803_vm1  ;;  %v294_v12 = vpop.f32.mrf.mxu3  ;;  %v236_v44 = vpop.f32.mrf.mxu0 }
  0xa4   :  { %v949_v52 = vadd.f32 %v917_v39, %v51_v35  ;;  %v1177_v22 = vpop.eup %1176  ;;  %vm577_vm4 = vweird.f32 %v1452_v13  ;;  %v581_v0 = vand.u32 2147483647, %v1452_v13  ;;  %1178 = vrcp.f32 %v1494_v56 }
  0xa5   :  { %v957_v59 = vadd.f32 %v925_v48, %v59_v42  ;;  %v681_v60 = vadd.f32 %v1167_v16, %v680_v49  ;;  %v800_v61 = vmul.f32 %v1171_v29, %v799_v50  ;;  %v1511_v1 = vadd.f32 1.0, %v1173_v47 }
  0xa6   :  { %982 = vst.msk [vmem:[%s2189_s4] sm:$0xff] %vm981_vm7, %v949_v52  ;;  %v454_v4 = vsub.f32 1.0, %v453_v62  ;;  %v573_v5 = vmul.f32 %v1177_v22, %v1452_v13  ;;  %vm458_vm6 = vweird.f32 %v1175_v21  ;;  %vm578_vm8 = vweird.f32 %v1177_v22  ;;  %v276_v62 = vpop.f32.mrf.mxu2 }
  0xa7   :  { %990 = vst.msk [vmem:[%s2189_s4 + $0x40] sm:$0xff] %vm981_vm7, %v957_v59  ;;  %v685_v2 = vsel %vm684_vm3, %v1167_v16, %v681_v60  ;;  %v801_v3 = vadd.f32 %v1171_v29, %v800_v61  ;;  %v583_v8 = vand.u32 2147483648, %v1452_v13  ;;  %v75_v16 = vld [vmem:[%s2188_s1 + $0xc0] sm:$0xff]  ;;  %v701_v19 = vand.u32 2147483647, %v1494_v56  ;;  %vm459_vm9 = vmor %vm457_vm0, %vm458_vm6 }
  0xa8   :  { %v690_v7 = vsel %vm1462_vm11, %v689_v33, %v685_v2  ;;  %v455_v14 = vmul.f32 %v1175_v21, %v454_v4  ;;  %v574_v15 = vsub.f32 1.0, %v573_v5  ;;  %v703_v57 = vand.u32 2147483648, %v1494_v56  ;;  %vm579_vm12 = vmor %vm577_vm4, %vm578_vm8 }
  0xa9   :  { %v933_v10 = vmul.f32 %v690_v7, %v1385_v27  ;;  %v805_v11 = vsel %vm804_vm5, %v1171_v29, %v801_v3  ;;  %1180 = vrcp.f32 %v1511_v1  ;;  %v464_v26 = vor.u32 1.1754944e-38, %v463_v53 }
  0xaa   :  { %v810_v17 = vsel %vm1478_vm14, %v809_v45, %v805_v11  ;;  %v456_v27 = vadd.f32 %v1175_v21, %v455_v14  ;;  %v575_v24 = vmul.f32 %v1177_v22, %v574_v15  ;;  %v1179_v25 = vpop.eup %1178  ;;  %vm1540_vm10 = vcmp.eq.f32.partialorder %v581_v0, 8.507059e+37  ;;  %v60_v45 = vld [vmem:[%s2188_s1 + $0x48] sm:$0xff] }
  0xab   :  { %v965_v20 = vadd.f32 %v933_v10, %v67_v54  ;;  %v941_v23 = vmul.f32 %v810_v17, %v1388_v28  ;;  %v584_v30 = vor.u32 1.1754944e-38, %v583_v8  ;;  %vm697_vm11 = vweird.f32 %v1494_v56  ;;  %v68_v54 = vld [vmem:[%s2188_s1 + $0x88] sm:$0xff] }
  0xac   :  { %v460_v33 = vsel %vm459_vm9, %v1175_v21, %v456_v27  ;;  %v576_v34 = vadd.f32 %v1177_v22, %v575_v24  ;;  %v693_v35 = vmul.f32 %v1179_v25, %v1494_v56  ;;  %vm698_vm13 = vweird.f32 %v1179_v25 }
  0xad   :  { %998 = vst.msk [vmem:[%s2189_s4 + $0x80] sm:$0xff] %vm981_vm7, %v965_v20  ;;  %v973_v28 = vadd.f32 %v941_v23, %v75_v16  ;;  %v465_v37 = vsel %vm1497_vm2, %v464_v26, %v460_v33  ;;  %vm1558_vm14 = vcmp.eq.f32.partialorder %v701_v19, 8.507059e+37  ;;  %v704_v40 = vor.u32 1.1754944e-38, %v703_v57  ;;  %vm699_vm0 = vmor %vm697_vm11, %vm698_vm13  ;;  %v296_v16 = vpop.f32.mrf.mxu3  ;;  %v239_v23 = vpop.f32.mrf.mxu0 }
  0xae   :  { %v918_v41 = vmul.f32 %v465_v37, %v1391_v31  ;;  %v580_v39 = vsel %vm579_vm12, %v1177_v22, %v576_v34  ;;  %v694_v42 = vsub.f32 1.0, %v693_v35  ;;  %1182 = vpow2.f32 %v1443_v6  ;;  %v256_v31 = vpop.f32.mrf.mxu1 }
  0xaf   :  { %1006 = vst.msk [vmem:[%s2189_s4 + $0xc0] sm:$0xff] %vm981_vm7, %v973_v28  ;;  %v1181_v13 = vpop.eup %1180  ;;  %v585_v47 = vsel %vm1540_vm10, %v584_v30, %v580_v39  ;;  %1184 = vpow2.f32 %v1447_v9  ;;  %v1116_v48 = vmul.f32 -1.442695, %v1489_v46  ;;  %v1576_v49 = vadd.f32 %v1374_v18, %v294_v12 }
  0xb0   :  { %v950_v50 = vadd.f32 %v918_v41, %v52_v36  ;;  %v926_v6 = vmul.f32 %v585_v47, %v1394_v32  ;;  %v695_v21 = vmul.f32 %v1179_v25, %v694_v42  ;;  %v813_v52 = vmul.f32 %v1181_v13, %v1511_v1 }
  0xb1   :  { %vm817_vm15 = vweird.f32 %v1511_v1  ;;  %1186 = vpow2.f32 %v1116_v48  ;;  %v1124_v53 = vmul.f32 -1.442695, %v1576_v49  ;;  %v1583_v59 = vadd.f32 %v1374_v18, %v236_v44 }
  0xb2   :  { %983 = vst.msk [vmem:[%s2189_s4 + $0x8] sm:$0xff] %vm981_vm7, %v950_v50  ;;  %v958_v9 = vadd.f32 %v926_v6, %v60_v45  ;;  %v696_v60 = vadd.f32 %v1179_v25, %v695_v21  ;;  %v814_v61 = vsub.f32 1.0, %v813_v52  ;;  %v1590_v32 = vadd.f32 %v1374_v18, %v256_v31 }
  0xb3   :  { %v821_v63 = vand.u32 2147483647, %v1511_v1  ;;  %v823_v22 = vand.u32 2147483648, %v1511_v1  ;;  %1188 = vpow2.f32 %v1124_v53  ;;  %v1101_v0 = vmul.f32 -1.442695, %v1583_v59 }
  0xb4   :  { %v1183_v2 = vpop.eup %1182  ;;  %991 = vst.msk [vmem:[%s2189_s4 + $0x48] sm:$0xff] %vm981_vm7, %v958_v9  ;;  %v700_v3 = vsel %vm699_vm0, %v1179_v25, %v696_v60  ;;  %v815_v4 = vmul.f32 %v1181_v13, %v814_v61  ;;  %vm818_vm1 = vweird.f32 %v1181_v13  ;;  %v1109_v5 = vmul.f32 -1.442695, %v1590_v32 }
  0xb5   :  { %v1185_v56 = vpop.eup %1184  ;;  %v705_v7 = vsel %vm1558_vm14, %v704_v40, %v700_v3  ;;  %v1608_v8 = vadd.f32 1.0, %v1183_v2  ;;  %1190 = vpow2.f32 %v1101_v0  ;;  %v1611_v10 = vadd.f32 %v1374_v18, %v276_v62  ;;  %vm819_vm2 = vmor %vm817_vm15, %vm818_vm1 }
  0xb6   :  { %v934_v11 = vmul.f32 %v705_v7, %v1407_v43  ;;  %v816_v14 = vadd.f32 %v1181_v13, %v815_v4  ;;  %v1614_v15 = vadd.f32 1.0, %v1185_v56  ;;  %1192 = vpow2.f32 %v1109_v5  ;;  %v76_v43 = vld [vmem:[%s2188_s1 + $0xc8] sm:$0xff] }
  0xb7   :  { %v1187_v17 = vpop.eup %1186  ;;  %v824_v19 = vor.u32 1.1754944e-38, %v823_v22  ;;  %1194 = vrcp.f32 %v1608_v8  ;;  %vm822_vm3 = vcmp.eq.f32.partialorder %v821_v63, 8.507059e+37  ;;  %v476_v25 = vand.u32 2147483647, %v1608_v8 }
  0xb8   :  { %v966_v57 = vadd.f32 %v934_v11, %v68_v54  ;;  %v820_v20 = vsel %vm819_vm2, %v1181_v13, %v816_v14  ;;  %1196 = vrcp.f32 %v1614_v15  ;;  %v1117_v1 = vmul.f32 -1.442695, %v1611_v10 }
  0xb9   :  { %v1189_v27 = vpop.eup %1188  ;;  %v825_v24 = vsel %vm822_vm3, %v824_v19, %v820_v20  ;;  %v1626_v26 = vadd.f32 %v1374_v18, %v296_v16  ;;  %v478_v30 = vand.u32 2147483648, %v1608_v8  ;;  %v1634_v28 = vadd.f32 1.0, %v1187_v17  ;;  %v53_v20 = vld [vmem:[%s2188_s1 + $0x10] sm:$0xff] }
  0xba   :  { %999 = vst.msk [vmem:[%s2189_s4 + $0x88] sm:$0xff] %vm981_vm7, %v966_v57  ;;  %v942_v29 = vmul.f32 %v825_v24, %v1414_v51  ;;  %v1636_v33 = vadd.f32 1.0, %v1189_v27  ;;  %v596_v35 = vand.u32 2147483647, %v1614_v15  ;;  %v598_v12 = vand.u32 2147483648, %v1614_v15 }
  0xbb   :  { %v1191_v34 = vpop.eup %1190  ;;  %v1641_v36 = vadd.f32 %v1374_v18, %v239_v23  ;;  %1198 = vrcp.f32 %v1634_v28  ;;  %vm472_vm4 = vweird.f32 %v1608_v8  ;;  %vm592_vm5 = vweird.f32 %v1614_v15 }
  0xbc   :  { %v1193_v37 = vpop.eup %1192  ;;  %v974_v38 = vadd.f32 %v942_v29, %v76_v43  ;;  %1200 = vrcp.f32 %v1636_v33  ;;  %v1125_v51 = vmul.f32 -1.442695, %v1626_v26  ;;  %vm1653_vm6 = vcmp.eq.f32.partialorder %v476_v25, 8.507059e+37  ;;  %v61_v25 = vld [vmem:[%s2188_s1 + $0x50] sm:$0xff] }
  0xbd   :  { %v1195_v40 = vpop.eup %1194  ;;  %v479_v44 = vor.u32 1.1754944e-38, %v478_v30  ;;  %1202 = vpow2.f32 %v1117_v1  ;;  %vm1658_vm8 = vcmp.eq.f32.partialorder %v596_v35, 8.507059e+37  ;;  %v599_v47 = vor.u32 1.1754944e-38, %v598_v12 }
  0xbe   :  { %v1197_v41 = vpop.eup %1196  ;;  %1007 = vst.msk [vmem:[%s2189_s4 + $0xc8] sm:$0xff] %vm981_vm7, %v974_v38  ;;  %v468_v39 = vmul.f32 %v1195_v40, %v1608_v8  ;;  %v716_v48 = vand.u32 2147483647, %v1634_v28  ;;  %v1664_v31 = vmul.f32 -1.442695, %v1641_v36  ;;  %v718_v6 = vand.u32 2147483648, %v1634_v28 }
  0xbf   :  { %v588_v13 = vmul.f32 %v1197_v41, %v1614_v15  ;;  %v836_v21 = vand.u32 2147483647, %v1636_v33  ;;  %v1668_v52 = vadd.f32 1.0, %v1191_v34  ;;  %vm712_vm9 = vweird.f32 %v1634_v28 }
  0xc0   :  { %v469_v50 = vsub.f32 1.0, %v468_v39  ;;  %v838_v9 = vand.u32 2147483648, %v1636_v33  ;;  %v1672_v60 = vadd.f32 1.0, %v1193_v37  ;;  %1204 = vpow2.f32 %v1125_v51  ;;  %v259_v51 = vpop.f32.mrf.mxu1 }
  0xc1   :  { %v589_v53 = vsub.f32 1.0, %v588_v13  ;;  %v1199_v61 = vpop.eup %1198  ;;  %vm473_vm10 = vweird.f32 %v1195_v40  ;;  %vm832_vm11 = vweird.f32 %v1636_v33  ;;  %1206 = vrcp.f32 %v1668_v52 }
  0xc2   :  { %v470_v62 = vmul.f32 %v1195_v40, %v469_v50  ;;  %v1201_v63 = vpop.eup %1200  ;;  %vm593_vm12 = vweird.f32 %v1197_v41  ;;  %v708_v0 = vmul.f32 %v1199_v61, %v1634_v28  ;;  %vm1677_vm13 = vcmp.eq.f32.partialorder %v716_v48, 8.507059e+37  ;;  %vm474_vm15 = vmor %vm472_vm4, %vm473_vm10  ;;  %v69_v28 = vld [vmem:[%s2188_s1 + $0x90] sm:$0xff] }
  0xc3   :  { %v590_v22 = vmul.f32 %v1197_v41, %v589_v53  ;;  %v1203_v3 = vpop.eup %1202  ;;  %v719_v5 = vor.u32 1.1754944e-38, %v718_v6  ;;  %v828_v56 = vmul.f32 %v1201_v63, %v1636_v33  ;;  %vm1682_vm14 = vcmp.eq.f32.partialorder %v836_v21, 8.507059e+37  ;;  %vm594_vm0 = vmor %vm592_vm5, %vm593_vm12  ;;  %v77_v48 = vld [vmem:[%s2188_s1 + $0xd0] sm:$0xff]  ;;  %v279_v21 = vpop.f32.mrf.mxu2 }
  0xc4   :  { %v471_v4 = vadd.f32 %v1195_v40, %v470_v62  ;;  %v709_v11 = vsub.f32 1.0, %v708_v0  ;;  %v839_v14 = vor.u32 1.1754944e-38, %v838_v9  ;;  %1208 = vrcp.f32 %v1672_v60 }
  0xc5   :  { %v591_v7 = vadd.f32 %v1197_v41, %v590_v22  ;;  %vm713_vm1 = vweird.f32 %v1199_v61  ;;  %v829_v17 = vsub.f32 1.0, %v828_v56  ;;  %v491_v19 = vand.u32 2147483647, %v1668_v52  ;;  %v299_v56 = vpop.f32.mrf.mxu3 }
  0xc6   :  { %v475_v16 = vsel %vm474_vm15, %v1195_v40, %v471_v4  ;;  %v1205_v57 = vpop.eup %1204  ;;  %v710_v27 = vmul.f32 %v1199_v61, %v709_v11  ;;  %v493_v43 = vand.u32 2147483648, %v1668_v52  ;;  %vm833_vm2 = vweird.f32 %v1201_v63  ;;  %vm714_vm3 = vmor %vm712_vm9, %vm713_vm1 }
  0xc7   :  { %v480_v8 = vsel %vm1653_vm6, %v479_v44, %v475_v16  ;;  %v595_v23 = vsel %vm594_vm0, %v1197_v41, %v591_v7  ;;  %v1207_v24 = vpop.eup %1206  ;;  %v830_v29 = vmul.f32 %v1201_v63, %v829_v17  ;;  %v611_v12 = vand.u32 2147483647, %v1672_v60  ;;  %vm834_vm4 = vmor %vm832_vm11, %vm833_vm2 }
  0xc8   :  { %v919_v15 = vmul.f32 %v480_v8, %v1420_v55  ;;  %v600_v1 = vsel %vm1658_vm8, %v599_v47, %v595_v23  ;;  %v711_v34 = vadd.f32 %v1199_v61, %v710_v27  ;;  %v483_v35 = vmul.f32 %v1207_v24, %v1668_v52 }
  0xc9   :  { %v927_v30 = vmul.f32 %v600_v1, %v1427_v58  ;;  %v831_v55 = vadd.f32 %v1201_v63, %v830_v29  ;;  %v613_v38 = vand.u32 2147483648, %v1672_v60  ;;  %v1711_v40 = vadd.f32 1.0, %v1203_v3  ;;  %v54_v3 = vld [vmem:[%s2188_s1 + $0x18] sm:$0xff] }
  0xca   :  { %v951_v37 = vadd.f32 %v919_v15, %v53_v20  ;;  %v1209_v41 = vpop.eup %1208  ;;  %v715_v42 = vsel %vm714_vm3, %v1199_v61, %v711_v34  ;;  %v484_v58 = vsub.f32 1.0, %v483_v35  ;;  %v1715_v44 = vadd.f32 1.0, %v1205_v57  ;;  %v241_v57 = vpop.f32.mrf.mxu0 }
  0xcb   :  { %v959_v39 = vadd.f32 %v927_v30, %v61_v25  ;;  %v720_v13 = vsel %vm1677_vm13, %v719_v5, %v715_v42  ;;  %v835_v45 = vsel %vm834_vm4, %v1201_v63, %v831_v55  ;;  %vm488_vm5 = vweird.f32 %v1207_v24  ;;  %v261_v20 = vpop.f32.mrf.mxu1 }
  0xcc   :  { %984 = vst.msk [vmem:[%s2189_s4 + $0x10] sm:$0xff] %vm981_vm7, %v951_v37  ;;  %v603_v33 = vmul.f32 %v1209_v41, %v1672_v60  ;;  %v935_v47 = vmul.f32 %v720_v13, %v1489_v46  ;;  %v840_v50 = vsel %vm1682_vm14, %v839_v14, %v835_v45  ;;  %v485_v6 = vmul.f32 %v1207_v24, %v484_v58 }
  0xcd   :  { %992 = vst.msk [vmem:[%s2189_s4 + $0x50] sm:$0xff] %vm981_vm7, %v959_v39  ;;  %1210 = vrcp.f32 %v1711_v40  ;;  %v943_v53 = vmul.f32 %v840_v50, %v1576_v49  ;;  %vm487_vm6 = vweird.f32 %v1668_v52  ;;  %v1741_v61 = vadd.f32 %v1374_v18, %v259_v51 }
  0xce   :  { %v604_v9 = vsub.f32 1.0, %v603_v33  ;;  %v967_v46 = vadd.f32 %v935_v47, %v69_v28  ;;  %v486_v62 = vadd.f32 %v1207_v24, %v485_v6  ;;  %vm492_vm8 = vcmp.eq.f32.partialorder %v491_v19, 8.507059e+37  ;;  %vm489_vm9 = vmor %vm487_vm6, %vm488_vm5  ;;  %v70_v6 = vld [vmem:[%s2188_s1 + $0x98] sm:$0xff] }
  0xcf   :  { %1212 = vrcp.f32 %v1715_v44  ;;  %v975_v63 = vadd.f32 %v943_v53, %v77_v48  ;;  %v494_v22 = vor.u32 1.1754944e-38, %v493_v43  ;;  %vm608_vm10 = vweird.f32 %v1209_v41 }
  0xd0   :  { %v605_v0 = vmul.f32 %v1209_v41, %v604_v9  ;;  %1000 = vst.msk [vmem:[%s2189_s4 + $0x90] sm:$0xff] %vm981_vm7, %v967_v46  ;;  %v490_v49 = vsel %vm489_vm9, %v1207_v24, %v486_v62  ;;  %vm607_vm11 = vweird.f32 %v1672_v60  ;;  %vm1750_vm12 = vcmp.eq.f32.partialorder %v611_v12, 8.507059e+37  ;;  %v301_v46 = vpop.f32.mrf.mxu3 }
  0xd1   :  { %v614_v2 = vor.u32 1.1754944e-38, %v613_v38  ;;  %1008 = vst.msk [vmem:[%s2189_s4 + $0xd0] sm:$0xff] %vm981_vm7, %v975_v63  ;;  %v495_v4 = vsel %vm492_vm8, %v494_v22, %v490_v49  ;;  %vm727_vm13 = vweird.f32 %v1711_v40  ;;  %1214 = vpow2.f32 %v1664_v31  ;;  %vm609_vm14 = vmor %vm607_vm11, %vm608_vm10  ;;  %v78_v63 = vld [vmem:[%s2188_s1 + $0xd8] sm:$0xff] }
  0xd2   :  { %v606_v5 = vadd.f32 %v1209_v41, %v605_v0  ;;  %v1110_v60 = vmul.f32 -1.442695, %v1741_v61  ;;  %v920_v7 = vmul.f32 %v495_v4, %v1583_v59  ;;  %v731_v11 = vand.u32 2147483647, %v1711_v40  ;;  %v62_v59 = vld [vmem:[%s2188_s1 + $0x58] sm:$0xff] }
  0xd3   :  { %v1211_v54 = vpop.eup %1210  ;;  %v733_v14 = vand.u32 2147483648, %v1711_v40  ;;  %v1769_v16 = vadd.f32 %v1374_v18, %v279_v21  ;;  %v851_v31 = vand.u32 2147483647, %v1715_v44  ;;  %v1780_v24 = vadd.f32 %v1374_v18, %v299_v56 }
  0xd4   :  { %v610_v17 = vsel %vm609_vm14, %v1209_v41, %v606_v5  ;;  %v723_v19 = vmul.f32 %v1211_v54, %v1711_v40  ;;  %1216 = vpow2.f32 %v1110_v60  ;;  %v952_v23 = vadd.f32 %v920_v7, %v54_v3 }
  0xd5   :  { %v1213_v8 = vpop.eup %1212  ;;  %v615_v27 = vsel %vm1750_vm12, %v614_v2, %v610_v17  ;;  %v1118_v43 = vmul.f32 -1.442695, %v1769_v16  ;;  %v853_v29 = vand.u32 2147483648, %v1715_v44  ;;  %v1126_v30 = vmul.f32 -1.442695, %v1780_v24 }
  0xd6   :  { %v928_v15 = vmul.f32 %v615_v27, %v1590_v32  ;;  %v724_v25 = vsub.f32 1.0, %v723_v19  ;;  %v843_v1 = vmul.f32 %v1213_v8, %v1715_v44  ;;  %985 = vst.msk [vmem:[%s2189_s4 + $0x18] sm:$0xff] %vm981_vm7, %v952_v23  ;;  %v1791_v34 = vadd.f32 %v1374_v18, %v241_v57  ;;  %v281_v32 = vpop.f32.mrf.mxu2 }
  0xd7   :  { %1218 = vpow2.f32 %v1118_v43  ;;  %v1794_v35 = vadd.f32 %v1374_v18, %v261_v20  ;;  %v1215_v12 = vpop.eup %1214  ;;  %vm728_vm15 = vweird.f32 %v1211_v54  ;;  %vm848_vm0 = vweird.f32 %v1213_v8 }
  0xd8   :  { %v960_v37 = vadd.f32 %v928_v15, %v62_v59  ;;  %v725_v55 = vmul.f32 %v1211_v54, %v724_v25  ;;  %v844_v38 = vsub.f32 1.0, %v843_v1  ;;  %v1796_v51 = vadd.f32 1.0, %v1215_v12  ;;  %vm729_vm1 = vmor %vm727_vm13, %vm728_vm15 }
  0xd9   :  { %1220 = vpow2.f32 %v1126_v30  ;;  %v1103_v41 = vmul.f32 -1.442695, %v1791_v34  ;;  %v1111_v39 = vmul.f32 -1.442695, %v1794_v35  ;;  %v1805_v13 = vadd.f32 %v1374_v18, %v281_v32 }
  0xda   :  { %v1217_v42 = vpop.eup %1216  ;;  %993 = vst.msk [vmem:[%s2189_s4 + $0x58] sm:$0xff] %vm981_vm7, %v960_v37  ;;  %v726_v58 = vadd.f32 %v1211_v54, %v725_v55  ;;  %v845_v28 = vmul.f32 %v1213_v8, %v844_v38  ;;  %vm732_vm2 = vcmp.eq.f32.partialorder %v731_v11, 8.507059e+37  ;;  %v734_v45 = vor.u32 1.1754944e-38, %v733_v14 }
  0xdb   :  { %vm847_vm3 = vweird.f32 %v1715_v44  ;;  %1222 = vrcp.f32 %v1796_v51  ;;  %v1811_v48 = vadd.f32 1.0, %v1217_v42  ;;  %vm852_vm5 = vcmp.eq.f32.partialorder %v851_v31, 8.507059e+37 }
  0xdc   :  { %v730_v33 = vsel %vm729_vm1, %v1211_v54, %v726_v58  ;;  %v846_v47 = vadd.f32 %v1213_v8, %v845_v28  ;;  %1224 = vpow2.f32 %v1103_v41  ;;  %vm849_vm4 = vmor %vm847_vm3, %vm848_vm0  ;;  %v854_v40 = vor.u32 1.1754944e-38, %v853_v29 }
  0xdd   :  { %v1219_v50 = vpop.eup %1218  ;;  %v735_v21 = vsel %vm732_vm2, %v734_v45, %v730_v33  ;;  %1226 = vpow2.f32 %v1111_v39  ;;  %v1119_v9 = vmul.f32 -1.442695, %v1805_v13  ;;  %v506_v0 = vand.u32 2147483647, %v1796_v51 }
  0xde   :  { %v936_v53 = vmul.f32 %v735_v21, %v1611_v10  ;;  %v850_v44 = vsel %vm849_vm4, %v1213_v8, %v846_v47  ;;  %1228 = vrcp.f32 %v1811_v48  ;;  %v508_v49 = vand.u32 2147483648, %v1796_v51 }
  0xdf   :  { %v1221_v62 = vpop.eup %1220  ;;  %v855_v22 = vsel %vm852_vm5, %v854_v40, %v850_v44  ;;  %v1824_v52 = vadd.f32 1.0, %v1219_v50  ;;  %v626_v5 = vand.u32 2147483647, %v1811_v48  ;;  %v628_v60 = vand.u32 2147483648, %v1811_v48 }
  0xe0   :  { %v968_v2 = vadd.f32 %v936_v53, %v70_v6  ;;  %v944_v10 = vmul.f32 %v855_v22, %v1626_v26  ;;  %v1827_v3 = vadd.f32 1.0, %v1221_v62  ;;  %v1833_v56 = vadd.f32 %v1374_v18, %v301_v46 }
  0xe1   :  { %v1223_v4 = vpop.eup %1222  ;;  %1230 = vrcp.f32 %v1824_v52  ;;  %vm502_vm6 = vweird.f32 %v1796_v51  ;;  %vm1841_vm8 = vcmp.eq.f32.partialorder %v506_v0, 8.507059e+37  ;;  %v509_v17 = vor.u32 1.1754944e-38, %v508_v49 }
  0xe2   :  { %v1225_v54 = vpop.eup %1224  ;;  %1001 = vst.msk [vmem:[%s2189_s4 + $0x98] sm:$0xff] %vm981_vm7, %v968_v2  ;;  %v976_v7 = vadd.f32 %v944_v10, %v78_v63  ;;  %v498_v26 = vmul.f32 %v1223_v4, %v1796_v51  ;;  %1232 = vpow2.f32 %v1119_v9  ;;  %vm622_vm9 = vweird.f32 %v1811_v48  ;;  %v55_v51 = vld [vmem:[%s2188_s1 + $0x20] sm:$0xff] }
  0xe3   :  { %v1227_v11 = vpop.eup %1226  ;;  %1234 = vrcp.f32 %v1827_v3  ;;  %v746_v31 = vand.u32 2147483647, %v1824_v52  ;;  %v748_v57 = vand.u32 2147483648, %v1824_v52  ;;  %v1853_v20 = vadd.f32 1.0, %v1225_v54 }
  0xe4   :  { %v1229_v18 = vpop.eup %1228  ;;  %1009 = vst.msk [vmem:[%s2189_s4 + $0xd8] sm:$0xff] %vm981_vm7, %v976_v7  ;;  %v499_v19 = vsub.f32 1.0, %v498_v26  ;;  %vm1856_vm10 = vcmp.eq.f32.partialorder %v626_v5, 8.507059e+37  ;;  %v629_v59 = vor.u32 1.1754944e-38, %v628_v60  ;;  %v868_v27 = vand.u32 2147483648, %v1827_v3  ;;  %v244_v5 = vpop.f32.mrf.mxu0 }
  0xe5   :  { %v618_v8 = vmul.f32 %v1229_v18, %v1811_v48  ;;  %vm503_vm11 = vweird.f32 %v1223_v4  ;;  %v866_v15 = vand.u32 2147483647, %v1827_v3  ;;  %1236 = vrcp.f32 %v1853_v20  ;;  %v63_v48 = vld [vmem:[%s2188_s1 + $0x60] sm:$0xff]  ;;  %v264_v60 = vpop.f32.mrf.mxu1 }
  0xe6   :  { %v500_v43 = vmul.f32 %v1223_v4, %v499_v19  ;;  %vm742_vm12 = vweird.f32 %v1824_v52  ;;  %v523_v29 = vand.u32 2147483648, %v1853_v20  ;;  %v1865_v30 = vadd.f32 1.0, %v1227_v11  ;;  %vm504_vm0 = vmor %vm502_vm6, %vm503_vm11 }
  0xe7   :  { %v1231_v25 = vpop.eup %1230  ;;  %v619_v1 = vsub.f32 1.0, %v618_v8  ;;  %vm623_vm13 = vweird.f32 %v1229_v18  ;;  %vm1868_vm14 = vcmp.eq.f32.partialorder %v746_v31, 8.507059e+37  ;;  %v749_v38 = vor.u32 1.1754944e-38, %v748_v57 }
  0xe8   :  { %v1233_v32 = vpop.eup %1232  ;;  %v501_v12 = vadd.f32 %v1223_v4, %v500_v43  ;;  %v738_v37 = vmul.f32 %v1231_v25, %v1824_v52  ;;  %vm862_vm15 = vweird.f32 %v1827_v3  ;;  %v869_v42 = vor.u32 1.1754944e-38, %v868_v27  ;;  %vm624_vm4 = vmor %vm622_vm9, %vm623_vm13  ;;  %v71_v52 = vld [vmem:[%s2188_s1 + $0xa0] sm:$0xff]  ;;  %v284_v27 = vpop.f32.mrf.mxu2 }
  0xe9   :  { %v1235_v41 = vpop.eup %1234  ;;  %v620_v39 = vmul.f32 %v1229_v18, %v619_v1  ;;  %v521_v58 = vand.u32 2147483647, %v1853_v20  ;;  %1238 = vrcp.f32 %v1865_v30  ;;  %vm743_vm1 = vweird.f32 %v1231_v25 }
  0xea   :  { %v505_v28 = vsel %vm504_vm0, %v1223_v4, %v501_v12  ;;  %v739_v45 = vsub.f32 1.0, %v738_v37  ;;  %v858_v33 = vmul.f32 %v1235_v41, %v1827_v3  ;;  %vm1879_vm2 = vcmp.eq.f32.partialorder %v866_v15, 8.507059e+37  ;;  %v79_v3 = vld [vmem:[%s2188_s1 + $0xe0] sm:$0xff]  ;;  %v304_v12 = vpop.f32.mrf.mxu3 }
  0xeb   :  { %v510_v50 = vsel %vm1841_vm8, %v509_v17, %v505_v28  ;;  %v621_v6 = vadd.f32 %v1229_v18, %v620_v39  ;;  %vm517_vm3 = vweird.f32 %v1853_v20  ;;  %v1889_v21 = vor.u32 1.1754944e-38, %v523_v29  ;;  %v1893_v53 = vpop.eup %1236  ;;  %vm744_vm8 = vmor %vm742_vm12, %vm743_vm1  ;;  %v56_v39 = vld [vmem:[%s2188_s1 + $0x28] sm:$0xff] }
  0xec   :  { %v1891_v40 = vadd.f32 1.0, %v1233_v32  ;;  %v921_v44 = vmul.f32 %v510_v50, %v1641_v36  ;;  %v740_v9 = vmul.f32 %v1231_v25, %v739_v45  ;;  %v859_v46 = vsub.f32 1.0, %v858_v33 }
  0xed   :  { %vm863_vm5 = vweird.f32 %v1235_v41  ;;  %v625_v62 = vsel %vm624_vm4, %v1229_v18, %v621_v6  ;;  %v513_v63 = vmul.f32 %v1893_v53, %v1853_v20  ;;  %vm1901_vm6 = vcmp.eq.f32.partialorder %v521_v58, 8.507059e+37 }
  0xee   :  { %v641_v0 = vand.u32 2147483647, %v1865_v30  ;;  %v643_v49 = vand.u32 2147483648, %v1865_v30  ;;  %v953_v36 = vadd.f32 %v921_v44, %v55_v51  ;;  %v630_v2 = vsel %vm1856_vm10, %v629_v59, %v625_v62  ;;  %vm864_vm11 = vmor %vm862_vm15, %vm863_vm5  ;;  %v64_v44 = vld [vmem:[%s2188_s1 + $0x68] sm:$0xff] }
  0xef   :  { %v741_v10 = vadd.f32 %v1231_v25, %v740_v9  ;;  %v860_v4 = vmul.f32 %v1235_v41, %v859_v46  ;;  %v1239_v54 = vpop.eup %1238  ;;  %v929_v7 = vmul.f32 %v630_v2, %v1741_v61  ;;  %v514_v26 = vsub.f32 1.0, %v513_v63 }
  0xf0   :  { %vm637_vm9 = vweird.f32 %v1865_v30  ;;  %1240 = vrcp.f32 %v1891_v40  ;;  %986 = vst.msk [vmem:[%s2189_s4 + $0x20] sm:$0xff] %vm981_vm7, %v953_v36  ;;  %vm518_vm10 = vweird.f32 %v1893_v53  ;;  %v633_v61 = vmul.f32 %v1239_v54, %v1865_v30 }
  0xf1   :  { %v745_v11 = vsel %vm744_vm8, %v1231_v25, %v741_v10  ;;  %v861_v14 = vadd.f32 %v1235_v41, %v860_v4  ;;  %v961_v17 = vadd.f32 %v929_v7, %v63_v48  ;;  %v515_v19 = vmul.f32 %v1893_v53, %v514_v26  ;;  %v286_v4 = vpop.f32.mrf.mxu2  ;;  %v72_v26 = vld [vmem:[%s2188_s1 + $0xa8] sm:$0xff] }
  0xf2   :  { %v750_v18 = vsel %vm1868_vm14, %v749_v38, %v745_v11  ;;  %vm1933_vm12 = vcmp.eq.f32.partialorder %v641_v0, 8.507059e+37  ;;  %v634_v23 = vsub.f32 1.0, %v633_v61  ;;  %v644_v59 = vor.u32 1.1754944e-38, %v643_v49  ;;  %vm519_vm14 = vmor %vm517_vm3, %vm518_vm10 }
  0xf3   :  { %v937_v57 = vmul.f32 %v750_v18, %v1769_v16  ;;  %v865_v8 = vsel %vm864_vm11, %v1235_v41, %v861_v14  ;;  %994 = vst.msk [vmem:[%s2189_s4 + $0x60] sm:$0xff] %vm981_vm7, %v961_v17  ;;  %v516_v15 = vadd.f32 %v1893_v53, %v515_v19  ;;  %vm638_vm13 = vweird.f32 %v1239_v54  ;;  %v1278_v41 = vld [vmem:[%s2187_s3] ss:$0 sm:$0xff] }
  0xf4   :  { %v870_v43 = vsel %vm1879_vm2, %v869_v42, %v865_v8  ;;  %v1127_v16 = vmul.f32 -1.442695, %v1833_v56  ;;  %v635_v29 = vmul.f32 %v1239_v54, %v634_v23  ;;  %v761_v32 = vand.u32 2147483647, %v1891_v40  ;;  %vm639_vm15 = vmor %vm637_vm9, %vm638_vm13 }
  0xf5   :  { %v969_v25 = vadd.f32 %v937_v57, %v71_v52  ;;  %v945_v1 = vmul.f32 %v870_v43, %v1780_v24  ;;  %v520_v55 = vsel %vm519_vm14, %v1893_v53, %v516_v15  ;;  %v763_v38 = vand.u32 2147483648, %v1891_v40  ;;  %v266_v53 = vpop.f32.mrf.mxu1 }
  0xf6   :  { %v1241_v37 = vpop.eup %1240  ;;  %1242 = vpow2.f32 %v1127_v16  ;;  %v1960_v24 = vadd.f32 %v1278_v41, %v244_v5  ;;  %v525_v42 = vsel %vm1901_vm6, %v1889_v21, %v520_v55  ;;  %v636_v58 = vadd.f32 %v1239_v54, %v635_v29 }
  0xf7   :  { %1002 = vst.msk [vmem:[%s2189_s4 + $0xa0] sm:$0xff] %vm981_vm7, %v969_v25  ;;  %v977_v20 = vadd.f32 %v945_v1, %v79_v3  ;;  %v753_v28 = vmul.f32 %v1241_v37, %v1891_v40  ;;  %v922_v45 = vmul.f32 %v525_v42, %v1791_v34  ;;  %vm758_vm0 = vweird.f32 %v1241_v37  ;;  %v246_v34 = vpop.f32.mrf.mxu0 }
  0xf8   :  { %v1104_v33 = vmul.f32 -1.442695, %v1960_v24  ;;  %v1978_v47 = vadd.f32 %v1278_v41, %v264_v60  ;;  %v640_v51 = vsel %vm639_vm15, %v1239_v54, %v636_v58  ;;  %v1984_v6 = vadd.f32 %v1278_v41, %v284_v27  ;;  %v306_v54 = vpop.f32.mrf.mxu3 }
  0xf9   :  { %1010 = vst.msk [vmem:[%s2189_s4 + $0xe0] sm:$0xff] %vm981_vm7, %v977_v20  ;;  %v754_v50 = vsub.f32 1.0, %v753_v28  ;;  %v1986_v21 = vadd.f32 %v1278_v41, %v304_v12  ;;  %v954_v30 = vadd.f32 %v922_v45, %v56_v39  ;;  %v645_v9 = vsel %vm1933_vm12, %v644_v59, %v640_v51 }
  0xfa   :  { %1244 = vpow2.f32 %v1104_v33  ;;  %v1112_v46 = vmul.f32 -1.442695, %v1978_v47  ;;  %v930_v62 = vmul.f32 %v645_v9, %v1794_v35  ;;  %v1120_v22 = vmul.f32 -1.442695, %v1984_v6 }
  0xfb   :  { %v755_v63 = vmul.f32 %v1241_v37, %v754_v50  ;;  %v1128_v0 = vmul.f32 -1.442695, %v1986_v21  ;;  %987 = vst.msk [vmem:[%s2189_s4 + $0x28] sm:$0xff] %vm981_vm7, %v954_v30  ;;  %vm757_vm1 = vweird.f32 %v1891_v40  ;;  %v2002_v36 = vadd.f32 %v1278_v41, %v246_v34 }
  0xfc   :  { %v1243_v49 = vpop.eup %1242  ;;  %1246 = vpow2.f32 %v1112_v46  ;;  %v2004_v48 = vadd.f32 %v1278_v41, %v266_v53  ;;  %v962_v2 = vadd.f32 %v930_v62, %v64_v44  ;;  %vm759_vm2 = vmor %vm757_vm1, %vm758_vm0  ;;  %v764_v5 = vor.u32 1.1754944e-38, %v763_v38 }
  0xfd   :  { %v756_v35 = vadd.f32 %v1241_v37, %v755_v63  ;;  %v2006_v10 = vadd.f32 1.0, %v1243_v49  ;;  %1248 = vpow2.f32 %v1120_v22  ;;  %v1105_v60 = vmul.f32 -1.442695, %v2002_v36 }
  0xfe   :  { %1250 = vpow2.f32 %v1128_v0  ;;  %995 = vst.msk [vmem:[%s2189_s4 + $0x68] sm:$0xff] %vm981_vm7, %v962_v2  ;;  %vm762_vm3 = vcmp.eq.f32.partialorder %v761_v32, 8.507059e+37  ;;  %v2018_v14 = vadd.f32 %v1278_v41, %v286_v4  ;;  %v1113_v52 = vmul.f32 -1.442695, %v2004_v48 }
  0xff   :  { %v760_v40 = vsel %vm759_vm2, %v1241_v37, %v756_v35  ;;  %1252 = vrcp.f32 %v2006_v10  ;;  %v2024_v19 = vadd.f32 %v1278_v41, %v306_v54  ;;  %v881_v8 = vand.u32 2147483647, %v2006_v10  ;;  %v80_v35 = vld [vmem:[%s2188_s1 + $0xe8] sm:$0xff] }
 0x100   :  { %v1245_v7 = vpop.eup %1244  ;;  %v765_v11 = vsel %vm762_vm3, %v764_v5, %v760_v40  ;;  %1254 = vpow2.f32 %v1105_v60  ;;  %v883_v59 = vand.u32 2147483648, %v2006_v10  ;;  %v1121_v3 = vmul.f32 -1.442695, %v2018_v14 }
 0x101   :  { %v938_v61 = vmul.f32 %v765_v11, %v1805_v13  ;;  %v2021_v17 = vadd.f32 1.0, %v1245_v7  ;;  %v1129_v25 = vmul.f32 -1.442695, %v2024_v19  ;;  %vm877_vm4 = vweird.f32 %v2006_v10 }
 0x102   :  { %v1247_v18 = vpop.eup %1246  ;;  %vm2047_vm5 = vcmp.eq.f32.partialorder %v881_v8, 8.507059e+37  ;;  %v884_v55 = vor.u32 1.1754944e-38, %v883_v59 }
 0x103   :  { %v1249_v31 = vpop.eup %1248  ;;  %v970_v57 = vadd.f32 %v938_v61, %v72_v26  ;;  %1256 = vrcp.f32 %v2021_v17  ;;  %v2029_v27 = vadd.f32 1.0, %v1247_v18  ;;  %v536_v1 = vand.u32 2147483647, %v2021_v17 }
 0x104   :  { %v1251_v23 = vpop.eup %1250  ;;  %v2031_v13 = vadd.f32 1.0, %v1249_v31  ;;  %1258 = vpow2.f32 %v1113_v52  ;;  %v538_v29 = vand.u32 2147483648, %v2021_v17  ;;  %vm532_vm6 = vweird.f32 %v2021_v17 }
 0x105   :  { %v1253_v43 = vpop.eup %1252  ;;  %1003 = vst.msk [vmem:[%s2189_s4 + $0xa8] sm:$0xff] %vm981_vm7, %v970_v57  ;;  %v2038_v15 = vadd.f32 1.0, %v1251_v23  ;;  %1260 = vrcp.f32 %v2029_v27  ;;  %v656_v41 = vand.u32 2147483647, %v2029_v27  ;;  %v658_v20 = vand.u32 2147483648, %v2029_v27 }
 0x106   :  { %v873_v16 = vmul.f32 %v1253_v43, %v2006_v10  ;;  %1262 = vrcp.f32 %v2031_v13  ;;  %v1255_v32 = vpop.eup %1254  ;;  %vm878_vm8 = vweird.f32 %v1253_v43  ;;  %vm2056_vm9 = vcmp.eq.f32.partialorder %v536_v1, 8.507059e+37 }
 0x107   :  { %1264 = vpow2.f32 %v1121_v3  ;;  %v539_v45 = vor.u32 1.1754944e-38, %v538_v29  ;;  %vm652_vm10 = vweird.f32 %v2029_v27  ;;  %v2061_v33 = vadd.f32 1.0, %v1255_v32  ;;  %vm879_vm12 = vmor %vm877_vm4, %vm878_vm8 }
 0x108   :  { %v874_v12 = vsub.f32 1.0, %v873_v16  ;;  %1266 = vrcp.f32 %v2038_v15  ;;  %vm772_vm11 = vweird.f32 %v2031_v13  ;;  %v776_v53 = vand.u32 2147483647, %v2031_v13 }
 0x109   :  { %v1257_v38 = vpop.eup %1256  ;;  %1268 = vpow2.f32 %v1129_v25  ;;  %vm2068_vm13 = vcmp.eq.f32.partialorder %v656_v41, 8.507059e+37  ;;  %v659_v46 = vor.u32 1.1754944e-38, %v658_v20  ;;  %v778_v62 = vand.u32 2147483648, %v2031_v13 }
 0x10a   :  { %v875_v39 = vmul.f32 %v1253_v43, %v874_v12  ;;  %v528_v42 = vmul.f32 %v1257_v38, %v2021_v17  ;;  %v1259_v58 = vpop.eup %1258  ;;  %vm533_vm14 = vweird.f32 %v1257_v38  ;;  %vm892_vm15 = vweird.f32 %v2038_v15 }
 0x10b   :  { %v1261_v51 = vpop.eup %1260  ;;  %1270 = vrcp.f32 %v2061_v33  ;;  %v2081_v5 = vadd.f32 1.0, %v1259_v58  ;;  %vm534_vm0 = vmor %vm532_vm6, %vm533_vm14  ;;  %v896_v61 = vand.u32 2147483647, %v2038_v15  ;;  %v898_v17 = vand.u32 2147483648, %v2038_v15  ;;  %v81_v58 = vld [vmem:[%s2188_s1 + $0xf0] sm:$0xff] }
 0x10c   :  { %v876_v50 = vadd.f32 %v1253_v43, %v875_v39  ;;  %v529_v34 = vsub.f32 1.0, %v528_v42  ;;  %v1263_v30 = vpop.eup %1262  ;;  %v648_v44 = vmul.f32 %v1261_v51, %v2029_v27  ;;  %vm653_vm1 = vweird.f32 %v1261_v51 }
 0x10d   :  { %v1265_v63 = vpop.eup %1264  ;;  %v768_v49 = vmul.f32 %v1263_v30, %v2031_v13  ;;  %vm773_vm2 = vweird.f32 %v1263_v30  ;;  %vm654_vm4 = vmor %vm652_vm10, %vm653_vm1  ;;  %1272 = vrcp.f32 %v2081_v5  ;;  %vm777_vm6 = vcmp.eq.f32.partialorder %v776_v53, 8.507059e+37  ;;  %v73_v13 = vld [vmem:[%s2188_s1 + $0xb0] sm:$0xff] }
 0x10e   :  { %v880_v22 = vsel %vm879_vm12, %v1253_v43, %v876_v50  ;;  %v530_v0 = vmul.f32 %v1257_v38, %v529_v34  ;;  %v1267_v2 = vpop.eup %1266  ;;  %v649_v4 = vsub.f32 1.0, %v648_v44  ;;  %v779_v1 = vor.u32 1.1754944e-38, %v778_v62 }
 0x10f   :  { %v885_v10 = vsel %vm2047_vm5, %v884_v55, %v880_v22  ;;  %v1269_v60 = vpop.eup %1268  ;;  %v769_v7 = vsub.f32 1.0, %v768_v49  ;;  %v888_v26 = vmul.f32 %v1267_v2, %v2038_v15  ;;  %vm893_vm3 = vweird.f32 %v1267_v2  ;;  %vm774_vm5 = vmor %vm772_vm11, %vm773_vm2 }
 0x110   :  { %v946_v40 = vmul.f32 %v885_v10, %v1833_v56  ;;  %v531_v54 = vadd.f32 %v1257_v38, %v530_v0  ;;  %v650_v11 = vmul.f32 %v1261_v51, %v649_v4  ;;  %v57_v56 = vld [vmem:[%s2188_s1 + $0x30] sm:$0xff]  ;;  %v2105_v29 = vadd.f32 1.0, %v1265_v63  ;;  %vm894_vm8 = vmor %vm892_vm15, %vm893_vm3 }
 0x111   :  { %v770_v31 = vmul.f32 %v1263_v30, %v769_v7  ;;  %v889_v57 = vsub.f32 1.0, %v888_v26  ;;  %v1271_v16 = vpop.eup %1270  ;;  %v899_v41 = vor.u32 1.1754944e-38, %v898_v17  ;;  %v551_v34 = vand.u32 2147483647, %v2061_v33 }
 0x112   :  { %v978_v52 = vadd.f32 %v946_v40, %v80_v35  ;;  %v535_v18 = vsel %vm534_vm0, %v1257_v38, %v531_v54  ;;  %v651_v23 = vadd.f32 %v1261_v51, %v650_v11  ;;  %v543_v20 = vmul.f32 %v1271_v16, %v2061_v33 }
 0x113   :  { %v540_v8 = vsel %vm2056_vm9, %v539_v45, %v535_v18  ;;  %v771_v3 = vadd.f32 %v1263_v30, %v770_v31  ;;  %v890_v43 = vmul.f32 %v1267_v2, %v889_v57  ;;  %vm897_vm9 = vcmp.eq.f32.partialorder %v896_v61, 8.507059e+37  ;;  %v1273_v45 = vpop.eup %1272 }
 0x114   :  { %1011 = vst.msk [vmem:[%s2189_s4 + $0xe8] sm:$0xff] %vm981_vm7, %v978_v52  ;;  %v923_v59 = vmul.f32 %v540_v8, %v1960_v24  ;;  %v655_v25 = vsel %vm654_vm4, %v1261_v51, %v651_v23  ;;  %v65_v24 = vld [vmem:[%s2188_s1 + $0x70] sm:$0xff]  ;;  %v544_v15 = vsub.f32 1.0, %v543_v20  ;;  %1274 = vrcp.f32 %v2105_v29  ;;  %v66_v52 = vld [vmem:[%s2188_s1 + $0x78] sm:$0xff] }
 0x115   :  { %v660_v27 = vsel %vm2068_vm13, %v659_v46, %v655_v25  ;;  %v775_v12 = vsel %vm774_vm5, %v1263_v30, %v771_v3  ;;  %v891_v37 = vadd.f32 %v1267_v2, %v890_v43  ;;  %v553_v53 = vand.u32 2147483648, %v2061_v33 }
 0x116   :  { %v955_v32 = vadd.f32 %v923_v59, %v57_v56  ;;  %v931_v55 = vmul.f32 %v660_v27, %v1978_v47  ;;  %v780_v38 = vsel %vm777_vm6, %v779_v1, %v775_v12  ;;  %vm548_vm10 = vweird.f32 %v1271_v16  ;;  %v82_v12 = vld [vmem:[%s2188_s1 + $0xf8] sm:$0xff] }
 0x117   :  { %v939_v39 = vmul.f32 %v780_v38, %v1984_v6  ;;  %v895_v47 = vsel %vm894_vm8, %v1267_v2, %v891_v37  ;;  %v545_v6 = vmul.f32 %v1271_v16, %v544_v15  ;;  %v663_v30 = vmul.f32 %v1273_v45, %v2081_v5 }
 0x118   :  { %988 = vst.msk [vmem:[%s2189_s4 + $0x30] sm:$0xff] %vm981_vm7, %v955_v32  ;;  %v963_v42 = vadd.f32 %v931_v55, %v65_v24  ;;  %v900_v28 = vsel %vm897_vm9, %v899_v41, %v895_v47  ;;  %vm547_vm11 = vweird.f32 %v2061_v33  ;;  %vm552_vm13 = vcmp.eq.f32.partialorder %v551_v34, 8.507059e+37  ;;  %v58_v33 = vld [vmem:[%s2188_s1 + $0x38] sm:$0xff] }
 0x119   :  { %v971_v51 = vadd.f32 %v939_v39, %v73_v13  ;;  %v947_v50 = vmul.f32 %v900_v28, %v1986_v21  ;;  %v436_v21 = vadd.f32 1.0, %v1269_v60  ;;  %v546_v9 = vadd.f32 %v1271_v16, %v545_v6  ;;  %vm549_vm12 = vmor %vm547_vm11, %vm548_vm10 }
 0x11a   :  { %996 = vst.msk [vmem:[%s2189_s4 + $0x70] sm:$0xff] %vm981_vm7, %v963_v42  ;;  %v664_v46 = vsub.f32 1.0, %v663_v30  ;;  %v554_v62 = vor.u32 1.1754944e-38, %v553_v53  ;;  %v673_v63 = vand.u32 2147483648, %v2081_v5  ;;  %v1275_v22 = vpop.eup %1274  ;;  %vm668_vm14 = vweird.f32 %v1273_v45 }
 0x11b   :  { %1004 = vst.msk [vmem:[%s2189_s4 + $0xb0] sm:$0xff] %vm981_vm7, %v971_v51  ;;  %v979_v44 = vadd.f32 %v947_v50, %v81_v58  ;;  %1276 = vrcp.f32 %v436_v21  ;;  %v550_v0 = vsel %vm549_vm12, %v1271_v16, %v546_v9  ;;  %v671_v2 = vand.u32 2147483647, %v2081_v5 }
 0x11c   :  { %v665_v49 = vmul.f32 %v1273_v45, %v664_v46  ;;  %v555_v35 = vsel %vm552_vm13, %v554_v62, %v550_v0  ;;  %v783_v10 = vmul.f32 %v1275_v22, %v2105_v29  ;;  %vm667_vm15 = vweird.f32 %v2081_v5 }
 0x11d   :  { %1012 = vst.msk [vmem:[%s2189_s4 + $0xf0] sm:$0xff] %vm981_vm7, %v979_v44  ;;  %v924_v4 = vmul.f32 %v555_v35, %v2002_v36  ;;  %vm669_vm0 = vmor %vm667_vm15, %vm668_vm14  ;;  %v674_v40 = vor.u32 1.1754944e-38, %v673_v63  ;;  %vm672_vm1 = vcmp.eq.f32.partialorder %v671_v2, 8.507059e+37  ;;  %v793_v11 = vand.u32 2147483648, %v2105_v29 }
 0x11e   :  { %v666_v60 = vadd.f32 %v1273_v45, %v665_v49  ;;  %v784_v54 = vsub.f32 1.0, %v783_v10  ;;  %vm788_vm2 = vweird.f32 %v1275_v22  ;;  %v791_v36 = vand.u32 2147483647, %v2105_v29 }
 0x11f   :  { %v956_v7 = vadd.f32 %v924_v4, %v58_v33  ;;  %vm787_vm3 = vweird.f32 %v2105_v29  ;;  %v794_v23 = vor.u32 1.1754944e-38, %v793_v11  ;;  %v913_v3 = vand.u32 2147483648, %v436_v21 }
 0x120   :  { %v670_v26 = vsel %vm669_vm0, %v1273_v45, %v666_v60  ;;  %v785_v31 = vmul.f32 %v1275_v22, %v784_v54  ;;  %vm789_vm4 = vmor %vm787_vm3, %vm788_vm2  ;;  %vm792_vm5 = vcmp.eq.f32.partialorder %v791_v36, 8.507059e+37  ;;  %v911_v25 = vand.u32 2147483647, %v436_v21 }
 0x121   :  { %v1277_v61 = vpop.eup %1276  ;;  %v675_v18 = vsel %vm672_vm1, %v674_v40, %v670_v26  ;;  %989 = vst.msk [vmem:[%s2189_s4 + $0x38] sm:$0xff] %vm981_vm7, %v956_v7  ;;  %vm907_vm8 = vweird.f32 %v436_v21  ;;  %v914_v24 = vor.u32 1.1754944e-38, %v913_v3 }
 0x122   :  { %v932_v5 = vmul.f32 %v675_v18, %v2004_v48  ;;  %v903_v57 = vmul.f32 %v1277_v61, %v436_v21  ;;  %v786_v56 = vadd.f32 %v1275_v22, %v785_v31  ;;  %v74_v48 = vld [vmem:[%s2188_s1 + $0xb8] sm:$0xff]  ;;  %vm908_vm6 = vweird.f32 %v1277_v61 }
 0x123   :  { %vm909_vm9 = vmor %vm907_vm8, %vm908_vm6  ;;  %vm912_vm10 = vcmp.eq.f32.partialorder %v911_v25, 8.507059e+37 }
 0x124   :  { %v964_v8 = vadd.f32 %v932_v5, %v66_v52  ;;  %v904_v17 = vsub.f32 1.0, %v903_v57  ;;  %v790_v59 = vsel %vm789_vm4, %v1275_v22, %v786_v56 }
 0x125   :  { %v795_v43 = vsel %vm792_vm5, %v794_v23, %v790_v59 }
 0x126   :  { %997 = vst.msk [vmem:[%s2189_s4 + $0x78] sm:$0xff] %vm981_vm7, %v964_v8  ;;  %v905_v16 = vmul.f32 %v1277_v61, %v904_v17  ;;  %v940_v1 = vmul.f32 %v795_v43, %v2018_v14 }
 0x128   :  { %v906_v29 = vadd.f32 %v1277_v61, %v905_v16  ;;  %v972_v32 = vadd.f32 %v940_v1, %v74_v48 }
 0x12a   :  { %v910_v27 = vsel %vm909_vm9, %v1277_v61, %v906_v29  ;;  %1005 = vst.msk [vmem:[%s2189_s4 + $0xb8] sm:$0xff] %vm981_vm7, %v972_v32 }
 0x12b   :  { %v915_v37 = vsel %vm912_vm10, %v914_v24, %v910_v27 }
 0x12c   :  { %v948_v55 = vmul.f32 %v915_v37, %v2024_v19 }
 0x12e   :  { %v980_v14 = vadd.f32 %v948_v55, %v82_v12 }
 0x130   :  { %1013 = vst.msk [vmem:[%s2189_s4 + $0xf8] sm:$0xff] %vm981_vm7, %v980_v14 }

// kernel: _lambda_.26
= control target key start
LH: loop header
LB: loop body
LE: loop exit
PB: predicated region body
PF: predicated region fallthrough
CT: control target
= control target key end

     0   :  { %s711_s24 = smov 0   ;;  %s780_s0 = inlined_call_operand.vmem [shape: f32[32,8,32], index: 0, kind: input, shape index: {}]   ;;  %s781_s1 = inlined_call_operand.vmem [shape: f32[1,32], index: 1, kind: input, shape index: {}]   ;;  %s782_s2 = inlined_call_operand.vmem [shape: f32[1,32], index: 2, kind: input, shape index: {}]   ;;  %s783_s3 = inlined_call_operand.vmem [shape: bf16[32,96], index: 3, kind: input, shape index: {}]   ;;  %s784_s4 = inlined_call_operand.vmem [shape: f32[1,96], index: 4, kind: input, shape index: {}]   ;;  %s785_s5 = inlined_call_operand.vmem [shape: bf16[32,32], index: 5, kind: input, shape index: {}]   ;;  %s786_s6 = inlined_call_operand.vmem [shape: f32[1,32], index: 6, kind: input, shape index: {}]   ;;  %s787_s7 = inlined_call_operand.vmem [shape: f32[32,8,32], index: 7, kind: output, shape index: {}]  }
   0x1 LB: > { %s591_s25 = sadd.s32 4294967295, %s663_s24   ;;  %p595_p0 = scmp.ge.s32.totalorder %s663_s24, 1  ;;  %s663_s24 = sphi %s711_s24, %s17_s24  }
   0x2   : > { %p236_p1 = scmp.lt.s32.totalorder %s663_s24, 33 }
   0x4   : > { %p237_p2 = pnand %p595_p0, %p236_p1 }
   0x5   : > { %p266_p3 = scmp.lt.s32.totalorder (!%p237_p2), %s591_s25, 31  ;;  %s666_s17 = smov (!%p237_p2), 64  }
   0x6   : > { %240 = sbr.rel (%p237_p2) target bundleno = 1081 (0x439), region = 48  ;;  %s667_s18 = smov (!%p237_p2), 96  }
   0x7   : > { %s668_s19 = smov (!%p237_p2), 112   ;;  %s669_s20 = smov (!%p237_p2), 48  }
   0x8   : > { %s670_s21 = smov (!%p237_p2), 80  }
   0xb   : > { %s789_s25 = smov (!%p266_p3, %s591_s25), 31  ;;  %vm278_vm0 = vcmask 261120   ;;  %v665_v2 = vmov 32.0   ;;  %v624_v14 = vld [vmem:[%s783_s3 + $0x8] sm:$0xff]  ;;  %v623_v15 = vld [vmem:[%s783_s3] sm:$0xff]  ;;  %vm367_vm5 = vcmask 130048   ;;  %v353_v48 = vlaneseq }
   0xc   : > { %s596_s26 = sshll.u32 %s789_s25, 3  ;;  %645 = vrcp.f32 %v665_v2  ;;  %346 = vmatpush.bf16.msra.mxu0 %v624_v14  ;;  %v641_v25 = vld [vmem:[%s781_s1] ss:$0 sm:$0xff]  ;;  %vm405_vm6 = vcmask 1043456   ;;  %vm388_vm8 = vcmask 64512  }
   0xd   : > { %s269_s29 = scalar_lea.vmem %s780_s0, %s596_s26  ;;  %v642_v28 = vld [vmem:[%s782_s2] ss:$0 sm:$0xff]  ;;  %v354_v49 = vshrl.u32 %v353_v48, 7  ;;  %v356_v50 = vand.u32 127, %v353_v48  ;;  %s273_s10 = scalar_lea.vmem %s787_s7, %s596_s26 }
   0xe   : > { %v727_v0 = vld [vmem:[%s269_s29] sm:$0xff] }
   0xf   : > { %v279_v1 = vsel %vm278_vm0, %v727_v0, 0.0  ;;  %v643_v32 = vld [vmem:[%s784_s4] ss:$0 sm:$0xff]  ;;  %vm357_vm7 = vcmp.ge.s32.totalorder %v354_v49, %v356_v50 }
  0x10   : > { %280 = vadd.xlane.f32.xlu0 %v279_v1  ;;  %347 = vmatpush.bf16.msra.mxu0 %v623_v15 }
  0x12   : > { %v646_v3 = vpop.eup %645 }
  0x13   : > { %v283_v4 = vmul.f32 32.0, %v646_v3  ;;  %vm287_vm1 = vweird.f32 %v646_v3 }
  0x15   : > { %v284_v5 = vsub.f32 1.0, %v283_v4 }
  0x17   : > { %v285_v6 = vmul.f32 %v646_v3, %v284_v5 }
  0x19   : > { %v286_v7 = vadd.f32 %v646_v3, %v285_v6 }
  0x1b   : > { %v288_v8 = vsel %vm287_vm1, %v646_v3, %v286_v7 }
  0x83   : > { %v281_v9 = vpop.xlane.xlu0 %280 }
  0x84   : > { %v289_v10 = vmul.f32 %v288_v8, %v281_v9  ;;  %v626_v9 = vld [vmem:[%s785_s5 + $0x8] sm:$0xff] }
  0x85   : > { %503 = vmatpush.bf16.msrb.mxu0 %v626_v9 }
  0x86   : > { %v290_v11 = vsub.f32 %v727_v0, %v289_v10 }
  0x88   : > { %v291_v12 = vmul.f32 %v290_v11, %v290_v11 }
  0x8a   : > { %v292_v13 = vsel %vm278_vm0, %v291_v12, 0.0 }
  0x8b   : > { %293 = vadd.xlane.f32.xlu0 %v292_v13 }
  0xfe   : > { %v294_v16 = vpop.xlane.xlu0 %293 }
  0xff   : > { %v295_v17 = vmul.f32 %v294_v16, %v288_v8  ;;  %v625_v8 = vld [vmem:[%s785_s5] sm:$0xff] }
 0x101   : > { %v296_v18 = vadd.f32 1e-05, %v295_v17 }
 0x103   : > { %647 = vrsqrt.f32 %v296_v18  ;;  %vm303_vm3 = vweird.f32 %v296_v18 }
 0x109   : > { %v648_v19 = vpop.eup %647 }
 0x10a   : > { %v298_v20 = vmul.f32 %v648_v19, %v296_v18  ;;  %vm304_vm2 = vweird.f32 %v648_v19 }
 0x10b   : > { %vm305_vm4 = vmor %vm303_vm3, %vm304_vm2 }
 0x10c   : > { %v299_v21 = vmul.f32 %v648_v19, %v298_v20 }
 0x10e   : > { %v300_v22 = vmul.f32 0.5, %v299_v21 }
 0x110   : > { %v301_v23 = vsub.f32 1.5, %v300_v22 }
 0x112   : > { %v302_v24 = vmul.f32 %v648_v19, %v301_v23 }
 0x114   : > { %v306_v26 = vsel %vm305_vm4, %v648_v19, %v302_v24 }
 0x115   : > { %v307_v27 = vmul.f32 %v306_v26, %v290_v11  ;;  %v644_v26 = vld [vmem:[%s786_s6] ss:$0 sm:$0xff] }
 0x117   : > { %v311_v29 = vmul.f32 %v641_v25, %v307_v27 }
 0x119   : > { %v315_v30 = vadd.f32 %v642_v28, %v311_v29 }
 0x11b   : > { %v316_v31 = vpack.c.bf16 %v315_v30, %v315_v30 }
 0x11d   : > { %606 = vmatmul.msk.bf16.vlgmr.msra.gmra.mxu0 %vm278_vm0, %v316_v31 }
 0x19a   : > { %v349_v33 = vpop.f32.mrf.mxu0 }
 0x19b   : > { %v350_v34 = vadd.f32 %v643_v32, %v349_v33 }
 0x19d   : > { %v363_v35 = vpack.c.bf16 %v350_v34, %v350_v34  ;;  %v361_v36 = vmul.f32 0.25, %v350_v34 }
 0x19f   : > { %400 = vrot.lane.b32.xlu0 %v363_v35, %s666_s17  ;;  %365 = vrot.lane.b32.xlu1 %v363_v35, %s667_s18  ;;  %v362_v37 = vpack.c.bf16 %v361_v36, %v361_v36 }
 0x1a1   : > { %427 = vrot.lane.b32.xlu2 %v362_v37, %s668_s19 }
 0x1a2   : > { %v351_v38 = vpop.f32.mrf.mxu0 }
 0x1a7   : > { %462 = vrot.lane.b32.xlu0 %v363_v35, %s669_s20  ;;  %429 = vrot.lane.b32.xlu1 %v363_v35, %s670_s21 }
 0x1fb   : > { %v428_v47 = vpop.permute.xlu2 %427 }
 0x211   : > { %v401_v39 = vpop.permute.xlu0 %400  ;;  %v366_v40 = vpop.permute.xlu1 %365 }
 0x212   : > { %v372_v41 = vsel %vm367_vm5, %v366_v40, 0  ;;  %v407_v42 = vsel %vm405_vm6, %v401_v39, 0 }
 0x213   : > { %381 = vmatpush.bf16.xpose.msra.mxu1 %v372_v41  ;;  %416 = vmatpush.bf16.msra.mxu2 %v407_v42 }
 0x219   : > { %v463_v43 = vpop.permute.xlu0 %462  ;;  %v430_v44 = vpop.permute.xlu1 %429 }
 0x21a   : > { %607 = vmatmul.msk.bf16.vlgmr.msra.gmra.mxu1 %vm367_vm5, %v362_v37  ;;  %v435_v45 = vsel %vm367_vm5, %v430_v44, 0  ;;  %v468_v46 = vsel %vm405_vm6, %v463_v43, 0 }
 0x21b   : > { %444 = vmatpush.bf16.xpose.msra.mxu3 %v435_v45  ;;  %477 = vmatpush.bf16.msrb.mxu2 %v468_v46 }
 0x21c   : > { %525 = vmatpush.bf16.msrb.mxu1 %v625_v8 }
 0x222   : > { %609 = vmatmul.msk.bf16.vlgmr.msra.gmra.mxu3 %vm367_vm5, %v428_v47 }
 0x297   : > { %v383_v51 = vpop.f32.mrf.mxu1 }
 0x298   : > { %v387_v52 = vsel %vm357_vm7, %v383_v51, -1e+30 }
 0x299   : > { %v389_v53 = vsel %vm388_vm8, %v387_v52, -inf }
 0x29a   : > { %390 = vmax.xlane.f32.xlu2 %v389_v53 }
 0x29f   : > { %v385_v54 = vpop.f32.mrf.mxu1 }
 0x2a5   : > { %v446_v55 = vpop.f32.mrf.mxu3 }
 0x2a6   : > { %v450_v56 = vsel %vm357_vm7, %v446_v55, -1e+30 }
 0x2a7   : > { %v451_v57 = vsel %vm388_vm8, %v450_v56, -inf }
 0x2a8   : > { %452 = vmax.xlane.f32.xlu1 %v451_v57 }
 0x2ad   : > { %v448_v58 = vpop.f32.mrf.mxu3 }
 0x30d   : > { %v391_v59 = vpop.xlane.xlu2 %390 }
 0x30e   : > { %v392_v60 = vsub.f32 %v387_v52, %v391_v59 }
 0x310   : > { %v393_v61 = vmul.f32 1.442695, %v392_v60 }
 0x312   : > { %649 = vpow2.f32 %v393_v61 }
 0x318   : > { %v650_v62 = vpop.eup %649 }
 0x319   : > { %v395_v63 = vsel %vm388_vm8, %v650_v62, 0.0  ;;  %v399_v1 = vpack.c.bf16 %v650_v62, %v650_v62 }
 0x31a   : > { %396 = vadd.xlane.f32.xlu0 %v395_v63 }
 0x31b   : > { %v453_v2 = vpop.xlane.xlu1 %452  ;;  %608 = vmatmul.msk.bf16.vlgmr.msra.gmra.mxu2 %vm388_vm8, %v399_v1 }
 0x31c   : > { %v454_v3 = vsub.f32 %v450_v56, %v453_v2 }
 0x31e   : > { %v455_v4 = vmul.f32 1.442695, %v454_v3 }
 0x320   : > { %651 = vpow2.f32 %v455_v4 }
 0x326   : > { %v652_v5 = vpop.eup %651 }
 0x327   : > { %v457_v6 = vsel %vm388_vm8, %v652_v5, 0.0  ;;  %v461_v7 = vpack.c.bf16 %v652_v5, %v652_v5 }
 0x328   : > { %458 = vadd.xlane.f32.xlu2 %v457_v6 }
 0x32b   : > { %610 = vmatmul.msk.bf16.vlgmr.msrb.gmra.mxu2 %vm388_vm8, %v461_v7 }
 0x38d   : > { %v397_v10 = vpop.xlane.xlu0 %396 }
 0x38e   : > { %653 = vrcp.f32 %v397_v10 }
 0x394   : > { %v654_v11 = vpop.eup %653 }
 0x39b   : > { %v459_v15 = vpop.xlane.xlu2 %458 }
 0x39c   : > { %655 = vrcp.f32 %v459_v15 }
 0x39e   : > { %v418_v12 = vpop.f32.mrf.mxu2 }
 0x39f   : > { %v422_v13 = vmul.f32 %v654_v11, %v418_v12 }
 0x3a1   : > { %v423_v14 = vpack.c.bf16 %v422_v13, %v422_v13 }
 0x3a2   : > { %v656_v17 = vpop.eup %655 }
 0x3a3   : > { %620 = vmatmul.msk.bf16.vlgmr.msrb.gmra.mxu1 %vm367_vm5, %v423_v14 }
 0x3a6   : > { %v420_v16 = vpop.f32.mrf.mxu2 }
 0x3ae   : > { %v479_v18 = vpop.f32.mrf.mxu2 }
 0x3af   : > { %v483_v19 = vmul.f32 %v656_v17, %v479_v18 }
 0x3b1   : > { %v484_v20 = vpack.c.bf16 %v483_v19, %v483_v19 }
 0x3b3   : > { %615 = vmatmul.msk.bf16.vlgmr.msrb.gmra.mxu0 %vm367_vm5, %v484_v20 }
 0x3b6   : > { %v481_v21 = vpop.f32.mrf.mxu2 }
 0x420   : > { %v527_v22 = vpop.f32.mrf.mxu1 }
 0x428   : > { %v529_v23 = vpop.f32.mrf.mxu1 }
 0x430   : > { %v505_v24 = vpop.f32.mrf.mxu0 }
 0x431   : > { %v528_v25 = vadd.f32 %v527_v22, %v505_v24 }
 0x433   : > { %v531_v27 = vadd.f32 %v528_v25, %v727_v0 }
 0x435   : > { %v536_v28 = vadd.f32 %v644_v26, %v531_v27 }
 0x437   : > { %537 = vst.msk [vmem:[%s273_s10] sm:$0xff] %vm278_vm0, %v536_v28 }
 0x438   : > { %v507_v29 = vpop.f32.mrf.mxu0 }
 0x439 PF: > { %s17_s24 = sadd.s32 1, %s663_s24  }
 0x43a   : > { %p14_p4 = scmp.ge.s32.totalorder %s17_s24, 34  }
 0x43c   :  { %16 = sbr.rel (!%p14_p4) target bundleno = 1 (0x1), region = 78 }

// kernel: _lambda_.28
= control target key start
LH: loop header
LB: loop body
LE: loop exit
PB: predicated region body
PF: predicated region fallthrough
CT: control target
= control target key end

     0   :  { %s1209_s18 = smov 0   ;;  %s1211_s19 = smov 0   ;;  %s2102_s0 = inlined_call_operand.vmem [shape: bf16[2,16,8,64], index: 0, kind: input, shape index: {}]   ;;  %s2103_s1 = inlined_call_operand.vmem [shape: f32[64,8], index: 1, kind: input, shape index: {}]   ;;  %s2104_s2 = inlined_call_operand.vmem [shape: f32[8,64], index: 2, kind: input, shape index: {}]   ;;  %s2105_s3 = inlined_call_operand.vmem [shape: f32[1,64], index: 3, kind: input, shape index: {}]   ;;  %s2106_s4 = inlined_call_operand.vmem [shape: f32[1,64], index: 4, kind: input, shape index: {}]   ;;  %s2107_s5 = inlined_call_operand.vmem [shape: bf16[2,16,8,64], index: 5, kind: output, shape index: {}]  }
   0x1   :  { %s1213_s20 = smov 0  }
   0x2 LB: > { %s27_s21 = sadd.s32 1, %s1173_s19  ;;  %p995_p0 = scmp.ge.s32.totalorder %s1177_s20, 1  ;;  %s1177_s20 = sphi %s1213_s20, %s15_s20   ;;  %s1173_s19 = sphi %s1211_s19, %s2180_s19   ;;  %s1169_s18 = sphi %s1209_s18, %s2179_s18  }
   0x3   : > { %p29_p1 = scmp.ge.s32.totalorder %s27_s21, 2  ;;  %p206_p2 = scmp.lt.s32.totalorder %s1177_s20, 3 }
   0x5   : > { %s2182_s21 = smov (%p29_p1, %s27_s21), 0  ;;  %p207_p3 = pnand %p995_p0, %p206_p2 }
   0x7   : > { %210 = sbr.rel (%p207_p3) target bundleno = 431 (0x1af), region = 40 }
   0xc   : > { %v374_v0 = vld [vmem:[%s2103_s1 + $0x38] sm:$0xff]  ;;  %v373_v1 = vld [vmem:[%s2103_s1 + $0x30] sm:$0xff]  ;;  %p240_p4 = scmp.lt.s32.totalorder %s1169_s18, 1  ;;  %v372_v2 = vld [vmem:[%s2103_s1 + $0x28] sm:$0xff]  ;;  %vm288_vm0 = vcmask 523264   ;;  %vm422_vm1 = vcmask 64512  }
   0xd   : > { %386 = vmatpush.msra.mxu0 %v374_v0  ;;  %409 = vmatpush.msra.mxu1 %v374_v0  ;;  %v371_v3 = vld [vmem:[%s2103_s1 + $0x20] sm:$0xff]  ;;  %v370_v4 = vld [vmem:[%s2103_s1 + $0x18] sm:$0xff]  ;;  %v369_v10 = vld [vmem:[%s2103_s1 + $0x10] sm:$0xff] }
   0xe   : > { %s2184_s18 = smov (!%p240_p4, %s1169_s18), 1  ;;  %v368_v13 = vld [vmem:[%s2103_s1 + $0x8] sm:$0xff]  ;;  %v367_v18 = vld [vmem:[%s2103_s1] sm:$0xff] }
   0xf   : > { %387 = vmatpush.msra.mxu0 %v373_v1  ;;  %410 = vmatpush.msra.mxu1 %v373_v1  ;;  %s1022_s30 = sshll.u32 %s2184_s18, 6 }
  0x10   : > { %s1247_s8 = scalar_lea.vmem %s2102_s0, %s1022_s30  ;;  %s2003_s29 = scalar_lea.vmem %s2107_s5, %s1022_s30 }
  0x11   : > { %388 = vmatpush.msra.mxu0 %v372_v2  ;;  %411 = vmatpush.msra.mxu1 %v372_v2  ;;  %v1025_v5 = vld [vmem:[%s1247_s8] sm:$0xff]   ;;  %v1056_v6 = vld [vmem:[%s1247_s8 + $0x8] sm:$0xff]   ;;  %v1057_v11 = vld [vmem:[%s1247_s8 + $0x10] sm:$0xff]  }
  0x12   : > { %v1254_v7 = vunpack.c.l.bf16 %v1025_v5  ;;  %v1256_v8 = vunpack.c.h.bf16 %v1025_v5  ;;  %v1258_v9 = vunpack.c.l.bf16 %v1056_v6  ;;  %v1264_v12 = vunpack.c.h.bf16 %v1056_v6  ;;  %v1058_v19 = vld [vmem:[%s1247_s8 + $0x18] sm:$0xff]   ;;  %v1059_v26 = vld [vmem:[%s1247_s8 + $0x20] sm:$0xff]   ;;  %v1060_v38 = vld [vmem:[%s1247_s8 + $0x28] sm:$0xff]  }
  0x13   : > { %389 = vmatpush.msra.mxu0 %v371_v3  ;;  %412 = vmatpush.msra.mxu1 %v371_v3  ;;  %v1269_v14 = vunpack.c.l.bf16 %v1057_v11  ;;  %v1281_v21 = vunpack.c.h.bf16 %v1057_v11  ;;  %v1285_v24 = vunpack.c.l.bf16 %v1058_v19  ;;  %v1296_v31 = vunpack.c.h.bf16 %v1058_v19  ;;  %v1061_v52 = vld [vmem:[%s1247_s8 + $0x30] sm:$0xff]   ;;  %v1062_v1 = vld [vmem:[%s1247_s8 + $0x38] sm:$0xff]  }
  0x14   : > { %v289_v15 = vsel %vm288_vm0, %v1254_v7, 0.0  ;;  %v290_v16 = vsel %vm288_vm0, %v1256_v8, 0.0  ;;  %v292_v17 = vsel %vm288_vm0, %v1258_v9, 0.0  ;;  %v294_v22 = vsel %vm288_vm0, %v1264_v12, 0.0 }
  0x15   : > { %390 = vmatpush.msra.mxu0 %v370_v4  ;;  %413 = vmatpush.msra.mxu1 %v370_v4  ;;  %v291_v20 = vadd.f32 %v290_v16, %v289_v15  ;;  %v296_v25 = vsel %vm288_vm0, %v1269_v14, 0.0  ;;  %v320_v28 = vmul.f32 %v1254_v7, %v1254_v7  ;;  %v321_v29 = vmul.f32 %v1256_v8, %v1256_v8 }
  0x16   : > { %v322_v30 = vmul.f32 %v1258_v9, %v1258_v9  ;;  %v298_v32 = vsel %vm288_vm0, %v1281_v21, 0.0  ;;  %v323_v34 = vmul.f32 %v1264_v12, %v1264_v12  ;;  %v1302_v35 = vunpack.c.l.bf16 %v1059_v26 }
  0x17   : > { %391 = vmatpush.msra.mxu0 %v369_v10  ;;  %414 = vmatpush.msra.mxu1 %v369_v10  ;;  %v293_v23 = vadd.f32 %v292_v17, %v291_v20  ;;  %v300_v36 = vsel %vm288_vm0, %v1285_v24, 0.0  ;;  %v324_v37 = vmul.f32 %v1269_v14, %v1269_v14  ;;  %v336_v40 = vsel %vm288_vm0, %v320_v28, 0.0 }
  0x18   : > { %v337_v41 = vsel %vm288_vm0, %v321_v29, 0.0  ;;  %v339_v42 = vsel %vm288_vm0, %v322_v30, 0.0  ;;  %v1312_v43 = vunpack.c.h.bf16 %v1059_v26  ;;  %v302_v44 = vsel %vm288_vm0, %v1296_v31, 0.0 }
  0x19   : > { %392 = vmatpush.msra.mxu0 %v368_v13  ;;  %415 = vmatpush.msra.mxu1 %v368_v13  ;;  %v295_v27 = vadd.f32 %v294_v22, %v293_v23  ;;  %v338_v45 = vadd.f32 %v337_v41, %v336_v40  ;;  %v325_v47 = vmul.f32 %v1281_v21, %v1281_v21  ;;  %v341_v48 = vsel %vm288_vm0, %v323_v34, 0.0 }
  0x1a   : > { %v1319_v49 = vunpack.c.l.bf16 %v1060_v38  ;;  %v304_v50 = vsel %vm288_vm0, %v1302_v35, 0.0  ;;  %v326_v54 = vmul.f32 %v1285_v24, %v1285_v24  ;;  %v343_v55 = vsel %vm288_vm0, %v324_v37, 0.0 }
  0x1b   : > { %393 = vmatpush.msra.mxu0 %v367_v18  ;;  %416 = vmatpush.msra.mxu1 %v367_v18  ;;  %v297_v33 = vadd.f32 %v296_v25, %v295_v27  ;;  %v340_v51 = vadd.f32 %v339_v42, %v338_v45  ;;  %v1327_v56 = vunpack.c.h.bf16 %v1060_v38  ;;  %v306_v57 = vsel %vm288_vm0, %v1312_v43, 0.0 }
  0x1c   : > { %v327_v60 = vmul.f32 %v1296_v31, %v1296_v31  ;;  %v345_v61 = vsel %vm288_vm0, %v325_v47, 0.0  ;;  %v1334_v62 = vunpack.c.l.bf16 %v1061_v52  ;;  %v308_v63 = vsel %vm288_vm0, %v1319_v49, 0.0 }
  0x1d   : > { %v299_v39 = vadd.f32 %v298_v32, %v297_v33  ;;  %v342_v58 = vadd.f32 %v341_v48, %v340_v51  ;;  %v328_v3 = vmul.f32 %v1302_v35, %v1302_v35  ;;  %v347_v4 = vsel %vm288_vm0, %v326_v54, 0.0 }
  0x1e   : > { %v1342_v5 = vunpack.c.h.bf16 %v1061_v52  ;;  %v310_v6 = vsel %vm288_vm0, %v1327_v56, 0.0  ;;  %v329_v13 = vmul.f32 %v1312_v43, %v1312_v43  ;;  %v349_v15 = vsel %vm288_vm0, %v327_v60, 0.0 }
  0x1f   : > { %v301_v46 = vadd.f32 %v300_v36, %v299_v39  ;;  %v344_v0 = vadd.f32 %v343_v55, %v342_v58  ;;  %v1349_v16 = vunpack.c.l.bf16 %v1062_v1  ;;  %v312_v17 = vsel %vm288_vm0, %v1334_v62, 0.0  ;;  %v421_v58 = vld [vmem:[%s2104_s2] sm:$0xff] }
  0x20   : > { %v330_v20 = vmul.f32 %v1319_v49, %v1319_v49  ;;  %v351_v22 = vsel %vm288_vm0, %v328_v3, 0.0  ;;  %v1356_v23 = vunpack.c.h.bf16 %v1062_v1  ;;  %v314_v25 = vsel %vm288_vm0, %v1342_v5, 0.0  ;;  %441 = vmatpush.msra.mxu2 %v421_v58  ;;  %464 = vmatpush.msra.mxu3 %v421_v58 }
  0x21   : > { %v303_v53 = vadd.f32 %v302_v44, %v301_v46  ;;  %v346_v10 = vadd.f32 %v345_v61, %v344_v0  ;;  %v331_v28 = vmul.f32 %v1327_v56, %v1327_v56  ;;  %v353_v29 = vsel %vm288_vm0, %v329_v13, 0.0 }
  0x22   : > { %v316_v30 = vsel %vm288_vm0, %v1349_v16, 0.0  ;;  %v332_v34 = vmul.f32 %v1334_v62, %v1334_v62  ;;  %v355_v36 = vsel %vm288_vm0, %v330_v20, 0.0  ;;  %v318_v37 = vsel %vm288_vm0, %v1356_v23, 0.0 }
  0x23   : > { %v305_v59 = vadd.f32 %v304_v50, %v303_v53  ;;  %v348_v18 = vadd.f32 %v347_v4, %v346_v10  ;;  %v333_v40 = vmul.f32 %v1342_v5, %v1342_v5  ;;  %v357_v41 = vsel %vm288_vm0, %v331_v28, 0.0 }
  0x24   : > { %v334_v45 = vmul.f32 %v1349_v16, %v1349_v16  ;;  %v359_v46 = vsel %vm288_vm0, %v332_v34, 0.0  ;;  %v335_v48 = vmul.f32 %v1356_v23, %v1356_v23 }
  0x25   : > { %v307_v2 = vadd.f32 %v306_v57, %v305_v59  ;;  %v350_v26 = vadd.f32 %v349_v15, %v348_v18  ;;  %v361_v50 = vsel %vm288_vm0, %v333_v40, 0.0 }
  0x26   : > { %v363_v52 = vsel %vm288_vm0, %v334_v45, 0.0  ;;  %v365_v54 = vsel %vm288_vm0, %v335_v48, 0.0 }
  0x27   : > { %v309_v11 = vadd.f32 %v308_v63, %v307_v2  ;;  %v352_v32 = vadd.f32 %v351_v22, %v350_v26 }
  0x29   : > { %v311_v19 = vadd.f32 %v310_v6, %v309_v11  ;;  %v354_v38 = vadd.f32 %v353_v29, %v352_v32 }
  0x2b   : > { %v313_v27 = vadd.f32 %v312_v17, %v311_v19  ;;  %v356_v42 = vadd.f32 %v355_v36, %v354_v38 }
  0x2d   : > { %v315_v33 = vadd.f32 %v314_v25, %v313_v27  ;;  %v358_v47 = vadd.f32 %v357_v41, %v356_v42  ;;  %v1402_v25 = vld [vmem:[%s2105_s3] ss:$0 sm:$0xff] }
  0x2f   : > { %v317_v39 = vadd.f32 %v316_v30, %v315_v33  ;;  %v360_v51 = vadd.f32 %v359_v46, %v358_v47 }
  0x31   : > { %v319_v44 = vadd.f32 %v318_v37, %v317_v39  ;;  %v362_v53 = vadd.f32 %v361_v50, %v360_v51 }
  0x33   : > { %1000 = vmatmul.msk.f32.vlgmr.msra.gmra.mxu0 %vm288_vm0, %v319_v44  ;;  %v364_v55 = vadd.f32 %v363_v52, %v362_v53 }
  0x35   : > { %v366_v57 = vadd.f32 %v365_v54, %v364_v55 }
  0x37   : > { %1001 = vmatmul.msk.f32.vlgmr.msra.gmra.mxu1 %vm288_vm0, %v366_v57 }
  0xb0   : > { %v395_v59 = vpop.f32.mrf.mxu0 }
  0xb1   : > { %1002 = vmatmul.msk.f32.vlgmr.msra.gmra.mxu2 %vm422_vm1, %v395_v59 }
  0xb4   : > { %v418_v60 = vpop.f32.mrf.mxu1 }
  0xb5   : > { %1003 = vmatmul.msk.f32.vlgmr.msra.gmra.mxu3 %vm422_vm1, %v418_v60 }
 0x134   : > { %v1386_v61 = vpop.f32.mrf.mxu2 }
 0x135   : > { %v469_v63 = vmul.f32 %v1386_v61, %v1386_v61  ;;  %v472_v17 = vsub.f32 %v1254_v7, %v1386_v61  ;;  %v473_v19 = vsub.f32 %v1256_v8, %v1386_v61  ;;  %v474_v20 = vsub.f32 %v1258_v9, %v1386_v61 }
 0x136   : > { %v475_v26 = vsub.f32 %v1264_v12, %v1386_v61  ;;  %v476_v27 = vsub.f32 %v1269_v14, %v1386_v61  ;;  %v477_v9 = vsub.f32 %v1281_v21, %v1386_v61  ;;  %v478_v29 = vsub.f32 %v1285_v24, %v1386_v61  ;;  %v1420_v12 = vld [vmem:[%s2106_s4] ss:$0 sm:$0xff] }
 0x137   : > { %v479_v21 = vsub.f32 %v1296_v31, %v1386_v61  ;;  %v480_v36 = vsub.f32 %v1302_v35, %v1386_v61  ;;  %v481_v38 = vsub.f32 %v1312_v43, %v1386_v61  ;;  %v482_v31 = vsub.f32 %v1319_v49, %v1386_v61 }
 0x138   : > { %v466_v0 = vpop.f32.mrf.mxu3  ;;  %v483_v43 = vsub.f32 %v1327_v56, %v1386_v61 }
 0x139   : > { %v470_v1 = vsub.f32 %v466_v0, %v469_v63 }
 0x13b   : > { %v471_v2 = vmax.f32 %v470_v1, 0.0 }
 0x13d   : > { %v488_v3 = vadd.f32 1e-05, %v471_v2 }
 0x13f   : > { %1089 = vrsqrt.f32 %v488_v3  ;;  %vm495_vm3 = vweird.f32 %v488_v3 }
 0x145   : > { %v1090_v4 = vpop.eup %1089 }
 0x146   : > { %v490_v6 = vmul.f32 %v1090_v4, %v488_v3  ;;  %vm496_vm2 = vweird.f32 %v1090_v4 }
 0x147   : > { %vm497_vm4 = vmor %vm495_vm3, %vm496_vm2 }
 0x148   : > { %v491_v10 = vmul.f32 %v1090_v4, %v490_v6  ;;  %v484_v6 = vsub.f32 %v1334_v62, %v1386_v61 }
 0x14a   : > { %v492_v11 = vmul.f32 0.5, %v491_v10 }
 0x14c   : > { %v493_v13 = vsub.f32 1.5, %v492_v11 }
 0x14e   : > { %v494_v15 = vmul.f32 %v1090_v4, %v493_v13  ;;  %v485_v13 = vsub.f32 %v1342_v5, %v1386_v61 }
 0x150   : > { %v1392_v18 = vsel %vm497_vm4, %v1090_v4, %v494_v15  ;;  %v486_v15 = vsub.f32 %v1349_v16, %v1386_v61  ;;  %v487_v16 = vsub.f32 %v1356_v23, %v1386_v61 }
 0x151   : > { %v499_v22 = vmul.f32 %v1392_v18, %v472_v17  ;;  %v500_v7 = vmul.f32 %v1392_v18, %v473_v19  ;;  %v501_v8 = vmul.f32 %v1392_v18, %v474_v20  ;;  %v502_v28 = vmul.f32 %v1392_v18, %v475_v26 }
 0x152   : > { %v503_v30 = vmul.f32 %v1392_v18, %v476_v27  ;;  %v504_v14 = vmul.f32 %v1392_v18, %v477_v9  ;;  %v505_v34 = vmul.f32 %v1392_v18, %v478_v29  ;;  %v506_v39 = vmul.f32 %v1392_v18, %v479_v21 }
 0x153   : > { %v519_v32 = vmul.f32 %v1402_v25, %v499_v22  ;;  %v520_v33 = vmul.f32 %v1402_v25, %v500_v7  ;;  %v521_v24 = vmul.f32 %v1402_v25, %v501_v8  ;;  %v522_v37 = vmul.f32 %v1402_v25, %v502_v28 }
 0x154   : > { %v523_v40 = vmul.f32 %v1402_v25, %v503_v30  ;;  %v507_v42 = vmul.f32 %v1392_v18, %v480_v36  ;;  %v524_v44 = vmul.f32 %v1402_v25, %v504_v14  ;;  %v508_v45 = vmul.f32 %v1392_v18, %v481_v38 }
 0x155   : > { %v1436_v41 = vadd.f32 %v1420_v12, %v519_v32  ;;  %v1443_v35 = vadd.f32 %v1420_v12, %v520_v33  ;;  %v525_v46 = vmul.f32 %v1402_v25, %v505_v34  ;;  %v1450_v47 = vadd.f32 %v1420_v12, %v521_v24 }
 0x156   : > { %v509_v48 = vmul.f32 %v1392_v18, %v482_v31  ;;  %v1454_v49 = vadd.f32 %v1420_v12, %v522_v37  ;;  %v510_v50 = vmul.f32 %v1392_v18, %v483_v43  ;;  %v526_v51 = vmul.f32 %v1402_v25, %v506_v39 }
 0x157   : > { %v1459_v52 = vadd.f32 %v1420_v12, %v523_v40  ;;  %v1004_v56 = vmul.f32 -1.442695, %v1436_v41  ;;  %v527_v53 = vmul.f32 %v1402_v25, %v507_v42  ;;  %v1464_v54 = vadd.f32 %v1420_v12, %v524_v44 }
 0x158   : > { %v1005_v55 = vmul.f32 -1.442695, %v1443_v35  ;;  %v528_v57 = vmul.f32 %v1402_v25, %v508_v45  ;;  %v1469_v58 = vadd.f32 %v1420_v12, %v525_v46  ;;  %v1006_v59 = vmul.f32 -1.442695, %v1450_v47 }
 0x159   : > { %v529_v60 = vmul.f32 %v1402_v25, %v509_v48  ;;  %v1007_v63 = vmul.f32 -1.442695, %v1454_v49  ;;  %v530_v0 = vmul.f32 %v1402_v25, %v510_v50  ;;  %v1476_v1 = vadd.f32 %v1420_v12, %v526_v51 }
 0x15a   : > { %1091 = vpow2.f32 %v1004_v56  ;;  %v1008_v2 = vmul.f32 -1.442695, %v1459_v52  ;;  %v1480_v3 = vadd.f32 %v1420_v12, %v527_v53  ;;  %v1009_v4 = vmul.f32 -1.442695, %v1464_v54 }
 0x15b   : > { %1093 = vpow2.f32 %v1005_v55  ;;  %v1486_v10 = vadd.f32 %v1420_v12, %v528_v57  ;;  %v1010_v11 = vmul.f32 -1.442695, %v1469_v58  ;;  %v1494_v17 = vadd.f32 %v1420_v12, %v529_v60 }
 0x15c   : > { %1095 = vpow2.f32 %v1006_v59  ;;  %v511_v19 = vmul.f32 %v1392_v18, %v484_v6  ;;  %v1498_v62 = vadd.f32 %v1420_v12, %v530_v0  ;;  %v1011_v20 = vmul.f32 -1.442695, %v1476_v1 }
 0x15d   : > { %1097 = vpow2.f32 %v1007_v63  ;;  %v512_v22 = vmul.f32 %v1392_v18, %v485_v13  ;;  %v1012_v5 = vmul.f32 -1.442695, %v1480_v3  ;;  %v513_v7 = vmul.f32 %v1392_v18, %v486_v15 }
 0x15e   : > { %1099 = vpow2.f32 %v1008_v2  ;;  %v1013_v27 = vmul.f32 -1.442695, %v1486_v10  ;;  %v1014_v9 = vmul.f32 -1.442695, %v1494_v17  ;;  %v514_v29 = vmul.f32 %v1392_v18, %v487_v16 }
 0x15f   : > { %1101 = vpow2.f32 %v1009_v4  ;;  %v531_v30 = vmul.f32 %v1402_v25, %v511_v19  ;;  %v1015_v32 = vmul.f32 -1.442695, %v1498_v62  ;;  %v532_v33 = vmul.f32 %v1402_v25, %v512_v22 }
 0x160   : > { %v1092_v26 = vpop.eup %1091  ;;  %1103 = vpow2.f32 %v1010_v11  ;;  %v533_v21 = vmul.f32 %v1402_v25, %v513_v7  ;;  %v534_v37 = vmul.f32 %v1402_v25, %v514_v29 }
 0x161   : > { %v1094_v8 = vpop.eup %1093  ;;  %1105 = vpow2.f32 %v1011_v20  ;;  %v1512_v23 = vadd.f32 1.0, %v1092_v26  ;;  %v1521_v38 = vadd.f32 %v1420_v12, %v531_v30  ;;  %v1526_v40 = vadd.f32 %v1420_v12, %v532_v33 }
 0x162   : > { %v1096_v28 = vpop.eup %1095  ;;  %1107 = vpow2.f32 %v1012_v5  ;;  %v1515_v34 = vadd.f32 1.0, %v1094_v8  ;;  %v1532_v44 = vadd.f32 %v1420_v12, %v533_v21  ;;  %v1541_v48 = vadd.f32 %v1420_v12, %v534_v37 }
 0x163   : > { %v1098_v14 = vpop.eup %1097  ;;  %1109 = vpow2.f32 %v1013_v27  ;;  %v1517_v18 = vadd.f32 1.0, %v1096_v28  ;;  %v1016_v50 = vmul.f32 -1.442695, %v1521_v38  ;;  %v1017_v56 = vmul.f32 -1.442695, %v1526_v40 }
 0x164   : > { %v1100_v61 = vpop.eup %1099  ;;  %1111 = vpow2.f32 %v1014_v9  ;;  %v1523_v39 = vadd.f32 1.0, %v1098_v14  ;;  %2110 = vst [vmem:[#allocation2_spill] sm:$0xff] %v1532_v44  ;;  %v1018_v55 = vmul.f32 -1.442695, %v1532_v44  ;;  %v1019_v59 = vmul.f32 -1.442695, %v1541_v48 }
 0x165   : > { %v1102_v24 = vpop.eup %1101  ;;  %1113 = vpow2.f32 %v1015_v32  ;;  %v1528_v31 = vadd.f32 1.0, %v1100_v61  ;;  %2111 = vst [vmem:[#allocation3_spill] sm:$0xff] %v1541_v48  ;;  %v630_v60 = vand.u32 2147483648, %v1512_v23  ;;  %v645_v0 = vand.u32 2147483648, %v1515_v34 }
 0x166   : > { %v1104_v36 = vpop.eup %1103  ;;  %1115 = vrcp.f32 %v1512_v23  ;;  %v1534_v43 = vadd.f32 1.0, %v1102_v24  ;;  %v628_v11 = vand.u32 2147483647, %v1512_v23  ;;  %v643_v15 = vand.u32 2147483647, %v1515_v34 }
 0x167   : > { %v1106_v42 = vpop.eup %1105  ;;  %1117 = vrcp.f32 %v1515_v34  ;;  %v1537_v45 = vadd.f32 1.0, %v1104_v36  ;;  %v1571_v20 = vor.u32 1.1754944e-38, %v630_v60  ;;  %v660_v5 = vand.u32 2147483648, %v1517_v18 }
 0x168   : > { %v1108_v25 = vpop.eup %1107  ;;  %1119 = vrcp.f32 %v1517_v18  ;;  %v1578_v16 = vadd.f32 1.0, %v1106_v42  ;;  %v1580_v7 = vor.u32 1.1754944e-38, %v645_v0  ;;  %v658_v27 = vand.u32 2147483647, %v1517_v18 }
 0x169   : > { %v1110_v46 = vpop.eup %1109  ;;  %1121 = vrcp.f32 %v1523_v39  ;;  %v1585_v28 = vadd.f32 1.0, %v1108_v25  ;;  %v675_v30 = vand.u32 2147483648, %v1523_v39  ;;  %v673_v21 = vand.u32 2147483647, %v1523_v39 }
 0x16a   : > { %v1112_v51 = vpop.eup %1111  ;;  %1123 = vrcp.f32 %v1528_v31  ;;  %v1587_v29 = vadd.f32 1.0, %v1110_v46  ;;  %vm624_vm5 = vweird.f32 %v1512_v23  ;;  %v1598_v25 = vor.u32 1.1754944e-38, %v660_v5 }
 0x16b   : > { %v1114_v53 = vpop.eup %1113  ;;  %1125 = vrcp.f32 %v1534_v43  ;;  %v1595_v37 = vadd.f32 1.0, %v1112_v51  ;;  %vm639_vm6 = vweird.f32 %v1515_v34  ;;  %vm654_vm7 = vweird.f32 %v1517_v18 }
 0x16c   : > { %v1549_v57 = vpop.eup %1115  ;;  %1127 = vrcp.f32 %v1537_v45  ;;  %v1611_v0 = vor.u32 1.1754944e-38, %v675_v30  ;;  %vm669_vm8 = vweird.f32 %v1523_v39  ;;  %vm1625_vm10 = vcmp.eq.f32.partialorder %v628_v11, 8.507059e+37 }
 0x16d   : > { %v1552_v12 = vpop.eup %1117  ;;  %1129 = vpow2.f32 %v1016_v50  ;;  %v620_v6 = vmul.f32 %v1549_v57, %v1512_v23  ;;  %v1602_v50 = vadd.f32 1.0, %v1114_v53  ;;  %vm1629_vm11 = vcmp.eq.f32.partialorder %v643_v15, 8.507059e+37 }
 0x16e   : > { %v1556_v63 = vpop.eup %1119  ;;  %1131 = vpow2.f32 %v1017_v56  ;;  %v635_v13 = vmul.f32 %v1552_v12, %v1515_v34  ;;  %vm625_vm13 = vweird.f32 %v1549_v57  ;;  %vm1639_vm14 = vcmp.eq.f32.partialorder %v658_v27, 8.507059e+37 }
 0x16f   : > { %v1559_v2 = vpop.eup %1121  ;;  %1133 = vpow2.f32 %v1018_v55  ;;  %v650_v22 = vmul.f32 %v1556_v63, %v1517_v18  ;;  %v621_v33 = vsub.f32 1.0, %v620_v6  ;;  %vm640_vm0 = vweird.f32 %v1552_v12  ;;  %vm1666_vm4 = vmor %vm624_vm5, %vm625_vm13 }
 0x170   : > { %v1561_v4 = vpop.eup %1123  ;;  %1135 = vpow2.f32 %v1019_v59  ;;  %v665_v8 = vmul.f32 %v1559_v2, %v1523_v39  ;;  %v636_v61 = vsub.f32 1.0, %v635_v13  ;;  %v690_v59 = vand.u32 2147483648, %v1528_v31  ;;  %vm1684_vm5 = vmor %vm639_vm6, %vm640_vm0 }
 0x171   : > { %v1569_v19 = vpop.eup %1125  ;;  %v680_v32 = vmul.f32 %v1561_v4, %v1528_v31  ;;  %v651_v42 = vsub.f32 1.0, %v650_v22  ;;  %v688_v13 = vand.u32 2147483647, %v1528_v31  ;;  %v622_v53 = vmul.f32 %v1549_v57, %v621_v33 }
 0x172   : > { %v1576_v26 = vpop.eup %1127  ;;  %v695_v24 = vmul.f32 %v1569_v19, %v1534_v43  ;;  %v666_v55 = vsub.f32 1.0, %v665_v8  ;;  %v637_v5 = vmul.f32 %v1552_v12, %v636_v61  ;;  %1137 = vrcp.f32 %v1578_v16 }
 0x173   : > { %v1130_v9 = vpop.eup %1129  ;;  %v710_v46 = vmul.f32 %v1576_v26, %v1537_v45  ;;  %v681_v6 = vsub.f32 1.0, %v680_v32  ;;  %1139 = vrcp.f32 %v1585_v28  ;;  %v623_v15 = vadd.f32 %v1549_v57, %v622_v53 }
 0x174   : > { %v1132_v14 = vpop.eup %1131  ;;  %v1604_v56 = vadd.f32 1.0, %v1130_v9  ;;  %v696_v8 = vsub.f32 1.0, %v695_v24  ;;  %v652_v9 = vmul.f32 %v1556_v63, %v651_v42  ;;  %v667_v61 = vmul.f32 %v1559_v2, %v666_v55 }
 0x175   : > { %v1134_v36 = vpop.eup %1133  ;;  %v1608_v51 = vadd.f32 1.0, %v1132_v14  ;;  %v703_v14 = vand.u32 2147483647, %v1534_v43  ;;  %v711_v30 = vsub.f32 1.0, %v710_v46  ;;  %v1634_v24 = vor.u32 1.1754944e-38, %v690_v59 }
 0x176   : > { %v1136_v60 = vpop.eup %1135  ;;  %v1614_v22 = vadd.f32 1.0, %v1134_v36  ;;  %v705_v42 = vand.u32 2147483648, %v1534_v43  ;;  %v682_v11 = vmul.f32 %v1561_v4, %v681_v6  ;;  %v638_v55 = vadd.f32 %v1552_v12, %v637_v5 }
 0x177   : > { %v1623_v32 = vadd.f32 1.0, %v1136_v60  ;;  %vm1649_vm1 = vcmp.eq.f32.partialorder %v673_v21, 8.507059e+37  ;;  %v697_v27 = vmul.f32 %v1569_v19, %v696_v8  ;;  %v653_v60 = vadd.f32 %v1556_v63, %v652_v9 }
 0x178   : > { %vm655_vm2 = vweird.f32 %v1556_v63  ;;  %vm1656_vm3 = vcmp.eq.f32.partialorder %v688_v13, 8.507059e+37  ;;  %v712_v53 = vmul.f32 %v1576_v26, %v711_v30  ;;  %1141 = vrcp.f32 %v1587_v29  ;;  %v1678_v9 = vpop.eup %1137 }
 0x179   : > { %v668_v5 = vadd.f32 %v1559_v2, %v667_v61  ;;  %vm670_vm15 = vweird.f32 %v1559_v2  ;;  %vm1672_vm12 = vcmp.eq.f32.partialorder %v703_v14, 8.507059e+37  ;;  %v718_v8 = vand.u32 2147483647, %v1537_v45  ;;  %vm1702_vm6 = vmor %vm654_vm7, %vm655_vm2  ;;  %v1708_v44 = vpop.eup %1139 }
 0x17a   : > { %1143 = vrcp.f32 %v1595_v37  ;;  %v683_v30 = vadd.f32 %v1561_v4, %v682_v11  ;;  %vm685_vm13 = vweird.f32 %v1561_v4  ;;  %vm700_vm9 = vweird.f32 %v1569_v19 }
 0x17b   : > { %v720_v14 = vand.u32 2147483648, %v1537_v45  ;;  %v627_v61 = vsel %vm1666_vm4, %v1549_v57, %v623_v15  ;;  %v642_v34 = vsel %vm1684_vm5, %v1552_v12, %v638_v55  ;;  %v698_v48 = vadd.f32 %v1569_v19, %v697_v27  ;;  %vm1717_vm4 = vmor %vm669_vm8, %vm670_vm15 }
 0x17c   : > { %vm715_vm0 = vweird.f32 %v1576_v26  ;;  %v657_v57 = vsel %vm1702_vm6, %v1556_v63, %v653_v60  ;;  %v713_v12 = vadd.f32 %v1576_v26, %v712_v53  ;;  %v725_v15 = vmul.f32 %v1678_v9, %v1578_v16 }
 0x17d   : > { %1145 = vrcp.f32 %v1602_v50  ;;  %v672_v55 = vsel %vm1717_vm4, %v1559_v2, %v668_v5  ;;  %vm2132_vm7 = vweird.f32 %v1528_v31  ;;  %v706_v63 = vor.u32 1.1754944e-38, %v705_v42 }
 0x17e   : > { %vm1732_vm2 = vmor %vm2132_vm7, %vm685_vm13  ;;  %vm1736_vm8 = vcmp.eq.f32.partialorder %v718_v8, 8.507059e+37  ;;  %v740_v60 = vmul.f32 %v1708_v44, %v1585_v28  ;;  %v1742_v53 = vpop.eup %1141  ;;  %v1747_v2 = vsel %vm1625_vm10, %v1571_v20, %v627_v61  ;;  %v1752_v31 = vsel %vm1629_vm11, %v1580_v7, %v642_v34 }
 0x17f   : > { %v687_v42 = vsel %vm1732_vm2, %v1561_v4, %v683_v30  ;;  %vm2137_vm15 = vweird.f32 %v1534_v43  ;;  %1147 = vrcp.f32 %v1604_v56  ;;  %v1771_v7 = vsel %vm1639_vm14, %v1598_v25, %v657_v57 }
 0x180   : > { %vm1761_vm5 = vmor %vm2137_vm15, %vm700_vm9  ;;  %v1766_v20 = vpop.eup %1143  ;;  %vm2140_vm9 = vweird.f32 %v1537_v45  ;;  %v721_v36 = vor.u32 1.1754944e-38, %v720_v14  ;;  %v755_v33 = vmul.f32 %v1742_v53, %v1587_v29  ;;  %v1789_v25 = vsel %vm1649_vm1, %v1611_v0, %v672_v55 }
 0x181   : > { %v702_v4 = vsel %vm1761_vm5, %v1569_v19, %v698_v48  ;;  %vm1780_vm10 = vmor %vm2140_vm9, %vm715_vm0  ;;  %v726_v19 = vsub.f32 1.0, %v725_v15  ;;  %v770_v45 = vmul.f32 %v1766_v20, %v1595_v37  ;;  %v1799_v46 = vsel %vm1656_vm3, %v1634_v24, %v687_v42 }
 0x182   : > { %v717_v48 = vsel %vm1780_vm10, %v1576_v26, %v713_v12  ;;  %v733_v5 = vand.u32 2147483647, %v1578_v16  ;;  %v735_v8 = vand.u32 2147483648, %v1578_v16  ;;  %v741_v59 = vsub.f32 1.0, %v740_v60 }
 0x183   : > { %v1803_v0 = vpop.eup %1145  ;;  %v1807_v23 = vsel %vm1672_vm12, %v706_v63, %v702_v4  ;;  %vm729_vm11 = vweird.f32 %v1578_v16  ;;  %v750_v26 = vand.u32 2147483648, %v1585_v28  ;;  %v756_v30 = vsub.f32 1.0, %v755_v33 }
 0x184   : > { %1149 = vrcp.f32 %v1608_v51  ;;  %v1814_v24 = vsel %vm1736_vm8, %v721_v36, %v717_v48  ;;  %v748_v6 = vand.u32 2147483647, %v1585_v28  ;;  %v771_v14 = vsub.f32 1.0, %v770_v45 }
 0x185   : > { %v785_v61 = vmul.f32 %v1803_v0, %v1602_v50  ;;  %v1819_v13 = vpop.eup %1147  ;;  %v727_v34 = vmul.f32 %v1678_v9, %v726_v19  ;;  %vm744_vm12 = vweird.f32 %v1585_v28  ;;  %v763_v11 = vand.u32 2147483647, %v1587_v29 }
 0x186   : > { %v765_v57 = vand.u32 2147483648, %v1587_v29  ;;  %v736_v18 = vor.u32 1.1754944e-38, %v735_v8  ;;  %v742_v12 = vmul.f32 %v1708_v44, %v741_v59  ;;  %v778_v15 = vand.u32 2147483647, %v1595_v37 }
 0x187   : > { %v786_v55 = vsub.f32 1.0, %v785_v61  ;;  %vm1827_vm14 = vcmp.eq.f32.partialorder %v733_v5, 8.507059e+37  ;;  %v751_v63 = vor.u32 1.1754944e-38, %v750_v26  ;;  %v757_v27 = vmul.f32 %v1742_v53, %v756_v30 }
 0x188   : > { %vm759_vm1 = vweird.f32 %v1587_v29  ;;  %v800_v60 = vmul.f32 %v1819_v13, %v1604_v56  ;;  %vm730_vm3 = vweird.f32 %v1678_v9  ;;  %vm1836_vm13 = vcmp.eq.f32.partialorder %v748_v6, 8.507059e+37 }
 0x189   : > { %v772_v21 = vmul.f32 %v1766_v20, %v771_v14  ;;  %vm774_vm6 = vweird.f32 %v1595_v37  ;;  %v780_v4 = vand.u32 2147483648, %v1595_v37  ;;  %v728_v36 = vadd.f32 %v1678_v9, %v727_v34  ;;  %vm1868_vm8 = vmor %vm729_vm11, %vm730_vm3 }
 0x18a   : > { %v1843_v43 = vpop.eup %1149  ;;  %vm745_vm0 = vweird.f32 %v1708_v44  ;;  %vm1847_vm4 = vcmp.eq.f32.partialorder %v763_v11, 8.507059e+37  ;;  %v766_v48 = vor.u32 1.1754944e-38, %v765_v57  ;;  %1151 = vrcp.f32 %v1614_v22 }
 0x18b   : > { %v743_v19 = vadd.f32 %v1708_v44, %v742_v12  ;;  %vm1853_vm7 = vcmp.eq.f32.partialorder %v778_v15, 8.507059e+37  ;;  %v787_v5 = vmul.f32 %v1803_v0, %v786_v55  ;;  %v793_v8 = vand.u32 2147483647, %v1602_v50  ;;  %vm1882_vm9 = vmor %vm744_vm12, %vm745_vm0 }
 0x18c   : > { %v795_v59 = vand.u32 2147483648, %v1602_v50  ;;  %v758_v26 = vadd.f32 %v1742_v53, %v757_v27  ;;  %vm760_vm2 = vweird.f32 %v1742_v53  ;;  %v801_v30 = vsub.f32 1.0, %v800_v60 }
 0x18d   : > { %v815_v6 = vmul.f32 %v1843_v43, %v1608_v51  ;;  %v773_v61 = vadd.f32 %v1766_v20, %v772_v21  ;;  %vm775_vm15 = vweird.f32 %v1766_v20  ;;  %v781_v34 = vor.u32 1.1754944e-38, %v780_v4  ;;  %vm1897_vm11 = vmor %vm759_vm1, %vm760_vm2 }
 0x18e   : > { %vm789_vm5 = vweird.f32 %v1602_v50  ;;  %v732_v11 = vsel %vm1868_vm8, %v1678_v9, %v728_v36  ;;  %vm804_vm10 = vweird.f32 %v1604_v56  ;;  %v808_v57 = vand.u32 2147483647, %v1604_v56  ;;  %vm1916_vm1 = vmor %vm774_vm6, %vm775_vm15 }
 0x18f   : > { %v810_v12 = vand.u32 2147483648, %v1604_v56  ;;  %1153 = vrcp.f32 %v1623_v32  ;;  %v747_v9 = vsel %vm1882_vm9, %v1708_v44, %v743_v19  ;;  %v788_v15 = vadd.f32 %v1803_v0, %v787_v5 }
 0x190   : > { %vm790_vm12 = vweird.f32 %v1803_v0  ;;  %vm1903_vm3 = vcmp.eq.f32.partialorder %v793_v8, 8.507059e+37  ;;  %v1907_v27 = vpop.eup %1151  ;;  %v762_v44 = vsel %vm1897_vm11, %v1742_v53, %v758_v26  ;;  %v796_v60 = vor.u32 1.1754944e-38, %v795_v59 }
 0x191   : > { %v802_v21 = vmul.f32 %v1819_v13, %v801_v30  ;;  %v816_v4 = vsub.f32 1.0, %v815_v6  ;;  %v737_v36 = vsel %vm1827_vm14, %v736_v18, %v732_v11  ;;  %v777_v19 = vsel %vm1916_vm1, %v1766_v20, %v773_v61  ;;  %vm1933_vm6 = vmor %vm789_vm5, %vm790_vm12 }
 0x192   : > { %v825_v53 = vand.u32 2147483648, %v1608_v51  ;;  %v830_v37 = vmul.f32 %v1907_v27, %v1614_v22  ;;  %v752_v5 = vsel %vm1836_vm13, %v751_v63, %v747_v9  ;;  %vm805_vm14 = vweird.f32 %v1819_v13 }
 0x193   : > { %v811_v18 = vor.u32 1.1754944e-38, %v810_v12  ;;  %vm819_vm0 = vweird.f32 %v1608_v51  ;;  %v823_v20 = vand.u32 2147483647, %v1608_v51  ;;  %v767_v39 = vsel %vm1847_vm4, %v766_v48, %v762_v44  ;;  %vm1976_vm8 = vmor %vm804_vm10, %vm805_vm14 }
 0x194   : > { %v792_v63 = vsel %vm1933_vm6, %v1803_v0, %v788_v15  ;;  %v831_v42 = vsub.f32 1.0, %v830_v37  ;;  %v838_v50 = vand.u32 2147483647, %v1614_v22  ;;  %v782_v26 = vsel %vm1853_vm7, %v781_v34, %v777_v19 }
 0x195   : > { %v1946_v59 = vpop.eup %1153  ;;  %v803_v30 = vadd.f32 %v1819_v13, %v802_v21  ;;  %v817_v6 = vmul.f32 %v1843_v43, %v816_v4  ;;  %vm820_vm13 = vweird.f32 %v1843_v43  ;;  %vm1953_vm2 = vcmp.eq.f32.partialorder %v808_v57, 8.507059e+37 }
 0x196   : > { %v826_v48 = vor.u32 1.1754944e-38, %v825_v53  ;;  %v832_v0 = vmul.f32 %v1907_v27, %v831_v42  ;;  %v845_v14 = vmul.f32 %v1946_v59, %v1623_v32  ;;  %v859_v45 = vmul.f32 %v1747_v2, %v1436_v41  ;;  %vm2013_vm11 = vmor %vm819_vm0, %vm820_vm13 }
 0x197   : > { %v797_v61 = vsel %vm1903_vm3, %v796_v60, %v792_v63  ;;  %vm1964_vm4 = vcmp.eq.f32.partialorder %v823_v20, 8.507059e+37  ;;  %vm834_vm7 = vweird.f32 %v1614_v22  ;;  %v840_v11 = vand.u32 2147483648, %v1614_v22 }
 0x198   : > { %v860_v16 = vmul.f32 %v1752_v31, %v1443_v35  ;;  %vm1980_vm15 = vcmp.eq.f32.partialorder %v838_v50, 8.507059e+37  ;;  %v846_v57 = vsub.f32 1.0, %v845_v14  ;;  %vm849_vm5 = vweird.f32 %v1623_v32 }
 0x199   : > { %v861_v12 = vmul.f32 %v1771_v7, %v1450_v47  ;;  %v807_v35 = vsel %vm1976_vm8, %v1819_v13, %v803_v30  ;;  %v818_v56 = vadd.f32 %v1843_v43, %v817_v6  ;;  %vm835_vm9 = vweird.f32 %v1907_v27 }
 0x19a   : > { %v862_v31 = vmul.f32 %v1789_v25, %v1454_v49  ;;  %v833_v9 = vadd.f32 %v1907_v27, %v832_v0  ;;  %v847_v28 = vmul.f32 %v1946_v59, %v846_v57  ;;  %v863_v15 = vmul.f32 %v1799_v46, %v1459_v52  ;;  %vm2028_vm12 = vmor %vm834_vm7, %vm835_vm9 }
 0x19b   : > { %v875_v55 = vpack.c.bf16 %v859_v45, %v859_v45  ;;  %vm850_vm10 = vweird.f32 %v1946_v59  ;;  %v853_v47 = vand.u32 2147483647, %v1623_v32  ;;  %v864_v49 = vmul.f32 %v1807_v23, %v1464_v54 }
 0x19c   : > { %v876_v7 = vpack.c.bf16 %v860_v16, %v860_v16  ;;  %v848_v25 = vadd.f32 %v1946_v59, %v847_v28  ;;  %v855_v46 = vand.u32 2147483648, %v1623_v32  ;;  %v865_v13 = vmul.f32 %v1814_v24, %v1469_v58  ;;  %vm2040_vm1 = vmor %vm849_vm5, %vm850_vm10 }
 0x19d   : > { %v877_v44 = vpack.c.bf16 %v861_v12, %v861_v12  ;;  %v822_v54 = vsel %vm2013_vm11, %v1843_v43, %v818_v56  ;;  %v866_v23 = vmul.f32 %v737_v36, %v1476_v1  ;;  %v878_v29 = vpack.c.bf16 %v862_v31, %v862_v31 }
 0x19e   : > { %vm891_vm3 = vcmask 519168   ;;  %v837_v58 = vsel %vm2028_vm12, %v1907_v27, %v833_v9  ;;  %v841_v24 = vor.u32 1.1754944e-38, %v840_v11  ;;  %v867_v43 = vmul.f32 %v752_v5, %v1480_v3 }
 0x19f   : > { %v879_v60 = vpack.c.bf16 %v863_v15, %v863_v15  ;;  %892 = vst.msk [vmem:[%s2003_s29] sm:$0xf] %vm891_vm3, %v875_v55  ;;  %v812_v1 = vsel %vm1953_vm2, %v811_v18, %v807_v35  ;;  %v852_v27 = vsel %vm2040_vm1, %v1946_v59, %v848_v25  ;;  %v868_v21 = vmul.f32 %v767_v39, %v1486_v10 }
 0x1a0   : > { %v880_v32 = vpack.c.bf16 %v864_v49, %v864_v49  ;;  %893 = vst.msk [vmem:[%s2003_s29 + $0x4] sm:$0xf] %vm891_vm3, %v876_v7  ;;  %v827_v3 = vsel %vm1964_vm4, %v826_v48, %v822_v54  ;;  %v856_v4 = vor.u32 1.1754944e-38, %v855_v46  ;;  %v869_v36 = vmul.f32 %v782_v26, %v1494_v17 }
 0x1a1   : > { %v881_v19 = vpack.c.bf16 %v865_v13, %v865_v13  ;;  %894 = vst.msk [vmem:[%s2003_s29 + $0x8] sm:$0xf] %vm891_vm3, %v877_v44  ;;  %v842_v53 = vsel %vm1980_vm15, %v841_v24, %v837_v58  ;;  %vm854_vm6 = vcmp.eq.f32.partialorder %v853_v47, 8.507059e+37  ;;  %v870_v10 = vmul.f32 %v797_v61, %v1498_v62  ;;  %v2177_v62 = vld [vmem:[#allocation2_spill] sm:$0xff] }
 0x1a2   : > { %v882_v37 = vpack.c.bf16 %v866_v23, %v866_v23  ;;  %895 = vst.msk [vmem:[%s2003_s29 + $0xc] sm:$0xf] %vm891_vm3, %v878_v29  ;;  %v857_v5 = vsel %vm854_vm6, %v856_v4, %v852_v27  ;;  %v871_v8 = vmul.f32 %v812_v1, %v1521_v38  ;;  %v883_v17 = vpack.c.bf16 %v867_v43, %v867_v43  ;;  %v2178_v38 = vld [vmem:[#allocation3_spill] sm:$0xff] }
 0x1a3   : > { %896 = vst.msk [vmem:[%s2003_s29 + $0x10] sm:$0xf] %vm891_vm3, %v879_v60  ;;  %v872_v18 = vmul.f32 %v827_v3, %v1526_v40  ;;  %v884_v20 = vpack.c.bf16 %v868_v21, %v868_v21  ;;  %v873_v39 = vmul.f32 %v842_v53, %v2177_v62  ;;  %v885_v63 = vpack.c.bf16 %v869_v36, %v869_v36 }
 0x1a4   : > { %897 = vst.msk [vmem:[%s2003_s29 + $0x14] sm:$0xf] %vm891_vm3, %v880_v32  ;;  %v874_v42 = vmul.f32 %v857_v5, %v2178_v38  ;;  %v886_v50 = vpack.c.bf16 %v870_v10, %v870_v10  ;;  %v887_v59 = vpack.c.bf16 %v871_v8, %v871_v8 }
 0x1a5   : > { %898 = vst.msk [vmem:[%s2003_s29 + $0x18] sm:$0xf] %vm891_vm3, %v881_v19  ;;  %v888_v40 = vpack.c.bf16 %v872_v18, %v872_v18  ;;  %v889_v26 = vpack.c.bf16 %v873_v39, %v873_v39 }
 0x1a6   : > { %899 = vst.msk [vmem:[%s2003_s29 + $0x1c] sm:$0xf] %vm891_vm3, %v882_v37  ;;  %v890_v30 = vpack.c.bf16 %v874_v42, %v874_v42 }
 0x1a7   : > { %900 = vst.msk [vmem:[%s2003_s29 + $0x20] sm:$0xf] %vm891_vm3, %v883_v17 }
 0x1a8   : > { %901 = vst.msk [vmem:[%s2003_s29 + $0x24] sm:$0xf] %vm891_vm3, %v884_v20 }
 0x1a9   : > { %902 = vst.msk [vmem:[%s2003_s29 + $0x28] sm:$0xf] %vm891_vm3, %v885_v63 }
 0x1aa   : > { %903 = vst.msk [vmem:[%s2003_s29 + $0x2c] sm:$0xf] %vm891_vm3, %v886_v50 }
 0x1ab   : > { %904 = vst.msk [vmem:[%s2003_s29 + $0x30] sm:$0xf] %vm891_vm3, %v887_v59 }
 0x1ac   : > { %905 = vst.msk [vmem:[%s2003_s29 + $0x34] sm:$0xf] %vm891_vm3, %v888_v40 }
 0x1ad   : > { %906 = vst.msk [vmem:[%s2003_s29 + $0x38] sm:$0xf] %vm891_vm3, %v889_v26 }
 0x1ae   : > { %907 = vst.msk [vmem:[%s2003_s29 + $0x3c] sm:$0xf] %vm891_vm3, %v890_v30 }
 0x1af PF: > { %s15_s20 = sadd.s32 1, %s1177_s20   ;;  %s2179_s18 = smov %s1173_s19 }
 0x1b0   : > { %p12_p5 = scmp.ge.s32.totalorder %s15_s20, 4   ;;  %s2180_s19 = smov %s2182_s21 }
 0x1b2   :  { %14 = sbr.rel (!%p12_p5) target bundleno = 2 (0x2), region = 70 }

// kernel: _lambda_.27
= control target key start
LH: loop header
LB: loop body
LE: loop exit
PB: predicated region body
PF: predicated region fallthrough
CT: control target
= control target key end

     0   :  { %s2532_s30 = smov 0   ;;  %s3191_s0 = inlined_call_operand.vmem [shape: f32[32,8,32], index: 0, kind: input, shape index: {}]   ;;  %s3192_s1 = inlined_call_operand.vmem [shape: f32[1,32], index: 1, kind: input, shape index: {}]   ;;  %s3193_s2 = inlined_call_operand.vmem [shape: f32[1,32], index: 2, kind: input, shape index: {}]   ;;  %s3194_s3 = inlined_call_operand.vmem [shape: bf16[32,64], index: 3, kind: input, shape index: {}]   ;;  %s3195_s4 = inlined_call_operand.vmem [shape: f32[1,64], index: 4, kind: input, shape index: {}]   ;;  %s3196_s5 = inlined_call_operand.vmem [shape: bf16[3,64,64], index: 5, kind: input, shape index: {}]   ;;  %s3197_s6 = inlined_call_operand.vmem [shape: f32[1,64], index: 6, kind: input, shape index: {}]   ;;  %s3198_s7 = inlined_call_operand.vmem [shape: bf16[3,64,64], index: 7, kind: input, shape index: {}]   ;;  %s3199_s8 = inlined_call_operand.vmem [shape: f32[1,64], index: 8, kind: input, shape index: {}]   ;;  %s3200_s9 = inlined_call_operand.vmem [shape: bf16[32,8,64], index: 9, kind: output, shape index: {}]  }
   0x1 LB: > { %s2094_s10 = sadd.s32 4294967295, %s2478_s30   ;;  %p2098_p0 = scmp.ge.s32.totalorder %s2478_s30, 1  ;;  %s2478_s30 = sphi %s2532_s30, %s19_s30  }
   0x2   : > { %p288_p1 = scmp.lt.s32.totalorder %s2478_s30, 5 }
   0x4   : > { %p289_p2 = pnand %p2098_p0, %p288_p1 }
   0x5   : > { %s2099_s11 = sshll.u32 (!%p289_p2), %s2094_s10, 3 }
   0x6   : > { %292 = sbr.rel (%p289_p2) target bundleno = 1027 (0x403), region = 56  ;;  %p325_p3 = scmp.lt.s32.totalorder (!%p289_p2), %s2099_s11, 31 }
   0xb   : > { %s3218_s11 = smov (!%p325_p3, %s2099_s11), 31  ;;  %vm347_vm0 = vcmask 261120   ;;  %v2480_v14 = vmov 32.0   ;;  %v2334_v58 = vld [vmem:[%s3194_s3 + $0x8] sm:$0xff]  ;;  %v2333_v62 = vld [vmem:[%s3194_s3] sm:$0xff] }
   0xc   : > { %s2100_s12 = sshll.u32 %s3218_s11, 3  ;;  %2390 = vrcp.f32 %v2480_v14  ;;  %595 = vmatpush.bf16.msra.mxu0 %v2334_v58  ;;  %s2102_s21 = sshll.u32 %s3218_s11, 2 }
   0xd   : > { %s2546_s15 = scalar_lea.vmem %s3191_s0, %s2100_s12  ;;  %s3170_s24 = scalar_lea.vmem %s3200_s9, %s2102_s21 }
   0xe   : > { %v341_v0 = vld [vmem:[%s2546_s15 + $0x20] sm:$0xff]  ;;  %v339_v1 = vld [vmem:[%s2546_s15 + $0x10] sm:$0xff]  ;;  %v342_v6 = vld [vmem:[%s2546_s15 + $0x28] sm:$0xff] }
   0xf   : > { %v337_v2 = vld [vmem:[%s2546_s15] sm:$0xff]  ;;  %v360_v3 = vsel %vm347_vm0, %v341_v0, 0.0  ;;  %v354_v4 = vsel %vm347_vm0, %v339_v1, 0.0  ;;  %v340_v7 = vld [vmem:[%s2546_s15 + $0x18] sm:$0xff]  ;;  %v338_v8 = vld [vmem:[%s2546_s15 + $0x8] sm:$0xff]  ;;  %v363_v9 = vsel %vm347_vm0, %v342_v6, 0.0 }
  0x10   : > { %v348_v5 = vsel %vm347_vm0, %v337_v2, 0.0  ;;  %361 = vadd.xlane.f32.xlu2 %v360_v3  ;;  %355 = vadd.xlane.f32.xlu1 %v354_v4  ;;  %v357_v10 = vsel %vm347_vm0, %v340_v7, 0.0  ;;  %v351_v11 = vsel %vm347_vm0, %v338_v8, 0.0  ;;  %v343_v12 = vld [vmem:[%s2546_s15 + $0x30] sm:$0xff]  ;;  %v344_v36 = vld [vmem:[%s2546_s15 + $0x38] sm:$0xff] }
  0x11   : > { %349 = vadd.xlane.f32.xlu0 %v348_v5  ;;  %v366_v13 = vsel %vm347_vm0, %v343_v12, 0.0  ;;  %v369_v41 = vsel %vm347_vm0, %v344_v36, 0.0  ;;  %596 = vmatpush.bf16.msra.mxu0 %v2333_v62 }
  0x12   : > { %v2391_v15 = vpop.eup %2390 }
  0x13   : > { %v373_v16 = vmul.f32 32.0, %v2391_v15  ;;  %vm377_vm1 = vweird.f32 %v2391_v15 }
  0x15   : > { %v374_v17 = vsub.f32 1.0, %v373_v16 }
  0x17   : > { %v375_v18 = vmul.f32 %v2391_v15, %v374_v17 }
  0x18   : > { %364 = vadd.xlane.f32.xlu2 %v363_v9  ;;  %358 = vadd.xlane.f32.xlu1 %v357_v10 }
  0x19   : > { %352 = vadd.xlane.f32.xlu0 %v351_v11  ;;  %v376_v19 = vadd.f32 %v2391_v15, %v375_v18 }
  0x1b   : > { %v2562_v20 = vsel %vm377_vm1, %v2391_v15, %v376_v19 }
  0x20   : > { %367 = vadd.xlane.f32.xlu2 %v366_v13 }
  0x83   : > { %v362_v21 = vpop.xlane.xlu2 %361  ;;  %v356_v22 = vpop.xlane.xlu1 %355 }
  0x84   : > { %v350_v23 = vpop.xlane.xlu0 %349  ;;  %v383_v32 = vmul.f32 %v2562_v20, %v362_v21  ;;  %v381_v33 = vmul.f32 %v2562_v20, %v356_v22 }
  0x85   : > { %v379_v24 = vmul.f32 %v2562_v20, %v350_v23 }
  0x86   : > { %v2581_v39 = vsub.f32 %v341_v0, %v383_v32  ;;  %v2583_v40 = vsub.f32 %v339_v1, %v381_v33 }
  0x87   : > { %v2565_v25 = vsub.f32 %v337_v2, %v379_v24 }
  0x88   : > { %v399_v48 = vmul.f32 %v2581_v39, %v2581_v39  ;;  %v397_v49 = vmul.f32 %v2583_v40, %v2583_v40 }
  0x89   : > { %v395_v26 = vmul.f32 %v2565_v25, %v2565_v25 }
  0x8a   : > { %v415_v53 = vsel %vm347_vm0, %v399_v48, 0.0  ;;  %v409_v54 = vsel %vm347_vm0, %v397_v49, 0.0 }
  0x8b   : > { %v365_v27 = vpop.xlane.xlu2 %364  ;;  %v359_v28 = vpop.xlane.xlu1 %358  ;;  %v403_v29 = vsel %vm347_vm0, %v395_v26, 0.0 }
  0x8c   : > { %v382_v30 = vmul.f32 %v2562_v20, %v359_v28  ;;  %404 = vadd.xlane.f32.xlu0 %v403_v29  ;;  %v353_v31 = vpop.xlane.xlu0 %352  ;;  %v384_v47 = vmul.f32 %v2562_v20, %v365_v27 }
  0x8d   : > { %v380_v34 = vmul.f32 %v2562_v20, %v353_v31 }
  0x8e   : > { %v2574_v35 = vsub.f32 %v340_v7, %v382_v30  ;;  %v2600_v52 = vsub.f32 %v342_v6, %v384_v47 }
  0x8f   : > { %v2577_v37 = vsub.f32 %v338_v8, %v380_v34 }
  0x90   : > { %v398_v38 = vmul.f32 %v2574_v35, %v2574_v35  ;;  %v400_v56 = vmul.f32 %v2600_v52, %v2600_v52 }
  0x91   : > { %v396_v42 = vmul.f32 %v2577_v37, %v2577_v37 }
  0x92   : > { %v412_v43 = vsel %vm347_vm0, %v398_v38, 0.0  ;;  %v418_v57 = vsel %vm347_vm0, %v400_v56, 0.0 }
  0x93   : > { %v368_v44 = vpop.xlane.xlu2 %367  ;;  %413 = vadd.xlane.f32.xlu2 %v412_v43  ;;  %v406_v45 = vsel %vm347_vm0, %v396_v42, 0.0 }
  0x94   : > { %v385_v46 = vmul.f32 %v2562_v20, %v368_v44  ;;  %370 = vadd.xlane.f32.xlu0 %v369_v41  ;;  %407 = vadd.xlane.f32.xlu1 %v406_v45  ;;  %v2638_v44 = vld [vmem:[%s3192_s1] ss:$0 sm:$0xff] }
  0x96   : > { %v2596_v50 = vsub.f32 %v343_v12, %v385_v46 }
  0x98   : > { %v401_v51 = vmul.f32 %v2596_v50, %v2596_v50 }
  0x9a   : > { %v421_v55 = vsel %vm347_vm0, %v401_v51, 0.0 }
  0x9b   : > { %422 = vadd.xlane.f32.xlu2 %v421_v55 }
  0x9c   : > { %416 = vadd.xlane.f32.xlu0 %v415_v53  ;;  %410 = vadd.xlane.f32.xlu1 %v409_v54 }
  0xa4   : > { %419 = vadd.xlane.f32.xlu1 %v418_v57 }
  0xff   : > { %v405_v59 = vpop.xlane.xlu0 %404 }
 0x100   : > { %v427_v60 = vmul.f32 %v405_v59, %v2562_v20 }
 0x102   : > { %v435_v61 = vadd.f32 1e-05, %v427_v60 }
 0x104   : > { %2392 = vrsqrt.f32 %v435_v61  ;;  %vm449_vm3 = vweird.f32 %v435_v61 }
 0x106   : > { %v414_v63 = vpop.xlane.xlu2 %413 }
 0x107   : > { %v430_v0 = vmul.f32 %v414_v63, %v2562_v20  ;;  %v408_v1 = vpop.xlane.xlu1 %407  ;;  %v371_v2 = vpop.xlane.xlu0 %370 }
 0x108   : > { %v428_v3 = vmul.f32 %v408_v1, %v2562_v20  ;;  %v386_v4 = vmul.f32 %v2562_v20, %v371_v2 }
 0x109   : > { %v2618_v5 = vadd.f32 1e-05, %v430_v0 }
 0x10a   : > { %v2393_v6 = vpop.eup %2392  ;;  %v436_v7 = vadd.f32 1e-05, %v428_v3  ;;  %v2620_v8 = vsub.f32 %v344_v36, %v386_v4 }
 0x10b   : > { %v444_v9 = vmul.f32 %v2393_v6, %v435_v61  ;;  %2394 = vrsqrt.f32 %v2618_v5  ;;  %vm450_vm2 = vweird.f32 %v2393_v6  ;;  %vm479_vm10 = vweird.f32 %v2618_v5 }
 0x10c   : > { %2396 = vrsqrt.f32 %v436_v7  ;;  %v402_v10 = vmul.f32 %v2620_v8, %v2620_v8  ;;  %vm451_vm4 = vmor %vm449_vm3, %vm450_vm2  ;;  %vm459_vm5 = vweird.f32 %v436_v7 }
 0x10d   : > { %v445_v11 = vmul.f32 %v2393_v6, %v444_v9 }
 0x10e   : > { %v424_v12 = vsel %vm347_vm0, %v402_v10, 0.0 }
 0x10f   : > { %v446_v13 = vmul.f32 0.5, %v445_v11  ;;  %v411_v14 = vpop.xlane.xlu1 %410  ;;  %425 = vadd.xlane.f32.xlu0 %v424_v12  ;;  %v417_v16 = vpop.xlane.xlu0 %416 }
 0x110   : > { %v429_v15 = vmul.f32 %v411_v14, %v2562_v20  ;;  %v431_v23 = vmul.f32 %v417_v16, %v2562_v20 }
 0x111   : > { %v2627_v17 = vpop.eup %2394  ;;  %v447_v18 = vsub.f32 1.5, %v446_v13 }
 0x112   : > { %v2397_v19 = vpop.eup %2396  ;;  %v437_v21 = vadd.f32 1e-05, %v429_v15  ;;  %v474_v26 = vmul.f32 %v2627_v17, %v2618_v5  ;;  %v439_v29 = vadd.f32 1e-05, %v431_v23  ;;  %vm480_vm11 = vweird.f32 %v2627_v17 }
 0x113   : > { %v454_v22 = vmul.f32 %v2397_v19, %v436_v7  ;;  %v448_v24 = vmul.f32 %v2393_v6, %v447_v18  ;;  %vm460_vm6 = vweird.f32 %v2397_v19  ;;  %vm481_vm13 = vmor %vm479_vm10, %vm480_vm11  ;;  %vm778_vm11 = vcmask 516096  }
 0x114   : > { %2398 = vrsqrt.f32 %v437_v21  ;;  %v475_v32 = vmul.f32 %v2627_v17, %v474_v26  ;;  %vm461_vm7 = vmor %vm459_vm5, %vm460_vm6  ;;  %vm469_vm8 = vweird.f32 %v437_v21  ;;  %vm489_vm1 = vweird.f32 %v439_v29 }
 0x115   : > { %v455_v27 = vmul.f32 %v2397_v19, %v454_v22  ;;  %v452_v31 = vsel %vm451_vm4, %v2393_v6, %v448_v24  ;;  %2400 = vrsqrt.f32 %v439_v29 }
 0x116   : > { %v523_v41 = vmul.f32 %v452_v31, %v2565_v25  ;;  %v476_v45 = vmul.f32 0.5, %v475_v32  ;;  %v2645_v25 = vld [vmem:[%s3193_s2] ss:$0 sm:$0xff] }
 0x117   : > { %v456_v28 = vmul.f32 0.5, %v455_v27  ;;  %v420_v30 = vpop.xlane.xlu1 %419  ;;  %v423_v27 = vpop.xlane.xlu2 %422 }
 0x118   : > { %v432_v33 = vmul.f32 %v420_v30, %v2562_v20  ;;  %v534_v51 = vmul.f32 %v2638_v44, %v523_v41  ;;  %v477_v53 = vsub.f32 1.5, %v476_v45 }
 0x119   : > { %v457_v34 = vsub.f32 1.5, %v456_v28  ;;  %v433_v28 = vmul.f32 %v423_v27, %v2562_v20 }
 0x11a   : > { %v2399_v36 = vpop.eup %2398  ;;  %v440_v38 = vadd.f32 1e-05, %v432_v33  ;;  %v545_v59 = vadd.f32 %v2645_v25, %v534_v51  ;;  %v478_v60 = vmul.f32 %v2627_v17, %v477_v53 }
 0x11b   : > { %v458_v42 = vmul.f32 %v2397_v19, %v457_v34  ;;  %v464_v43 = vmul.f32 %v2399_v36, %v437_v21  ;;  %vm470_vm9 = vweird.f32 %v2399_v36  ;;  %v2401_v55 = vpop.eup %2400 }
 0x11c   : > { %2402 = vrsqrt.f32 %v440_v38  ;;  %vm471_vm12 = vmor %vm469_vm8, %vm470_vm9  ;;  %v484_v61 = vmul.f32 %v2401_v55, %v439_v29  ;;  %v482_v2 = vsel %vm481_vm13, %v2627_v17, %v478_v60  ;;  %vm499_vm14 = vweird.f32 %v440_v38 }
 0x11d   : > { %v462_v46 = vsel %vm461_vm7, %v2397_v19, %v458_v42  ;;  %v465_v47 = vmul.f32 %v2399_v36, %v464_v43  ;;  %v526_v6 = vmul.f32 %v482_v2, %v2574_v35  ;;  %vm490_vm2 = vweird.f32 %v2401_v55 }
 0x11e   : > { %v524_v48 = vmul.f32 %v462_v46, %v2577_v37  ;;  %v485_v3 = vmul.f32 %v2401_v55, %v484_v61  ;;  %vm491_vm4 = vmor %vm489_vm1, %vm490_vm2  ;;  %v441_v29 = vadd.f32 1e-05, %v433_v28  ;;  %vm835_vm1 = vcmask 519169  }
 0x11f   : > { %v466_v49 = vmul.f32 0.5, %v465_v47  ;;  %v537_v11 = vmul.f32 %v2638_v44, %v526_v6 }
 0x120   : > { %v535_v54 = vmul.f32 %v2638_v44, %v524_v48  ;;  %v486_v7 = vmul.f32 0.5, %v485_v3  ;;  %2404 = vrsqrt.f32 %v441_v29  ;;  %vm509_vm5 = vweird.f32 %v441_v29  ;;  %v2346_v3 = vld [vmem:[%s3196_s5 + $0x38] sm:$0xff] }
 0x121   : > { %v467_v56 = vsub.f32 1.5, %v466_v49  ;;  %1053 = vmatpush.bf16.msra.mxu1 %v2346_v3  ;;  %2367 = vmatpush.bf16.msra.mxu3 %v2346_v3 }
 0x122   : > { %v546_v37 = vadd.f32 %v2645_v25, %v535_v54  ;;  %v2403_v57 = vpop.eup %2402  ;;  %v487_v12 = vsub.f32 1.5, %v486_v7 }
 0x123   : > { %v468_v58 = vmul.f32 %v2399_v36, %v467_v56  ;;  %v494_v62 = vmul.f32 %v2403_v57, %v440_v38  ;;  %vm500_vm15 = vweird.f32 %v2403_v57 }
 0x124   : > { %v553_v63 = vpack.c.bf16 %v546_v37, %v545_v59  ;;  %vm501_vm3 = vmor %vm499_vm14, %vm500_vm15  ;;  %v488_v15 = vmul.f32 %v2401_v55, %v487_v12  ;;  %v2342_v12 = vld [vmem:[%s3196_s5 + $0x18] sm:$0xff] }
 0x125   : > { %v472_v0 = vsel %vm471_vm12, %v2399_v36, %v468_v58  ;;  %v495_v1 = vmul.f32 %v2403_v57, %v494_v62  ;;  %2371 = vmatpush.bf16.msra.mxu2 %v2342_v12 }
 0x126   : > { %2111 = vmatmul.msk.bf16.vlgmr.msra.gmra.mxu0 %vm347_vm0, %v553_v63  ;;  %v525_v4 = vmul.f32 %v472_v0, %v2583_v40  ;;  %v548_v40 = vadd.f32 %v2645_v25, %v537_v11  ;;  %v492_v17 = vsel %vm491_vm4, %v2401_v55, %v488_v15  ;;  %v2405_v30 = vpop.eup %2404 }
 0x127   : > { %v496_v5 = vmul.f32 0.5, %v495_v1  ;;  %v527_v19 = vmul.f32 %v492_v17, %v2581_v39  ;;  %vm510_vm6 = vweird.f32 %v2405_v30  ;;  %v2344_v17 = vld [vmem:[%s3196_s5 + $0x28] sm:$0xff] }
 0x128   : > { %v536_v9 = vmul.f32 %v2638_v44, %v525_v4  ;;  %vm511_vm7 = vmor %vm509_vm5, %vm510_vm6 }
 0x129   : > { %v497_v10 = vsub.f32 1.5, %v496_v5  ;;  %v538_v22 = vmul.f32 %v2638_v44, %v527_v19 }
 0x12a   : > { %v547_v13 = vadd.f32 %v2645_v25, %v536_v9  ;;  %v2345_v9 = vld [vmem:[%s3196_s5 + $0x30] sm:$0xff] }
 0x12b   : > { %v498_v14 = vmul.f32 %v2403_v57, %v497_v10  ;;  %v549_v24 = vadd.f32 %v2645_v25, %v538_v22  ;;  %1054 = vmatpush.bf16.msra.mxu1 %v2345_v9  ;;  %2368 = vmatpush.bf16.msra.mxu3 %v2345_v9  ;;  %v2341_v22 = vld [vmem:[%s3196_s5 + $0x10] sm:$0xff] }
 0x12c   : > { %v554_v35 = vpack.c.bf16 %v548_v40, %v547_v13  ;;  %2372 = vmatpush.bf16.msra.mxu2 %v2341_v22 }
 0x12d   : > { %v502_v16 = vsel %vm501_vm3, %v2403_v57, %v498_v14 }
 0x12e   : > { %v528_v18 = vmul.f32 %v502_v16, %v2600_v52  ;;  %v504_v52 = vmul.f32 %v2405_v30, %v441_v29  ;;  %v2343_v29 = vld [vmem:[%s3196_s5 + $0x20] sm:$0xff] }
 0x12f   : > { %1055 = vmatpush.bf16.msra.mxu1 %v2344_v17  ;;  %2369 = vmatpush.bf16.msra.mxu3 %v2344_v17 }
 0x130   : > { %v539_v21 = vmul.f32 %v2638_v44, %v528_v18  ;;  %v505_v31 = vmul.f32 %v2405_v30, %v504_v52 }
 0x132   : > { %v550_v23 = vadd.f32 %v2645_v25, %v539_v21  ;;  %v506_v34 = vmul.f32 0.5, %v505_v31 }
 0x133   : > { %1056 = vmatpush.bf16.msra.mxu1 %v2343_v29  ;;  %2370 = vmatpush.bf16.msra.mxu3 %v2343_v29 }
 0x134   : > { %v555_v26 = vpack.c.bf16 %v550_v23, %v549_v24  ;;  %v507_v36 = vsub.f32 1.5, %v506_v34 }
 0x136   : > { %2112 = vmatmul.msk.bf16.gmra.mxu0 %vm347_vm0, %v554_v35  ;;  %v508_v41 = vmul.f32 %v2405_v30, %v507_v36 }
 0x137   : > { %1138 = vmatpush.bf16.msrb.mxu1 %v2342_v12 }
 0x138   : > { %v512_v45 = vsel %vm511_vm7, %v2405_v30, %v508_v41 }
 0x139   : > { %v529_v48 = vmul.f32 %v512_v45, %v2596_v50  ;;  %v2681_v50 = vld [vmem:[%s3195_s4] ss:$0 sm:$0xff] }
 0x13b   : > { %v540_v53 = vmul.f32 %v2638_v44, %v529_v48  ;;  %1139 = vmatpush.bf16.msrb.mxu1 %v2341_v22 }
 0x13d   : > { %v551_v55 = vadd.f32 %v2645_v25, %v540_v53 }
 0x146   : > { %2113 = vmatmul.msk.bf16.gmra.mxu0 %vm347_vm0, %v555_v26 }
 0x182   : > { %v426_v39 = vpop.xlane.xlu0 %425 }
 0x183   : > { %v434_v32 = vmul.f32 %v426_v39, %v2562_v20  ;;  %v2340_v39 = vld [vmem:[%s3196_s5 + $0x8] sm:$0xff] }
 0x184   : > { %2373 = vmatpush.bf16.msra.mxu2 %v2340_v39  ;;  %1140 = vmatpush.bf16.msrb.mxu1 %v2340_v39 }
 0x185   : > { %v442_v33 = vadd.f32 1e-05, %v434_v32 }
 0x187   : > { %2406 = vrsqrt.f32 %v442_v33  ;;  %vm519_vm9 = vweird.f32 %v442_v33 }
 0x18d   : > { %v2407_v38 = vpop.eup %2406 }
 0x18e   : > { %v514_v42 = vmul.f32 %v2407_v38, %v442_v33  ;;  %vm520_vm8 = vweird.f32 %v2407_v38 }
 0x18f   : > { %vm521_vm10 = vmor %vm519_vm9, %vm520_vm8 }
 0x190   : > { %v515_v43 = vmul.f32 %v2407_v38, %v514_v42 }
 0x192   : > { %v516_v46 = vmul.f32 0.5, %v515_v43 }
 0x194   : > { %v517_v47 = vsub.f32 1.5, %v516_v46 }
 0x196   : > { %v518_v49 = vmul.f32 %v2407_v38, %v517_v47 }
 0x198   : > { %v522_v20 = vsel %vm521_vm10, %v2407_v38, %v518_v49 }
 0x199   : > { %v530_v51 = vmul.f32 %v522_v20, %v2620_v8 }
 0x19b   : > { %v541_v54 = vmul.f32 %v2638_v44, %v530_v51  ;;  %v2481_v44 = vmov 0   ;;  %v2339_v51 = vld [vmem:[%s3196_s5] sm:$0xff] }
 0x19c   : > { %779 = vst.msk [vmem:[#allocation2] sm:$0x1] %vm778_vm11, %v2481_v44  ;;  %2374 = vmatpush.bf16.msra.mxu2 %v2339_v51  ;;  %1141 = vmatpush.bf16.msrb.mxu1 %v2339_v51 }
 0x19d   : > { %v552_v56 = vadd.f32 %v2645_v25, %v541_v54  ;;  %780 = vst.msk [vmem:[#allocation2 + $0x8] sm:$0x1] %vm778_vm11, %v2481_v44 }
 0x19e   : > { %781 = vst.msk [vmem:[#allocation2 + $0x10] sm:$0x1] %vm778_vm11, %v2481_v44 }
 0x19f   : > { %v556_v37 = vpack.c.bf16 %v552_v56, %v551_v55  ;;  %782 = vst.msk [vmem:[#allocation2 + $0x18] sm:$0x1] %vm778_vm11, %v2481_v44 }
 0x1a0   : > { %783 = vst.msk [vmem:[#allocation2 + $0x20] sm:$0x1] %vm778_vm11, %v2481_v44 }
 0x1a1   : > { %2114 = vmatmul.msk.bf16.gmra.mxu0 %vm347_vm0, %v556_v37  ;;  %784 = vst.msk [vmem:[#allocation2 + $0x28] sm:$0x1] %vm778_vm11, %v2481_v44 }
 0x1a2   : > { %785 = vst.msk [vmem:[#allocation2 + $0x30] sm:$0x1] %vm778_vm11, %v2481_v44 }
 0x1a3   : > { %v598_v57 = vpop.f32.mrf.mxu0  ;;  %786 = vst.msk [vmem:[#allocation2 + $0x38] sm:$0x1] %vm778_vm11, %v2481_v44 }
 0x1a4   : > { %v2684_v58 = vadd.f32 %v2681_v50, %v598_v57 }
 0x1a6   : > { %v2115_v8 = vmul.f32 -1.442695, %v2684_v58 }
 0x1a8   : > { %2408 = vpow2.f32 %v2115_v8 }
 0x1ab   : > { %v600_v25 = vpop.f32.mrf.mxu0 }
 0x1ac   : > { %v2690_v59 = vadd.f32 %v2681_v50, %v600_v25 }
 0x1ae   : > { %v2409_v60 = vpop.eup %2408  ;;  %v2116_v61 = vmul.f32 -1.442695, %v2690_v59 }
 0x1af   : > { %v642_v62 = vadd.f32 1.0, %v2409_v60 }
 0x1b0   : > { %2410 = vpow2.f32 %v2116_v61 }
 0x1b1   : > { %2412 = vrcp.f32 %v642_v62  ;;  %v661_v10 = vand.u32 2147483648, %v642_v62  ;;  %v659_v14 = vand.u32 2147483647, %v642_v62  ;;  %vm655_vm12 = vweird.f32 %v642_v62 }
 0x1b3   : > { %v603_v63 = vpop.f32.mrf.mxu0  ;;  %v662_v19 = vor.u32 1.1754944e-38, %v661_v10  ;;  %vm660_vm14 = vcmp.eq.f32.partialorder %v659_v14, 8.507059e+37 }
 0x1b4   : > { %v2700_v0 = vadd.f32 %v2681_v50, %v603_v63 }
 0x1b6   : > { %v2411_v1 = vpop.eup %2410  ;;  %v2117_v2 = vmul.f32 -1.442695, %v2700_v0 }
 0x1b7   : > { %v2413_v4 = vpop.eup %2412  ;;  %v2706_v5 = vadd.f32 1.0, %v2411_v1 }
 0x1b8   : > { %v651_v6 = vmul.f32 %v2413_v4, %v642_v62  ;;  %2414 = vpow2.f32 %v2117_v2  ;;  %vm656_vm0 = vweird.f32 %v2413_v4 }
 0x1b9   : > { %2416 = vrcp.f32 %v2706_v5  ;;  %vm657_vm13 = vmor %vm655_vm12, %vm656_vm0  ;;  %v674_v30 = vand.u32 2147483647, %v2706_v5  ;;  %v676_v52 = vand.u32 2147483648, %v2706_v5  ;;  %vm670_vm2 = vweird.f32 %v2706_v5 }
 0x1ba   : > { %v652_v7 = vsub.f32 1.0, %v651_v6  ;;  %vm876_vm0 = vsmask.f32 3328 }
 0x1bb   : > { %v605_v11 = vpop.f32.mrf.mxu0  ;;  %v677_v45 = vor.u32 1.1754944e-38, %v676_v52  ;;  %vm675_vm4 = vcmp.eq.f32.partialorder %v674_v30, 8.507059e+37 }
 0x1bc   : > { %v653_v13 = vmul.f32 %v2413_v4, %v652_v7  ;;  %v2716_v40 = vadd.f32 %v2681_v50, %v605_v11 }
 0x1be   : > { %v2415_v15 = vpop.eup %2414  ;;  %v654_v35 = vadd.f32 %v2413_v4, %v653_v13  ;;  %v2118_v16 = vmul.f32 -1.442695, %v2716_v40 }
 0x1bf   : > { %v2417_v18 = vpop.eup %2416  ;;  %v2722_v21 = vadd.f32 1.0, %v2415_v15 }
 0x1c0   : > { %v658_v23 = vsel %vm657_vm13, %v2413_v4, %v654_v35  ;;  %v666_v24 = vmul.f32 %v2417_v18, %v2706_v5  ;;  %2418 = vpow2.f32 %v2118_v16  ;;  %vm671_vm15 = vweird.f32 %v2417_v18 }
 0x1c1   : > { %v663_v26 = vsel %vm660_vm14, %v662_v19, %v658_v23  ;;  %2420 = vrcp.f32 %v2722_v21  ;;  %vm672_vm3 = vmor %vm670_vm2, %vm671_vm15  ;;  %v689_v55 = vand.u32 2147483647, %v2722_v21  ;;  %v691_v56 = vand.u32 2147483648, %v2722_v21 }
 0x1c2   : > { %v770_v27 = vmul.f32 %v663_v26, %v2684_v58  ;;  %v667_v28 = vsub.f32 1.0, %v666_v24  ;;  %vm685_vm6 = vweird.f32 %v2722_v21  ;;  %vm877_vm13 = vsmask.f32 7440 }
 0x1c3   : > { %v608_v31 = vpop.f32.mrf.mxu0  ;;  %v692_v61 = vor.u32 1.1754944e-38, %v691_v56  ;;  %vm690_vm8 = vcmp.eq.f32.partialorder %v689_v55, 8.507059e+37  ;;  %vm2785_vm15 = vmor %vm876_vm0, %vm877_vm13 }
 0x1c4   : > { %v787_v32 = vpack.c.bf16 %v770_v27, %v770_v27  ;;  %v668_v33 = vmul.f32 %v2417_v18, %v667_v28  ;;  %v2739_v34 = vadd.f32 %v2681_v50, %v608_v31 }
 0x1c6   : > { %v2419_v36 = vpop.eup %2418  ;;  %v803_v38 = vrot.slane %v787_v32, 7  ;;  %v669_v41 = vadd.f32 %v2417_v18, %v668_v33  ;;  %v2119_v42 = vmul.f32 -1.442695, %v2739_v34 }
 0x1c7   : > { %v2421_v43 = vpop.eup %2420  ;;  %v2743_v46 = vadd.f32 1.0, %v2419_v36 }
 0x1c8   : > { %v804_v47 = vrot.slane %v803_v38, 4  ;;  %836 = vst.msk [vmem:[#allocation2] sm:$0xe] %vm835_vm1, %v803_v38  ;;  %v673_v48 = vsel %vm672_vm3, %v2417_v18, %v669_v41  ;;  %v681_v49 = vmul.f32 %v2421_v43, %v2722_v21  ;;  %vm686_vm5 = vweird.f32 %v2421_v43 }
 0x1c9   : > { %v678_v20 = vsel %vm675_vm4, %v677_v45, %v673_v48  ;;  %2422 = vrcp.f32 %v2743_v46  ;;  %vm687_vm7 = vmor %vm685_vm6, %vm686_vm5  ;;  %v704_v11 = vand.u32 2147483647, %v2743_v46  ;;  %v706_v12 = vand.u32 2147483648, %v2743_v46 }
 0x1ca   : > { %837 = vst.msk [vmem:[#allocation2 + $0x4] sm:$0x1] %vm778_vm11, %v804_v47  ;;  %v771_v53 = vmul.f32 %v678_v20, %v2690_v59  ;;  %v682_v54 = vsub.f32 1.0, %v681_v49  ;;  %2424 = vpow2.f32 %v2119_v42  ;;  %vm700_vm10 = vweird.f32 %v2743_v46 }
 0x1cb   : > { %v610_v37 = vpop.f32.mrf.mxu0  ;;  %v707_v19 = vor.u32 1.1754944e-38, %v706_v12  ;;  %vm705_vm14 = vcmp.eq.f32.partialorder %v704_v11, 8.507059e+37  ;;  %vm1036_vm6 = vcmask 523264  }
 0x1cc   : > { %v788_v57 = vpack.c.bf16 %v771_v53, %v771_v53  ;;  %v683_v58 = vmul.f32 %v2421_v43, %v682_v54  ;;  %v2756_v8 = vadd.f32 %v2681_v50, %v610_v37 }
 0x1ce   : > { %v805_v44 = vrot.slane %v788_v57, 7  ;;  %v684_v25 = vadd.f32 %v2421_v43, %v683_v58  ;;  %v2120_v59 = vmul.f32 -1.442695, %v2756_v8 }
 0x1cf   : > { %v2423_v60 = vpop.eup %2422  ;;  %v852_v62 = vld [vmem:[#allocation2] sm:$0xf] }
 0x1d0   : > { %v2425_v63 = vpop.eup %2424  ;;  %v806_v1 = vrot.slane %v805_v44, 4  ;;  %838 = vst.msk [vmem:[#allocation2 + $0x8] sm:$0xe] %vm835_vm1, %v805_v44  ;;  %v688_v2 = vsel %vm687_vm7, %v2421_v43, %v684_v25  ;;  %v696_v3 = vmul.f32 %v2423_v60, %v2743_v46  ;;  %2426 = vpow2.f32 %v2120_v59 }
 0x1d1   : > { %v693_v4 = vsel %vm690_vm8, %v692_v61, %v688_v2  ;;  %v2762_v5 = vadd.f32 1.0, %v2425_v63  ;;  %v880_v6 = vshrl.u32 %v852_v62, 16  ;;  %v883_v10 = vshll.u32 %v852_v62, 16  ;;  %v2770_v18 = vld [vmem:[#allocation2 + $0x4] sm:$0x1] }
 0x1d2   : > { %839 = vst.msk [vmem:[#allocation2 + $0xc] sm:$0x1] %vm778_vm11, %v806_v1  ;;  %v772_v7 = vmul.f32 %v693_v4, %v2700_v0  ;;  %v697_v9 = vsub.f32 1.0, %v696_v3  ;;  %vm701_vm9 = vweird.f32 %v2423_v60  ;;  %v889_v29 = vshll.u32 %v2770_v18, 16 }
 0x1d3   : > { %2428 = vrcp.f32 %v2762_v5  ;;  %v882_v15 = vrot.slane %v880_v6, 4  ;;  %v885_v35 = vrot.slane %v883_v10, 5  ;;  %vm702_vm12 = vmor %vm700_vm10, %vm701_vm9  ;;  %v719_v33 = vand.u32 2147483647, %v2762_v5 }
 0x1d4   : > { %v789_v13 = vpack.c.bf16 %v772_v7, %v772_v7  ;;  %v698_v14 = vmul.f32 %v2423_v60, %v697_v9  ;;  %v891_v46 = vrot.slane %v889_v29, 5  ;;  %vm715_vm3 = vweird.f32 %v2762_v5 }
 0x1d5   : > { %v886_v22 = vor.u32 %v885_v35, %v882_v15  ;;  %vm2792_vm4 = vcmp.eq.f32.partialorder %v719_v33, 8.507059e+37 }
 0x1d6   : > { %v807_v16 = vrot.slane %v789_v13, 7  ;;  %v699_v17 = vadd.f32 %v2423_v60, %v698_v14  ;;  %v2427_v0 = vpop.eup %2426 }
 0x1d7   : > { %v853_v21 = vld [vmem:[#allocation2 + $0x8] sm:$0xf]  ;;  %v2773_v26 = vadd.f32 1.0, %v2427_v0  ;;  %v887_v36 = vrot.slane %v886_v22, 4 }
 0x1d8   : > { %v808_v23 = vrot.slane %v807_v16, 4  ;;  %840 = vst.msk [vmem:[#allocation2 + $0x10] sm:$0xe] %vm835_vm1, %v807_v16  ;;  %v703_v24 = vsel %vm702_vm12, %v2423_v60, %v699_v17  ;;  %v894_v30 = vshrl.u32 %v853_v21, 16  ;;  %v897_v52 = vshll.u32 %v853_v21, 16 }
 0x1d9   : > { %v2429_v27 = vpop.eup %2428  ;;  %v708_v28 = vsel %vm705_vm14, %v707_v19, %v703_v24  ;;  %2430 = vrcp.f32 %v2773_v26  ;;  %v2780_v32 = vld [vmem:[#allocation2 + $0xc] sm:$0x1]  ;;  %v892_v53 = vsel %vm2785_vm15, %v887_v36, %v891_v46  ;;  %v736_v60 = vand.u32 2147483648, %v2773_v26 }
 0x1da   : > { %841 = vst.msk [vmem:[#allocation2 + $0x14] sm:$0x1] %vm778_vm11, %v808_v23  ;;  %v773_v31 = vmul.f32 %v708_v28, %v2716_v40  ;;  %v711_v39 = vmul.f32 %v2429_v27, %v2762_v5  ;;  %v896_v43 = vrot.slane %v894_v30, 4  ;;  %v899_v45 = vrot.slane %v897_v52, 5 }
 0x1db   : > { %v721_v40 = vand.u32 2147483648, %v2762_v5  ;;  %v903_v47 = vshll.u32 %v2780_v32, 16  ;;  %vm716_vm2 = vweird.f32 %v2429_v27  ;;  %v1000_v1 = vunpack.c.l.b16 %v892_v53 }
 0x1dc   : > { %v790_v38 = vpack.c.bf16 %v773_v31, %v773_v31  ;;  %v712_v41 = vsub.f32 1.0, %v711_v39  ;;  %v900_v20 = vor.u32 %v899_v45, %v896_v43  ;;  %vm717_vm5 = vmor %vm715_vm3, %vm716_vm2  ;;  %v734_v9 = vand.u32 2147483647, %v2773_v26 }
 0x1dd   : > { %v905_v54 = vrot.slane %v903_v47, 5  ;;  %v722_v25 = vor.u32 1.1754944e-38, %v721_v40  ;;  %vm730_vm8 = vweird.f32 %v2773_v26  ;;  %v737_v16 = vor.u32 1.1754944e-38, %v736_v60 }
 0x1de   : > { %v809_v48 = vrot.slane %v790_v38, 7  ;;  %v713_v49 = vmul.f32 %v2429_v27, %v712_v41  ;;  %v901_v58 = vrot.slane %v900_v20, 4  ;;  %vm735_vm10 = vcmp.eq.f32.partialorder %v734_v9, 8.507059e+37 }
 0x1df   : > { %v854_v55 = vld [vmem:[#allocation2 + $0x10] sm:$0xf]  ;;  %v2431_v56 = vpop.eup %2430 }
 0x1e0   : > { %v810_v37 = vrot.slane %v809_v48, 4  ;;  %842 = vst.msk [vmem:[#allocation2 + $0x18] sm:$0xe] %vm835_vm1, %v809_v48  ;;  %v714_v57 = vadd.f32 %v2429_v27, %v713_v49  ;;  %v908_v44 = vshrl.u32 %v854_v55, 16  ;;  %v726_v59 = vmul.f32 %v2431_v56, %v2773_v26  ;;  %v2157_v15 = vld [vmem:[#allocation2 + $0x10] sm:$0xf] }
 0x1e1   : > { %v911_v61 = vshll.u32 %v854_v55, 16  ;;  %v906_v63 = vsel %vm2785_vm15, %v901_v58, %v905_v54  ;;  %v2808_v10 = vld [vmem:[#allocation2 + $0x14] sm:$0x1]  ;;  %vm731_vm7 = vweird.f32 %v2431_v56  ;;  %v2335_v49 = vld [vmem:[#allocation2 + $0x4] sm:$0xf0] }
 0x1e2   : > { %843 = vst.msk [vmem:[#allocation2 + $0x1c] sm:$0x1] %vm778_vm11, %v810_v37  ;;  %v718_v62 = vsel %vm717_vm5, %v2429_v27, %v714_v57  ;;  %v910_v2 = vrot.slane %v908_v44, 4  ;;  %v727_v4 = vsub.f32 1.0, %v726_v59  ;;  %v1001_v5 = vunpack.c.l.b16 %v906_v63  ;;  %vm732_vm9 = vmor %vm730_vm8, %vm731_vm7  ;;  %v2153_v55 = vld [vmem:[#allocation2] sm:$0xf] }
 0x1e3   : > { %v723_v3 = vsel %vm2792_vm4, %v722_v25, %v718_v62  ;;  %v913_v6 = vrot.slane %v911_v61, 5  ;;  %vm1187_vm7 = vcmask 1042432   ;;  %vm1188_vm8 = vcmask 1046532  }
 0x1e4   : > { %v774_v7 = vmul.f32 %v723_v3, %v2739_v34  ;;  %v728_v11 = vmul.f32 %v2431_v56, %v727_v4  ;;  %v1008_v12 = vpack.c.b16 %v1001_v5, %v1000_v1  ;;  %v917_v34 = vshll.u32 %v2808_v10, 16 }
 0x1e5   : > { %v914_v13 = vor.u32 %v913_v6, %v910_v2 }
 0x1e6   : > { %v791_v14 = vpack.c.bf16 %v774_v7, %v774_v7  ;;  %v729_v35 = vadd.f32 %v2431_v56, %v728_v11  ;;  %2147 = vmatmul.msk.bf16.vlgmr.msra.gmra.mxu1 %vm1036_vm6, %v1008_v12  ;;  %v919_v33 = vrot.slane %v917_v34, 5 }
 0x1e7   : > { %v2336_v17 = vld [vmem:[#allocation2 + $0x14] sm:$0xf0]  ;;  %v915_v28 = vrot.slane %v914_v13, 4 }
 0x1e8   : > { %v855_v0 = vld [vmem:[#allocation2 + $0x18] sm:$0xf]  ;;  %v811_v19 = vrot.slane %v791_v14, 7  ;;  %v2158_v21 = vor.u32 %v2336_v17, %v2157_v15  ;;  %v733_v24 = vsel %vm732_vm9, %v2431_v56, %v729_v35  ;;  %v2154_v56 = vor.u32 %v2335_v49, %v2153_v55  ;;  %vm2872_vm9 = vmor %vm1187_vm7, %vm1188_vm8 }
 0x1e9   : > { %v922_v22 = vshrl.u32 %v855_v0, 16  ;;  %v925_v23 = vshll.u32 %v855_v0, 16  ;;  %v2813_v27 = vld [vmem:[#allocation2 + $0x1c] sm:$0x1]  ;;  %v738_v26 = vsel %vm735_vm10, %v737_v16, %v733_v24  ;;  %v920_v41 = vsel %vm2785_vm15, %v915_v28, %v919_v33 }
 0x1ea   : > { %v812_v29 = vrot.slane %v811_v19, 4  ;;  %844 = vst.msk [vmem:[#allocation2 + $0x20] sm:$0xe] %vm835_vm1, %v811_v19  ;;  %2184 = vmatmul.msk.bf16.vlgmr.msra.gmra.mxu2 %vm1036_vm6, %v2158_v21  ;;  %v775_v31 = vmul.f32 %v738_v26, %v2756_v8  ;;  %v931_v39 = vshll.u32 %v2813_v27, 16  ;;  %v1002_v8 = vunpack.c.l.b16 %v920_v41  ;;  %v2350_v28 = vld [vmem:[%s3196_s5 + $0x58] sm:$0xff] }
 0x1eb   : > { %v924_v30 = vrot.slane %v922_v22, 4  ;;  %v927_v52 = vrot.slane %v925_v23, 5  ;;  %1283 = vmatpush.bf16.msrb.mxu3 %v2350_v28 }
 0x1ec   : > { %845 = vst.msk [vmem:[#allocation2 + $0x24] sm:$0x1] %vm778_vm11, %v812_v29  ;;  %v792_v38 = vpack.c.bf16 %v775_v31, %v775_v31  ;;  %v933_v45 = vrot.slane %v931_v39, 5  ;;  %v2349_v29 = vld [vmem:[%s3196_s5 + $0x50] sm:$0xff]  ;;  %v2348_v39 = vld [vmem:[%s3196_s5 + $0x48] sm:$0xff] }
 0x1ed   : > { %v928_v36 = vor.u32 %v927_v52, %v924_v30 }
 0x1ee   : > { %v813_v40 = vrot.slane %v792_v38, 7 }
 0x1ef   : > { %v929_v43 = vrot.slane %v928_v36, 4  ;;  %1284 = vmatpush.bf16.msrb.mxu3 %v2349_v29 }
 0x1f0   : > { %v814_v47 = vrot.slane %v813_v40, 4  ;;  %846 = vst.msk [vmem:[#allocation2 + $0x28] sm:$0xe] %vm835_vm1, %v813_v40 }
 0x1f1   : > { %v934_v46 = vsel %vm2785_vm15, %v929_v43, %v933_v45  ;;  %v856_v20 = vld [vmem:[#allocation2 + $0x20] sm:$0xf] }
 0x1f2   : > { %v1003_v48 = vunpack.c.l.b16 %v934_v46  ;;  %847 = vst.msk [vmem:[#allocation2 + $0x2c] sm:$0x1] %vm778_vm11, %v814_v47  ;;  %v936_v53 = vshrl.u32 %v856_v20, 16  ;;  %v939_v54 = vshll.u32 %v856_v20, 16  ;;  %v2161_v25 = vld [vmem:[#allocation2 + $0x20] sm:$0xf] }
 0x1f3   : > { %v2827_v58 = vld [vmem:[#allocation2 + $0x24] sm:$0x1]  ;;  %1285 = vmatpush.bf16.msrb.mxu3 %v2348_v39  ;;  %v1163_v39 = vld [vmem:[#allocation2] sm:$0xe] }
 0x1f4   : > { %v1009_v51 = vpack.c.b16 %v1003_v48, %v1002_v8  ;;  %v938_v37 = vrot.slane %v936_v53, 4  ;;  %v941_v57 = vrot.slane %v939_v54, 5  ;;  %v945_v62 = vshll.u32 %v2827_v58, 16 }
 0x1f6   : > { %2148 = vmatmul.msk.bf16.vlgmr.msra.gmra.mxu3 %vm1036_vm6, %v1009_v51  ;;  %2183 = vmatmul.msk.bf16.vlgmr.msrb.gmra.mxu1 %vm1036_vm6, %v2154_v56  ;;  %v942_v44 = vor.u32 %v941_v57, %v938_v37  ;;  %v947_v7 = vrot.slane %v945_v62, 5 }
 0x1f7   : > { %v2337_v59 = vld [vmem:[#allocation2 + $0x24] sm:$0xf0] }
 0x1f8   : > { %v857_v60 = vld [vmem:[#allocation2 + $0x28] sm:$0xf]  ;;  %v2162_v61 = vor.u32 %v2337_v59, %v2161_v25  ;;  %v943_v3 = vrot.slane %v942_v44, 4  ;;  %v2347_v59 = vld [vmem:[%s3196_s5 + $0x40] sm:$0xff] }
 0x1f9   : > { %v950_v63 = vshrl.u32 %v857_v60, 16  ;;  %v953_v1 = vshll.u32 %v857_v60, 16  ;;  %v2831_v2 = vld [vmem:[#allocation2 + $0x2c] sm:$0x1]  ;;  %1286 = vmatpush.bf16.msrb.mxu3 %v2347_v59 }
 0x1fa   : > { %2185 = vmatmul.msk.bf16.gmra.mxu2 %vm1036_vm6, %v2162_v61  ;;  %v959_v6 = vshll.u32 %v2831_v2, 16  ;;  %v948_v11 = vsel %vm2785_vm15, %v943_v3, %v947_v7 }
 0x1fb   : > { %v952_v4 = vrot.slane %v950_v63, 4  ;;  %v955_v5 = vrot.slane %v953_v1, 5  ;;  %v1004_v15 = vunpack.c.l.b16 %v948_v11 }
 0x1fc   : > { %v961_v13 = vrot.slane %v959_v6, 5 }
 0x1fd   : > { %v956_v9 = vor.u32 %v955_v5, %v952_v4 }
 0x1ff   : > { %v957_v12 = vrot.slane %v956_v9, 4 }
 0x201   : > { %v962_v14 = vsel %vm2785_vm15, %v957_v12, %v961_v13 }
 0x202   : > { %v1005_v35 = vunpack.c.l.b16 %v962_v14 }
 0x204   : > { %v1010_v16 = vpack.c.b16 %v1005_v35, %v1004_v15 }
 0x206   : > { %2149 = vmatmul.msk.bf16.gmra.mxu3 %vm1036_vm6, %v1010_v16 }
 0x21e   : > { %v613_v17 = vpop.f32.mrf.mxu0 }
 0x21f   : > { %v614_v0 = vadd.f32 %v2681_v50, %v613_v17 }
 0x221   : > { %v2121_v34 = vmul.f32 -1.442695, %v614_v0 }
 0x223   : > { %2432 = vpow2.f32 %v2121_v34 }
 0x226   : > { %v615_v19 = vpop.f32.mrf.mxu0 }
 0x227   : > { %v616_v21 = vadd.f32 %v2681_v50, %v615_v19 }
 0x229   : > { %v2433_v22 = vpop.eup %2432  ;;  %v2122_v23 = vmul.f32 -1.442695, %v616_v21 }
 0x22a   : > { %v648_v24 = vadd.f32 1.0, %v2433_v22 }
 0x22b   : > { %2434 = vpow2.f32 %v2122_v23 }
 0x22c   : > { %2436 = vrcp.f32 %v648_v24  ;;  %v751_v33 = vand.u32 2147483648, %v648_v24  ;;  %v749_v38 = vand.u32 2147483647, %v648_v24  ;;  %vm745_vm12 = vweird.f32 %v648_v24 }
 0x22e   : > { %v752_v45 = vor.u32 1.1754944e-38, %v751_v33  ;;  %vm750_vm14 = vcmp.eq.f32.partialorder %v749_v38, 8.507059e+37  ;;  %v1192_v33 = vrot.slane %v2770_v18, 5  ;;  %v1204_v18 = vrot.slane %v2813_v27, 5  ;;  %v1167_v27 = vld [vmem:[#allocation2 + $0x20] sm:$0xe] }
 0x231   : > { %v2435_v26 = vpop.eup %2434 }
 0x232   : > { %v2437_v30 = vpop.eup %2436  ;;  %v649_v52 = vadd.f32 1.0, %v2435_v26 }
 0x233   : > { %v741_v31 = vmul.f32 %v2437_v30, %v648_v24  ;;  %vm746_vm0 = vweird.f32 %v2437_v30 }
 0x234   : > { %2438 = vrcp.f32 %v649_v52  ;;  %vm747_vm13 = vmor %vm745_vm12, %vm746_vm0  ;;  %v766_v49 = vand.u32 2147483648, %v649_v52  ;;  %v764_v53 = vand.u32 2147483647, %v649_v52  ;;  %vm760_vm3 = vweird.f32 %v649_v52 }
 0x235   : > { %v742_v50 = vsub.f32 1.0, %v741_v31  ;;  %v1164_v31 = vld [vmem:[#allocation2 + $0x8] sm:$0xe] }
 0x236   : > { %v767_v56 = vor.u32 1.1754944e-38, %v766_v49  ;;  %vm765_vm5 = vcmp.eq.f32.partialorder %v764_v53, 8.507059e+37 }
 0x237   : > { %v743_v36 = vmul.f32 %v2437_v30, %v742_v50  ;;  %v1196_v50 = vrot.slane %v2780_v32, 5  ;;  %v1166_v32 = vld [vmem:[#allocation2 + $0x18] sm:$0xe] }
 0x238   : > { %v2190_v49 = vrot.slane %v1166_v32, 9 }
 0x239   : > { %v744_v41 = vadd.f32 %v2437_v30, %v743_v36  ;;  %v2188_v36 = vrot.slane %v1164_v31, 9 }
 0x23a   : > { %v2439_v43 = vpop.eup %2438 }
 0x23b   : > { %v748_v40 = vsel %vm747_vm13, %v2437_v30, %v744_v41  ;;  %v756_v46 = vmul.f32 %v2439_v43, %v649_v52  ;;  %vm761_vm2 = vweird.f32 %v2439_v43  ;;  %v2187_v41 = vrot.slane %v1163_v39, 9 }
 0x23c   : > { %v753_v47 = vsel %vm750_vm14, %v752_v45, %v748_v40  ;;  %vm762_vm4 = vmor %vm760_vm3, %vm761_vm2 }
 0x23d   : > { %v776_v8 = vmul.f32 %v753_v47, %v614_v0  ;;  %v757_v48 = vsub.f32 1.0, %v756_v46  ;;  %v1193_v45 = vsel %vm2872_vm9, %v2187_v41, %v1192_v33 }
 0x23e   : > { %v1231_v46 = vunpack.c.l.b16 %v1193_v45 }
 0x23f   : > { %v793_v20 = vpack.c.bf16 %v776_v8, %v776_v8  ;;  %v758_v51 = vmul.f32 %v2439_v43, %v757_v48  ;;  %v1165_v8 = vld [vmem:[#allocation2 + $0x10] sm:$0xe]  ;;  %v1200_v48 = vrot.slane %v2808_v10, 5 }
 0x241   : > { %v815_v54 = vrot.slane %v793_v20, 7  ;;  %v759_v55 = vadd.f32 %v2439_v43, %v758_v51  ;;  %v2189_v20 = vrot.slane %v1165_v8, 9  ;;  %v1205_v51 = vsel %vm2872_vm9, %v2190_v49, %v1204_v18  ;;  %v2358_v18 = vld [vmem:[%s3198_s7 + $0x18] sm:$0xff] }
 0x242   : > { %1834 = vmatpush.bf16.msra.mxu1 %v2358_v18 }
 0x243   : > { %v816_v37 = vrot.slane %v815_v54, 4  ;;  %848 = vst.msk [vmem:[#allocation2 + $0x30] sm:$0xe] %vm835_vm1, %v815_v54  ;;  %v763_v57 = vsel %vm762_vm4, %v2439_v43, %v759_v55  ;;  %v1197_v43 = vsel %vm2872_vm9, %v2188_v36, %v1196_v50  ;;  %v1201_v53 = vsel %vm2872_vm9, %v2189_v20, %v1200_v48  ;;  %v2362_v50 = vld [vmem:[%s3198_s7 + $0x38] sm:$0xff] }
 0x244   : > { %v768_v44 = vsel %vm765_vm5, %v767_v56, %v763_v57  ;;  %v1232_v40 = vunpack.c.l.b16 %v1197_v43  ;;  %v1234_v54 = vunpack.c.l.b16 %v1205_v51  ;;  %v1233_v55 = vunpack.c.l.b16 %v1201_v53  ;;  %1749 = vmatpush.bf16.msrb.mxu0 %v2362_v50 }
 0x245   : > { %849 = vst.msk [vmem:[#allocation2 + $0x34] sm:$0x1] %vm778_vm11, %v816_v37  ;;  %v777_v25 = vmul.f32 %v768_v44, %v616_v21  ;;  %v1168_v37 = vld [vmem:[#allocation2 + $0x28] sm:$0xe]  ;;  %v1212_v57 = vrot.slane %v2831_v2, 5  ;;  %v1208_v44 = vrot.slane %v2827_v58, 5 }
 0x246   : > { %v1239_v47 = vpack.c.b16 %v1232_v40, %v1231_v46  ;;  %v1240_v56 = vpack.c.b16 %v1234_v54, %v1233_v55  ;;  %v2192_v10 = vrot.slane %v1168_v37, 9  ;;  %v2357_v55 = vld [vmem:[%s3198_s7 + $0x10] sm:$0xff] }
 0x247   : > { %v794_v60 = vpack.c.bf16 %v777_v25, %v777_v25  ;;  %v2191_v25 = vrot.slane %v1167_v27, 9  ;;  %v2361_v27 = vld [vmem:[%s3198_s7 + $0x30] sm:$0xff]  ;;  %1835 = vmatpush.bf16.msra.mxu1 %v2357_v55 }
 0x248   : > { %v1213_v59 = vsel %vm2872_vm9, %v2192_v10, %v1212_v57  ;;  %v2366_v57 = vld [vmem:[%s3198_s7 + $0x58] sm:$0xff]  ;;  %1750 = vmatpush.bf16.msrb.mxu0 %v2361_v27 }
 0x249   : > { %v817_v61 = vrot.slane %v794_v60, 7  ;;  %v1209_v60 = vsel %vm2872_vm9, %v2191_v25, %v1208_v44  ;;  %1976 = vmatpush.bf16.msrb.mxu2 %v2366_v57 }
 0x24a   : > { %v858_v62 = vld [vmem:[#allocation2 + $0x30] sm:$0xf] }
 0x24b   : > { %v818_v63 = vrot.slane %v817_v61, 4  ;;  %850 = vst.msk [vmem:[#allocation2 + $0x38] sm:$0xe] %vm835_vm1, %v817_v61  ;;  %v964_v1 = vshrl.u32 %v858_v62, 16  ;;  %v967_v3 = vshll.u32 %v858_v62, 16  ;;  %v1236_v61 = vunpack.c.l.b16 %v1213_v59 }
 0x24c   : > { %v2858_v6 = vld [vmem:[#allocation2 + $0x34] sm:$0x1]  ;;  %v2165_v9 = vld [vmem:[#allocation2 + $0x30] sm:$0xf]  ;;  %v1235_v62 = vunpack.c.l.b16 %v1209_v60 }
 0x24d   : > { %851 = vst.msk [vmem:[#allocation2 + $0x3c] sm:$0x1] %vm778_vm11, %v818_v63  ;;  %v966_v4 = vrot.slane %v964_v1, 4  ;;  %v969_v5 = vrot.slane %v967_v3, 5  ;;  %v973_v14 = vshll.u32 %v2858_v6, 16 }
 0x24e   : > { %v1241_v63 = vpack.c.b16 %v1236_v61, %v1235_v62  ;;  %v1169_v2 = vld [vmem:[#allocation2 + $0x30] sm:$0xe]  ;;  %v2356_v61 = vld [vmem:[%s3198_s7 + $0x8] sm:$0xff] }
 0x24f   : > { %v970_v7 = vor.u32 %v969_v5, %v966_v4  ;;  %v975_v21 = vrot.slane %v973_v14, 5  ;;  %v1216_v4 = vrot.slane %v2858_v6, 5  ;;  %v2193_v5 = vrot.slane %v1169_v2, 9  ;;  %1836 = vmatpush.bf16.msra.mxu1 %v2356_v61 }
 0x251   : > { %v971_v17 = vrot.slane %v970_v7, 4 }
 0x252   : > { %v2338_v11 = vld [vmem:[#allocation2 + $0x34] sm:$0xf0] }
 0x253   : > { %v859_v12 = vld [vmem:[#allocation2 + $0x38] sm:$0xf]  ;;  %v2166_v13 = vor.u32 %v2338_v11, %v2165_v9  ;;  %v976_v23 = vsel %vm2785_vm15, %v971_v17, %v975_v21  ;;  %v1217_v9 = vsel %vm2872_vm9, %v2193_v5, %v1216_v4  ;;  %v2365_v5 = vld [vmem:[%s3198_s7 + $0x50] sm:$0xff] }
 0x254   : > { %v978_v15 = vshrl.u32 %v859_v12, 16  ;;  %v981_v35 = vshll.u32 %v859_v12, 16  ;;  %v2861_v16 = vld [vmem:[#allocation2 + $0x3c] sm:$0x1]  ;;  %v1006_v26 = vunpack.c.l.b16 %v976_v23  ;;  %v1170_v1 = vld [vmem:[#allocation2 + $0x38] sm:$0xe]  ;;  %v1237_v12 = vunpack.c.l.b16 %v1217_v9  ;;  %1977 = vmatpush.bf16.msrb.mxu2 %v2365_v5 }
 0x255   : > { %2186 = vmatmul.msk.bf16.gmra.mxu2 %vm1036_vm6, %v2166_v13  ;;  %v987_v19 = vshll.u32 %v2861_v16, 16  ;;  %v1220_v3 = vrot.slane %v2861_v16, 5  ;;  %v2194_v58 = vrot.slane %v1170_v1, 9 }
 0x256   : > { %v980_v0 = vrot.slane %v978_v15, 4  ;;  %v983_v34 = vrot.slane %v981_v35, 5 }
 0x257   : > { %v989_v28 = vrot.slane %v987_v19, 5  ;;  %v1221_v7 = vsel %vm2872_vm9, %v2194_v58, %v1220_v3 }
 0x258   : > { %v984_v22 = vor.u32 %v983_v34, %v980_v0  ;;  %v1238_v11 = vunpack.c.l.b16 %v1221_v7 }
 0x25a   : > { %v985_v24 = vrot.slane %v984_v22, 4  ;;  %v1242_v13 = vpack.c.b16 %v1238_v11, %v1237_v12  ;;  %v2913_v22 = vld [vmem:[%s3197_s6] ss:$0 sm:$0xff] }
 0x25b   : > { %v2355_v11 = vld [vmem:[%s3198_s7] sm:$0xff] }
 0x25c   : > { %v990_v29 = vsel %vm2785_vm15, %v985_v24, %v989_v28  ;;  %1837 = vmatpush.bf16.msra.mxu1 %v2355_v11 }
 0x25d   : > { %v1007_v30 = vunpack.c.l.b16 %v990_v29 }
 0x25f   : > { %v1011_v52 = vpack.c.b16 %v1007_v30, %v1006_v26 }
 0x261   : > { %2150 = vmatmul.msk.bf16.gmra.mxu3 %vm1036_vm6, %v1011_v52 }
 0x263   : > { %v1058_v16 = vpop.f32.mrf.mxu1 }
 0x26b   : > { %v1060_v6 = vpop.f32.mrf.mxu1 }
 0x26d   : > { %v1148_v28 = vpop.f32.mrf.mxu2 }
 0x271   : > { %2219 = vmatmul.msk.bf16.vlgmr.msrb.gmra.mxu3 %vm1036_vm6, %v1239_v47 }
 0x273   : > { %v1143_v19 = vpop.f32.mrf.mxu1 }
 0x274   : > { %v1144_v21 = vadd.f32 %v1143_v19, %v1058_v16 }
 0x275   : > { %v1150_v41 = vpop.f32.mrf.mxu2 }
 0x279   : > { %v1063_v14 = vpop.f32.mrf.mxu3 }
 0x27a   : > { %v1149_v40 = vadd.f32 %v1148_v28, %v1063_v14 }
 0x27b   : > { %v1145_v26 = vpop.f32.mrf.mxu1 }
 0x27c   : > { %v1146_v52 = vadd.f32 %v1145_v26, %v1060_v6 }
 0x27d   : > { %v1153_v51 = vpop.f32.mrf.mxu2 }
 0x281   : > { %2220 = vmatmul.msk.bf16.gmra.mxu3 %vm1036_vm6, %v1240_v56  ;;  %v1065_v15 = vpop.f32.mrf.mxu3 }
 0x282   : > { %v1151_v53 = vadd.f32 %v1150_v41, %v1065_v15  ;;  %v2363_v41 = vld [vmem:[%s3198_s7 + $0x40] sm:$0xff] }
 0x285   : > { %v1155_v14 = vpop.f32.mrf.mxu2 }
 0x289   : > { %v2902_v35 = vpop.f32.mrf.mxu3 }
 0x28a   : > { %v1154_v2 = vadd.f32 %v1153_v51, %v2902_v35 }
 0x291   : > { %2221 = vmatmul.msk.bf16.gmra.mxu3 %vm1036_vm6, %v1241_v63  ;;  %v2904_v17 = vpop.f32.mrf.mxu3 }
 0x2a1   : > { %2222 = vmatmul.msk.bf16.gmra.mxu3 %vm1036_vm6, %v1242_v13 }
 0x2e4   : > { %v2906_v0 = vpop.f32.mrf.mxu3 }
 0x2ec   : > { %v2908_v34 = vpop.f32.mrf.mxu3 }
 0x2f4   : > { %v1288_v23 = vpop.f32.mrf.mxu3 }
 0x2f5   : > { %v1308_v24 = vadd.f32 %v1288_v23, %v1144_v21  ;;  %v2364_v21 = vld [vmem:[%s3198_s7 + $0x48] sm:$0xff] }
 0x2f6   : > { %1978 = vmatpush.bf16.msrb.mxu2 %v2364_v21 }
 0x2f7   : > { %v2916_v29 = vadd.f32 %v2913_v22, %v1308_v24 }
 0x2f9   : > { %v2223_v30 = vmul.f32 -1.442695, %v2916_v29 }
 0x2fa   : > { %1979 = vmatpush.bf16.msrb.mxu2 %v2363_v41 }
 0x2fb   : > { %2440 = vpow2.f32 %v2223_v30 }
 0x2fc   : > { %v1290_v31 = vpop.f32.mrf.mxu3 }
 0x2fd   : > { %v1309_v39 = vadd.f32 %v1290_v31, %v1146_v52 }
 0x2ff   : > { %v2923_v33 = vadd.f32 %v2913_v22, %v1309_v39 }
 0x301   : > { %v2441_v36 = vpop.eup %2440  ;;  %v2224_v43 = vmul.f32 -1.442695, %v2923_v33 }
 0x302   : > { %v1352_v45 = vadd.f32 1.0, %v2441_v36  ;;  %v2360_v36 = vld [vmem:[%s3198_s7 + $0x28] sm:$0xff] }
 0x303   : > { %2442 = vpow2.f32 %v2224_v43  ;;  %1751 = vmatpush.bf16.msrb.mxu0 %v2360_v36 }
 0x304   : > { %2444 = vrcp.f32 %v1352_v45  ;;  %v1293_v46 = vpop.f32.mrf.mxu3  ;;  %v1371_v10 = vand.u32 2147483648, %v1352_v45  ;;  %v1369_v59 = vand.u32 2147483647, %v1352_v45  ;;  %vm1365_vm0 = vweird.f32 %v1352_v45 }
 0x305   : > { %v1310_v47 = vadd.f32 %v1293_v46, %v1149_v40  ;;  %v1156_v46 = vadd.f32 %v1155_v14, %v2904_v17  ;;  %v2359_v17 = vld [vmem:[%s3198_s7 + $0x20] sm:$0xff] }
 0x306   : > { %v1372_v4 = vor.u32 1.1754944e-38, %v1371_v10  ;;  %vm1370_vm13 = vcmp.eq.f32.partialorder %v1369_v59, 8.507059e+37 }
 0x307   : > { %v2927_v32 = vadd.f32 %v2913_v22, %v1310_v47  ;;  %1752 = vmatpush.bf16.msrb.mxu0 %v2359_v17 }
 0x309   : > { %v2443_v8 = vpop.eup %2442  ;;  %v2225_v48 = vmul.f32 -1.442695, %v2927_v32 }
 0x30a   : > { %v2445_v49 = vpop.eup %2444  ;;  %v2933_v20 = vadd.f32 1.0, %v2443_v8  ;;  %v1158_v8 = vpop.f32.mrf.mxu2 }
 0x30b   : > { %v1361_v54 = vmul.f32 %v2445_v49, %v1352_v45  ;;  %2446 = vpow2.f32 %v2225_v48  ;;  %vm1366_vm10 = vweird.f32 %v2445_v49  ;;  %v1159_v27 = vadd.f32 %v1158_v8, %v2906_v0 }
 0x30c   : > { %2448 = vrcp.f32 %v2933_v20  ;;  %v1295_v56 = vpop.f32.mrf.mxu3  ;;  %vm1367_vm12 = vmor %vm1365_vm0, %vm1366_vm10  ;;  %v1384_v6 = vand.u32 2147483647, %v2933_v20  ;;  %v1386_v19 = vand.u32 2147483648, %v2933_v20  ;;  %vm1380_vm2 = vweird.f32 %v2933_v20 }
 0x30d   : > { %v1362_v37 = vsub.f32 1.0, %v1361_v54  ;;  %v1311_v44 = vadd.f32 %v1295_v56, %v1151_v53 }
 0x30e   : > { %v1387_v50 = vor.u32 1.1754944e-38, %v1386_v19  ;;  %vm1385_vm4 = vcmp.eq.f32.partialorder %v1384_v6, 8.507059e+37 }
 0x30f   : > { %v1363_v25 = vmul.f32 %v2445_v49, %v1362_v37  ;;  %v2946_v60 = vadd.f32 %v2913_v22, %v1311_v44 }
 0x311   : > { %v2447_v62 = vpop.eup %2446  ;;  %v1364_v63 = vadd.f32 %v2445_v49, %v1363_v25  ;;  %v2226_v1 = vmul.f32 -1.442695, %v2946_v60 }
 0x312   : > { %v2449_v3 = vpop.eup %2448  ;;  %v2953_v58 = vadd.f32 1.0, %v2447_v62 }
 0x313   : > { %v1368_v7 = vsel %vm1367_vm12, %v2445_v49, %v1364_v63  ;;  %v1376_v9 = vmul.f32 %v2449_v3, %v2933_v20  ;;  %2450 = vpow2.f32 %v2226_v1  ;;  %vm1381_vm14 = vweird.f32 %v2449_v3 }
 0x314   : > { %v1373_v12 = vsel %vm1370_vm13, %v1372_v4, %v1368_v7  ;;  %2452 = vrcp.f32 %v2953_v58  ;;  %v1298_v13 = vpop.f32.mrf.mxu3  ;;  %vm1382_vm3 = vmor %vm1380_vm2, %vm1381_vm14  ;;  %v1401_v20 = vand.u32 2147483648, %v2953_v58  ;;  %v1399_v55 = vand.u32 2147483647, %v2953_v58  ;;  %v1160_v7 = vpop.f32.mrf.mxu2 }
 0x315   : > { %v1480_v15 = vmul.f32 %v1373_v12, %v2916_v29  ;;  %v1377_v35 = vsub.f32 1.0, %v1376_v9  ;;  %v1312_v16 = vadd.f32 %v1298_v13, %v1154_v2  ;;  %vm1395_vm7 = vweird.f32 %v2953_v58 }
 0x316   : > { %v1402_v44 = vor.u32 1.1754944e-38, %v1401_v20  ;;  %vm1400_vm10 = vcmp.eq.f32.partialorder %v1399_v55, 8.507059e+37 }
 0x317   : > { %v1488_v23 = vpack.c.bf16 %v1480_v15, %v1480_v15  ;;  %v1378_v24 = vmul.f32 %v2449_v3, %v1377_v35  ;;  %v2970_v28 = vadd.f32 %v2913_v22, %v1312_v16  ;;  %v1161_v35 = vadd.f32 %v1160_v7, %v2908_v34 }
 0x319   : > { %v2451_v26 = vpop.eup %2450  ;;  %v1504_v29 = vrot.slane %v1488_v23, 7  ;;  %v1379_v30 = vadd.f32 %v2449_v3, %v1378_v24  ;;  %v2227_v52 = vmul.f32 -1.442695, %v2970_v28 }
 0x31a   : > { %v2453_v31 = vpop.eup %2452  ;;  %v2974_v39 = vadd.f32 1.0, %v2451_v26 }
 0x31b   : > { %v1505_v43 = vrot.slane %v1504_v29, 4  ;;  %1536 = vst.msk [vmem:[#allocation2] sm:$0xe] %vm835_vm1, %v1504_v29  ;;  %v1383_v45 = vsel %vm1382_vm3, %v2449_v3, %v1379_v30  ;;  %v1391_v40 = vmul.f32 %v2453_v31, %v2953_v58  ;;  %vm1396_vm5 = vweird.f32 %v2453_v31 }
 0x31c   : > { %v1388_v47 = vsel %vm1385_vm4, %v1387_v50, %v1383_v45  ;;  %2454 = vrcp.f32 %v2974_v39  ;;  %v1300_v18 = vpop.f32.mrf.mxu3  ;;  %vm1397_vm8 = vmor %vm1395_vm7, %vm1396_vm5  ;;  %v1414_v1 = vand.u32 2147483647, %v2974_v39  ;;  %v1416_v58 = vand.u32 2147483648, %v2974_v39 }
 0x31d   : > { %1537 = vst.msk [vmem:[#allocation2 + $0x4] sm:$0x1] %vm778_vm11, %v1505_v43  ;;  %v1481_v48 = vmul.f32 %v1388_v47, %v2923_v33  ;;  %v1392_v49 = vsub.f32 1.0, %v1391_v40  ;;  %2456 = vpow2.f32 %v2227_v52  ;;  %v1313_v51 = vadd.f32 %v1300_v18, %v1156_v46 }
 0x31e   : > { %vm1410_vm12 = vweird.f32 %v2974_v39  ;;  %vm3015_vm13 = vcmp.eq.f32.partialorder %v1414_v1, 8.507059e+37  ;;  %v1417_v19 = vor.u32 1.1754944e-38, %v1416_v58 }
 0x31f   : > { %v1489_v53 = vpack.c.bf16 %v1481_v48, %v1481_v48  ;;  %v1393_v54 = vmul.f32 %v2453_v31, %v1392_v49  ;;  %v2994_v56 = vadd.f32 %v2913_v22, %v1313_v51 }
 0x321   : > { %v1506_v37 = vrot.slane %v1489_v53, 7  ;;  %v1394_v33 = vadd.f32 %v2453_v31, %v1393_v54  ;;  %v2228_v10 = vmul.f32 -1.442695, %v2994_v56 }
 0x322   : > { %v2455_v57 = vpop.eup %2454  ;;  %v1859_v14 = vld [vmem:[#allocation2] sm:$0xe] }
 0x323   : > { %v2457_v25 = vpop.eup %2456  ;;  %v1507_v59 = vrot.slane %v1506_v37, 4  ;;  %1538 = vst.msk [vmem:[#allocation2 + $0x8] sm:$0xe] %vm835_vm1, %v1506_v37  ;;  %v1398_v61 = vsel %vm1397_vm8, %v2453_v31, %v1394_v33  ;;  %v1406_v62 = vmul.f32 %v2455_v57, %v2974_v39  ;;  %2458 = vpow2.f32 %v2228_v10  ;;  %v1552_v15 = vld [vmem:[#allocation2] sm:$0xf] }
 0x324   : > { %v1403_v63 = vsel %vm1400_vm10, %v1402_v44, %v1398_v61  ;;  %v3002_v3 = vadd.f32 1.0, %v2457_v25  ;;  %v1303_v2 = vpop.f32.mrf.mxu3  ;;  %vm1411_vm0 = vweird.f32 %v2455_v57  ;;  %v3011_v13 = vld [vmem:[#allocation2 + $0x4] sm:$0x1]  ;;  %v2261_v23 = vld [vmem:[#allocation2] sm:$0xf]  ;;  %v2295_v29 = vrot.slane %v1859_v14, 9 }
 0x325   : > { %1539 = vst.msk [vmem:[#allocation2 + $0xc] sm:$0x1] %vm778_vm11, %v1507_v59  ;;  %v1482_v0 = vmul.f32 %v1403_v63, %v2927_v32  ;;  %v1407_v4 = vsub.f32 1.0, %v1406_v62  ;;  %v1314_v5 = vadd.f32 %v1303_v2, %v1159_v27  ;;  %vm1412_vm14 = vmor %vm1410_vm12, %vm1411_vm0  ;;  %v1885_v30 = vrot.slane %v3011_v13, 5 }
 0x326   : > { %2460 = vrcp.f32 %v3002_v3  ;;  %v1577_v52 = vshrl.u32 %v1552_v15, 16  ;;  %v1580_v34 = vshll.u32 %v1552_v15, 16  ;;  %v1429_v45 = vand.u32 2147483647, %v3002_v3 }
 0x327   : > { %v1490_v9 = vpack.c.bf16 %v1482_v0, %v1482_v0  ;;  %v1408_v11 = vmul.f32 %v2455_v57, %v1407_v4  ;;  %v3009_v12 = vadd.f32 %v2913_v22, %v1314_v5  ;;  %v1431_v40 = vand.u32 2147483648, %v3002_v3 }
 0x328   : > { %vm1425_vm2 = vweird.f32 %v3002_v3  ;;  %v1886_v20 = vsel %vm2872_vm9, %v2295_v29, %v1885_v30  ;;  %v1579_v17 = vrot.slane %v1577_v52, 4  ;;  %v1582_v37 = vrot.slane %v1580_v34, 5 }
 0x329   : > { %v1508_v16 = vrot.slane %v1490_v9, 7  ;;  %v1409_v6 = vadd.f32 %v2455_v57, %v1408_v11  ;;  %v2229_v21 = vmul.f32 -1.442695, %v3009_v12  ;;  %v2459_v24 = vpop.eup %2458  ;;  %vm3039_vm4 = vcmp.eq.f32.partialorder %v1429_v45, 8.507059e+37 }
 0x32a   : > { %v2351_v26 = vld [vmem:[#allocation2 + $0x4] sm:$0xf0]  ;;  %v3022_v39 = vadd.f32 1.0, %v2459_v24  ;;  %v1432_v33 = vor.u32 1.1754944e-38, %v1431_v40  ;;  %v1583_v2 = vor.u32 %v1582_v37, %v1579_v17  ;;  %v1586_v5 = vshll.u32 %v3011_v13, 16 }
 0x32b   : > { %v1509_v31 = vrot.slane %v1508_v16, 4  ;;  %1540 = vst.msk [vmem:[#allocation2 + $0x10] sm:$0xe] %vm835_vm1, %v1508_v16  ;;  %v1413_v50 = vsel %vm1412_vm14, %v2455_v57, %v1409_v6  ;;  %2462 = vpow2.f32 %v2229_v21  ;;  %v1860_v36 = vld [vmem:[#allocation2 + $0x8] sm:$0xe]  ;;  %v2262_v47 = vor.u32 %v2351_v26, %v2261_v23 }
 0x32c   : > { %v2461_v41 = vpop.eup %2460  ;;  %v1418_v43 = vsel %vm3015_vm13, %v1417_v19, %v1413_v50  ;;  %v1305_v46 = vpop.f32.mrf.mxu3  ;;  %v3028_v18 = vld [vmem:[#allocation2 + $0xc] sm:$0x1]  ;;  %2464 = vrcp.f32 %v3022_v39  ;;  %v2296_v51 = vrot.slane %v1860_v36, 9  ;;  %v1444_v25 = vand.u32 2147483647, %v3022_v39 }
 0x32d   : > { %1541 = vst.msk [vmem:[#allocation2 + $0x14] sm:$0x1] %vm778_vm11, %v1509_v31  ;;  %v1483_v8 = vmul.f32 %v1418_v43, %v2946_v60  ;;  %v1421_v48 = vmul.f32 %v2461_v41, %v3002_v3  ;;  %v1315_v49 = vadd.f32 %v1305_v46, %v1161_v35  ;;  %2291 = vmatmul.msk.bf16.vlgmr.msra.gmra.mxu1 %vm1036_vm6, %v2262_v47  ;;  %v1889_v55 = vrot.slane %v3028_v18, 5  ;;  %v1553_v61 = vld [vmem:[#allocation2 + $0x8] sm:$0xf] }
 0x32e   : > { %vm1426_vm3 = vweird.f32 %v2461_v41  ;;  %v1446_v58 = vand.u32 2147483648, %v3022_v39  ;;  %v1924_v9 = vunpack.c.l.b16 %v1886_v20  ;;  %v1591_v11 = vshrl.u32 %v1553_v61, 16 }
 0x32f   : > { %v1491_v53 = vpack.c.bf16 %v1483_v8, %v1483_v8  ;;  %v1422_v54 = vsub.f32 1.0, %v1421_v48  ;;  %v3044_v57 = vadd.f32 %v2913_v22, %v1315_v49  ;;  %v1890_v59 = vsel %vm2872_vm9, %v2296_v51, %v1889_v55  ;;  %vm1427_vm5 = vmor %vm1425_vm2, %vm1426_vm3 }
 0x330   : > { %v1925_v1 = vunpack.c.l.b16 %v1890_v59  ;;  %vm1440_vm7 = vweird.f32 %v3022_v39  ;;  %vm3062_vm8 = vcmp.eq.f32.partialorder %v1444_v25, 8.507059e+37  ;;  %v1584_v32 = vrot.slane %v1583_v2, 4 }
 0x331   : > { %v2463_v27 = vpop.eup %2462  ;;  %v1510_v44 = vrot.slane %v1491_v53, 7  ;;  %v1423_v10 = vmul.f32 %v2461_v41, %v1422_v54  ;;  %v2230_v63 = vmul.f32 -1.442695, %v3044_v57  ;;  %v1447_v6 = vor.u32 1.1754944e-38, %v1446_v58 }
 0x332   : > { %v3049_v62 = vadd.f32 1.0, %v2463_v27  ;;  %v2465_v0 = vpop.eup %2464  ;;  %v1932_v35 = vpack.c.b16 %v1925_v1, %v1924_v9  ;;  %v1588_v21 = vrot.slane %v1586_v5, 5  ;;  %v1593_v26 = vrot.slane %v1591_v11, 4  ;;  %v1861_v30 = vld [vmem:[#allocation2 + $0x10] sm:$0xe] }
 0x333   : > { %v1511_v4 = vrot.slane %v1510_v44, 4  ;;  %1542 = vst.msk [vmem:[#allocation2 + $0x18] sm:$0xe] %vm835_vm1, %v1510_v44  ;;  %v1424_v22 = vadd.f32 %v2461_v41, %v1423_v10  ;;  %v1436_v7 = vmul.f32 %v2465_v0, %v3022_v39  ;;  %vm1441_vm10 = vweird.f32 %v2465_v0  ;;  %v1554_v31 = vld [vmem:[#allocation2 + $0x10] sm:$0xf] }
 0x334   : > { %2466 = vrcp.f32 %v3049_v62  ;;  %v1459_v19 = vand.u32 2147483647, %v3049_v62  ;;  %v3070_v23 = vld [vmem:[#allocation2 + $0x14] sm:$0x1]  ;;  %2327 = vmatmul.msk.bf16.vlgmr.msrb.gmra.mxu2 %vm1036_vm6, %v1932_v35  ;;  %v1594_v29 = vshll.u32 %v1553_v61, 16  ;;  %vm1455_vm0 = vweird.f32 %v3049_v62  ;;  %vm1442_vm12 = vmor %vm1440_vm7, %vm1441_vm10 }
 0x335   : > { %1543 = vst.msk [vmem:[#allocation2 + $0x1c] sm:$0x1] %vm778_vm11, %v1511_v4  ;;  %v1428_v14 = vsel %vm1427_vm5, %v2461_v41, %v1424_v22  ;;  %2468 = vpow2.f32 %v2230_v63  ;;  %v1437_v13 = vsub.f32 1.0, %v1436_v7  ;;  %v1461_v34 = vand.u32 2147483648, %v3049_v62  ;;  %v2265_v45 = vld [vmem:[#allocation2 + $0x10] sm:$0xf] }
 0x336   : > { %v1433_v3 = vsel %vm3039_vm4, %v1432_v33, %v1428_v14  ;;  %v1589_v41 = vsel %vm2785_vm15, %v1584_v32, %v1588_v21  ;;  %v1596_v43 = vrot.slane %v1594_v29, 5  ;;  %v1893_v46 = vrot.slane %v3070_v23, 5 }
 0x337   : > { %v1484_v16 = vmul.f32 %v1433_v3, %v2970_v28  ;;  %v1438_v24 = vmul.f32 %v2465_v0, %v1437_v13  ;;  %v1600_v28 = vshll.u32 %v3028_v18, 16  ;;  %vm3083_vm13 = vcmp.eq.f32.partialorder %v1459_v19, 8.507059e+37 }
 0x338   : > { %v2297_v20 = vrot.slane %v1861_v30, 9  ;;  %v1597_v53 = vor.u32 %v1596_v43, %v1593_v26  ;;  %v1605_v37 = vshrl.u32 %v1554_v31, 16  ;;  %v1462_v2 = vor.u32 1.1754944e-38, %v1461_v34 }
 0x339   : > { %v1492_v52 = vpack.c.bf16 %v1484_v16, %v1484_v16  ;;  %v1439_v36 = vadd.f32 %v2465_v0, %v1438_v24  ;;  %v1602_v27 = vrot.slane %v1600_v28, 5  ;;  %v1608_v15 = vshll.u32 %v1554_v31, 16 }
 0x33a   : > { %v2467_v50 = vpop.eup %2466  ;;  %v2352_v40 = vld [vmem:[#allocation2 + $0x14] sm:$0xf0]  ;;  %v1894_v10 = vsel %vm2872_vm9, %v2297_v20, %v1893_v46  ;;  %v1598_v59 = vrot.slane %v1597_v53, 4  ;;  %v1607_v13 = vrot.slane %v1605_v37, 4  ;;  %v1614_v30 = vshll.u32 %v3070_v23, 16 }
 0x33b   : > { %v2469_v47 = vpop.eup %2468  ;;  %v1512_v8 = vrot.slane %v1492_v52, 7  ;;  %v1451_v48 = vmul.f32 %v2467_v50, %v3049_v62  ;;  %v2266_v49 = vor.u32 %v2352_v40, %v2265_v45  ;;  %v1443_v51 = vsel %vm1442_vm12, %v2465_v0, %v1439_v36  ;;  %v1862_v55 = vld [vmem:[#allocation2 + $0x18] sm:$0xe] }
 0x33c   : > { %v3087_v17 = vadd.f32 1.0, %v2469_v47  ;;  %v3089_v54 = vld [vmem:[#allocation2 + $0x1c] sm:$0x1]  ;;  %v1448_v39 = vsel %vm3062_vm8, %v1447_v6, %v1443_v51  ;;  %vm1456_vm14 = vweird.f32 %v2467_v50  ;;  %v2298_v61 = vrot.slane %v1862_v55, 9  ;;  %v1555_v4 = vld [vmem:[#allocation2 + $0x18] sm:$0xf] }
 0x33d   : > { %v1513_v60 = vrot.slane %v1512_v8, 4  ;;  %1544 = vst.msk [vmem:[#allocation2 + $0x20] sm:$0xe] %vm835_vm1, %v1512_v8  ;;  %v1452_v33 = vsub.f32 1.0, %v1451_v48  ;;  %v1485_v44 = vmul.f32 %v1448_v39, %v2994_v56  ;;  %2292 = vmatmul.msk.bf16.gmra.mxu1 %vm1036_vm6, %v2266_v49  ;;  %v1897_v63 = vrot.slane %v3089_v54, 5  ;;  %vm1457_vm2 = vmor %vm1455_vm0, %vm1456_vm14 }
 0x33e   : > { %2470 = vrcp.f32 %v3087_v17  ;;  %v1474_v0 = vand.u32 2147483647, %v3087_v17  ;;  %v1697_v56 = vunpack.c.l.b16 %v1589_v41  ;;  %v1603_v58 = vsel %vm2785_vm15, %v1598_v59, %v1602_v27 }
 0x33f   : > { %1545 = vst.msk [vmem:[#allocation2 + $0x24] sm:$0x1] %vm778_vm11, %v1513_v60  ;;  %v1453_v25 = vmul.f32 %v2467_v50, %v1452_v33  ;;  %v1493_v1 = vpack.c.bf16 %v1485_v44, %v1485_v44  ;;  %v1898_v5 = vsel %vm2872_vm9, %v2298_v61, %v1897_v63  ;;  %v1926_v7 = vunpack.c.l.b16 %v1894_v10 }
 0x340   : > { %v1698_v11 = vunpack.c.l.b16 %v1603_v58  ;;  %v1927_v14 = vunpack.c.l.b16 %v1898_v5  ;;  %v1619_v35 = vshrl.u32 %v1555_v4, 16  ;;  %v1622_v32 = vshll.u32 %v1555_v4, 16 }
 0x341   : > { %v1454_v22 = vadd.f32 %v2467_v50, %v1453_v25  ;;  %v1514_v9 = vrot.slane %v1493_v1, 7  ;;  %v1610_v29 = vrot.slane %v1608_v15, 5  ;;  %v1628_v28 = vshll.u32 %v3089_v54, 16 }
 0x342   : > { %v1705_v21 = vpack.c.b16 %v1698_v11, %v1697_v56  ;;  %v1933_v24 = vpack.c.b16 %v1927_v14, %v1926_v7  ;;  %v1621_v52 = vrot.slane %v1619_v35, 4  ;;  %v1624_v34 = vrot.slane %v1622_v32, 5 }
 0x343   : > { %v1458_v3 = vsel %vm1457_vm2, %v2467_v50, %v1454_v22  ;;  %v1515_v6 = vrot.slane %v1514_v9, 4  ;;  %1546 = vst.msk [vmem:[#allocation2 + $0x28] sm:$0xe] %vm835_vm1, %v1514_v9  ;;  %v1611_v36 = vor.u32 %v1610_v29, %v1607_v13  ;;  %vm3120_vm3 = vcmp.eq.f32.partialorder %v1474_v0, 8.507059e+37 }
 0x344   : > { %v2471_v16 = vpop.eup %2470  ;;  %v1463_v19 = vsel %vm3083_vm13, %v1462_v2, %v1458_v3  ;;  %2255 = vmatmul.msk.bf16.vlgmr.msrb.gmra.mxu0 %vm1036_vm6, %v1705_v21  ;;  %v1476_v43 = vand.u32 2147483648, %v3087_v17  ;;  %2328 = vmatmul.msk.bf16.gmra.mxu2 %vm1036_vm6, %v1933_v24  ;;  %v1625_v45 = vor.u32 %v1624_v34, %v1621_v52  ;;  %v1556_v40 = vld [vmem:[#allocation2 + $0x20] sm:$0xf]  ;;  %v1616_v48 = vrot.slane %v1614_v30, 5 }
 0x345   : > { %v1486_v26 = vmul.f32 %v1463_v19, %v3009_v12  ;;  %v1466_v62 = vmul.f32 %v2471_v16, %v3087_v17  ;;  %1547 = vst.msk [vmem:[#allocation2 + $0x2c] sm:$0x1] %vm778_vm11, %v1515_v6  ;;  %vm1471_vm4 = vweird.f32 %v2471_v16  ;;  %v1612_v47 = vrot.slane %v1611_v36, 4  ;;  %v2269_v8 = vld [vmem:[#allocation2 + $0x20] sm:$0xf] }
 0x346   : > { %v3118_v41 = vld [vmem:[#allocation2 + $0x24] sm:$0x1]  ;;  %v1626_v18 = vrot.slane %v1625_v45, 4  ;;  %v1630_v49 = vrot.slane %v1628_v28, 5  ;;  %v1863_v20 = vld [vmem:[#allocation2 + $0x20] sm:$0xe]  ;;  %vm1470_vm5 = vweird.f32 %v3087_v17 }
 0x347   : > { %v1494_v31 = vpack.c.bf16 %v1486_v26, %v1486_v26  ;;  %v1467_v50 = vsub.f32 1.0, %v1466_v62  ;;  %v1901_v51 = vrot.slane %v3118_v41, 5  ;;  %v1633_v37 = vshrl.u32 %v1556_v40, 16  ;;  %vm1472_vm7 = vmor %vm1470_vm5, %vm1471_vm4 }
 0x348   : > { %v1477_v60 = vor.u32 1.1754944e-38, %v1476_v43  ;;  %v1631_v39 = vsel %vm2785_vm15, %v1626_v18, %v1630_v49  ;;  %v1636_v10 = vshll.u32 %v1556_v40, 16  ;;  %v1617_v59 = vsel %vm2785_vm15, %v1612_v47, %v1616_v48 }
 0x349   : > { %v1516_v23 = vrot.slane %v1494_v31, 7  ;;  %v1468_v46 = vmul.f32 %v2471_v16, %v1467_v50  ;;  %v1700_v61 = vunpack.c.l.b16 %v1631_v39  ;;  %v2299_v17 = vrot.slane %v1863_v20, 9 }
 0x34a   : > { %v2353_v55 = vld [vmem:[#allocation2 + $0x24] sm:$0xf0]  ;;  %v1635_v58 = vrot.slane %v1633_v37, 4  ;;  %v1699_v7 = vunpack.c.l.b16 %v1617_v59  ;;  %v1638_v11 = vrot.slane %v1636_v10, 5  ;;  %v1642_v26 = vshll.u32 %v3118_v41, 16 }
 0x34b   : > { %v1517_v53 = vrot.slane %v1516_v23, 4  ;;  %1548 = vst.msk [vmem:[#allocation2 + $0x30] sm:$0xe] %vm835_vm1, %v1516_v23  ;;  %v1469_v54 = vadd.f32 %v2471_v16, %v1468_v46  ;;  %v2270_v33 = vor.u32 %v2353_v55, %v2269_v8  ;;  %v1864_v27 = vld [vmem:[#allocation2 + $0x28] sm:$0xe]  ;;  %v1902_v22 = vsel %vm2872_vm9, %v2299_v17, %v1901_v51 }
 0x34c   : > { %v1557_v44 = vld [vmem:[#allocation2 + $0x28] sm:$0xf]  ;;  %v1573_v63 = vld [vmem:[#allocation2 + $0x2c] sm:$0x1]  ;;  %v2300_v2 = vrot.slane %v1864_v27, 9  ;;  %v1706_v35 = vpack.c.b16 %v1700_v61, %v1699_v7  ;;  %v1928_v32 = vunpack.c.l.b16 %v1902_v22  ;;  %v1644_v31 = vrot.slane %v1642_v26, 5 }
 0x34d   : > { %1549 = vst.msk [vmem:[#allocation2 + $0x34] sm:$0x1] %vm778_vm11, %v1517_v53  ;;  %v1473_v25 = vsel %vm1472_vm7, %v2471_v16, %v1469_v54  ;;  %2293 = vmatmul.msk.bf16.gmra.mxu1 %vm1036_vm6, %v2270_v33  ;;  %v1905_v0 = vrot.slane %v1573_v63, 5  ;;  %v1647_v56 = vshrl.u32 %v1557_v44, 16  ;;  %v1650_v5 = vshll.u32 %v1557_v44, 16 }
 0x34e   : > { %v1478_v1 = vsel %vm3120_vm3, %v1477_v60, %v1473_v25  ;;  %v1656_v24 = vshll.u32 %v1573_v63, 16 }
 0x34f   : > { %v1487_v4 = vmul.f32 %v1478_v1, %v3044_v57  ;;  %v1906_v9 = vsel %vm2872_vm9, %v2300_v2, %v1905_v0  ;;  %v1649_v14 = vrot.slane %v1647_v56, 4  ;;  %v1652_v13 = vrot.slane %v1650_v5, 5 }
 0x350   : > { %v1929_v3 = vunpack.c.l.b16 %v1906_v9  ;;  %v1639_v57 = vor.u32 %v1638_v11, %v1635_v58  ;;  %v1658_v28 = vrot.slane %v1656_v24, 5 }
 0x351   : > { %v1495_v15 = vpack.c.bf16 %v1487_v4, %v1487_v4  ;;  %v1653_v6 = vor.u32 %v1652_v13, %v1649_v14 }
 0x352   : > { %v1934_v19 = vpack.c.b16 %v1929_v3, %v1928_v32  ;;  %v1640_v30 = vrot.slane %v1639_v57, 4  ;;  %v1865_v52 = vld [vmem:[#allocation2 + $0x30] sm:$0xe] }
 0x353   : > { %v1518_v16 = vrot.slane %v1495_v15, 7  ;;  %v1654_v62 = vrot.slane %v1653_v6, 4  ;;  %v1558_v34 = vld [vmem:[#allocation2 + $0x30] sm:$0xf]  ;;  %v2301_v43 = vrot.slane %v1865_v52, 9 }
 0x354   : > { %2256 = vmatmul.msk.bf16.gmra.mxu0 %vm1036_vm6, %v1706_v35  ;;  %v1574_v29 = vld [vmem:[#allocation2 + $0x34] sm:$0x1]  ;;  %2329 = vmatmul.msk.bf16.gmra.mxu2 %vm1036_vm6, %v1934_v19  ;;  %v2273_v12 = vld [vmem:[#allocation2 + $0x30] sm:$0xf]  ;;  %v1661_v45 = vshrl.u32 %v1558_v34, 16  ;;  %v1645_v41 = vsel %vm2785_vm15, %v1640_v30, %v1644_v31  ;;  %v1664_v8 = vshll.u32 %v1558_v34, 16 }
 0x355   : > { %v1519_v21 = vrot.slane %v1518_v16, 4  ;;  %1550 = vst.msk [vmem:[#allocation2 + $0x38] sm:$0xe] %vm835_vm1, %v1518_v16  ;;  %v1909_v50 = vrot.slane %v1574_v29, 5  ;;  %v1659_v36 = vsel %vm2785_vm15, %v1654_v62, %v1658_v28  ;;  %v1701_v60 = vunpack.c.l.b16 %v1645_v41  ;;  %v2389_v35 = vld [vmem:[%s3199_s8] ss:$0 sm:$0xff] }
 0x356   : > { %v1702_v49 = vunpack.c.l.b16 %v1659_v36  ;;  %v1663_v33 = vrot.slane %v1661_v45, 4  ;;  %v1666_v27 = vrot.slane %v1664_v8, 5  ;;  %v1670_v1 = vshll.u32 %v1574_v29, 16 }
 0x357   : > { %1551 = vst.msk [vmem:[#allocation2 + $0x3c] sm:$0x1] %vm778_vm11, %v1519_v21  ;;  %v1910_v51 = vsel %vm2872_vm9, %v2301_v43, %v1909_v50  ;;  %vm2029_vm11 = vcmask 519168  }
 0x358   : > { %v1707_v44 = vpack.c.b16 %v1702_v49, %v1701_v60  ;;  %v1930_v10 = vunpack.c.l.b16 %v1910_v51  ;;  %v1667_v63 = vor.u32 %v1666_v27, %v1663_v33  ;;  %v1672_v38 = vrot.slane %v1670_v1, 5 }
 0x35a   : > { %v1668_v0 = vrot.slane %v1667_v63, 4 }
 0x35c   : > { %v2354_v40 = vld [vmem:[#allocation2 + $0x34] sm:$0xf0]  ;;  %v1673_v22 = vsel %vm2785_vm15, %v1668_v0, %v1672_v38 }
 0x35d   : > { %v1866_v23 = vld [vmem:[#allocation2 + $0x38] sm:$0xe]  ;;  %v2274_v47 = vor.u32 %v2354_v40, %v2273_v12  ;;  %v1703_v5 = vunpack.c.l.b16 %v1673_v22 }
 0x35e   : > { %v1559_v46 = vld [vmem:[#allocation2 + $0x38] sm:$0xf]  ;;  %v1575_v20 = vld [vmem:[#allocation2 + $0x3c] sm:$0x1]  ;;  %v2302_v53 = vrot.slane %v1866_v23, 9 }
 0x35f   : > { %v1675_v48 = vshrl.u32 %v1559_v46, 16  ;;  %v1678_v18 = vshll.u32 %v1559_v46, 16  ;;  %2294 = vmatmul.msk.bf16.gmra.mxu1 %vm1036_vm6, %v2274_v47  ;;  %v1913_v54 = vrot.slane %v1575_v20, 5  ;;  %v1684_v17 = vshll.u32 %v1575_v20, 16 }
 0x361   : > { %v1677_v55 = vrot.slane %v1675_v48, 4  ;;  %v1680_v37 = vrot.slane %v1678_v18, 5  ;;  %v1914_v39 = vsel %vm2872_vm9, %v2302_v53, %v1913_v54  ;;  %v1686_v56 = vrot.slane %v1684_v17, 5 }
 0x362   : > { %v1931_v25 = vunpack.c.l.b16 %v1914_v39 }
 0x363   : > { %v1681_v59 = vor.u32 %v1680_v37, %v1677_v55 }
 0x364   : > { %v1935_v61 = vpack.c.b16 %v1931_v25, %v1930_v10  ;;  %2257 = vmatmul.msk.bf16.gmra.mxu0 %vm1036_vm6, %v1707_v44 }
 0x365   : > { %v1682_v2 = vrot.slane %v1681_v59, 4 }
 0x366   : > { %2330 = vmatmul.msk.bf16.gmra.mxu2 %vm1036_vm6, %v1935_v61 }
 0x367   : > { %v1687_v4 = vsel %vm2785_vm15, %v1682_v2, %v1686_v56 }
 0x368   : > { %v1704_v58 = vunpack.c.l.b16 %v1687_v4 }
 0x36a   : > { %v1708_v7 = vpack.c.b16 %v1704_v58, %v1703_v5 }
 0x374   : > { %2258 = vmatmul.msk.bf16.gmra.mxu0 %vm1036_vm6, %v1708_v7 }
 0x3aa   : > { %v1839_v9 = vpop.f32.mrf.mxu1 }
 0x3b2   : > { %v1841_v14 = vpop.f32.mrf.mxu1 }
 0x3b7   : > { %v1981_v11 = vpop.f32.mrf.mxu2 }
 0x3ba   : > { %v1844_v42 = vpop.f32.mrf.mxu1 }
 0x3bf   : > { %v1983_v3 = vpop.f32.mrf.mxu2 }
 0x3c1   : > { %v1754_v15 = vpop.f32.mrf.mxu0 }
 0x3c2   : > { %v1840_v13 = vadd.f32 %v1839_v9, %v1754_v15  ;;  %v1846_v29 = vpop.f32.mrf.mxu1 }
 0x3c4   : > { %v2001_v32 = vadd.f32 %v1981_v11, %v1840_v13 }
 0x3c6   : > { %v2013_v16 = vadd.f32 %v2389_v35, %v2001_v32 }
 0x3c7   : > { %v1986_v57 = vpop.f32.mrf.mxu2 }
 0x3c8   : > { %v2021_v6 = vpack.c.bf16 %v2013_v16, %v2013_v16 }
 0x3c9   : > { %v1756_v19 = vpop.f32.mrf.mxu0 }
 0x3ca   : > { %2030 = vst.msk [vmem:[%s3170_s24] sm:$0xf] %vm2029_vm11, %v2021_v6  ;;  %v1842_v21 = vadd.f32 %v1841_v14, %v1756_v19  ;;  %v1849_v12 = vpop.f32.mrf.mxu1 }
 0x3cc   : > { %v2002_v24 = vadd.f32 %v1983_v3, %v1842_v21 }
 0x3ce   : > { %v2014_v26 = vadd.f32 %v2389_v35, %v2002_v24 }
 0x3cf   : > { %v1988_v52 = vpop.f32.mrf.mxu2 }
 0x3d0   : > { %v2022_v62 = vpack.c.bf16 %v2014_v26, %v2014_v26 }
 0x3d1   : > { %v1759_v30 = vpop.f32.mrf.mxu0 }
 0x3d2   : > { %2031 = vst.msk [vmem:[%s3170_s24 + $0x4] sm:$0xf] %vm2029_vm11, %v2022_v62  ;;  %v1845_v34 = vadd.f32 %v1844_v42, %v1759_v30  ;;  %v1851_v8 = vpop.f32.mrf.mxu1 }
 0x3d4   : > { %v2003_v28 = vadd.f32 %v1986_v57, %v1845_v34 }
 0x3d6   : > { %v2015_v31 = vadd.f32 %v2389_v35, %v2003_v28 }
 0x3d7   : > { %v1991_v45 = vpop.f32.mrf.mxu2 }
 0x3d8   : > { %v2023_v50 = vpack.c.bf16 %v2015_v31, %v2015_v31 }
 0x3d9   : > { %v1761_v36 = vpop.f32.mrf.mxu0 }
 0x3da   : > { %2032 = vst.msk [vmem:[%s3170_s24 + $0x8] sm:$0xf] %vm2029_vm11, %v2023_v50  ;;  %v1847_v43 = vadd.f32 %v1846_v29, %v1761_v36 }
 0x3dc   : > { %v2004_v41 = vadd.f32 %v1988_v52, %v1847_v43  ;;  %v1854_v55 = vpop.f32.mrf.mxu1 }
 0x3de   : > { %v2016_v40 = vadd.f32 %v2389_v35, %v2004_v41 }
 0x3df   : > { %v1993_v18 = vpop.f32.mrf.mxu2 }
 0x3e0   : > { %v2024_v23 = vpack.c.bf16 %v2016_v40, %v2016_v40 }
 0x3e1   : > { %v1764_v46 = vpop.f32.mrf.mxu0 }
 0x3e2   : > { %2033 = vst.msk [vmem:[%s3170_s24 + $0xc] sm:$0xf] %vm2029_vm11, %v2024_v23  ;;  %v1850_v47 = vadd.f32 %v1849_v12, %v1764_v46 }
 0x3e4   : > { %v2005_v48 = vadd.f32 %v1991_v45, %v1850_v47  ;;  %v1856_v25 = vpop.f32.mrf.mxu1 }
 0x3e6   : > { %v2017_v49 = vadd.f32 %v2389_v35, %v2005_v48 }
 0x3e8   : > { %v2025_v20 = vpack.c.bf16 %v2017_v49, %v2017_v49 }
 0x3e9   : > { %v1766_v51 = vpop.f32.mrf.mxu0  ;;  %v1996_v60 = vpop.f32.mrf.mxu2 }
 0x3ea   : > { %2034 = vst.msk [vmem:[%s3170_s24 + $0x10] sm:$0xf] %vm2029_vm11, %v2025_v20  ;;  %v1852_v53 = vadd.f32 %v1851_v8, %v1766_v51 }
 0x3ec   : > { %v2006_v54 = vadd.f32 %v1993_v18, %v1852_v53 }
 0x3ee   : > { %v2018_v37 = vadd.f32 %v2389_v35, %v2006_v54 }
 0x3f0   : > { %v2026_v39 = vpack.c.bf16 %v2018_v37, %v2018_v37 }
 0x3f1   : > { %v1769_v33 = vpop.f32.mrf.mxu0  ;;  %v1998_v63 = vpop.f32.mrf.mxu2 }
 0x3f2   : > { %2035 = vst.msk [vmem:[%s3170_s24 + $0x14] sm:$0xf] %vm2029_vm11, %v2026_v39  ;;  %v1855_v27 = vadd.f32 %v1854_v55, %v1769_v33 }
 0x3f4   : > { %v2007_v44 = vadd.f32 %v1996_v60, %v1855_v27 }
 0x3f6   : > { %v2019_v10 = vadd.f32 %v2389_v35, %v2007_v44 }
 0x3f8   : > { %v2027_v59 = vpack.c.bf16 %v2019_v10, %v2019_v10 }
 0x3f9   : > { %v1771_v61 = vpop.f32.mrf.mxu0 }
 0x3fa   : > { %2036 = vst.msk [vmem:[%s3170_s24 + $0x18] sm:$0xf] %vm2029_vm11, %v2027_v59  ;;  %v1857_v17 = vadd.f32 %v1856_v25, %v1771_v61 }
 0x3fc   : > { %v2008_v1 = vadd.f32 %v1998_v63, %v1857_v17 }
 0x3fe   : > { %v2020_v2 = vadd.f32 %v2389_v35, %v2008_v1 }
 0x400   : > { %v2028_v0 = vpack.c.bf16 %v2020_v2, %v2020_v2 }
 0x402   : > { %2037 = vst.msk [vmem:[%s3170_s24 + $0x1c] sm:$0xf] %vm2029_vm11, %v2028_v0 }
 0x403 PF: > { %s19_s30 = sadd.s32 1, %s2478_s30  }
 0x404   : > { %p16_p4 = scmp.ge.s32.totalorder %s19_s30, 6  }
 0x406   :  { %18 = sbr.rel (!%p16_p4) target bundleno = 1 (0x1), region = 90 }

// kernel: _lambda_.39
= control target key start
LH: loop header
LB: loop body
LE: loop exit
PB: predicated region body
PF: predicated region fallthrough
CT: control target
= control target key end

     0   :  { %vm83_vm0 = vcmask 261120   ;;  %vm221_vm1 = vcmask 15360   ;;  %s594_s1 = inlined_call_operand.vmem [shape: bf16[32,2], index: 1, kind: input, shape index: {}]   ;;  %s595_s0 = inlined_call_operand.vmem [shape: f32[256,32], index: 0, kind: input, shape index: {}]   ;;  %s596_s2 = inlined_call_operand.vmem [shape: f32[1,2], index: 2, kind: input, shape index: {}]   ;;  %s597_s3 = inlined_call_operand.vmem [shape: f32[256,2], index: 3, kind: output, shape index: {}]  }
   0x1   :  { %v283_v0 = vld [vmem:[%s594_s1 + $0x8] sm:$0xff]  ;;  %v282_v1 = vld [vmem:[%s594_s1] sm:$0xff]  ;;  %v17_v14 = vld [vmem:[%s595_s0 + $0x10] sm:$0xff] }
   0x2   :  { %v15_v2 = vld [vmem:[%s595_s0] sm:$0xff]  ;;  %v16_v3 = vld [vmem:[%s595_s0 + $0x8] sm:$0xff]  ;;  %138 = vmatpush.bf16.msra.mxu0 %v283_v0  ;;  %284 = vmatpush.bf16.msra.mxu1 %v283_v0  ;;  %v18_v15 = vld [vmem:[%s595_s0 + $0x18] sm:$0xff] }
   0x3   :  { %v23_v4 = vld [vmem:[%s595_s0 + $0x40] sm:$0xff]  ;;  %v24_v5 = vld [vmem:[%s595_s0 + $0x48] sm:$0xff]  ;;  %285 = vmatpush.bf16.msra.mxu2 %v283_v0  ;;  %286 = vmatpush.bf16.msra.mxu3 %v283_v0  ;;  %v47_v10 = vpack.c.bf16 %v16_v3, %v15_v2  ;;  %v25_v16 = vld [vmem:[%s595_s0 + $0x50] sm:$0xff]  ;;  %v48_v22 = vpack.c.bf16 %v18_v15, %v17_v14 }
   0x4   :  { %v31_v6 = vld [vmem:[%s595_s0 + $0x80] sm:$0xff]  ;;  %v32_v7 = vld [vmem:[%s595_s0 + $0x88] sm:$0xff]  ;;  %v51_v11 = vpack.c.bf16 %v24_v5, %v23_v4  ;;  %v26_v17 = vld [vmem:[%s595_s0 + $0x58] sm:$0xff] }
   0x5   :  { %v39_v8 = vld [vmem:[%s595_s0 + $0xc0] sm:$0xff]  ;;  %v40_v9 = vld [vmem:[%s595_s0 + $0xc8] sm:$0xff]  ;;  %v55_v12 = vpack.c.bf16 %v32_v7, %v31_v6  ;;  %v33_v18 = vld [vmem:[%s595_s0 + $0x90] sm:$0xff]  ;;  %v52_v23 = vpack.c.bf16 %v26_v17, %v25_v16 }
   0x6   :  { %139 = vmatpush.bf16.msra.mxu0 %v282_v1  ;;  %287 = vmatpush.bf16.msra.mxu1 %v282_v1  ;;  %v59_v13 = vpack.c.bf16 %v40_v9, %v39_v8  ;;  %v34_v19 = vld [vmem:[%s595_s0 + $0x98] sm:$0xff]  ;;  %v41_v20 = vld [vmem:[%s595_s0 + $0xd0] sm:$0xff]  ;;  %v19_v26 = vld [vmem:[%s595_s0 + $0x20] sm:$0xff] }
   0x7   :  { %288 = vmatpush.bf16.msra.mxu2 %v282_v1  ;;  %289 = vmatpush.bf16.msra.mxu3 %v282_v1  ;;  %v42_v21 = vld [vmem:[%s595_s0 + $0xd8] sm:$0xff]  ;;  %v56_v24 = vpack.c.bf16 %v34_v19, %v33_v18  ;;  %v20_v27 = vld [vmem:[%s595_s0 + $0x28] sm:$0xff]  ;;  %v27_v28 = vld [vmem:[%s595_s0 + $0x60] sm:$0xff] }
   0x8   :  { %v60_v25 = vpack.c.bf16 %v42_v21, %v41_v20  ;;  %v28_v29 = vld [vmem:[%s595_s0 + $0x68] sm:$0xff]  ;;  %v35_v30 = vld [vmem:[%s595_s0 + $0xa0] sm:$0xff]  ;;  %v49_v34 = vpack.c.bf16 %v20_v27, %v19_v26  ;;  %v21_v38 = vld [vmem:[%s595_s0 + $0x30] sm:$0xff] }
   0x9   :  { %266 = vmatmul.msk.bf16.vlgmr.msra.gmra.mxu0 %vm83_vm0, %v47_v10  ;;  %270 = vmatmul.msk.bf16.vlgmr.msra.gmra.mxu1 %vm83_vm0, %v51_v11  ;;  %v36_v31 = vld [vmem:[%s595_s0 + $0xa8] sm:$0xff]  ;;  %v43_v32 = vld [vmem:[%s595_s0 + $0xe0] sm:$0xff]  ;;  %v53_v35 = vpack.c.bf16 %v28_v29, %v27_v28  ;;  %v22_v39 = vld [vmem:[%s595_s0 + $0x38] sm:$0xff] }
   0xa   :  { %274 = vmatmul.msk.bf16.vlgmr.msra.gmra.mxu2 %vm83_vm0, %v55_v12  ;;  %278 = vmatmul.msk.bf16.vlgmr.msra.gmra.mxu3 %vm83_vm0, %v59_v13  ;;  %v44_v33 = vld [vmem:[%s595_s0 + $0xe8] sm:$0xff]  ;;  %v57_v36 = vpack.c.bf16 %v36_v31, %v35_v30  ;;  %v29_v40 = vld [vmem:[%s595_s0 + $0x70] sm:$0xff]  ;;  %v30_v41 = vld [vmem:[%s595_s0 + $0x78] sm:$0xff]  ;;  %v50_v46 = vpack.c.bf16 %v22_v39, %v21_v38 }
   0xb   :  { %v61_v37 = vpack.c.bf16 %v44_v33, %v43_v32  ;;  %v37_v42 = vld [vmem:[%s595_s0 + $0xb0] sm:$0xff]  ;;  %v38_v43 = vld [vmem:[%s595_s0 + $0xb8] sm:$0xff]  ;;  %v54_v47 = vpack.c.bf16 %v30_v41, %v29_v40  ;;  %v432_v50 = vld [vmem:[%s596_s2] ss:$0 sm:$0xff] }
   0xc   :  { %v45_v44 = vld [vmem:[%s595_s0 + $0xf0] sm:$0xff]  ;;  %v46_v45 = vld [vmem:[%s595_s0 + $0xf8] sm:$0xff]  ;;  %v58_v48 = vpack.c.bf16 %v38_v43, %v37_v42 }
   0xd   :  { %v62_v49 = vpack.c.bf16 %v46_v45, %v45_v44 }
  0x19   :  { %267 = vmatmul.msk.bf16.gmra.mxu0 %vm83_vm0, %v48_v22  ;;  %271 = vmatmul.msk.bf16.gmra.mxu1 %vm83_vm0, %v52_v23 }
  0x1a   :  { %275 = vmatmul.msk.bf16.gmra.mxu2 %vm83_vm0, %v56_v24  ;;  %279 = vmatmul.msk.bf16.gmra.mxu3 %vm83_vm0, %v60_v25 }
  0x29   :  { %268 = vmatmul.msk.bf16.gmra.mxu0 %vm83_vm0, %v49_v34  ;;  %272 = vmatmul.msk.bf16.gmra.mxu1 %vm83_vm0, %v53_v35 }
  0x2a   :  { %276 = vmatmul.msk.bf16.gmra.mxu2 %vm83_vm0, %v57_v36  ;;  %280 = vmatmul.msk.bf16.gmra.mxu3 %vm83_vm0, %v61_v37 }
  0x39   :  { %269 = vmatmul.msk.bf16.gmra.mxu0 %vm83_vm0, %v50_v46  ;;  %273 = vmatmul.msk.bf16.gmra.mxu1 %vm83_vm0, %v54_v47 }
  0x3a   :  { %277 = vmatmul.msk.bf16.gmra.mxu2 %vm83_vm0, %v58_v48  ;;  %281 = vmatmul.msk.bf16.gmra.mxu3 %vm83_vm0, %v62_v49 }
  0x86   :  { %v141_v51 = vpop.f32.mrf.mxu0  ;;  %v161_v52 = vpop.f32.mrf.mxu1 }
  0x87   :  { %v142_v53 = vadd.f32 %v432_v50, %v141_v51  ;;  %v162_v54 = vadd.f32 %v432_v50, %v161_v52 }
  0x89   :  { %222 = vst.msk [vmem:[%s597_s3] sm:$0xff] %vm221_vm1, %v142_v53 }
  0x8a   :  { %230 = vst.msk [vmem:[%s597_s3 + $0x40] sm:$0xff] %vm221_vm1, %v162_v54 }
  0x8d   :  { %v181_v55 = vpop.f32.mrf.mxu2  ;;  %v201_v56 = vpop.f32.mrf.mxu3 }
  0x8e   :  { %v182_v57 = vadd.f32 %v432_v50, %v181_v55  ;;  %v202_v58 = vadd.f32 %v432_v50, %v201_v56  ;;  %v143_v59 = vpop.f32.mrf.mxu0  ;;  %v163_v60 = vpop.f32.mrf.mxu1 }
  0x8f   :  { %v144_v61 = vadd.f32 %v432_v50, %v143_v59  ;;  %v164_v62 = vadd.f32 %v432_v50, %v163_v60 }
  0x90   :  { %238 = vst.msk [vmem:[%s597_s3 + $0x80] sm:$0xff] %vm221_vm1, %v182_v57 }
  0x91   :  { %246 = vst.msk [vmem:[%s597_s3 + $0xc0] sm:$0xff] %vm221_vm1, %v202_v58 }
  0x92   :  { %223 = vst.msk [vmem:[%s597_s3 + $0x8] sm:$0xff] %vm221_vm1, %v144_v61 }
  0x93   :  { %231 = vst.msk [vmem:[%s597_s3 + $0x48] sm:$0xff] %vm221_vm1, %v164_v62 }
  0x95   :  { %v183_v63 = vpop.f32.mrf.mxu2  ;;  %v203_v0 = vpop.f32.mrf.mxu3 }
  0x96   :  { %v184_v1 = vadd.f32 %v432_v50, %v183_v63  ;;  %v204_v2 = vadd.f32 %v432_v50, %v203_v0  ;;  %v146_v3 = vpop.f32.mrf.mxu0  ;;  %v166_v4 = vpop.f32.mrf.mxu1 }
  0x97   :  { %v147_v5 = vadd.f32 %v432_v50, %v146_v3  ;;  %v167_v6 = vadd.f32 %v432_v50, %v166_v4 }
  0x98   :  { %239 = vst.msk [vmem:[%s597_s3 + $0x88] sm:$0xff] %vm221_vm1, %v184_v1 }
  0x99   :  { %247 = vst.msk [vmem:[%s597_s3 + $0xc8] sm:$0xff] %vm221_vm1, %v204_v2 }
  0x9a   :  { %224 = vst.msk [vmem:[%s597_s3 + $0x10] sm:$0xff] %vm221_vm1, %v147_v5 }
  0x9b   :  { %232 = vst.msk [vmem:[%s597_s3 + $0x50] sm:$0xff] %vm221_vm1, %v167_v6 }
  0x9d   :  { %v186_v7 = vpop.f32.mrf.mxu2  ;;  %v206_v8 = vpop.f32.mrf.mxu3 }
  0x9e   :  { %v187_v9 = vadd.f32 %v432_v50, %v186_v7  ;;  %v207_v10 = vadd.f32 %v432_v50, %v206_v8  ;;  %v148_v11 = vpop.f32.mrf.mxu0  ;;  %v168_v12 = vpop.f32.mrf.mxu1 }
  0x9f   :  { %v149_v13 = vadd.f32 %v432_v50, %v148_v11  ;;  %v169_v14 = vadd.f32 %v432_v50, %v168_v12 }
  0xa0   :  { %240 = vst.msk [vmem:[%s597_s3 + $0x90] sm:$0xff] %vm221_vm1, %v187_v9 }
  0xa1   :  { %248 = vst.msk [vmem:[%s597_s3 + $0xd0] sm:$0xff] %vm221_vm1, %v207_v10 }
  0xa2   :  { %225 = vst.msk [vmem:[%s597_s3 + $0x18] sm:$0xff] %vm221_vm1, %v149_v13 }
  0xa3   :  { %233 = vst.msk [vmem:[%s597_s3 + $0x58] sm:$0xff] %vm221_vm1, %v169_v14 }
  0xa5   :  { %v188_v15 = vpop.f32.mrf.mxu2  ;;  %v208_v16 = vpop.f32.mrf.mxu3 }
  0xa6   :  { %v189_v17 = vadd.f32 %v432_v50, %v188_v15  ;;  %v209_v18 = vadd.f32 %v432_v50, %v208_v16  ;;  %v151_v19 = vpop.f32.mrf.mxu0  ;;  %v171_v20 = vpop.f32.mrf.mxu1 }
  0xa7   :  { %v152_v21 = vadd.f32 %v432_v50, %v151_v19  ;;  %v172_v22 = vadd.f32 %v432_v50, %v171_v20 }
  0xa8   :  { %241 = vst.msk [vmem:[%s597_s3 + $0x98] sm:$0xff] %vm221_vm1, %v189_v17 }
  0xa9   :  { %249 = vst.msk [vmem:[%s597_s3 + $0xd8] sm:$0xff] %vm221_vm1, %v209_v18 }
  0xaa   :  { %226 = vst.msk [vmem:[%s597_s3 + $0x20] sm:$0xff] %vm221_vm1, %v152_v21 }
  0xab   :  { %234 = vst.msk [vmem:[%s597_s3 + $0x60] sm:$0xff] %vm221_vm1, %v172_v22 }
  0xad   :  { %v191_v23 = vpop.f32.mrf.mxu2  ;;  %v211_v24 = vpop.f32.mrf.mxu3 }
  0xae   :  { %v192_v25 = vadd.f32 %v432_v50, %v191_v23  ;;  %v212_v26 = vadd.f32 %v432_v50, %v211_v24  ;;  %v153_v27 = vpop.f32.mrf.mxu0  ;;  %v173_v28 = vpop.f32.mrf.mxu1 }
  0xaf   :  { %v154_v29 = vadd.f32 %v432_v50, %v153_v27  ;;  %v174_v30 = vadd.f32 %v432_v50, %v173_v28 }
  0xb0   :  { %242 = vst.msk [vmem:[%s597_s3 + $0xa0] sm:$0xff] %vm221_vm1, %v192_v25 }
  0xb1   :  { %250 = vst.msk [vmem:[%s597_s3 + $0xe0] sm:$0xff] %vm221_vm1, %v212_v26 }
  0xb2   :  { %227 = vst.msk [vmem:[%s597_s3 + $0x28] sm:$0xff] %vm221_vm1, %v154_v29 }
  0xb3   :  { %235 = vst.msk [vmem:[%s597_s3 + $0x68] sm:$0xff] %vm221_vm1, %v174_v30 }
  0xb5   :  { %v193_v31 = vpop.f32.mrf.mxu2  ;;  %v213_v32 = vpop.f32.mrf.mxu3 }
  0xb6   :  { %v194_v33 = vadd.f32 %v432_v50, %v193_v31  ;;  %v214_v34 = vadd.f32 %v432_v50, %v213_v32  ;;  %v156_v35 = vpop.f32.mrf.mxu0  ;;  %v176_v36 = vpop.f32.mrf.mxu1 }
  0xb7   :  { %v157_v37 = vadd.f32 %v432_v50, %v156_v35  ;;  %v177_v38 = vadd.f32 %v432_v50, %v176_v36 }
  0xb8   :  { %243 = vst.msk [vmem:[%s597_s3 + $0xa8] sm:$0xff] %vm221_vm1, %v194_v33 }
  0xb9   :  { %251 = vst.msk [vmem:[%s597_s3 + $0xe8] sm:$0xff] %vm221_vm1, %v214_v34 }
  0xba   :  { %228 = vst.msk [vmem:[%s597_s3 + $0x30] sm:$0xff] %vm221_vm1, %v157_v37 }
  0xbb   :  { %236 = vst.msk [vmem:[%s597_s3 + $0x70] sm:$0xff] %vm221_vm1, %v177_v38 }
  0xbd   :  { %v196_v39 = vpop.f32.mrf.mxu2  ;;  %v216_v40 = vpop.f32.mrf.mxu3 }
  0xbe   :  { %v197_v41 = vadd.f32 %v432_v50, %v196_v39  ;;  %v217_v42 = vadd.f32 %v432_v50, %v216_v40  ;;  %v158_v43 = vpop.f32.mrf.mxu0  ;;  %v178_v44 = vpop.f32.mrf.mxu1 }
  0xbf   :  { %v159_v45 = vadd.f32 %v432_v50, %v158_v43  ;;  %v179_v46 = vadd.f32 %v432_v50, %v178_v44 }
  0xc0   :  { %244 = vst.msk [vmem:[%s597_s3 + $0xb0] sm:$0xff] %vm221_vm1, %v197_v41 }
  0xc1   :  { %252 = vst.msk [vmem:[%s597_s3 + $0xf0] sm:$0xff] %vm221_vm1, %v217_v42 }
  0xc2   :  { %229 = vst.msk [vmem:[%s597_s3 + $0x38] sm:$0xff] %vm221_vm1, %v159_v45 }
  0xc3   :  { %237 = vst.msk [vmem:[%s597_s3 + $0x78] sm:$0xff] %vm221_vm1, %v179_v46 }
  0xc5   :  { %v198_v47 = vpop.f32.mrf.mxu2  ;;  %v218_v48 = vpop.f32.mrf.mxu3 }
  0xc6   :  { %v199_v49 = vadd.f32 %v432_v50, %v198_v47  ;;  %v219_v51 = vadd.f32 %v432_v50, %v218_v48 }
  0xc8   :  { %245 = vst.msk [vmem:[%s597_s3 + $0xb8] sm:$0xff] %vm221_vm1, %v199_v49 }
  0xc9   :  { %253 = vst.msk [vmem:[%s597_s3 + $0xf8] sm:$0xff] %vm221_vm1, %v219_v51 }

// kernel: _lambda_.29
= control target key start
LH: loop header
LB: loop body
LE: loop exit
PB: predicated region body
PF: predicated region fallthrough
CT: control target
= control target key end

     0   :  { %s1410_s21 = smov 0   ;;  %s1677_s0 = inlined_call_operand.vmem [shape: bf16[32,8,64], index: 0, kind: input, shape index: {}]   ;;  %s1678_s1 = inlined_call_operand.vmem [shape: f32[32,8,32], index: 1, kind: input, shape index: {}]   ;;  %s1679_s2 = inlined_call_operand.vmem [shape: bf16[3,64,64], index: 2, kind: input, shape index: {}]   ;;  %s1680_s3 = inlined_call_operand.vmem [shape: f32[1,64], index: 3, kind: input, shape index: {}]   ;;  %s1681_s4 = inlined_call_operand.vmem [shape: bf16[64,32], index: 4, kind: input, shape index: {}]   ;;  %s1682_s5 = inlined_call_operand.vmem [shape: f32[1,32], index: 5, kind: input, shape index: {}]   ;;  %s1683_s6 = inlined_call_operand.vmem [shape: f32[32,8,32], index: 6, kind: output, shape index: {}]  }
   0x1 LB: > { %s1162_s22 = sadd.s32 4294967295, %s1372_s21   ;;  %p1166_p0 = scmp.ge.s32.totalorder %s1372_s21, 1  ;;  %s1372_s21 = sphi %s1410_s21, %s16_s21  }
   0x2   : > { %p224_p1 = scmp.lt.s32.totalorder %s1372_s21, 5 }
   0x4   : > { %p225_p2 = pnand %p1166_p0, %p224_p1 }
   0x5   : > { %s1167_s27 = sshll.u32 (!%p225_p2), %s1162_s22, 3 }
   0x6   : > { %228 = sbr.rel (%p225_p2) target bundleno = 414 (0x19e), region = 44  ;;  %p260_p3 = scmp.lt.s32.totalorder (!%p225_p2), %s1167_s27, 31 }
   0xb   : > { %v1310_v0 = vld [vmem:[%s1679_s2 + $0x18] sm:$0xff]  ;;  %vm278_vm0 = vcmask 516096   ;;  %v1374_v3 = vmov 0   ;;  %v1309_v4 = vld [vmem:[%s1679_s2 + $0x10] sm:$0xff]  ;;  %s1691_s27 = smov (!%p260_p3, %s1167_s27), 31  ;;  %v1308_v7 = vld [vmem:[%s1679_s2 + $0x8] sm:$0xff] }
   0xc   : > { %v1318_v1 = vld [vmem:[%s1679_s2 + $0x58] sm:$0xff]  ;;  %279 = vst.msk [vmem:[#allocation2] sm:$0x1] %vm278_vm0, %v1374_v3  ;;  %638 = vmatpush.bf16.msra.mxu1 %v1310_v0  ;;  %v1317_v5 = vld [vmem:[%s1679_s2 + $0x50] sm:$0xff]  ;;  %v1316_v8 = vld [vmem:[%s1679_s2 + $0x48] sm:$0xff]  ;;  %s1168_s16 = sshll.u32 %s1691_s27, 2 }
   0xd   : > { %v1314_v2 = vld [vmem:[%s1679_s2 + $0x38] sm:$0xff]  ;;  %783 = vmatpush.bf16.msra.mxu2 %v1318_v1  ;;  %280 = vst.msk [vmem:[#allocation2 + $0x8] sm:$0x1] %vm278_vm0, %v1374_v3  ;;  %v1313_v6 = vld [vmem:[%s1679_s2 + $0x30] sm:$0xff]  ;;  %s1453_s19 = scalar_lea.vmem %s1677_s0, %s1168_s16  ;;  %vm335_vm1 = vcmask 519169   ;;  %v1312_v9 = vld [vmem:[%s1679_s2 + $0x28] sm:$0xff] }
   0xe   : > { %553 = vmatpush.bf16.msra.mxu0 %v1314_v2  ;;  %281 = vst.msk [vmem:[#allocation2 + $0x10] sm:$0x1] %vm278_vm0, %v1374_v3  ;;  %v287_v10 = vld [vmem:[%s1453_s19] sm:$0xf]  ;;  %v288_v11 = vld [vmem:[%s1453_s19 + $0x4] sm:$0xf] }
   0xf   : > { %282 = vst.msk [vmem:[#allocation2 + $0x18] sm:$0x1] %vm278_vm0, %v1374_v3  ;;  %v303_v12 = vrot.slane %v287_v10, 7  ;;  %v305_v13 = vrot.slane %v288_v11, 7  ;;  %v289_v14 = vld [vmem:[%s1453_s19 + $0x8] sm:$0xf] }
  0x10   : > { %283 = vst.msk [vmem:[#allocation2 + $0x20] sm:$0x1] %vm278_vm0, %v1374_v3  ;;  %639 = vmatpush.bf16.msra.mxu1 %v1309_v4  ;;  %v290_v15 = vld [vmem:[%s1453_s19 + $0xc] sm:$0xf]  ;;  %v307_v16 = vrot.slane %v289_v14, 7  ;;  %v1307_v17 = vld [vmem:[%s1679_s2] sm:$0xff] }
  0x11   : > { %784 = vmatpush.bf16.msra.mxu2 %v1317_v5  ;;  %284 = vst.msk [vmem:[#allocation2 + $0x28] sm:$0x1] %vm278_vm0, %v1374_v3  ;;  %v304_v18 = vrot.slane %v303_v12, 4  ;;  %v306_v19 = vrot.slane %v305_v13, 4  ;;  %v1315_v20 = vld [vmem:[%s1679_s2 + $0x40] sm:$0xff]  ;;  %v309_v23 = vrot.slane %v290_v15, 7 }
  0x12   : > { %554 = vmatpush.bf16.msra.mxu0 %v1313_v6  ;;  %285 = vst.msk [vmem:[#allocation2 + $0x30] sm:$0x1] %vm278_vm0, %v1374_v3  ;;  %v1311_v21 = vld [vmem:[%s1679_s2 + $0x20] sm:$0xff]  ;;  %v308_v22 = vrot.slane %v307_v16, 4  ;;  %v1479_v24 = vld [vmem:[%s1453_s19 + $0x10] sm:$0xf] }
  0x13   : > { %286 = vst.msk [vmem:[#allocation2 + $0x38] sm:$0x1] %vm278_vm0, %v1374_v3  ;;  %v1482_v25 = vld [vmem:[%s1453_s19 + $0x14] sm:$0xf]  ;;  %vm536_vm2 = vcmask 523264   ;;  %vm687_vm3 = vcmask 1042432  }
  0x14   : > { %640 = vmatpush.bf16.msra.mxu1 %v1308_v7  ;;  %336 = vst.msk [vmem:[#allocation2] sm:$0xe] %vm335_vm1, %v303_v12  ;;  %vm376_vm4 = vsmask.f32 3328  ;;  %vm377_vm5 = vsmask.f32 7440 }
  0x15   : > { %785 = vmatpush.bf16.msra.mxu2 %v1316_v8  ;;  %338 = vst.msk [vmem:[#allocation2 + $0x8] sm:$0xe] %vm335_vm1, %v305_v13  ;;  %vm688_vm6 = vcmask 1046532   ;;  %v310_v26 = vrot.slane %v309_v23, 4  ;;  %v311_v27 = vrot.slane %v1479_v24, 7  ;;  %v313_v28 = vrot.slane %v1482_v25, 7  ;;  %vm1502_vm8 = vmor %vm376_vm4, %vm377_vm5 }
  0x16   : > { %555 = vmatpush.bf16.msra.mxu0 %v1312_v9  ;;  %337 = vst.msk [vmem:[#allocation2 + $0x4] sm:$0x1] %vm278_vm0, %v304_v18  ;;  %vm1490_vm7 = vmor %vm687_vm3, %vm688_vm6  ;;  %v293_v13 = vld [vmem:[%s1453_s19 + $0x18] sm:$0xf]  ;;  %v1561_v61 = vld [vmem:[%s1680_s3] ss:$0 sm:$0xff] }
  0x17   : > { %339 = vst.msk [vmem:[#allocation2 + $0xc] sm:$0x1] %vm278_vm0, %v306_v19  ;;  %v312_v54 = vrot.slane %v311_v27, 4  ;;  %v314_v0 = vrot.slane %v313_v28, 4  ;;  %s1170_s16 = sshll.u32 %s1691_s27, 3 }
  0x18   : > { %641 = vmatpush.bf16.msra.mxu1 %v1307_v17  ;;  %340 = vst.msk [vmem:[#allocation2 + $0x10] sm:$0xe] %vm335_vm1, %v307_v16  ;;  %s1649_s27 = scalar_lea.vmem %s1683_s6, %s1170_s16 }
  0x19   : > { %786 = vmatpush.bf16.msra.mxu2 %v1315_v20  ;;  %341 = vst.msk [vmem:[#allocation2 + $0x14] sm:$0x1] %vm278_vm0, %v308_v22 }
  0x1a   : > { %556 = vmatpush.bf16.msra.mxu0 %v1311_v21  ;;  %342 = vst.msk [vmem:[#allocation2 + $0x18] sm:$0xe] %vm335_vm1, %v309_v23 }
  0x1b   : > { %v1203_v29 = vld [vmem:[#allocation2] sm:$0xf]  ;;  %343 = vst.msk [vmem:[#allocation2 + $0x1c] sm:$0x1] %vm278_vm0, %v310_v26 }
  0x1c   : > { %v663_v30 = vld [vmem:[#allocation2] sm:$0xe]  ;;  %v1303_v32 = vld [vmem:[#allocation2 + $0x4] sm:$0xf0]  ;;  %344 = vst.msk [vmem:[#allocation2 + $0x20] sm:$0xe] %vm335_vm1, %v311_v27 }
  0x1d   : > { %v352_v31 = vld [vmem:[#allocation2] sm:$0xf]  ;;  %v664_v33 = vld [vmem:[#allocation2 + $0x8] sm:$0xe]  ;;  %v1237_v34 = vrot.slane %v663_v30, 9  ;;  %v1204_v36 = vor.u32 %v1303_v32, %v1203_v29 }
  0x1e   : > { %v380_v35 = vshrl.u32 %v352_v31, 16  ;;  %v368_v37 = vld [vmem:[#allocation2 + $0x4] sm:$0x1]  ;;  %v1238_v39 = vrot.slane %v664_v33, 9  ;;  %v353_v40 = vld [vmem:[#allocation2 + $0x8] sm:$0xf] }
  0x1f   : > { %v383_v41 = vshll.u32 %v352_v31, 16  ;;  %v369_v42 = vld [vmem:[#allocation2 + $0xc] sm:$0x1]  ;;  %v692_v43 = vrot.slane %v368_v37, 5  ;;  %v389_v45 = vshll.u32 %v368_v37, 16  ;;  %v394_v46 = vshrl.u32 %v353_v40, 16  ;;  %1233 = vmatmul.msk.bf16.vlgmr.msra.gmra.mxu1 %vm536_vm2, %v1204_v36 }
  0x20   : > { %v382_v44 = vrot.slane %v380_v35, 4  ;;  %v696_v47 = vrot.slane %v369_v42, 5  ;;  %v397_v49 = vshll.u32 %v353_v40, 16  ;;  %v403_v50 = vshll.u32 %v369_v42, 16  ;;  %v665_v59 = vld [vmem:[#allocation2 + $0x10] sm:$0xe] }
  0x21   : > { %v385_v48 = vrot.slane %v383_v41, 5  ;;  %v693_v51 = vsel %vm1490_vm7, %v1237_v34, %v692_v43  ;;  %v391_v52 = vrot.slane %v389_v45, 5  ;;  %v396_v53 = vrot.slane %v394_v46, 4  ;;  %v370_v62 = vld [vmem:[#allocation2 + $0x14] sm:$0x1] }
  0x22   : > { %v697_v55 = vsel %vm1490_vm7, %v1238_v39, %v696_v47  ;;  %v731_v56 = vunpack.c.l.b16 %v693_v51  ;;  %v399_v58 = vrot.slane %v397_v49, 5  ;;  %v354_v63 = vld [vmem:[#allocation2 + $0x10] sm:$0xf]  ;;  %v405_v3 = vrot.slane %v403_v50, 5  ;;  %v666_v4 = vld [vmem:[#allocation2 + $0x18] sm:$0xe] }
  0x23   : > { %v386_v57 = vor.u32 %v385_v48, %v382_v44  ;;  %v732_v60 = vunpack.c.l.b16 %v697_v55  ;;  %v355_v5 = vld [vmem:[#allocation2 + $0x18] sm:$0xf]  ;;  %v1239_v7 = vrot.slane %v665_v59, 9  ;;  %v408_v8 = vshrl.u32 %v354_v63, 16  ;;  %345 = vst.msk [vmem:[#allocation2 + $0x24] sm:$0x1] %vm278_vm0, %v312_v54 }
  0x24   : > { %v400_v2 = vor.u32 %v399_v58, %v396_v53  ;;  %v411_v9 = vshll.u32 %v354_v63, 16  ;;  %v422_v12 = vshrl.u32 %v355_v5, 16  ;;  %v371_v15 = vld [vmem:[#allocation2 + $0x1c] sm:$0x1]  ;;  %346 = vst.msk [vmem:[#allocation2 + $0x28] sm:$0xe] %vm335_vm1, %v313_v28 }
  0x25   : > { %v387_v1 = vrot.slane %v386_v57, 4  ;;  %v739_v6 = vpack.c.b16 %v732_v60, %v731_v56  ;;  %v410_v16 = vrot.slane %v408_v8, 4  ;;  %v700_v19 = vrot.slane %v370_v62, 5  ;;  %347 = vst.msk [vmem:[#allocation2 + $0x2c] sm:$0x1] %vm278_vm0, %v314_v0 }
  0x26   : > { %v401_v11 = vrot.slane %v400_v2, 4  ;;  %v413_v17 = vrot.slane %v411_v9, 5  ;;  %v1240_v20 = vrot.slane %v666_v4, 9  ;;  %v704_v21 = vrot.slane %v371_v15, 5  ;;  %v1207_v23 = vld [vmem:[#allocation2 + $0x10] sm:$0xf] }
  0x27   : > { %v392_v10 = vsel %vm1502_vm8, %v387_v1, %v391_v52  ;;  %1269 = vmatmul.msk.bf16.vlgmr.msra.gmra.mxu2 %vm536_vm2, %v739_v6  ;;  %v1304_v24 = vld [vmem:[#allocation2 + $0x14] sm:$0xf0]  ;;  %v424_v25 = vrot.slane %v422_v12, 4  ;;  %v425_v26 = vshll.u32 %v355_v5, 16  ;;  %v417_v29 = vshll.u32 %v370_v62, 16 }
  0x28   : > { %v500_v14 = vunpack.c.l.b16 %v392_v10  ;;  %v406_v18 = vsel %vm1502_vm8, %v401_v11, %v405_v3  ;;  %v414_v27 = vor.u32 %v413_v17, %v410_v16  ;;  %v431_v30 = vshll.u32 %v371_v15, 16  ;;  %v294_v33 = vld [vmem:[%s1453_s19 + $0x1c] sm:$0xf]  ;;  %v356_v43 = vld [vmem:[#allocation2 + $0x20] sm:$0xf]  ;;  %s1640_s19 = scalar_lea.vmem %s1678_s1, %s1170_s16 }
  0x29   : > { %v501_v22 = vunpack.c.l.b16 %v406_v18  ;;  %v315_v31 = vrot.slane %v293_v13, 7  ;;  %v427_v28 = vrot.slane %v425_v26, 5  ;;  %v1208_v34 = vor.u32 %v1304_v24, %v1207_v23  ;;  %v667_v57 = vld [vmem:[#allocation2 + $0x20] sm:$0xe] }
  0x2a   : > { %v701_v35 = vsel %vm1490_vm7, %v1239_v7, %v700_v19  ;;  %v705_v36 = vsel %vm1490_vm7, %v1240_v20, %v704_v21  ;;  %v415_v40 = vrot.slane %v414_v27, 4  ;;  %v419_v41 = vrot.slane %v417_v29, 5  ;;  %v372_v56 = vld [vmem:[#allocation2 + $0x24] sm:$0x1]  ;;  %v1211_v9 = vld [vmem:[#allocation2 + $0x20] sm:$0xf] }
  0x2b   : > { %v508_v32 = vpack.c.b16 %v501_v22, %v500_v14  ;;  %v428_v37 = vor.u32 %v427_v28, %v424_v25  ;;  %v316_v39 = vrot.slane %v315_v31, 4  ;;  %v433_v42 = vrot.slane %v431_v30, 5  ;;  %v357_v48 = vld [vmem:[#allocation2 + $0x28] sm:$0xf]  ;;  %348 = vst.msk [vmem:[#allocation2 + $0x30] sm:$0xe] %vm335_vm1, %v315_v31 }
  0x2c   : > { %v317_v44 = vrot.slane %v294_v33, 7  ;;  %v733_v45 = vunpack.c.l.b16 %v701_v35  ;;  %v734_v46 = vunpack.c.l.b16 %v705_v36  ;;  %v436_v49 = vshrl.u32 %v356_v43, 16  ;;  %v373_v62 = vld [vmem:[#allocation2 + $0x2c] sm:$0x1]  ;;  %v668_v63 = vld [vmem:[#allocation2 + $0x28] sm:$0xe] }
  0x2d   : > { %1197 = vmatmul.msk.bf16.vlgmr.msra.gmra.mxu0 %vm536_vm2, %v508_v32  ;;  %v429_v47 = vrot.slane %v428_v37, 4  ;;  %v439_v50 = vshll.u32 %v356_v43, 16  ;;  %349 = vst.msk [vmem:[#allocation2 + $0x34] sm:$0x1] %vm278_vm0, %v316_v39  ;;  %v420_v51 = vsel %vm1502_vm8, %v415_v40, %v419_v41  ;;  %v450_v53 = vshrl.u32 %v357_v48, 16 }
  0x2e   : > { %v453_v54 = vshll.u32 %v357_v48, 16  ;;  %350 = vst.msk [vmem:[#allocation2 + $0x38] sm:$0xe] %vm335_vm1, %v317_v44  ;;  %v740_v55 = vpack.c.b16 %v734_v46, %v733_v45  ;;  %v318_v58 = vrot.slane %v317_v44, 4  ;;  %v502_v59 = vunpack.c.l.b16 %v420_v51  ;;  %v1305_v10 = vld [vmem:[#allocation2 + $0x24] sm:$0xf0] }
  0x2f   : > { %1234 = vmatmul.msk.bf16.gmra.mxu1 %vm536_vm2, %v1208_v34  ;;  %v434_v52 = vsel %vm1502_vm8, %v429_v47, %v433_v42  ;;  %v438_v0 = vrot.slane %v436_v49, 4  ;;  %v441_v1 = vrot.slane %v439_v50, 5  ;;  %v452_v2 = vrot.slane %v450_v53, 4 }
  0x30   : > { %v503_v60 = vunpack.c.l.b16 %v434_v52  ;;  %v455_v3 = vrot.slane %v453_v54, 5  ;;  %351 = vst.msk [vmem:[#allocation2 + $0x3c] sm:$0x1] %vm278_vm0, %v318_v58  ;;  %v1241_v4 = vrot.slane %v667_v57, 9  ;;  %v708_v5 = vrot.slane %v372_v56, 5 }
  0x31   : > { %v1242_v6 = vrot.slane %v668_v63, 9  ;;  %v712_v7 = vrot.slane %v373_v62, 5  ;;  %v442_v11 = vor.u32 %v441_v1, %v438_v0  ;;  %v445_v12 = vshll.u32 %v372_v56, 16 }
  0x32   : > { %v509_v8 = vpack.c.b16 %v503_v60, %v502_v59  ;;  %v456_v13 = vor.u32 %v455_v3, %v452_v2  ;;  %v459_v14 = vshll.u32 %v373_v62, 16  ;;  %v1212_v15 = vor.u32 %v1305_v10, %v1211_v9  ;;  %v358_v22 = vld [vmem:[#allocation2 + $0x30] sm:$0xf]  ;;  %v1322_v10 = vld [vmem:[%s1681_s4 + $0x18] sm:$0xff] }
  0x33   : > { %v709_v16 = vsel %vm1490_vm7, %v1241_v4, %v708_v5  ;;  %v713_v17 = vsel %vm1490_vm7, %v1242_v6, %v712_v7  ;;  %v443_v18 = vrot.slane %v442_v11, 4  ;;  %v447_v19 = vrot.slane %v445_v12, 5  ;;  %v669_v33 = vld [vmem:[#allocation2 + $0x30] sm:$0xe]  ;;  %1044 = vmatpush.bf16.msra.mxu3 %v1322_v10 }
  0x34   : > { %v457_v20 = vrot.slane %v456_v13, 4  ;;  %v461_v21 = vrot.slane %v459_v14, 5  ;;  %v735_v23 = vunpack.c.l.b16 %v709_v16  ;;  %v736_v24 = vunpack.c.l.b16 %v713_v17  ;;  %v374_v36 = vld [vmem:[#allocation2 + $0x34] sm:$0x1]  ;;  %v1215_v49 = vld [vmem:[#allocation2 + $0x30] sm:$0xf] }
  0x35   : > { %v359_v25 = vld [vmem:[#allocation2 + $0x38] sm:$0xf]  ;;  %v448_v26 = vsel %vm1502_vm8, %v443_v18, %v447_v19  ;;  %v464_v27 = vshrl.u32 %v358_v22, 16  ;;  %v467_v30 = vshll.u32 %v358_v22, 16  ;;  %v1243_v44 = vrot.slane %v669_v33, 9  ;;  %v1321_v13 = vld [vmem:[%s1681_s4 + $0x10] sm:$0xff] }
  0x36   : > { %v462_v29 = vsel %vm1502_vm8, %v457_v20, %v461_v21  ;;  %v478_v31 = vshrl.u32 %v359_v25, 16  ;;  %v481_v32 = vshll.u32 %v359_v25, 16  ;;  %v741_v28 = vpack.c.b16 %v736_v24, %v735_v23  ;;  %v670_v39 = vld [vmem:[#allocation2 + $0x38] sm:$0xe]  ;;  %v1320_v20 = vld [vmem:[%s1681_s4 + $0x8] sm:$0xff]  ;;  %v1319_v23 = vld [vmem:[%s1681_s4] sm:$0xff] }
  0x37   : > { %1270 = vmatmul.msk.bf16.gmra.mxu2 %vm536_vm2, %v740_v55  ;;  %v504_v34 = vunpack.c.l.b16 %v448_v26  ;;  %v505_v35 = vunpack.c.l.b16 %v462_v29  ;;  %v375_v37 = vld [vmem:[#allocation2 + $0x3c] sm:$0x1]  ;;  %v466_v40 = vrot.slane %v464_v27, 4  ;;  %v469_v41 = vrot.slane %v467_v30, 5  ;;  %v1306_v50 = vld [vmem:[#allocation2 + $0x34] sm:$0xf0]  ;;  %1045 = vmatpush.bf16.msra.mxu3 %v1321_v13 }
  0x38   : > { %v480_v42 = vrot.slane %v478_v31, 4  ;;  %v483_v43 = vrot.slane %v481_v32, 5  ;;  %v716_v45 = vrot.slane %v374_v36, 5  ;;  %v1244_v46 = vrot.slane %v670_v39, 9 }
  0x39   : > { %v720_v47 = vrot.slane %v375_v37, 5  ;;  %v510_v48 = vpack.c.b16 %v505_v35, %v504_v34  ;;  %v470_v51 = vor.u32 %v469_v41, %v466_v40  ;;  %v473_v52 = vshll.u32 %v374_v36, 16 }
  0x3a   : > { %v484_v53 = vor.u32 %v483_v43, %v480_v42  ;;  %v487_v54 = vshll.u32 %v375_v37, 16  ;;  %v1216_v55 = vor.u32 %v1306_v50, %v1215_v49  ;;  %v717_v56 = vsel %vm1490_vm7, %v1243_v44, %v716_v45 }
  0x3b   : > { %v721_v57 = vsel %vm1490_vm7, %v1244_v46, %v720_v47  ;;  %v471_v58 = vrot.slane %v470_v51, 4  ;;  %v475_v59 = vrot.slane %v473_v52, 5  ;;  %v737_v63 = vunpack.c.l.b16 %v717_v56  ;;  %1046 = vmatpush.bf16.msra.mxu3 %v1320_v20 }
  0x3c   : > { %v485_v60 = vrot.slane %v484_v53, 4  ;;  %v489_v62 = vrot.slane %v487_v54, 5  ;;  %v738_v0 = vunpack.c.l.b16 %v721_v57 }
  0x3d   : > { %1198 = vmatmul.msk.bf16.gmra.mxu0 %vm536_vm2, %v509_v8  ;;  %v476_v1 = vsel %vm1502_vm8, %v471_v58, %v475_v59 }
  0x3e   : > { %v490_v2 = vsel %vm1502_vm8, %v485_v60, %v489_v62  ;;  %v742_v3 = vpack.c.b16 %v738_v0, %v737_v63  ;;  %v506_v4 = vunpack.c.l.b16 %v476_v1 }
  0x3f   : > { %1235 = vmatmul.msk.bf16.gmra.mxu1 %vm536_vm2, %v1212_v15  ;;  %v507_v38 = vunpack.c.l.b16 %v490_v2  ;;  %1047 = vmatpush.bf16.msra.mxu3 %v1319_v23 }
  0x41   : > { %v511_v5 = vpack.c.b16 %v507_v38, %v506_v4 }
  0x47   : > { %1271 = vmatmul.msk.bf16.gmra.mxu2 %vm536_vm2, %v741_v28 }
  0x4d   : > { %1199 = vmatmul.msk.bf16.gmra.mxu0 %vm536_vm2, %v510_v48 }
  0x4f   : > { %1236 = vmatmul.msk.bf16.gmra.mxu1 %vm536_vm2, %v1216_v55 }
  0x57   : > { %1272 = vmatmul.msk.bf16.gmra.mxu2 %vm536_vm2, %v742_v3 }
  0x5d   : > { %1200 = vmatmul.msk.bf16.gmra.mxu0 %vm536_vm2, %v511_v5 }
  0x9c   : > { %v643_v6 = vpop.f32.mrf.mxu1 }
  0xa4   : > { %v645_v7 = vpop.f32.mrf.mxu1 }
  0xaa   : > { %v558_v8 = vpop.f32.mrf.mxu0  ;;  %v788_v9 = vpop.f32.mrf.mxu2 }
  0xab   : > { %v644_v11 = vadd.f32 %v643_v6, %v558_v8 }
  0xac   : > { %v648_v15 = vpop.f32.mrf.mxu1 }
  0xad   : > { %v808_v12 = vadd.f32 %v788_v9, %v644_v11 }
  0xaf   : > { %v1567_v14 = vadd.f32 %v1561_v61, %v808_v12 }
  0xb1   : > { %v1273_v16 = vmul.f32 -1.442695, %v1567_v14 }
  0xb2   : > { %v560_v17 = vpop.f32.mrf.mxu0  ;;  %v790_v18 = vpop.f32.mrf.mxu2 }
  0xb3   : > { %1334 = vpow2.f32 %v1273_v16  ;;  %v646_v19 = vadd.f32 %v645_v7, %v560_v17 }
  0xb4   : > { %v650_v26 = vpop.f32.mrf.mxu1 }
  0xb5   : > { %v809_v21 = vadd.f32 %v790_v18, %v646_v19 }
  0xb7   : > { %v1574_v22 = vadd.f32 %v1561_v61, %v809_v21 }
  0xb9   : > { %v1335_v24 = vpop.eup %1334  ;;  %v1274_v25 = vmul.f32 -1.442695, %v1574_v22 }
  0xba   : > { %v852_v27 = vadd.f32 1.0, %v1335_v24  ;;  %v563_v29 = vpop.f32.mrf.mxu0  ;;  %v793_v30 = vpop.f32.mrf.mxu2 }
  0xbb   : > { %1336 = vpow2.f32 %v1274_v25  ;;  %v649_v31 = vadd.f32 %v648_v15, %v563_v29 }
  0xbc   : > { %1338 = vrcp.f32 %v852_v27  ;;  %v653_v42 = vpop.f32.mrf.mxu1  ;;  %v871_v55 = vand.u32 2147483648, %v852_v27  ;;  %vm865_vm10 = vweird.f32 %v852_v27  ;;  %v869_v56 = vand.u32 2147483647, %v852_v27 }
  0xbd   : > { %v810_v32 = vadd.f32 %v793_v30, %v649_v31 }
  0xbe   : > { %v872_v2 = vor.u32 1.1754944e-38, %v871_v55  ;;  %vm870_vm13 = vcmp.eq.f32.partialorder %v869_v56, 8.507059e+37 }
  0xbf   : > { %v1581_v28 = vadd.f32 %v1561_v61, %v810_v32 }
  0xc1   : > { %v1337_v33 = vpop.eup %1336  ;;  %v1275_v34 = vmul.f32 -1.442695, %v1581_v28 }
  0xc2   : > { %v1339_v35 = vpop.eup %1338  ;;  %v853_v36 = vadd.f32 1.0, %v1337_v33  ;;  %v565_v37 = vpop.f32.mrf.mxu0 }
  0xc3   : > { %v795_v39 = vpop.f32.mrf.mxu2  ;;  %v861_v40 = vmul.f32 %v1339_v35, %v852_v27  ;;  %1340 = vpow2.f32 %v1275_v34  ;;  %v651_v41 = vadd.f32 %v650_v26, %v565_v37  ;;  %vm866_vm9 = vweird.f32 %v1339_v35 }
  0xc4   : > { %1342 = vrcp.f32 %v853_v36  ;;  %v655_v59 = vpop.f32.mrf.mxu1  ;;  %vm867_vm11 = vmor %vm865_vm10, %vm866_vm9  ;;  %v884_v60 = vand.u32 2147483647, %v853_v36  ;;  %v886_v62 = vand.u32 2147483648, %v853_v36  ;;  %vm880_vm14 = vweird.f32 %v853_v36 }
  0xc5   : > { %v862_v43 = vsub.f32 1.0, %v861_v40  ;;  %v811_v44 = vadd.f32 %v795_v39, %v651_v41 }
  0xc6   : > { %v887_v7 = vor.u32 1.1754944e-38, %v886_v62  ;;  %vm885_vm0 = vcmp.eq.f32.partialorder %v884_v60, 8.507059e+37 }
  0xc7   : > { %v863_v45 = vmul.f32 %v1339_v35, %v862_v43  ;;  %v1585_v46 = vadd.f32 %v1561_v61, %v811_v44 }
  0xc9   : > { %v1341_v47 = vpop.eup %1340  ;;  %v1276_v48 = vmul.f32 -1.442695, %v1585_v46  ;;  %v864_v53 = vadd.f32 %v1339_v35, %v863_v45 }
  0xca   : > { %v1343_v49 = vpop.eup %1342  ;;  %v1588_v50 = vadd.f32 1.0, %v1341_v47  ;;  %v568_v51 = vpop.f32.mrf.mxu0 }
  0xcb   : > { %v798_v52 = vpop.f32.mrf.mxu2  ;;  %v876_v54 = vmul.f32 %v1343_v49, %v853_v36  ;;  %1344 = vpow2.f32 %v1276_v48  ;;  %v654_v58 = vadd.f32 %v653_v42, %v568_v51  ;;  %v868_v63 = vsel %vm867_vm11, %v1339_v35, %v864_v53 }
  0xcc   : > { %1346 = vrcp.f32 %v1588_v50  ;;  %vm881_vm12 = vweird.f32 %v1343_v49  ;;  %v873_v6 = vsel %vm870_vm13, %v872_v2, %v868_v63  ;;  %v658_v21 = vpop.f32.mrf.mxu1  ;;  %vm895_vm3 = vweird.f32 %v1588_v50 }
  0xcd   : > { %v877_v57 = vsub.f32 1.0, %v876_v54  ;;  %v812_v1 = vadd.f32 %v798_v52, %v654_v58  ;;  %vm882_vm15 = vmor %vm880_vm14, %vm881_vm12  ;;  %v980_v16 = vmul.f32 %v873_v6, %v1567_v14  ;;  %v901_v32 = vand.u32 2147483648, %v1588_v50 }
  0xce   : > { %v899_v36 = vand.u32 2147483647, %v1588_v50 }
  0xcf   : > { %v878_v0 = vmul.f32 %v1343_v49, %v877_v57  ;;  %v1592_v38 = vadd.f32 %v1561_v61, %v812_v1  ;;  %v902_v45 = vor.u32 1.1754944e-38, %v901_v32 }
  0xd0   : > { %vm900_vm6 = vcmp.eq.f32.partialorder %v899_v36, 8.507059e+37 }
  0xd1   : > { %v1345_v3 = vpop.eup %1344  ;;  %v879_v4 = vadd.f32 %v1343_v49, %v878_v0  ;;  %v1277_v13 = vmul.f32 -1.442695, %v1592_v38 }
  0xd2   : > { %v1347_v5 = vpop.eup %1346  ;;  %v855_v8 = vadd.f32 1.0, %v1345_v3  ;;  %v570_v9 = vpop.f32.mrf.mxu0 }
  0xd3   : > { %v800_v10 = vpop.f32.mrf.mxu2  ;;  %v883_v11 = vsel %vm882_vm15, %v1343_v49, %v879_v4  ;;  %v891_v12 = vmul.f32 %v1347_v5, %v1588_v50  ;;  %v656_v19 = vadd.f32 %v655_v59, %v570_v9  ;;  %vm896_vm1 = vweird.f32 %v1347_v5 }
  0xd4   : > { %v888_v15 = vsel %vm885_vm0, %v887_v7, %v883_v11  ;;  %1348 = vrcp.f32 %v855_v8  ;;  %vm1607_vm4 = vmor %vm895_vm3, %vm896_vm1  ;;  %v914_v41 = vand.u32 2147483647, %v855_v8  ;;  %v916_v42 = vand.u32 2147483648, %v855_v8  ;;  %v660_v48 = vpop.f32.mrf.mxu1 }
  0xd5   : > { %v981_v17 = vmul.f32 %v888_v15, %v1574_v22  ;;  %v892_v18 = vsub.f32 1.0, %v891_v12  ;;  %1350 = vpow2.f32 %v1277_v13  ;;  %v813_v24 = vadd.f32 %v800_v10, %v656_v19 }
  0xd6   : > { %vm910_vm7 = vweird.f32 %v855_v8  ;;  %v917_v51 = vor.u32 1.1754944e-38, %v916_v42  ;;  %vm915_vm9 = vcmp.eq.f32.partialorder %v914_v41, 8.507059e+37 }
  0xd7   : > { %v893_v20 = vmul.f32 %v1347_v5, %v892_v18  ;;  %v988_v23 = vpack.c.bf16 %v981_v17, %v980_v16  ;;  %v1600_v27 = vadd.f32 %v1561_v61, %v813_v24 }
  0xd9   : > { %1297 = vmatmul.msk.bf16.vlgmr.msra.gmra.mxu3 %vm536_vm2, %v988_v23  ;;  %v894_v26 = vadd.f32 %v1347_v5, %v893_v20  ;;  %v1278_v34 = vmul.f32 -1.442695, %v1600_v27 }
  0xda   : > { %v1349_v25 = vpop.eup %1348  ;;  %v573_v29 = vpop.f32.mrf.mxu0 }
  0xdb   : > { %v803_v30 = vpop.f32.mrf.mxu2  ;;  %v1351_v14 = vpop.eup %1350  ;;  %v906_v31 = vmul.f32 %v1349_v25, %v855_v8  ;;  %v659_v22 = vadd.f32 %v658_v21, %v573_v29  ;;  %v898_v40 = vsel %vm1607_vm4, %v1347_v5, %v894_v26  ;;  %vm911_vm5 = vweird.f32 %v1349_v25 }
  0xdc   : > { %v1604_v33 = vadd.f32 1.0, %v1351_v14  ;;  %v903_v50 = vsel %vm900_vm6, %v902_v45, %v898_v40  ;;  %vm912_vm8 = vmor %vm910_vm7, %vm911_vm5 }
  0xdd   : > { %v907_v37 = vsub.f32 1.0, %v906_v31  ;;  %v814_v39 = vadd.f32 %v803_v30, %v659_v22  ;;  %v982_v59 = vmul.f32 %v903_v50, %v1581_v28 }
  0xde   : > { %1352 = vrcp.f32 %v1604_v33  ;;  %v931_v9 = vand.u32 2147483648, %v1604_v33  ;;  %vm925_vm11 = vweird.f32 %v1604_v33 }
  0xdf   : > { %v908_v43 = vmul.f32 %v1349_v25, %v907_v37  ;;  %1354 = vpow2.f32 %v1278_v34  ;;  %v1616_v44 = vadd.f32 %v1561_v61, %v814_v39 }
  0xe0   : > { %v932_v20 = vor.u32 1.1754944e-38, %v931_v9 }
  0xe1   : > { %v909_v47 = vadd.f32 %v1349_v25, %v908_v43  ;;  %v1279_v49 = vmul.f32 -1.442695, %v1616_v44 }
  0xe2   : > { %v575_v52 = vpop.f32.mrf.mxu0 }
  0xe3   : > { %v805_v53 = vpop.f32.mrf.mxu2  ;;  %v913_v54 = vsel %vm912_vm8, %v1349_v25, %v909_v47  ;;  %1356 = vpow2.f32 %v1279_v49  ;;  %v661_v55 = vadd.f32 %v660_v48, %v575_v52  ;;  %v1333_v52 = vld [vmem:[%s1682_s5] ss:$0 sm:$0xff] }
  0xe4   : > { %v1353_v56 = vpop.eup %1352  ;;  %v918_v57 = vsel %vm915_vm9, %v917_v51, %v913_v54  ;;  %v1069_v54 = vld [vmem:[%s1640_s19] sm:$0xff] }
  0xe5   : > { %v1355_v58 = vpop.eup %1354  ;;  %v983_v60 = vmul.f32 %v918_v57, %v1585_v46  ;;  %v921_v62 = vmul.f32 %v1353_v56, %v1604_v33  ;;  %v815_v63 = vadd.f32 %v805_v53, %v661_v55  ;;  %vm926_vm10 = vweird.f32 %v1353_v56  ;;  %v1070_v57 = vld [vmem:[%s1640_s19 + $0x8] sm:$0xff] }
  0xe6   : > { %v857_v0 = vadd.f32 1.0, %v1355_v58  ;;  %vm927_vm12 = vmor %vm925_vm11, %vm926_vm10 }
  0xe7   : > { %v922_v1 = vsub.f32 1.0, %v921_v62  ;;  %v1623_v2 = vadd.f32 %v1561_v61, %v815_v63  ;;  %v989_v3 = vpack.c.bf16 %v983_v60, %v982_v59  ;;  %v929_v61 = vand.u32 2147483647, %v1604_v33  ;;  %v1071_v62 = vld [vmem:[%s1640_s19 + $0x10] sm:$0xff] }
  0xe8   : > { %1358 = vrcp.f32 %v857_v0  ;;  %v944_v13 = vand.u32 2147483647, %v857_v0  ;;  %v946_v15 = vand.u32 2147483648, %v857_v0  ;;  %vm940_vm15 = vweird.f32 %v857_v0 }
  0xe9   : > { %v1357_v4 = vpop.eup %1356  ;;  %v1280_v5 = vmul.f32 -1.442695, %v1623_v2  ;;  %1298 = vmatmul.msk.bf16.gmra.mxu3 %vm536_vm2, %v989_v3  ;;  %v923_v7 = vmul.f32 %v1353_v56, %v922_v1  ;;  %vm930_vm14 = vcmp.eq.f32.partialorder %v929_v61, 8.507059e+37 }
  0xea   : > { %v858_v6 = vadd.f32 1.0, %v1357_v4  ;;  %v947_v25 = vor.u32 1.1754944e-38, %v946_v15  ;;  %vm945_vm1 = vcmp.eq.f32.partialorder %v944_v13, 8.507059e+37 }
  0xeb   : > { %1360 = vpow2.f32 %v1280_v5  ;;  %v924_v46 = vadd.f32 %v1353_v56, %v923_v7 }
  0xec   : > { %1362 = vrcp.f32 %v858_v6  ;;  %vm955_vm4 = vweird.f32 %v858_v6  ;;  %v961_v36 = vand.u32 2147483648, %v858_v6  ;;  %v959_v39 = vand.u32 2147483647, %v858_v6 }
  0xed   : > { %v928_v17 = vsel %vm927_vm12, %v1353_v56, %v924_v46 }
  0xee   : > { %v1359_v28 = vpop.eup %1358  ;;  %v933_v24 = vsel %vm930_vm14, %v932_v20, %v928_v17  ;;  %v962_v42 = vor.u32 1.1754944e-38, %v961_v36  ;;  %vm960_vm9 = vcmp.eq.f32.partialorder %v959_v39, 8.507059e+37 }
  0xef   : > { %v936_v8 = vmul.f32 %v1359_v28, %v857_v0  ;;  %vm941_vm13 = vweird.f32 %v1359_v28  ;;  %v984_v30 = vmul.f32 %v933_v24, %v1592_v38 }
  0xf0   : > { %vm942_vm0 = vmor %vm940_vm15, %vm941_vm13 }
  0xf1   : > { %v1361_v10 = vpop.eup %1360  ;;  %v937_v11 = vsub.f32 1.0, %v936_v8  ;;  %v1074_v8 = vld [vmem:[%s1640_s19 + $0x28] sm:$0xff] }
  0xf2   : > { %v1363_v12 = vpop.eup %1362  ;;  %v859_v16 = vadd.f32 1.0, %v1361_v10 }
  0xf3   : > { %v938_v18 = vmul.f32 %v1359_v28, %v937_v11  ;;  %v951_v19 = vmul.f32 %v1363_v12, %v858_v6  ;;  %vm956_vm3 = vweird.f32 %v1363_v12  ;;  %v1073_v6 = vld [vmem:[%s1640_s19 + $0x20] sm:$0xff]  ;;  %v1075_v11 = vld [vmem:[%s1640_s19 + $0x30] sm:$0xff] }
  0xf4   : > { %1364 = vrcp.f32 %v859_v16  ;;  %v976_v37 = vand.u32 2147483648, %v859_v16  ;;  %v974_v41 = vand.u32 2147483647, %v859_v16  ;;  %vm957_vm6 = vmor %vm955_vm4, %vm956_vm3  ;;  %vm970_vm7 = vweird.f32 %v859_v16 }
  0xf5   : > { %v939_v21 = vadd.f32 %v1359_v28, %v938_v18  ;;  %v952_v23 = vsub.f32 1.0, %v951_v19 }
  0xf6   : > { %v977_v43 = vor.u32 1.1754944e-38, %v976_v37  ;;  %vm975_vm10 = vcmp.eq.f32.partialorder %v974_v41, 8.507059e+37 }
  0xf7   : > { %v943_v26 = vsel %vm942_vm0, %v1359_v28, %v939_v21  ;;  %v953_v31 = vmul.f32 %v1363_v12, %v952_v23 }
  0xf8   : > { %v948_v29 = vsel %vm945_vm1, %v947_v25, %v943_v26 }
  0xf9   : > { %v985_v14 = vmul.f32 %v948_v29, %v1600_v27  ;;  %v954_v34 = vadd.f32 %v1363_v12, %v953_v31 }
  0xfa   : > { %v1365_v22 = vpop.eup %1364 }
  0xfb   : > { %v966_v32 = vmul.f32 %v1365_v22, %v859_v16  ;;  %v990_v33 = vpack.c.bf16 %v985_v14, %v984_v30  ;;  %vm971_vm5 = vweird.f32 %v1365_v22  ;;  %v958_v38 = vsel %vm957_vm6, %v1363_v12, %v954_v34  ;;  %v1076_v16 = vld [vmem:[%s1640_s19 + $0x38] sm:$0xff] }
  0xfc   : > { %vm972_vm8 = vmor %vm970_vm7, %vm971_vm5  ;;  %v963_v47 = vsel %vm960_vm9, %v962_v42, %v958_v38 }
  0xfd   : > { %v967_v35 = vsub.f32 1.0, %v966_v32  ;;  %1299 = vmatmul.msk.bf16.gmra.mxu3 %vm536_vm2, %v990_v33  ;;  %v986_v50 = vmul.f32 %v963_v47, %v1616_v44 }
  0xff   : > { %v968_v40 = vmul.f32 %v1365_v22, %v967_v35 }
 0x101   : > { %v969_v27 = vadd.f32 %v1365_v22, %v968_v40 }
 0x103   : > { %v973_v45 = vsel %vm972_vm8, %v1365_v22, %v969_v27 }
 0x104   : > { %v978_v48 = vsel %vm975_vm10, %v977_v43, %v973_v45 }
 0x105   : > { %v987_v49 = vmul.f32 %v978_v48, %v1623_v2  ;;  %v1072_v2 = vld [vmem:[%s1640_s19 + $0x18] sm:$0xff] }
 0x107   : > { %v991_v51 = vpack.c.bf16 %v987_v49, %v986_v50 }
 0x10d   : > { %1300 = vmatmul.msk.bf16.gmra.mxu3 %vm536_vm2, %v991_v51  ;;  %vm1085_vm2 = vcmask 261120  }
 0x15c   : > { %v1049_v53 = vpop.f32.mrf.mxu3 }
 0x15d   : > { %v1050_v55 = vadd.f32 %v1333_v52, %v1049_v53 }
 0x15f   : > { %v1077_v44 = vadd.f32 %v1069_v54, %v1050_v55 }
 0x161   : > { %1086 = vst.msk [vmem:[%s1649_s27] sm:$0xff] %vm1085_vm2, %v1077_v44 }
 0x164   : > { %v1051_v56 = vpop.f32.mrf.mxu3 }
 0x165   : > { %v1052_v58 = vadd.f32 %v1333_v52, %v1051_v56 }
 0x167   : > { %v1078_v59 = vadd.f32 %v1070_v57, %v1052_v58 }
 0x169   : > { %1087 = vst.msk [vmem:[%s1649_s27 + $0x8] sm:$0xff] %vm1085_vm2, %v1078_v59 }
 0x16c   : > { %v1054_v60 = vpop.f32.mrf.mxu3 }
 0x16d   : > { %v1055_v63 = vadd.f32 %v1333_v52, %v1054_v60 }
 0x16f   : > { %v1079_v0 = vadd.f32 %v1071_v62, %v1055_v63 }
 0x171   : > { %1088 = vst.msk [vmem:[%s1649_s27 + $0x10] sm:$0xff] %vm1085_vm2, %v1079_v0 }
 0x174   : > { %v1056_v1 = vpop.f32.mrf.mxu3 }
 0x175   : > { %v1057_v3 = vadd.f32 %v1333_v52, %v1056_v1 }
 0x177   : > { %v1080_v4 = vadd.f32 %v1072_v2, %v1057_v3 }
 0x179   : > { %1089 = vst.msk [vmem:[%s1649_s27 + $0x18] sm:$0xff] %vm1085_vm2, %v1080_v4 }
 0x180   : > { %v1059_v5 = vpop.f32.mrf.mxu3 }
 0x181   : > { %v1060_v7 = vadd.f32 %v1333_v52, %v1059_v5 }
 0x183   : > { %v1081_v28 = vadd.f32 %v1073_v6, %v1060_v7 }
 0x185   : > { %1090 = vst.msk [vmem:[%s1649_s27 + $0x20] sm:$0xff] %vm1085_vm2, %v1081_v28 }
 0x188   : > { %v1061_v46 = vpop.f32.mrf.mxu3 }
 0x189   : > { %v1062_v9 = vadd.f32 %v1333_v52, %v1061_v46 }
 0x18b   : > { %v1082_v10 = vadd.f32 %v1074_v8, %v1062_v9 }
 0x18d   : > { %1091 = vst.msk [vmem:[%s1649_s27 + $0x28] sm:$0xff] %vm1085_vm2, %v1082_v10 }
 0x190   : > { %v1064_v61 = vpop.f32.mrf.mxu3 }
 0x191   : > { %v1065_v12 = vadd.f32 %v1333_v52, %v1064_v61 }
 0x193   : > { %v1083_v13 = vadd.f32 %v1075_v11, %v1065_v12 }
 0x195   : > { %1092 = vst.msk [vmem:[%s1649_s27 + $0x30] sm:$0xff] %vm1085_vm2, %v1083_v13 }
 0x198   : > { %v1066_v15 = vpop.f32.mrf.mxu3 }
 0x199   : > { %v1067_v17 = vadd.f32 %v1333_v52, %v1066_v15 }
 0x19b   : > { %v1084_v18 = vadd.f32 %v1076_v16, %v1067_v17 }
 0x19d   : > { %1093 = vst.msk [vmem:[%s1649_s27 + $0x38] sm:$0xff] %vm1085_vm2, %v1084_v18 }
 0x19e PF: > { %s16_s21 = sadd.s32 1, %s1372_s21  }
 0x19f   : > { %p13_p4 = scmp.ge.s32.totalorder %s16_s21, 6  }
 0x1a1   :  { %15 = sbr.rel (!%p13_p4) target bundleno = 1 (0x1), region = 79 }

</bundles_post_ra>
